<compile_context>
chip_gen: v7x
topology: tpu7x:2x2x1
jax: 0.10.0
libtpu: 0.0.40
codegen_flags: <defaults>
</compile_context>

<pallas_src>
import jax
import jax.numpy as jnp
from jax import lax
from jax.experimental import pallas as pl
from jax.experimental.pallas import tpu as pltpu


# ----------------------------------------------------------------------------
# Bilinear (align_corners=True) interpolation matrices — matches
# nn.UpsamplingBilinear2d(scale_factor=2).
# ----------------------------------------------------------------------------
def bilinear_matrix(in_size, out_size):
    if in_size == 1:
        return jnp.ones((out_size, 1), jnp.float32)
    src = jnp.arange(out_size, dtype=jnp.float32) * (in_size - 1) / (out_size - 1)
    lo = jnp.clip(jnp.floor(src).astype(jnp.int32), 0, in_size - 2)
    frac = src - lo.astype(jnp.float32)
    rows = jnp.arange(out_size)
    A = jnp.zeros((out_size, in_size), jnp.float32)
    A = A.at[rows, lo].add(1.0 - frac)
    A = A.at[rows, lo + 1].add(frac)
    return A


def _padded_interp_matrices(H, W):
    """Interp matrices with the conv's zero padding (pad=1) folded in."""
    Ho, Wo = 2 * H, 2 * W
    ahp = jnp.pad(bilinear_matrix(H, Ho), ((1, 1), (0, 0)))        # (Ho+2, H)
    awp_t = jnp.pad(bilinear_matrix(W, Wo), ((1, 1), (0, 0))).T    # (W, Wo+2)
    return ahp, awp_t


# ----------------------------------------------------------------------------
# Fused kernel: per batch element, upsample (MXU) + 3x3 conv (VPU) for both
# the x path and the mask path.
# ----------------------------------------------------------------------------
def _upsample_conv_path(x_ref, ahp_ref, awp_ref, w_ref, b_ref, o_ref):
    """conv3x3(pad=1)( bilinear_up_2x(x) ) for one batch element.

    x_ref : VMEM (1, C_in, H, W)    (W in lanes)
    ahp   : VMEM (Ho+2, H)          H-interp matrix, zero rows top/bottom
    awp   : VMEM (W, Wo+2)          W-interp matrix^T, zero cols left/right
    w_ref : SMEM (C_out*C_in*9,)    conv weights, flattened (co, ci, ky, kx)
    b_ref : SMEM (C_out,)           conv bias
    o_ref : VMEM (1, C_out, Ho, Wo)
    """
    c_in = x_ref.shape[1]
    c_out, Ho, Wo = o_ref.shape[1], o_ref.shape[2], o_ref.shape[3]

    ahp = ahp_ref[...]
    awp = awp_ref[...]

    accs = [jnp.zeros((Ho, Wo), jnp.float32) for _ in range(c_out)]
    for ci in range(c_in):
        # Separable bilinear upsample on the MXU:  u = Ah_pad @ x[ci] @ Aw_pad^T.
        # Because the interp matrices carry a zero border, u is already the
        # zero-padded upsampled channel — the conv taps are plain static slices.
        t = jnp.dot(x_ref[0, ci], awp, preferred_element_type=jnp.float32)   # (H, Wo+2)
        u = jnp.dot(ahp, t, preferred_element_type=jnp.float32)              # (Ho+2, Wo+2)
        for ky in range(3):
            for kx in range(3):
                tap = u[ky:ky + Ho, kx:kx + Wo]                              # (Ho, Wo)
                k = ky * 3 + kx
                for co in range(c_out):
                    w = w_ref[(co * c_in + ci) * 9 + k]                      # SMEM scalar
                    accs[co] = accs[co] + w * tap
    for co in range(c_out):
        o_ref[0, co] = (accs[co] + b_ref[co]).astype(o_ref.dtype)


def _up_kernel(x_ref, ahx_ref, awx_ref, wx_ref, bx_ref,
               m_ref, ahm_ref, awm_ref, wm_ref, bm_ref,
               xo_ref, mo_ref):
    _upsample_conv_path(x_ref, ahx_ref, awx_ref, wx_ref, bx_ref, xo_ref)
    _upsample_conv_path(m_ref, ahm_ref, awm_ref, wm_ref, bm_ref, mo_ref)


def _smem_spec():
    return pl.BlockSpec(memory_space=pltpu.MemorySpace.SMEM)


# ----------------------------------------------------------------------------
# Up.forward  (public API: NCHW in, NCHW out — same as the PyTorch module)
# ----------------------------------------------------------------------------
def up_forward(x_nchw, mask_nchw, params):
    x = x_nchw.astype(jnp.float32)
    m = mask_nchw.astype(jnp.float32)
    N, Cx, Hx, Wx = x.shape
    Nm, Cm, Hm, Wm = m.shape
    assert N == Nm
    Cxo = params["conv_w"].shape[0]
    Cmo = params["mask_w"].shape[0]
    Hxo, Wxo = 2 * Hx, 2 * Wx
    Hmo, Wmo = 2 * Hm, 2 * Wm

    ahx, awx = _padded_interp_matrices(Hx, Wx)
    ahm, awm = _padded_interp_matrices(Hm, Wm)
    wx = params["conv_w"].astype(jnp.float32).reshape(-1)
    bx = params["conv_b"].astype(jnp.float32)
    wm = params["mask_w"].astype(jnp.float32).reshape(-1)
    bm = params["mask_b"].astype(jnp.float32)

    # Advisory cost hint for XLA scheduling around the fused custom call.
    flops = 2 * N * (
        Cx * (Hx * Wx * (Wxo + 2) + (Hxo + 2) * Hx * (Wxo + 2))
        + Cxo * Cx * 9 * Hxo * Wxo
        + Cm * (Hm * Wm * (Wmo + 2) + (Hmo + 2) * Hm * (Wmo + 2))
        + Cmo * Cm * 9 * Hmo * Wmo)
    bytes_accessed = 4 * (x.size + m.size
                          + N * Cxo * Hxo * Wxo + N * Cmo * Hmo * Wmo
                          + wx.size + wm.size + bx.size + bm.size
                          + ahx.size + awx.size + ahm.size + awm.size)

    return pl.pallas_call(
        _up_kernel,
        out_shape=(jax.ShapeDtypeStruct((N, Cxo, Hxo, Wxo), jnp.float32),
                   jax.ShapeDtypeStruct((N, Cmo, Hmo, Wmo), jnp.float32)),
        grid=(N,),
        in_specs=[
            pl.BlockSpec((1, Cx, Hx, Wx), lambda n: (n, 0, 0, 0)),
            pl.BlockSpec((Hxo + 2, Hx), lambda n: (0, 0)),
            pl.BlockSpec((Wx, Wxo + 2), lambda n: (0, 0)),
            _smem_spec(), _smem_spec(),
            pl.BlockSpec((1, Cm, Hm, Wm), lambda n: (n, 0, 0, 0)),
            pl.BlockSpec((Hmo + 2, Hm), lambda n: (0, 0)),
            pl.BlockSpec((Wm, Wmo + 2), lambda n: (0, 0)),
            _smem_spec(), _smem_spec(),
        ],
        out_specs=(
            pl.BlockSpec((1, Cxo, Hxo, Wxo), lambda n: (n, 0, 0, 0)),
            pl.BlockSpec((1, Cmo, Hmo, Wmo), lambda n: (n, 0, 0, 0)),
        ),
        compiler_params=pltpu.CompilerParams(
            dimension_semantics=("parallel",)),
        cost_estimate=pl.CostEstimate(flops=int(flops), transcendentals=0,
                                      bytes_accessed=int(bytes_accessed)),
    )(x, ahx, awx, wx, bx, m, ahm, awm, wm, bm)


# ----------------------------------------------------------------------------
# Pure-JAX reference (correctness check only)
# ----------------------------------------------------------------------------
def up_forward_ref(x, mask, params):
    def up(v):
        _, _, H, W = v.shape
        Ah = bilinear_matrix(H, 2 * H)
        Aw = bilinear_matrix(W, 2 * W)
        return jnp.einsum("oh,pw,nchw->ncop", Ah, Aw, v)

    def conv(v, w, b):
        y = lax.conv_general_dilated(v, w, (1, 1), ((1, 1), (1, 1)),
                                     dimension_numbers=("NCHW", "OIHW", "NCHW"))
        return y + b[None, :, None, None]

    return (conv(up(x), params["conv_w"], params["conv_b"]),
            conv(up(mask), params["mask_w"], params["mask_b"]))


if __name__ == "__main__":
    # small shapes consistent with the module
    N, in_ch, out_ch = 2, 4, 4
    mask_in_ch, mask_out_ch = 2, 2
    H = W = 16

    key = jax.random.PRNGKey(0)
    k1, k2, k3, k4, k5, k6 = jax.random.split(key, 6)

    x = jax.random.normal(k1, (N, in_ch, H, W), jnp.float32)
    mask = jax.random.normal(k2, (N, mask_in_ch, H, W), jnp.float32)

    params = {
        "conv_w": 0.1 * jax.random.normal(k3, (out_ch, in_ch, 3, 3), jnp.float32),
        "conv_b": 0.1 * jax.random.normal(k4, (out_ch,), jnp.float32),
        "mask_w": 0.1 * jax.random.normal(k5, (mask_out_ch, mask_in_ch, 3, 3), jnp.float32),
        "mask_b": 0.1 * jax.random.normal(k6, (mask_out_ch,), jnp.float32),
    }

    x_out, m_out = jax.block_until_ready(jax.jit(up_forward)(x, mask, params))

    x_ref, m_ref = up_forward_ref(x, mask, params)
    assert x_out.shape == (N, out_ch, 2 * H, 2 * W)
    assert m_out.shape == (N, mask_out_ch, 2 * H, 2 * W)
    assert jnp.allclose(x_out, x_ref, atol=1e-4, rtol=1e-4)
    assert jnp.allclose(m_out, m_ref, atol=1e-4, rtol=1e-4)

    print("KERNEL_OK")
</pallas_src>

<mosaic_0001>
module attributes {stable_mosaic.version = 11 : i64} {
  func.func private @main(%arg0: i32) attributes {dimension_semantics = [#tpu.dimension_semantics<core_parallel>], iteration_bounds = array<i64: 2>, tpu.core_type = #tpu.core_type<sc_scalar_subcore>, window_params = []} {
    return
  }
}

module attributes {stable_mosaic.version = 11 : i64} {
  func.func private @main(%arg0: i32) attributes {dimension_semantics = [#tpu.dimension_semantics<core_parallel>], iteration_bounds = array<i64: 2>, tpu.core_type = #tpu.core_type<sc_scalar_subcore>, window_params = []} {
    return
  }
}

module attributes {stable_mosaic.version = 11 : i64} {
  func.func @_up_kernel(%arg0: i32, %arg1: memref<1x4x16x16xf32, #tpu.memory_space<vmem>>, %arg2: memref<34x16xf32, #tpu.memory_space<vmem>>, %arg3: memref<16x34xf32, #tpu.memory_space<vmem>>, %arg4: memref<144xf32, #tpu.memory_space<smem>>, %arg5: memref<4xf32, #tpu.memory_space<smem>>, %arg6: memref<1x2x16x16xf32, #tpu.memory_space<vmem>>, %arg7: memref<34x16xf32, #tpu.memory_space<vmem>>, %arg8: memref<16x34xf32, #tpu.memory_space<vmem>>, %arg9: memref<36xf32, #tpu.memory_space<smem>>, %arg10: memref<2xf32, #tpu.memory_space<smem>>, %arg11: memref<1x4x32x32xf32, #tpu.memory_space<vmem>>, %arg12: memref<1x2x32x32xf32, #tpu.memory_space<vmem>>) attributes {dimension_semantics = [#tpu.dimension_semantics<parallel>], iteration_bounds = array<i64: 2>, scalar_prefetch = 0 : i64, scratch_operands = 0 : i64, tpu.core_type = #tpu.core_type<tc>, window_params = [{transform_indices = @transform_0, window_bounds = array<i64: 1, 4, 16, 16>}, {pipeline_mode = #tpu.pipeline_mode<synchronous>, transform_indices = @transform_1, window_bounds = array<i64: 34, 16>}, {pipeline_mode = #tpu.pipeline_mode<synchronous>, transform_indices = @transform_2, window_bounds = array<i64: 16, 34>}, {transform_indices = @transform_3, window_bounds = array<i64: 144>}, {transform_indices = @transform_4, window_bounds = array<i64: 4>}, {transform_indices = @transform_5, window_bounds = array<i64: 1, 2, 16, 16>}, {pipeline_mode = #tpu.pipeline_mode<synchronous>, transform_indices = @transform_6, window_bounds = array<i64: 34, 16>}, {pipeline_mode = #tpu.pipeline_mode<synchronous>, transform_indices = @transform_7, window_bounds = array<i64: 16, 34>}, {transform_indices = @transform_8, window_bounds = array<i64: 36>}, {transform_indices = @transform_9, window_bounds = array<i64: 2>}, {transform_indices = @transform_10, window_bounds = array<i64: 1, 4, 32, 32>}, {transform_indices = @transform_11, window_bounds = array<i64: 1, 2, 32, 32>}]} {
    %c0 = arith.constant 0 : index
    %c0_0 = arith.constant 0 : index
    %0 = vector.load %arg2[%c0, %c0_0] : memref<34x16xf32, #tpu.memory_space<vmem>>, vector<34x16xf32>
    %c0_1 = arith.constant 0 : index
    %c0_2 = arith.constant 0 : index
    %1 = vector.load %arg3[%c0_1, %c0_2] : memref<16x34xf32, #tpu.memory_space<vmem>>, vector<16x34xf32>
    %cst = arith.constant 0.000000e+00 : f32
    %2 = vector.broadcast %cst : f32 to vector<32x32xf32>
    %cst_3 = arith.constant 0.000000e+00 : f32
    %3 = vector.broadcast %cst_3 : f32 to vector<32x32xf32>
    %cst_4 = arith.constant 0.000000e+00 : f32
    %4 = vector.broadcast %cst_4 : f32 to vector<32x32xf32>
    %cst_5 = arith.constant 0.000000e+00 : f32
    %5 = vector.broadcast %cst_5 : f32 to vector<32x32xf32>
    %c0_6 = arith.constant 0 : index
    %c0_7 = arith.constant 0 : index
    %c0_8 = arith.constant 0 : index
    %c0_9 = arith.constant 0 : index
    %6 = vector.load %arg1[%c0_6, %c0_7, %c0_8, %c0_9] : memref<1x4x16x16xf32, #tpu.memory_space<vmem>>, vector<1x1x16x16xf32>
    %7 = vector.shape_cast %6 : vector<1x1x16x16xf32> to vector<16x16xf32>
    %cst_10 = arith.constant dense<0.000000e+00> : vector<16x34xf32>
    %8 = tpu.matmul %7, %1, %cst_10 {dimension_numbers = #tpu.dot_dimension_numbers<[1], [0], [0], [1], [0, 0, 1, 1], [], []>} : vector<16x16xf32>, vector<16x34xf32>, vector<16x34xf32> -> vector<16x34xf32>
    %cst_11 = arith.constant dense<0.000000e+00> : vector<34x34xf32>
    %9 = tpu.matmul %0, %8, %cst_11 {dimension_numbers = #tpu.dot_dimension_numbers<[1], [0], [0], [1], [0, 0, 1, 1], [], []>} : vector<34x16xf32>, vector<16x34xf32>, vector<34x34xf32> -> vector<34x34xf32>
    %10 = vector.extract_strided_slice %9 {offsets = [0, 0], sizes = [32, 32], strides = [1, 1]} : vector<34x34xf32> to vector<32x32xf32>
    %c0_12 = arith.constant 0 : index
    %11 = memref.load %arg4[%c0_12] : memref<144xf32, #tpu.memory_space<smem>>
    %12 = vector.broadcast %11 : f32 to vector<32x32xf32>
    %13 = arith.mulf %12, %10 : vector<32x32xf32>
    %14 = arith.addf %2, %13 : vector<32x32xf32>
    %c36 = arith.constant 36 : index
    %15 = memref.load %arg4[%c36] : memref<144xf32, #tpu.memory_space<smem>>
    %16 = vector.broadcast %15 : f32 to vector<32x32xf32>
    %17 = arith.mulf %16, %10 : vector<32x32xf32>
    %18 = arith.addf %3, %17 : vector<32x32xf32>
    %c72 = arith.constant 72 : index
    %19 = memref.load %arg4[%c72] : memref<144xf32, #tpu.memory_space<smem>>
    %20 = vector.broadcast %19 : f32 to vector<32x32xf32>
    %21 = arith.mulf %20, %10 : vector<32x32xf32>
    %22 = arith.addf %4, %21 : vector<32x32xf32>
    %c108 = arith.constant 108 : index
    %23 = memref.load %arg4[%c108] : memref<144xf32, #tpu.memory_space<smem>>
    %24 = vector.broadcast %23 : f32 to vector<32x32xf32>
    %25 = arith.mulf %24, %10 : vector<32x32xf32>
    %26 = arith.addf %5, %25 : vector<32x32xf32>
    %27 = vector.extract_strided_slice %9 {offsets = [0, 1], sizes = [32, 32], strides = [1, 1]} : vector<34x34xf32> to vector<32x32xf32>
    %c1 = arith.constant 1 : index
    %28 = memref.load %arg4[%c1] : memref<144xf32, #tpu.memory_space<smem>>
    %29 = vector.broadcast %28 : f32 to vector<32x32xf32>
    %30 = arith.mulf %29, %27 : vector<32x32xf32>
    %31 = arith.addf %14, %30 : vector<32x32xf32>
    %c37 = arith.constant 37 : index
    %32 = memref.load %arg4[%c37] : memref<144xf32, #tpu.memory_space<smem>>
    %33 = vector.broadcast %32 : f32 to vector<32x32xf32>
    %34 = arith.mulf %33, %27 : vector<32x32xf32>
    %35 = arith.addf %18, %34 : vector<32x32xf32>
    %c73 = arith.constant 73 : index
    %36 = memref.load %arg4[%c73] : memref<144xf32, #tpu.memory_space<smem>>
    %37 = vector.broadcast %36 : f32 to vector<32x32xf32>
    %38 = arith.mulf %37, %27 : vector<32x32xf32>
    %39 = arith.addf %22, %38 : vector<32x32xf32>
    %c109 = arith.constant 109 : index
    %40 = memref.load %arg4[%c109] : memref<144xf32, #tpu.memory_space<smem>>
    %41 = vector.broadcast %40 : f32 to vector<32x32xf32>
    %42 = arith.mulf %41, %27 : vector<32x32xf32>
    %43 = arith.addf %26, %42 : vector<32x32xf32>
    %44 = vector.extract_strided_slice %9 {offsets = [0, 2], sizes = [32, 32], strides = [1, 1]} : vector<34x34xf32> to vector<32x32xf32>
    %c2 = arith.constant 2 : index
    %45 = memref.load %arg4[%c2] : memref<144xf32, #tpu.memory_space<smem>>
    %46 = vector.broadcast %45 : f32 to vector<32x32xf32>
    %47 = arith.mulf %46, %44 : vector<32x32xf32>
    %48 = arith.addf %31, %47 : vector<32x32xf32>
    %c38 = arith.constant 38 : index
    %49 = memref.load %arg4[%c38] : memref<144xf32, #tpu.memory_space<smem>>
    %50 = vector.broadcast %49 : f32 to vector<32x32xf32>
    %51 = arith.mulf %50, %44 : vector<32x32xf32>
    %52 = arith.addf %35, %51 : vector<32x32xf32>
    %c74 = arith.constant 74 : index
    %53 = memref.load %arg4[%c74] : memref<144xf32, #tpu.memory_space<smem>>
    %54 = vector.broadcast %53 : f32 to vector<32x32xf32>
    %55 = arith.mulf %54, %44 : vector<32x32xf32>
    %56 = arith.addf %39, %55 : vector<32x32xf32>
    %c110 = arith.constant 110 : index
    %57 = memref.load %arg4[%c110] : memref<144xf32, #tpu.memory_space<smem>>
    %58 = vector.broadcast %57 : f32 to vector<32x32xf32>
    %59 = arith.mulf %58, %44 : vector<32x32xf32>
    %60 = arith.addf %43, %59 : vector<32x32xf32>
    %61 = vector.extract_strided_slice %9 {offsets = [1, 0], sizes = [32, 32], strides = [1, 1]} : vector<34x34xf32> to vector<32x32xf32>
    %c3 = arith.constant 3 : index
    %62 = memref.load %arg4[%c3] : memref<144xf32, #tpu.memory_space<smem>>
    %63 = vector.broadcast %62 : f32 to vector<32x32xf32>
    %64 = arith.mulf %63, %61 : vector<32x32xf32>
    %65 = arith.addf %48, %64 : vector<32x32xf32>
    %c39 = arith.constant 39 : index
    %66 = memref.load %arg4[%c39] : memref<144xf32, #tpu.memory_space<smem>>
    %67 = vector.broadcast %66 : f32 to vector<32x32xf32>
    %68 = arith.mulf %67, %61 : vector<32x32xf32>
    %69 = arith.addf %52, %68 : vector<32x32xf32>
    %c75 = arith.constant 75 : index
    %70 = memref.load %arg4[%c75] : memref<144xf32, #tpu.memory_space<smem>>
    %71 = vector.broadcast %70 : f32 to vector<32x32xf32>
    %72 = arith.mulf %71, %61 : vector<32x32xf32>
    %73 = arith.addf %56, %72 : vector<32x32xf32>
    %c111 = arith.constant 111 : index
    %74 = memref.load %arg4[%c111] : memref<144xf32, #tpu.memory_space<smem>>
    %75 = vector.broadcast %74 : f32 to vector<32x32xf32>
    %76 = arith.mulf %75, %61 : vector<32x32xf32>
    %77 = arith.addf %60, %76 : vector<32x32xf32>
    %78 = vector.extract_strided_slice %9 {offsets = [1, 1], sizes = [32, 32], strides = [1, 1]} : vector<34x34xf32> to vector<32x32xf32>
    %c4 = arith.constant 4 : index
    %79 = memref.load %arg4[%c4] : memref<144xf32, #tpu.memory_space<smem>>
    %80 = vector.broadcast %79 : f32 to vector<32x32xf32>
    %81 = arith.mulf %80, %78 : vector<32x32xf32>
    %82 = arith.addf %65, %81 : vector<32x32xf32>
    %c40 = arith.constant 40 : index
    %83 = memref.load %arg4[%c40] : memref<144xf32, #tpu.memory_space<smem>>
    %84 = vector.broadcast %83 : f32 to vector<32x32xf32>
    %85 = arith.mulf %84, %78 : vector<32x32xf32>
    %86 = arith.addf %69, %85 : vector<32x32xf32>
    %c76 = arith.constant 76 : index
    %87 = memref.load %arg4[%c76] : memref<144xf32, #tpu.memory_space<smem>>
    %88 = vector.broadcast %87 : f32 to vector<32x32xf32>
    %89 = arith.mulf %88, %78 : vector<32x32xf32>
    %90 = arith.addf %73, %89 : vector<32x32xf32>
    %c112 = arith.constant 112 : index
    %91 = memref.load %arg4[%c112] : memref<144xf32, #tpu.memory_space<smem>>
    %92 = vector.broadcast %91 : f32 to vector<32x32xf32>
    %93 = arith.mulf %92, %78 : vector<32x32xf32>
    %94 = arith.addf %77, %93 : vector<32x32xf32>
    %95 = vector.extract_strided_slice %9 {offsets = [1, 2], sizes = [32, 32], strides = [1, 1]} : vector<34x34xf32> to vector<32x32xf32>
    %c5 = arith.constant 5 : index
    %96 = memref.load %arg4[%c5] : memref<144xf32, #tpu.memory_space<smem>>
    %97 = vector.broadcast %96 : f32 to vector<32x32xf32>
    %98 = arith.mulf %97, %95 : vector<32x32xf32>
    %99 = arith.addf %82, %98 : vector<32x32xf32>
    %c41 = arith.constant 41 : index
    %100 = memref.load %arg4[%c41] : memref<144xf32, #tpu.memory_space<smem>>
    %101 = vector.broadcast %100 : f32 to vector<32x32xf32>
    %102 = arith.mulf %101, %95 : vector<32x32xf32>
    %103 = arith.addf %86, %102 : vector<32x32xf32>
    %c77 = arith.constant 77 : index
    %104 = memref.load %arg4[%c77] : memref<144xf32, #tpu.memory_space<smem>>
    %105 = vector.broadcast %104 : f32 to vector<32x32xf32>
    %106 = arith.mulf %105, %95 : vector<32x32xf32>
    %107 = arith.addf %90, %106 : vector<32x32xf32>
    %c113 = arith.constant 113 : index
    %108 = memref.load %arg4[%c113] : memref<144xf32, #tpu.memory_space<smem>>
    %109 = vector.broadcast %108 : f32 to vector<32x32xf32>
    %110 = arith.mulf %109, %95 : vector<32x32xf32>
    %111 = arith.addf %94, %110 : vector<32x32xf32>
    %112 = vector.extract_strided_slice %9 {offsets = [2, 0], sizes = [32, 32], strides = [1, 1]} : vector<34x34xf32> to vector<32x32xf32>
    %c6 = arith.constant 6 : index
    %113 = memref.load %arg4[%c6] : memref<144xf32, #tpu.memory_space<smem>>
    %114 = vector.broadcast %113 : f32 to vector<32x32xf32>
    %115 = arith.mulf %114, %112 : vector<32x32xf32>
    %116 = arith.addf %99, %115 : vector<32x32xf32>
    %c42 = arith.constant 42 : index
    %117 = memref.load %arg4[%c42] : memref<144xf32, #tpu.memory_space<smem>>
    %118 = vector.broadcast %117 : f32 to vector<32x32xf32>
    %119 = arith.mulf %118, %112 : vector<32x32xf32>
    %120 = arith.addf %103, %119 : vector<32x32xf32>
    %c78 = arith.constant 78 : index
    %121 = memref.load %arg4[%c78] : memref<144xf32, #tpu.memory_space<smem>>
    %122 = vector.broadcast %121 : f32 to vector<32x32xf32>
    %123 = arith.mulf %122, %112 : vector<32x32xf32>
    %124 = arith.addf %107, %123 : vector<32x32xf32>
    %c114 = arith.constant 114 : index
    %125 = memref.load %arg4[%c114] : memref<144xf32, #tpu.memory_space<smem>>
    %126 = vector.broadcast %125 : f32 to vector<32x32xf32>
    %127 = arith.mulf %126, %112 : vector<32x32xf32>
    %128 = arith.addf %111, %127 : vector<32x32xf32>
    %129 = vector.extract_strided_slice %9 {offsets = [2, 1], sizes = [32, 32], strides = [1, 1]} : vector<34x34xf32> to vector<32x32xf32>
    %c7 = arith.constant 7 : index
    %130 = memref.load %arg4[%c7] : memref<144xf32, #tpu.memory_space<smem>>
    %131 = vector.broadcast %130 : f32 to vector<32x32xf32>
    %132 = arith.mulf %131, %129 : vector<32x32xf32>
    %133 = arith.addf %116, %132 : vector<32x32xf32>
    %c43 = arith.constant 43 : index
    %134 = memref.load %arg4[%c43] : memref<144xf32, #tpu.memory_space<smem>>
    %135 = vector.broadcast %134 : f32 to vector<32x32xf32>
    %136 = arith.mulf %135, %129 : vector<32x32xf32>
    %137 = arith.addf %120, %136 : vector<32x32xf32>
    %c79 = arith.constant 79 : index
    %138 = memref.load %arg4[%c79] : memref<144xf32, #tpu.memory_space<smem>>
    %139 = vector.broadcast %138 : f32 to vector<32x32xf32>
    %140 = arith.mulf %139, %129 : vector<32x32xf32>
    %141 = arith.addf %124, %140 : vector<32x32xf32>
    %c115 = arith.constant 115 : index
    %142 = memref.load %arg4[%c115] : memref<144xf32, #tpu.memory_space<smem>>
    %143 = vector.broadcast %142 : f32 to vector<32x32xf32>
    %144 = arith.mulf %143, %129 : vector<32x32xf32>
    %145 = arith.addf %128, %144 : vector<32x32xf32>
    %146 = vector.extract_strided_slice %9 {offsets = [2, 2], sizes = [32, 32], strides = [1, 1]} : vector<34x34xf32> to vector<32x32xf32>
    %c8 = arith.constant 8 : index
    %147 = memref.load %arg4[%c8] : memref<144xf32, #tpu.memory_space<smem>>
    %148 = vector.broadcast %147 : f32 to vector<32x32xf32>
    %149 = arith.mulf %148, %146 : vector<32x32xf32>
    %150 = arith.addf %133, %149 : vector<32x32xf32>
    %c44 = arith.constant 44 : index
    %151 = memref.load %arg4[%c44] : memref<144xf32, #tpu.memory_space<smem>>
    %152 = vector.broadcast %151 : f32 to vector<32x32xf32>
    %153 = arith.mulf %152, %146 : vector<32x32xf32>
    %154 = arith.addf %137, %153 : vector<32x32xf32>
    %c80 = arith.constant 80 : index
    %155 = memref.load %arg4[%c80] : memref<144xf32, #tpu.memory_space<smem>>
    %156 = vector.broadcast %155 : f32 to vector<32x32xf32>
    %157 = arith.mulf %156, %146 : vector<32x32xf32>
    %158 = arith.addf %141, %157 : vector<32x32xf32>
    %c116 = arith.constant 116 : index
    %159 = memref.load %arg4[%c116] : memref<144xf32, #tpu.memory_space<smem>>
    %160 = vector.broadcast %159 : f32 to vector<32x32xf32>
    %161 = arith.mulf %160, %146 : vector<32x32xf32>
    %162 = arith.addf %145, %161 : vector<32x32xf32>
    %c0_13 = arith.constant 0 : index
    %c1_14 = arith.constant 1 : index
    %c0_15 = arith.constant 0 : index
    %c0_16 = arith.constant 0 : index
    %163 = vector.load %arg1[%c0_13, %c1_14, %c0_15, %c0_16] : memref<1x4x16x16xf32, #tpu.memory_space<vmem>>, vector<1x1x16x16xf32>
    %164 = vector.shape_cast %163 : vector<1x1x16x16xf32> to vector<16x16xf32>
    %cst_17 = arith.constant dense<0.000000e+00> : vector<16x34xf32>
    %165 = tpu.matmul %164, %1, %cst_17 {dimension_numbers = #tpu.dot_dimension_numbers<[1], [0], [0], [1], [0, 0, 1, 1], [], []>} : vector<16x16xf32>, vector<16x34xf32>, vector<16x34xf32> -> vector<16x34xf32>
    %cst_18 = arith.constant dense<0.000000e+00> : vector<34x34xf32>
    %166 = tpu.matmul %0, %165, %cst_18 {dimension_numbers = #tpu.dot_dimension_numbers<[1], [0], [0], [1], [0, 0, 1, 1], [], []>} : vector<34x16xf32>, vector<16x34xf32>, vector<34x34xf32> -> vector<34x34xf32>
    %167 = vector.extract_strided_slice %166 {offsets = [0, 0], sizes = [32, 32], strides = [1, 1]} : vector<34x34xf32> to vector<32x32xf32>
    %c9 = arith.constant 9 : index
    %168 = memref.load %arg4[%c9] : memref<144xf32, #tpu.memory_space<smem>>
    %169 = vector.broadcast %168 : f32 to vector<32x32xf32>
    %170 = arith.mulf %169, %167 : vector<32x32xf32>
    %171 = arith.addf %150, %170 : vector<32x32xf32>
    %c45 = arith.constant 45 : index
    %172 = memref.load %arg4[%c45] : memref<144xf32, #tpu.memory_space<smem>>
    %173 = vector.broadcast %172 : f32 to vector<32x32xf32>
    %174 = arith.mulf %173, %167 : vector<32x32xf32>
    %175 = arith.addf %154, %174 : vector<32x32xf32>
    %c81 = arith.constant 81 : index
    %176 = memref.load %arg4[%c81] : memref<144xf32, #tpu.memory_space<smem>>
    %177 = vector.broadcast %176 : f32 to vector<32x32xf32>
    %178 = arith.mulf %177, %167 : vector<32x32xf32>
    %179 = arith.addf %158, %178 : vector<32x32xf32>
    %c117 = arith.constant 117 : index
    %180 = memref.load %arg4[%c117] : memref<144xf32, #tpu.memory_space<smem>>
    %181 = vector.broadcast %180 : f32 to vector<32x32xf32>
    %182 = arith.mulf %181, %167 : vector<32x32xf32>
    %183 = arith.addf %162, %182 : vector<32x32xf32>
    %184 = vector.extract_strided_slice %166 {offsets = [0, 1], sizes = [32, 32], strides = [1, 1]} : vector<34x34xf32> to vector<32x32xf32>
    %c10 = arith.constant 10 : index
    %185 = memref.load %arg4[%c10] : memref<144xf32, #tpu.memory_space<smem>>
    %186 = vector.broadcast %185 : f32 to vector<32x32xf32>
    %187 = arith.mulf %186, %184 : vector<32x32xf32>
    %188 = arith.addf %171, %187 : vector<32x32xf32>
    %c46 = arith.constant 46 : index
    %189 = memref.load %arg4[%c46] : memref<144xf32, #tpu.memory_space<smem>>
    %190 = vector.broadcast %189 : f32 to vector<32x32xf32>
    %191 = arith.mulf %190, %184 : vector<32x32xf32>
    %192 = arith.addf %175, %191 : vector<32x32xf32>
    %c82 = arith.constant 82 : index
    %193 = memref.load %arg4[%c82] : memref<144xf32, #tpu.memory_space<smem>>
    %194 = vector.broadcast %193 : f32 to vector<32x32xf32>
    %195 = arith.mulf %194, %184 : vector<32x32xf32>
    %196 = arith.addf %179, %195 : vector<32x32xf32>
    %c118 = arith.constant 118 : index
    %197 = memref.load %arg4[%c118] : memref<144xf32, #tpu.memory_space<smem>>
    %198 = vector.broadcast %197 : f32 to vector<32x32xf32>
    %199 = arith.mulf %198, %184 : vector<32x32xf32>
    %200 = arith.addf %183, %199 : vector<32x32xf32>
    %201 = vector.extract_strided_slice %166 {offsets = [0, 2], sizes = [32, 32], strides = [1, 1]} : vector<34x34xf32> to vector<32x32xf32>
    %c11 = arith.constant 11 : index
    %202 = memref.load %arg4[%c11] : memref<144xf32, #tpu.memory_space<smem>>
    %203 = vector.broadcast %202 : f32 to vector<32x32xf32>
    %204 = arith.mulf %203, %201 : vector<32x32xf32>
    %205 = arith.addf %188, %204 : vector<32x32xf32>
    %c47 = arith.constant 47 : index
    %206 = memref.load %arg4[%c47] : memref<144xf32, #tpu.memory_space<smem>>
    %207 = vector.broadcast %206 : f32 to vector<32x32xf32>
    %208 = arith.mulf %207, %201 : vector<32x32xf32>
    %209 = arith.addf %192, %208 : vector<32x32xf32>
    %c83 = arith.constant 83 : index
    %210 = memref.load %arg4[%c83] : memref<144xf32, #tpu.memory_space<smem>>
    %211 = vector.broadcast %210 : f32 to vector<32x32xf32>
    %212 = arith.mulf %211, %201 : vector<32x32xf32>
    %213 = arith.addf %196, %212 : vector<32x32xf32>
    %c119 = arith.constant 119 : index
    %214 = memref.load %arg4[%c119] : memref<144xf32, #tpu.memory_space<smem>>
    %215 = vector.broadcast %214 : f32 to vector<32x32xf32>
    %216 = arith.mulf %215, %201 : vector<32x32xf32>
    %217 = arith.addf %200, %216 : vector<32x32xf32>
    %218 = vector.extract_strided_slice %166 {offsets = [1, 0], sizes = [32, 32], strides = [1, 1]} : vector<34x34xf32> to vector<32x32xf32>
    %c12 = arith.constant 12 : index
    %219 = memref.load %arg4[%c12] : memref<144xf32, #tpu.memory_space<smem>>
    %220 = vector.broadcast %219 : f32 to vector<32x32xf32>
    %221 = arith.mulf %220, %218 : vector<32x32xf32>
    %222 = arith.addf %205, %221 : vector<32x32xf32>
    %c48 = arith.constant 48 : index
    %223 = memref.load %arg4[%c48] : memref<144xf32, #tpu.memory_space<smem>>
    %224 = vector.broadcast %223 : f32 to vector<32x32xf32>
    %225 = arith.mulf %224, %218 : vector<32x32xf32>
    %226 = arith.addf %209, %225 : vector<32x32xf32>
    %c84 = arith.constant 84 : index
    %227 = memref.load %arg4[%c84] : memref<144xf32, #tpu.memory_space<smem>>
    %228 = vector.broadcast %227 : f32 to vector<32x32xf32>
    %229 = arith.mulf %228, %218 : vector<32x32xf32>
    %230 = arith.addf %213, %229 : vector<32x32xf32>
    %c120 = arith.constant 120 : index
    %231 = memref.load %arg4[%c120] : memref<144xf32, #tpu.memory_space<smem>>
    %232 = vector.broadcast %231 : f32 to vector<32x32xf32>
    %233 = arith.mulf %232, %218 : vector<32x32xf32>
    %234 = arith.addf %217, %233 : vector<32x32xf32>
    %235 = vector.extract_strided_slice %166 {offsets = [1, 1], sizes = [32, 32], strides = [1, 1]} : vector<34x34xf32> to vector<32x32xf32>
    %c13 = arith.constant 13 : index
    %236 = memref.load %arg4[%c13] : memref<144xf32, #tpu.memory_space<smem>>
    %237 = vector.broadcast %236 : f32 to vector<32x32xf32>
    %238 = arith.mulf %237, %235 : vector<32x32xf32>
    %239 = arith.addf %222, %238 : vector<32x32xf32>
    %c49 = arith.constant 49 : index
    %240 = memref.load %arg4[%c49] : memref<144xf32, #tpu.memory_space<smem>>
    %241 = vector.broadcast %240 : f32 to vector<32x32xf32>
    %242 = arith.mulf %241, %235 : vector<32x32xf32>
    %243 = arith.addf %226, %242 : vector<32x32xf32>
    %c85 = arith.constant 85 : index
    %244 = memref.load %arg4[%c85] : memref<144xf32, #tpu.memory_space<smem>>
    %245 = vector.broadcast %244 : f32 to vector<32x32xf32>
    %246 = arith.mulf %245, %235 : vector<32x32xf32>
    %247 = arith.addf %230, %246 : vector<32x32xf32>
    %c121 = arith.constant 121 : index
    %248 = memref.load %arg4[%c121] : memref<144xf32, #tpu.memory_space<smem>>
    %249 = vector.broadcast %248 : f32 to vector<32x32xf32>
    %250 = arith.mulf %249, %235 : vector<32x32xf32>
    %251 = arith.addf %234, %250 : vector<32x32xf32>
    %252 = vector.extract_strided_slice %166 {offsets = [1, 2], sizes = [32, 32], strides = [1, 1]} : vector<34x34xf32> to vector<32x32xf32>
    %c14 = arith.constant 14 : index
    %253 = memref.load %arg4[%c14] : memref<144xf32, #tpu.memory_space<smem>>
    %254 = vector.broadcast %253 : f32 to vector<32x32xf32>
    %255 = arith.mulf %254, %252 : vector<32x32xf32>
    %256 = arith.addf %239, %255 : vector<32x32xf32>
    %c50 = arith.constant 50 : index
    %257 = memref.load %arg4[%c50] : memref<144xf32, #tpu.memory_space<smem>>
    %258 = vector.broadcast %257 : f32 to vector<32x32xf32>
    %259 = arith.mulf %258, %252 : vector<32x32xf32>
    %260 = arith.addf %243, %259 : vector<32x32xf32>
    %c86 = arith.constant 86 : index
    %261 = memref.load %arg4[%c86] : memref<144xf32, #tpu.memory_space<smem>>
    %262 = vector.broadcast %261 : f32 to vector<32x32xf32>
    %263 = arith.mulf %262, %252 : vector<32x32xf32>
    %264 = arith.addf %247, %263 : vector<32x32xf32>
    %c122 = arith.constant 122 : index
    %265 = memref.load %arg4[%c122] : memref<144xf32, #tpu.memory_space<smem>>
    %266 = vector.broadcast %265 : f32 to vector<32x32xf32>
    %267 = arith.mulf %266, %252 : vector<32x32xf32>
    %268 = arith.addf %251, %267 : vector<32x32xf32>
    %269 = vector.extract_strided_slice %166 {offsets = [2, 0], sizes = [32, 32], strides = [1, 1]} : vector<34x34xf32> to vector<32x32xf32>
    %c15 = arith.constant 15 : index
    %270 = memref.load %arg4[%c15] : memref<144xf32, #tpu.memory_space<smem>>
    %271 = vector.broadcast %270 : f32 to vector<32x32xf32>
    %272 = arith.mulf %271, %269 : vector<32x32xf32>
    %273 = arith.addf %256, %272 : vector<32x32xf32>
    %c51 = arith.constant 51 : index
    %274 = memref.load %arg4[%c51] : memref<144xf32, #tpu.memory_space<smem>>
    %275 = vector.broadcast %274 : f32 to vector<32x32xf32>
    %276 = arith.mulf %275, %269 : vector<32x32xf32>
    %277 = arith.addf %260, %276 : vector<32x32xf32>
    %c87 = arith.constant 87 : index
    %278 = memref.load %arg4[%c87] : memref<144xf32, #tpu.memory_space<smem>>
    %279 = vector.broadcast %278 : f32 to vector<32x32xf32>
    %280 = arith.mulf %279, %269 : vector<32x32xf32>
    %281 = arith.addf %264, %280 : vector<32x32xf32>
    %c123 = arith.constant 123 : index
    %282 = memref.load %arg4[%c123] : memref<144xf32, #tpu.memory_space<smem>>
    %283 = vector.broadcast %282 : f32 to vector<32x32xf32>
    %284 = arith.mulf %283, %269 : vector<32x32xf32>
    %285 = arith.addf %268, %284 : vector<32x32xf32>
    %286 = vector.extract_strided_slice %166 {offsets = [2, 1], sizes = [32, 32], strides = [1, 1]} : vector<34x34xf32> to vector<32x32xf32>
    %c16 = arith.constant 16 : index
    %287 = memref.load %arg4[%c16] : memref<144xf32, #tpu.memory_space<smem>>
    %288 = vector.broadcast %287 : f32 to vector<32x32xf32>
    %289 = arith.mulf %288, %286 : vector<32x32xf32>
    %290 = arith.addf %273, %289 : vector<32x32xf32>
    %c52 = arith.constant 52 : index
    %291 = memref.load %arg4[%c52] : memref<144xf32, #tpu.memory_space<smem>>
    %292 = vector.broadcast %291 : f32 to vector<32x32xf32>
    %293 = arith.mulf %292, %286 : vector<32x32xf32>
    %294 = arith.addf %277, %293 : vector<32x32xf32>
    %c88 = arith.constant 88 : index
    %295 = memref.load %arg4[%c88] : memref<144xf32, #tpu.memory_space<smem>>
    %296 = vector.broadcast %295 : f32 to vector<32x32xf32>
    %297 = arith.mulf %296, %286 : vector<32x32xf32>
    %298 = arith.addf %281, %297 : vector<32x32xf32>
    %c124 = arith.constant 124 : index
    %299 = memref.load %arg4[%c124] : memref<144xf32, #tpu.memory_space<smem>>
    %300 = vector.broadcast %299 : f32 to vector<32x32xf32>
    %301 = arith.mulf %300, %286 : vector<32x32xf32>
    %302 = arith.addf %285, %301 : vector<32x32xf32>
    %303 = vector.extract_strided_slice %166 {offsets = [2, 2], sizes = [32, 32], strides = [1, 1]} : vector<34x34xf32> to vector<32x32xf32>
    %c17 = arith.constant 17 : index
    %304 = memref.load %arg4[%c17] : memref<144xf32, #tpu.memory_space<smem>>
    %305 = vector.broadcast %304 : f32 to vector<32x32xf32>
    %306 = arith.mulf %305, %303 : vector<32x32xf32>
    %307 = arith.addf %290, %306 : vector<32x32xf32>
    %c53 = arith.constant 53 : index
    %308 = memref.load %arg4[%c53] : memref<144xf32, #tpu.memory_space<smem>>
    %309 = vector.broadcast %308 : f32 to vector<32x32xf32>
    %310 = arith.mulf %309, %303 : vector<32x32xf32>
    %311 = arith.addf %294, %310 : vector<32x32xf32>
    %c89 = arith.constant 89 : index
    %312 = memref.load %arg4[%c89] : memref<144xf32, #tpu.memory_space<smem>>
    %313 = vector.broadcast %312 : f32 to vector<32x32xf32>
    %314 = arith.mulf %313, %303 : vector<32x32xf32>
    %315 = arith.addf %298, %314 : vector<32x32xf32>
    %c125 = arith.constant 125 : index
    %316 = memref.load %arg4[%c125] : memref<144xf32, #tpu.memory_space<smem>>
    %317 = vector.broadcast %316 : f32 to vector<32x32xf32>
    %318 = arith.mulf %317, %303 : vector<32x32xf32>
    %319 = arith.addf %302, %318 : vector<32x32xf32>
    %c0_19 = arith.constant 0 : index
    %c2_20 = arith.constant 2 : index
    %c0_21 = arith.constant 0 : index
    %c0_22 = arith.constant 0 : index
    %320 = vector.load %arg1[%c0_19, %c2_20, %c0_21, %c0_22] : memref<1x4x16x16xf32, #tpu.memory_space<vmem>>, vector<1x1x16x16xf32>
    %321 = vector.shape_cast %320 : vector<1x1x16x16xf32> to vector<16x16xf32>
    %cst_23 = arith.constant dense<0.000000e+00> : vector<16x34xf32>
    %322 = tpu.matmul %321, %1, %cst_23 {dimension_numbers = #tpu.dot_dimension_numbers<[1], [0], [0], [1], [0, 0, 1, 1], [], []>} : vector<16x16xf32>, vector<16x34xf32>, vector<16x34xf32> -> vector<16x34xf32>
    %cst_24 = arith.constant dense<0.000000e+00> : vector<34x34xf32>
    %323 = tpu.matmul %0, %322, %cst_24 {dimension_numbers = #tpu.dot_dimension_numbers<[1], [0], [0], [1], [0, 0, 1, 1], [], []>} : vector<34x16xf32>, vector<16x34xf32>, vector<34x34xf32> -> vector<34x34xf32>
    %324 = vector.extract_strided_slice %323 {offsets = [0, 0], sizes = [32, 32], strides = [1, 1]} : vector<34x34xf32> to vector<32x32xf32>
    %c18 = arith.constant 18 : index
    %325 = memref.load %arg4[%c18] : memref<144xf32, #tpu.memory_space<smem>>
    %326 = vector.broadcast %325 : f32 to vector<32x32xf32>
    %327 = arith.mulf %326, %324 : vector<32x32xf32>
    %328 = arith.addf %307, %327 : vector<32x32xf32>
    %c54 = arith.constant 54 : index
    %329 = memref.load %arg4[%c54] : memref<144xf32, #tpu.memory_space<smem>>
    %330 = vector.broadcast %329 : f32 to vector<32x32xf32>
    %331 = arith.mulf %330, %324 : vector<32x32xf32>
    %332 = arith.addf %311, %331 : vector<32x32xf32>
    %c90 = arith.constant 90 : index
    %333 = memref.load %arg4[%c90] : memref<144xf32, #tpu.memory_space<smem>>
    %334 = vector.broadcast %333 : f32 to vector<32x32xf32>
    %335 = arith.mulf %334, %324 : vector<32x32xf32>
    %336 = arith.addf %315, %335 : vector<32x32xf32>
    %c126 = arith.constant 126 : index
    %337 = memref.load %arg4[%c126] : memref<144xf32, #tpu.memory_space<smem>>
    %338 = vector.broadcast %337 : f32 to vector<32x32xf32>
    %339 = arith.mulf %338, %324 : vector<32x32xf32>
    %340 = arith.addf %319, %339 : vector<32x32xf32>
    %341 = vector.extract_strided_slice %323 {offsets = [0, 1], sizes = [32, 32], strides = [1, 1]} : vector<34x34xf32> to vector<32x32xf32>
    %c19 = arith.constant 19 : index
    %342 = memref.load %arg4[%c19] : memref<144xf32, #tpu.memory_space<smem>>
    %343 = vector.broadcast %342 : f32 to vector<32x32xf32>
    %344 = arith.mulf %343, %341 : vector<32x32xf32>
    %345 = arith.addf %328, %344 : vector<32x32xf32>
    %c55 = arith.constant 55 : index
    %346 = memref.load %arg4[%c55] : memref<144xf32, #tpu.memory_space<smem>>
    %347 = vector.broadcast %346 : f32 to vector<32x32xf32>
    %348 = arith.mulf %347, %341 : vector<32x32xf32>
    %349 = arith.addf %332, %348 : vector<32x32xf32>
    %c91 = arith.constant 91 : index
    %350 = memref.load %arg4[%c91] : memref<144xf32, #tpu.memory_space<smem>>
    %351 = vector.broadcast %350 : f32 to vector<32x32xf32>
    %352 = arith.mulf %351, %341 : vector<32x32xf32>
    %353 = arith.addf %336, %352 : vector<32x32xf32>
    %c127 = arith.constant 127 : index
    %354 = memref.load %arg4[%c127] : memref<144xf32, #tpu.memory_space<smem>>
    %355 = vector.broadcast %354 : f32 to vector<32x32xf32>
    %356 = arith.mulf %355, %341 : vector<32x32xf32>
    %357 = arith.addf %340, %356 : vector<32x32xf32>
    %358 = vector.extract_strided_slice %323 {offsets = [0, 2], sizes = [32, 32], strides = [1, 1]} : vector<34x34xf32> to vector<32x32xf32>
    %c20 = arith.constant 20 : index
    %359 = memref.load %arg4[%c20] : memref<144xf32, #tpu.memory_space<smem>>
    %360 = vector.broadcast %359 : f32 to vector<32x32xf32>
    %361 = arith.mulf %360, %358 : vector<32x32xf32>
    %362 = arith.addf %345, %361 : vector<32x32xf32>
    %c56 = arith.constant 56 : index
    %363 = memref.load %arg4[%c56] : memref<144xf32, #tpu.memory_space<smem>>
    %364 = vector.broadcast %363 : f32 to vector<32x32xf32>
    %365 = arith.mulf %364, %358 : vector<32x32xf32>
    %366 = arith.addf %349, %365 : vector<32x32xf32>
    %c92 = arith.constant 92 : index
    %367 = memref.load %arg4[%c92] : memref<144xf32, #tpu.memory_space<smem>>
    %368 = vector.broadcast %367 : f32 to vector<32x32xf32>
    %369 = arith.mulf %368, %358 : vector<32x32xf32>
    %370 = arith.addf %353, %369 : vector<32x32xf32>
    %c128 = arith.constant 128 : index
    %371 = memref.load %arg4[%c128] : memref<144xf32, #tpu.memory_space<smem>>
    %372 = vector.broadcast %371 : f32 to vector<32x32xf32>
    %373 = arith.mulf %372, %358 : vector<32x32xf32>
    %374 = arith.addf %357, %373 : vector<32x32xf32>
    %375 = vector.extract_strided_slice %323 {offsets = [1, 0], sizes = [32, 32], strides = [1, 1]} : vector<34x34xf32> to vector<32x32xf32>
    %c21 = arith.constant 21 : index
    %376 = memref.load %arg4[%c21] : memref<144xf32, #tpu.memory_space<smem>>
    %377 = vector.broadcast %376 : f32 to vector<32x32xf32>
    %378 = arith.mulf %377, %375 : vector<32x32xf32>
    %379 = arith.addf %362, %378 : vector<32x32xf32>
    %c57 = arith.constant 57 : index
    %380 = memref.load %arg4[%c57] : memref<144xf32, #tpu.memory_space<smem>>
    %381 = vector.broadcast %380 : f32 to vector<32x32xf32>
    %382 = arith.mulf %381, %375 : vector<32x32xf32>
    %383 = arith.addf %366, %382 : vector<32x32xf32>
    %c93 = arith.constant 93 : index
    %384 = memref.load %arg4[%c93] : memref<144xf32, #tpu.memory_space<smem>>
    %385 = vector.broadcast %384 : f32 to vector<32x32xf32>
    %386 = arith.mulf %385, %375 : vector<32x32xf32>
    %387 = arith.addf %370, %386 : vector<32x32xf32>
    %c129 = arith.constant 129 : index
    %388 = memref.load %arg4[%c129] : memref<144xf32, #tpu.memory_space<smem>>
    %389 = vector.broadcast %388 : f32 to vector<32x32xf32>
    %390 = arith.mulf %389, %375 : vector<32x32xf32>
    %391 = arith.addf %374, %390 : vector<32x32xf32>
    %392 = vector.extract_strided_slice %323 {offsets = [1, 1], sizes = [32, 32], strides = [1, 1]} : vector<34x34xf32> to vector<32x32xf32>
    %c22 = arith.constant 22 : index
    %393 = memref.load %arg4[%c22] : memref<144xf32, #tpu.memory_space<smem>>
    %394 = vector.broadcast %393 : f32 to vector<32x32xf32>
    %395 = arith.mulf %394, %392 : vector<32x32xf32>
    %396 = arith.addf %379, %395 : vector<32x32xf32>
    %c58 = arith.constant 58 : index
    %397 = memref.load %arg4[%c58] : memref<144xf32, #tpu.memory_space<smem>>
    %398 = vector.broadcast %397 : f32 to vector<32x32xf32>
    %399 = arith.mulf %398, %392 : vector<32x32xf32>
    %400 = arith.addf %383, %399 : vector<32x32xf32>
    %c94 = arith.constant 94 : index
    %401 = memref.load %arg4[%c94] : memref<144xf32, #tpu.memory_space<smem>>
    %402 = vector.broadcast %401 : f32 to vector<32x32xf32>
    %403 = arith.mulf %402, %392 : vector<32x32xf32>
    %404 = arith.addf %387, %403 : vector<32x32xf32>
    %c130 = arith.constant 130 : index
    %405 = memref.load %arg4[%c130] : memref<144xf32, #tpu.memory_space<smem>>
    %406 = vector.broadcast %405 : f32 to vector<32x32xf32>
    %407 = arith.mulf %406, %392 : vector<32x32xf32>
    %408 = arith.addf %391, %407 : vector<32x32xf32>
    %409 = vector.extract_strided_slice %323 {offsets = [1, 2], sizes = [32, 32], strides = [1, 1]} : vector<34x34xf32> to vector<32x32xf32>
    %c23 = arith.constant 23 : index
    %410 = memref.load %arg4[%c23] : memref<144xf32, #tpu.memory_space<smem>>
    %411 = vector.broadcast %410 : f32 to vector<32x32xf32>
    %412 = arith.mulf %411, %409 : vector<32x32xf32>
    %413 = arith.addf %396, %412 : vector<32x32xf32>
    %c59 = arith.constant 59 : index
    %414 = memref.load %arg4[%c59] : memref<144xf32, #tpu.memory_space<smem>>
    %415 = vector.broadcast %414 : f32 to vector<32x32xf32>
    %416 = arith.mulf %415, %409 : vector<32x32xf32>
    %417 = arith.addf %400, %416 : vector<32x32xf32>
    %c95 = arith.constant 95 : index
    %418 = memref.load %arg4[%c95] : memref<144xf32, #tpu.memory_space<smem>>
    %419 = vector.broadcast %418 : f32 to vector<32x32xf32>
    %420 = arith.mulf %419, %409 : vector<32x32xf32>
    %421 = arith.addf %404, %420 : vector<32x32xf32>
    %c131 = arith.constant 131 : index
    %422 = memref.load %arg4[%c131] : memref<144xf32, #tpu.memory_space<smem>>
    %423 = vector.broadcast %422 : f32 to vector<32x32xf32>
    %424 = arith.mulf %423, %409 : vector<32x32xf32>
    %425 = arith.addf %408, %424 : vector<32x32xf32>
    %426 = vector.extract_strided_slice %323 {offsets = [2, 0], sizes = [32, 32], strides = [1, 1]} : vector<34x34xf32> to vector<32x32xf32>
    %c24 = arith.constant 24 : index
    %427 = memref.load %arg4[%c24] : memref<144xf32, #tpu.memory_space<smem>>
    %428 = vector.broadcast %427 : f32 to vector<32x32xf32>
    %429 = arith.mulf %428, %426 : vector<32x32xf32>
    %430 = arith.addf %413, %429 : vector<32x32xf32>
    %c60 = arith.constant 60 : index
    %431 = memref.load %arg4[%c60] : memref<144xf32, #tpu.memory_space<smem>>
    %432 = vector.broadcast %431 : f32 to vector<32x32xf32>
    %433 = arith.mulf %432, %426 : vector<32x32xf32>
    %434 = arith.addf %417, %433 : vector<32x32xf32>
    %c96 = arith.constant 96 : index
    %435 = memref.load %arg4[%c96] : memref<144xf32, #tpu.memory_space<smem>>
    %436 = vector.broadcast %435 : f32 to vector<32x32xf32>
    %437 = arith.mulf %436, %426 : vector<32x32xf32>
    %438 = arith.addf %421, %437 : vector<32x32xf32>
    %c132 = arith.constant 132 : index
    %439 = memref.load %arg4[%c132] : memref<144xf32, #tpu.memory_space<smem>>
    %440 = vector.broadcast %439 : f32 to vector<32x32xf32>
    %441 = arith.mulf %440, %426 : vector<32x32xf32>
    %442 = arith.addf %425, %441 : vector<32x32xf32>
    %443 = vector.extract_strided_slice %323 {offsets = [2, 1], sizes = [32, 32], strides = [1, 1]} : vector<34x34xf32> to vector<32x32xf32>
    %c25 = arith.constant 25 : index
    %444 = memref.load %arg4[%c25] : memref<144xf32, #tpu.memory_space<smem>>
    %445 = vector.broadcast %444 : f32 to vector<32x32xf32>
    %446 = arith.mulf %445, %443 : vector<32x32xf32>
    %447 = arith.addf %430, %446 : vector<32x32xf32>
    %c61 = arith.constant 61 : index
    %448 = memref.load %arg4[%c61] : memref<144xf32, #tpu.memory_space<smem>>
    %449 = vector.broadcast %448 : f32 to vector<32x32xf32>
    %450 = arith.mulf %449, %443 : vector<32x32xf32>
    %451 = arith.addf %434, %450 : vector<32x32xf32>
    %c97 = arith.constant 97 : index
    %452 = memref.load %arg4[%c97] : memref<144xf32, #tpu.memory_space<smem>>
    %453 = vector.broadcast %452 : f32 to vector<32x32xf32>
    %454 = arith.mulf %453, %443 : vector<32x32xf32>
    %455 = arith.addf %438, %454 : vector<32x32xf32>
    %c133 = arith.constant 133 : index
    %456 = memref.load %arg4[%c133] : memref<144xf32, #tpu.memory_space<smem>>
    %457 = vector.broadcast %456 : f32 to vector<32x32xf32>
    %458 = arith.mulf %457, %443 : vector<32x32xf32>
    %459 = arith.addf %442, %458 : vector<32x32xf32>
    %460 = vector.extract_strided_slice %323 {offsets = [2, 2], sizes = [32, 32], strides = [1, 1]} : vector<34x34xf32> to vector<32x32xf32>
    %c26 = arith.constant 26 : index
    %461 = memref.load %arg4[%c26] : memref<144xf32, #tpu.memory_space<smem>>
    %462 = vector.broadcast %461 : f32 to vector<32x32xf32>
    %463 = arith.mulf %462, %460 : vector<32x32xf32>
    %464 = arith.addf %447, %463 : vector<32x32xf32>
    %c62 = arith.constant 62 : index
    %465 = memref.load %arg4[%c62] : memref<144xf32, #tpu.memory_space<smem>>
    %466 = vector.broadcast %465 : f32 to vector<32x32xf32>
    %467 = arith.mulf %466, %460 : vector<32x32xf32>
    %468 = arith.addf %451, %467 : vector<32x32xf32>
    %c98 = arith.constant 98 : index
    %469 = memref.load %arg4[%c98] : memref<144xf32, #tpu.memory_space<smem>>
    %470 = vector.broadcast %469 : f32 to vector<32x32xf32>
    %471 = arith.mulf %470, %460 : vector<32x32xf32>
    %472 = arith.addf %455, %471 : vector<32x32xf32>
    %c134 = arith.constant 134 : index
    %473 = memref.load %arg4[%c134] : memref<144xf32, #tpu.memory_space<smem>>
    %474 = vector.broadcast %473 : f32 to vector<32x32xf32>
    %475 = arith.mulf %474, %460 : vector<32x32xf32>
    %476 = arith.addf %459, %475 : vector<32x32xf32>
    %c0_25 = arith.constant 0 : index
    %c3_26 = arith.constant 3 : index
    %c0_27 = arith.constant 0 : index
    %c0_28 = arith.constant 0 : index
    %477 = vector.load %arg1[%c0_25, %c3_26, %c0_27, %c0_28] : memref<1x4x16x16xf32, #tpu.memory_space<vmem>>, vector<1x1x16x16xf32>
    %478 = vector.shape_cast %477 : vector<1x1x16x16xf32> to vector<16x16xf32>
    %cst_29 = arith.constant dense<0.000000e+00> : vector<16x34xf32>
    %479 = tpu.matmul %478, %1, %cst_29 {dimension_numbers = #tpu.dot_dimension_numbers<[1], [0], [0], [1], [0, 0, 1, 1], [], []>} : vector<16x16xf32>, vector<16x34xf32>, vector<16x34xf32> -> vector<16x34xf32>
    %cst_30 = arith.constant dense<0.000000e+00> : vector<34x34xf32>
    %480 = tpu.matmul %0, %479, %cst_30 {dimension_numbers = #tpu.dot_dimension_numbers<[1], [0], [0], [1], [0, 0, 1, 1], [], []>} : vector<34x16xf32>, vector<16x34xf32>, vector<34x34xf32> -> vector<34x34xf32>
    %481 = vector.extract_strided_slice %480 {offsets = [0, 0], sizes = [32, 32], strides = [1, 1]} : vector<34x34xf32> to vector<32x32xf32>
    %c27 = arith.constant 27 : index
    %482 = memref.load %arg4[%c27] : memref<144xf32, #tpu.memory_space<smem>>
    %483 = vector.broadcast %482 : f32 to vector<32x32xf32>
    %484 = arith.mulf %483, %481 : vector<32x32xf32>
    %485 = arith.addf %464, %484 : vector<32x32xf32>
    %c63 = arith.constant 63 : index
    %486 = memref.load %arg4[%c63] : memref<144xf32, #tpu.memory_space<smem>>
    %487 = vector.broadcast %486 : f32 to vector<32x32xf32>
    %488 = arith.mulf %487, %481 : vector<32x32xf32>
    %489 = arith.addf %468, %488 : vector<32x32xf32>
    %c99 = arith.constant 99 : index
    %490 = memref.load %arg4[%c99] : memref<144xf32, #tpu.memory_space<smem>>
    %491 = vector.broadcast %490 : f32 to vector<32x32xf32>
    %492 = arith.mulf %491, %481 : vector<32x32xf32>
    %493 = arith.addf %472, %492 : vector<32x32xf32>
    %c135 = arith.constant 135 : index
    %494 = memref.load %arg4[%c135] : memref<144xf32, #tpu.memory_space<smem>>
    %495 = vector.broadcast %494 : f32 to vector<32x32xf32>
    %496 = arith.mulf %495, %481 : vector<32x32xf32>
    %497 = arith.addf %476, %496 : vector<32x32xf32>
    %498 = vector.extract_strided_slice %480 {offsets = [0, 1], sizes = [32, 32], strides = [1, 1]} : vector<34x34xf32> to vector<32x32xf32>
    %c28 = arith.constant 28 : index
    %499 = memref.load %arg4[%c28] : memref<144xf32, #tpu.memory_space<smem>>
    %500 = vector.broadcast %499 : f32 to vector<32x32xf32>
    %501 = arith.mulf %500, %498 : vector<32x32xf32>
    %502 = arith.addf %485, %501 : vector<32x32xf32>
    %c64 = arith.constant 64 : index
    %503 = memref.load %arg4[%c64] : memref<144xf32, #tpu.memory_space<smem>>
    %504 = vector.broadcast %503 : f32 to vector<32x32xf32>
    %505 = arith.mulf %504, %498 : vector<32x32xf32>
    %506 = arith.addf %489, %505 : vector<32x32xf32>
    %c100 = arith.constant 100 : index
    %507 = memref.load %arg4[%c100] : memref<144xf32, #tpu.memory_space<smem>>
    %508 = vector.broadcast %507 : f32 to vector<32x32xf32>
    %509 = arith.mulf %508, %498 : vector<32x32xf32>
    %510 = arith.addf %493, %509 : vector<32x32xf32>
    %c136 = arith.constant 136 : index
    %511 = memref.load %arg4[%c136] : memref<144xf32, #tpu.memory_space<smem>>
    %512 = vector.broadcast %511 : f32 to vector<32x32xf32>
    %513 = arith.mulf %512, %498 : vector<32x32xf32>
    %514 = arith.addf %497, %513 : vector<32x32xf32>
    %515 = vector.extract_strided_slice %480 {offsets = [0, 2], sizes = [32, 32], strides = [1, 1]} : vector<34x34xf32> to vector<32x32xf32>
    %c29 = arith.constant 29 : index
    %516 = memref.load %arg4[%c29] : memref<144xf32, #tpu.memory_space<smem>>
    %517 = vector.broadcast %516 : f32 to vector<32x32xf32>
    %518 = arith.mulf %517, %515 : vector<32x32xf32>
    %519 = arith.addf %502, %518 : vector<32x32xf32>
    %c65 = arith.constant 65 : index
    %520 = memref.load %arg4[%c65] : memref<144xf32, #tpu.memory_space<smem>>
    %521 = vector.broadcast %520 : f32 to vector<32x32xf32>
    %522 = arith.mulf %521, %515 : vector<32x32xf32>
    %523 = arith.addf %506, %522 : vector<32x32xf32>
    %c101 = arith.constant 101 : index
    %524 = memref.load %arg4[%c101] : memref<144xf32, #tpu.memory_space<smem>>
    %525 = vector.broadcast %524 : f32 to vector<32x32xf32>
    %526 = arith.mulf %525, %515 : vector<32x32xf32>
    %527 = arith.addf %510, %526 : vector<32x32xf32>
    %c137 = arith.constant 137 : index
    %528 = memref.load %arg4[%c137] : memref<144xf32, #tpu.memory_space<smem>>
    %529 = vector.broadcast %528 : f32 to vector<32x32xf32>
    %530 = arith.mulf %529, %515 : vector<32x32xf32>
    %531 = arith.addf %514, %530 : vector<32x32xf32>
    %532 = vector.extract_strided_slice %480 {offsets = [1, 0], sizes = [32, 32], strides = [1, 1]} : vector<34x34xf32> to vector<32x32xf32>
    %c30 = arith.constant 30 : index
    %533 = memref.load %arg4[%c30] : memref<144xf32, #tpu.memory_space<smem>>
    %534 = vector.broadcast %533 : f32 to vector<32x32xf32>
    %535 = arith.mulf %534, %532 : vector<32x32xf32>
    %536 = arith.addf %519, %535 : vector<32x32xf32>
    %c66 = arith.constant 66 : index
    %537 = memref.load %arg4[%c66] : memref<144xf32, #tpu.memory_space<smem>>
    %538 = vector.broadcast %537 : f32 to vector<32x32xf32>
    %539 = arith.mulf %538, %532 : vector<32x32xf32>
    %540 = arith.addf %523, %539 : vector<32x32xf32>
    %c102 = arith.constant 102 : index
    %541 = memref.load %arg4[%c102] : memref<144xf32, #tpu.memory_space<smem>>
    %542 = vector.broadcast %541 : f32 to vector<32x32xf32>
    %543 = arith.mulf %542, %532 : vector<32x32xf32>
    %544 = arith.addf %527, %543 : vector<32x32xf32>
    %c138 = arith.constant 138 : index
    %545 = memref.load %arg4[%c138] : memref<144xf32, #tpu.memory_space<smem>>
    %546 = vector.broadcast %545 : f32 to vector<32x32xf32>
    %547 = arith.mulf %546, %532 : vector<32x32xf32>
    %548 = arith.addf %531, %547 : vector<32x32xf32>
    %549 = vector.extract_strided_slice %480 {offsets = [1, 1], sizes = [32, 32], strides = [1, 1]} : vector<34x34xf32> to vector<32x32xf32>
    %c31 = arith.constant 31 : index
    %550 = memref.load %arg4[%c31] : memref<144xf32, #tpu.memory_space<smem>>
    %551 = vector.broadcast %550 : f32 to vector<32x32xf32>
    %552 = arith.mulf %551, %549 : vector<32x32xf32>
    %553 = arith.addf %536, %552 : vector<32x32xf32>
    %c67 = arith.constant 67 : index
    %554 = memref.load %arg4[%c67] : memref<144xf32, #tpu.memory_space<smem>>
    %555 = vector.broadcast %554 : f32 to vector<32x32xf32>
    %556 = arith.mulf %555, %549 : vector<32x32xf32>
    %557 = arith.addf %540, %556 : vector<32x32xf32>
    %c103 = arith.constant 103 : index
    %558 = memref.load %arg4[%c103] : memref<144xf32, #tpu.memory_space<smem>>
    %559 = vector.broadcast %558 : f32 to vector<32x32xf32>
    %560 = arith.mulf %559, %549 : vector<32x32xf32>
    %561 = arith.addf %544, %560 : vector<32x32xf32>
    %c139 = arith.constant 139 : index
    %562 = memref.load %arg4[%c139] : memref<144xf32, #tpu.memory_space<smem>>
    %563 = vector.broadcast %562 : f32 to vector<32x32xf32>
    %564 = arith.mulf %563, %549 : vector<32x32xf32>
    %565 = arith.addf %548, %564 : vector<32x32xf32>
    %566 = vector.extract_strided_slice %480 {offsets = [1, 2], sizes = [32, 32], strides = [1, 1]} : vector<34x34xf32> to vector<32x32xf32>
    %c32 = arith.constant 32 : index
    %567 = memref.load %arg4[%c32] : memref<144xf32, #tpu.memory_space<smem>>
    %568 = vector.broadcast %567 : f32 to vector<32x32xf32>
    %569 = arith.mulf %568, %566 : vector<32x32xf32>
    %570 = arith.addf %553, %569 : vector<32x32xf32>
    %c68 = arith.constant 68 : index
    %571 = memref.load %arg4[%c68] : memref<144xf32, #tpu.memory_space<smem>>
    %572 = vector.broadcast %571 : f32 to vector<32x32xf32>
    %573 = arith.mulf %572, %566 : vector<32x32xf32>
    %574 = arith.addf %557, %573 : vector<32x32xf32>
    %c104 = arith.constant 104 : index
    %575 = memref.load %arg4[%c104] : memref<144xf32, #tpu.memory_space<smem>>
    %576 = vector.broadcast %575 : f32 to vector<32x32xf32>
    %577 = arith.mulf %576, %566 : vector<32x32xf32>
    %578 = arith.addf %561, %577 : vector<32x32xf32>
    %c140 = arith.constant 140 : index
    %579 = memref.load %arg4[%c140] : memref<144xf32, #tpu.memory_space<smem>>
    %580 = vector.broadcast %579 : f32 to vector<32x32xf32>
    %581 = arith.mulf %580, %566 : vector<32x32xf32>
    %582 = arith.addf %565, %581 : vector<32x32xf32>
    %583 = vector.extract_strided_slice %480 {offsets = [2, 0], sizes = [32, 32], strides = [1, 1]} : vector<34x34xf32> to vector<32x32xf32>
    %c33 = arith.constant 33 : index
    %584 = memref.load %arg4[%c33] : memref<144xf32, #tpu.memory_space<smem>>
    %585 = vector.broadcast %584 : f32 to vector<32x32xf32>
    %586 = arith.mulf %585, %583 : vector<32x32xf32>
    %587 = arith.addf %570, %586 : vector<32x32xf32>
    %c69 = arith.constant 69 : index
    %588 = memref.load %arg4[%c69] : memref<144xf32, #tpu.memory_space<smem>>
    %589 = vector.broadcast %588 : f32 to vector<32x32xf32>
    %590 = arith.mulf %589, %583 : vector<32x32xf32>
    %591 = arith.addf %574, %590 : vector<32x32xf32>
    %c105 = arith.constant 105 : index
    %592 = memref.load %arg4[%c105] : memref<144xf32, #tpu.memory_space<smem>>
    %593 = vector.broadcast %592 : f32 to vector<32x32xf32>
    %594 = arith.mulf %593, %583 : vector<32x32xf32>
    %595 = arith.addf %578, %594 : vector<32x32xf32>
    %c141 = arith.constant 141 : index
    %596 = memref.load %arg4[%c141] : memref<144xf32, #tpu.memory_space<smem>>
    %597 = vector.broadcast %596 : f32 to vector<32x32xf32>
    %598 = arith.mulf %597, %583 : vector<32x32xf32>
    %599 = arith.addf %582, %598 : vector<32x32xf32>
    %600 = vector.extract_strided_slice %480 {offsets = [2, 1], sizes = [32, 32], strides = [1, 1]} : vector<34x34xf32> to vector<32x32xf32>
    %c34 = arith.constant 34 : index
    %601 = memref.load %arg4[%c34] : memref<144xf32, #tpu.memory_space<smem>>
    %602 = vector.broadcast %601 : f32 to vector<32x32xf32>
    %603 = arith.mulf %602, %600 : vector<32x32xf32>
    %604 = arith.addf %587, %603 : vector<32x32xf32>
    %c70 = arith.constant 70 : index
    %605 = memref.load %arg4[%c70] : memref<144xf32, #tpu.memory_space<smem>>
    %606 = vector.broadcast %605 : f32 to vector<32x32xf32>
    %607 = arith.mulf %606, %600 : vector<32x32xf32>
    %608 = arith.addf %591, %607 : vector<32x32xf32>
    %c106 = arith.constant 106 : index
    %609 = memref.load %arg4[%c106] : memref<144xf32, #tpu.memory_space<smem>>
    %610 = vector.broadcast %609 : f32 to vector<32x32xf32>
    %611 = arith.mulf %610, %600 : vector<32x32xf32>
    %612 = arith.addf %595, %611 : vector<32x32xf32>
    %c142 = arith.constant 142 : index
    %613 = memref.load %arg4[%c142] : memref<144xf32, #tpu.memory_space<smem>>
    %614 = vector.broadcast %613 : f32 to vector<32x32xf32>
    %615 = arith.mulf %614, %600 : vector<32x32xf32>
    %616 = arith.addf %599, %615 : vector<32x32xf32>
    %617 = vector.extract_strided_slice %480 {offsets = [2, 2], sizes = [32, 32], strides = [1, 1]} : vector<34x34xf32> to vector<32x32xf32>
    %c35 = arith.constant 35 : index
    %618 = memref.load %arg4[%c35] : memref<144xf32, #tpu.memory_space<smem>>
    %619 = vector.broadcast %618 : f32 to vector<32x32xf32>
    %620 = arith.mulf %619, %617 : vector<32x32xf32>
    %621 = arith.addf %604, %620 : vector<32x32xf32>
    %c71 = arith.constant 71 : index
    %622 = memref.load %arg4[%c71] : memref<144xf32, #tpu.memory_space<smem>>
    %623 = vector.broadcast %622 : f32 to vector<32x32xf32>
    %624 = arith.mulf %623, %617 : vector<32x32xf32>
    %625 = arith.addf %608, %624 : vector<32x32xf32>
    %c107 = arith.constant 107 : index
    %626 = memref.load %arg4[%c107] : memref<144xf32, #tpu.memory_space<smem>>
    %627 = vector.broadcast %626 : f32 to vector<32x32xf32>
    %628 = arith.mulf %627, %617 : vector<32x32xf32>
    %629 = arith.addf %612, %628 : vector<32x32xf32>
    %c143 = arith.constant 143 : index
    %630 = memref.load %arg4[%c143] : memref<144xf32, #tpu.memory_space<smem>>
    %631 = vector.broadcast %630 : f32 to vector<32x32xf32>
    %632 = arith.mulf %631, %617 : vector<32x32xf32>
    %633 = arith.addf %616, %632 : vector<32x32xf32>
    %c0_31 = arith.constant 0 : index
    %634 = memref.load %arg5[%c0_31] : memref<4xf32, #tpu.memory_space<smem>>
    %635 = vector.broadcast %634 : f32 to vector<32x32xf32>
    %636 = arith.addf %621, %635 : vector<32x32xf32>
    %c0_32 = arith.constant 0 : index
    %c0_33 = arith.constant 0 : index
    %c0_34 = arith.constant 0 : index
    %c0_35 = arith.constant 0 : index
    %637 = vector.load %arg11[%c0_32, %c0_33, %c0_34, %c0_35] : memref<1x4x32x32xf32, #tpu.memory_space<vmem>>, vector<1x1x32x32xf32>
    %638 = vector.shape_cast %637 : vector<1x1x32x32xf32> to vector<32x32xf32>
    %639 = vector.shape_cast %636 : vector<32x32xf32> to vector<1x1x32x32xf32>
    tpu.vector_store %arg11[%c0_32, %c0_33, %c0_34, %c0_35], %639 {strides = array<i32>} : memref<1x4x32x32xf32, #tpu.memory_space<vmem>>, vector<1x1x32x32xf32>,
    %c1_36 = arith.constant 1 : index
    %640 = memref.load %arg5[%c1_36] : memref<4xf32, #tpu.memory_space<smem>>
    %641 = vector.broadcast %640 : f32 to vector<32x32xf32>
    %642 = arith.addf %625, %641 : vector<32x32xf32>
    %c0_37 = arith.constant 0 : index
    %c1_38 = arith.constant 1 : index
    %c0_39 = arith.constant 0 : index
    %c0_40 = arith.constant 0 : index
    %643 = vector.load %arg11[%c0_37, %c1_38, %c0_39, %c0_40] : memref<1x4x32x32xf32, #tpu.memory_space<vmem>>, vector<1x1x32x32xf32>
    %644 = vector.shape_cast %643 : vector<1x1x32x32xf32> to vector<32x32xf32>
    %645 = vector.shape_cast %642 : vector<32x32xf32> to vector<1x1x32x32xf32>
    tpu.vector_store %arg11[%c0_37, %c1_38, %c0_39, %c0_40], %645 {strides = array<i32>} : memref<1x4x32x32xf32, #tpu.memory_space<vmem>>, vector<1x1x32x32xf32>,
    %c2_41 = arith.constant 2 : index
    %646 = memref.load %arg5[%c2_41] : memref<4xf32, #tpu.memory_space<smem>>
    %647 = vector.broadcast %646 : f32 to vector<32x32xf32>
    %648 = arith.addf %629, %647 : vector<32x32xf32>
    %c0_42 = arith.constant 0 : index
    %c2_43 = arith.constant 2 : index
    %c0_44 = arith.constant 0 : index
    %c0_45 = arith.constant 0 : index
    %649 = vector.load %arg11[%c0_42, %c2_43, %c0_44, %c0_45] : memref<1x4x32x32xf32, #tpu.memory_space<vmem>>, vector<1x1x32x32xf32>
    %650 = vector.shape_cast %649 : vector<1x1x32x32xf32> to vector<32x32xf32>
    %651 = vector.shape_cast %648 : vector<32x32xf32> to vector<1x1x32x32xf32>
    tpu.vector_store %arg11[%c0_42, %c2_43, %c0_44, %c0_45], %651 {strides = array<i32>} : memref<1x4x32x32xf32, #tpu.memory_space<vmem>>, vector<1x1x32x32xf32>,
    %c3_46 = arith.constant 3 : index
    %652 = memref.load %arg5[%c3_46] : memref<4xf32, #tpu.memory_space<smem>>
    %653 = vector.broadcast %652 : f32 to vector<32x32xf32>
    %654 = arith.addf %633, %653 : vector<32x32xf32>
    %c0_47 = arith.constant 0 : index
    %c3_48 = arith.constant 3 : index
    %c0_49 = arith.constant 0 : index
    %c0_50 = arith.constant 0 : index
    %655 = vector.load %arg11[%c0_47, %c3_48, %c0_49, %c0_50] : memref<1x4x32x32xf32, #tpu.memory_space<vmem>>, vector<1x1x32x32xf32>
    %656 = vector.shape_cast %655 : vector<1x1x32x32xf32> to vector<32x32xf32>
    %657 = vector.shape_cast %654 : vector<32x32xf32> to vector<1x1x32x32xf32>
    tpu.vector_store %arg11[%c0_47, %c3_48, %c0_49, %c0_50], %657 {strides = array<i32>} : memref<1x4x32x32xf32, #tpu.memory_space<vmem>>, vector<1x1x32x32xf32>,
    %c0_51 = arith.constant 0 : index
    %c0_52 = arith.constant 0 : index
    %658 = vector.load %arg7[%c0_51, %c0_52] : memref<34x16xf32, #tpu.memory_space<vmem>>, vector<34x16xf32>
    %c0_53 = arith.constant 0 : index
    %c0_54 = arith.constant 0 : index
    %659 = vector.load %arg8[%c0_53, %c0_54] : memref<16x34xf32, #tpu.memory_space<vmem>>, vector<16x34xf32>
    %cst_55 = arith.constant 0.000000e+00 : f32
    %660 = vector.broadcast %cst_55 : f32 to vector<32x32xf32>
    %cst_56 = arith.constant 0.000000e+00 : f32
    %661 = vector.broadcast %cst_56 : f32 to vector<32x32xf32>
    %c0_57 = arith.constant 0 : index
    %c0_58 = arith.constant 0 : index
    %c0_59 = arith.constant 0 : index
    %c0_60 = arith.constant 0 : index
    %662 = vector.load %arg6[%c0_57, %c0_58, %c0_59, %c0_60] : memref<1x2x16x16xf32, #tpu.memory_space<vmem>>, vector<1x1x16x16xf32>
    %663 = vector.shape_cast %662 : vector<1x1x16x16xf32> to vector<16x16xf32>
    %cst_61 = arith.constant dense<0.000000e+00> : vector<16x34xf32>
    %664 = tpu.matmul %663, %659, %cst_61 {dimension_numbers = #tpu.dot_dimension_numbers<[1], [0], [0], [1], [0, 0, 1, 1], [], []>} : vector<16x16xf32>, vector<16x34xf32>, vector<16x34xf32> -> vector<16x34xf32>
    %cst_62 = arith.constant dense<0.000000e+00> : vector<34x34xf32>
    %665 = tpu.matmul %658, %664, %cst_62 {dimension_numbers = #tpu.dot_dimension_numbers<[1], [0], [0], [1], [0, 0, 1, 1], [], []>} : vector<34x16xf32>, vector<16x34xf32>, vector<34x34xf32> -> vector<34x34xf32>
    %666 = vector.extract_strided_slice %665 {offsets = [0, 0], sizes = [32, 32], strides = [1, 1]} : vector<34x34xf32> to vector<32x32xf32>
    %c0_63 = arith.constant 0 : index
    %667 = memref.load %arg9[%c0_63] : memref<36xf32, #tpu.memory_space<smem>>
    %668 = vector.broadcast %667 : f32 to vector<32x32xf32>
    %669 = arith.mulf %668, %666 : vector<32x32xf32>
    %670 = arith.addf %660, %669 : vector<32x32xf32>
    %c18_64 = arith.constant 18 : index
    %671 = memref.load %arg9[%c18_64] : memref<36xf32, #tpu.memory_space<smem>>
    %672 = vector.broadcast %671 : f32 to vector<32x32xf32>
    %673 = arith.mulf %672, %666 : vector<32x32xf32>
    %674 = arith.addf %661, %673 : vector<32x32xf32>
    %675 = vector.extract_strided_slice %665 {offsets = [0, 1], sizes = [32, 32], strides = [1, 1]} : vector<34x34xf32> to vector<32x32xf32>
    %c1_65 = arith.constant 1 : index
    %676 = memref.load %arg9[%c1_65] : memref<36xf32, #tpu.memory_space<smem>>
    %677 = vector.broadcast %676 : f32 to vector<32x32xf32>
    %678 = arith.mulf %677, %675 : vector<32x32xf32>
    %679 = arith.addf %670, %678 : vector<32x32xf32>
    %c19_66 = arith.constant 19 : index
    %680 = memref.load %arg9[%c19_66] : memref<36xf32, #tpu.memory_space<smem>>
    %681 = vector.broadcast %680 : f32 to vector<32x32xf32>
    %682 = arith.mulf %681, %675 : vector<32x32xf32>
    %683 = arith.addf %674, %682 : vector<32x32xf32>
    %684 = vector.extract_strided_slice %665 {offsets = [0, 2], sizes = [32, 32], strides = [1, 1]} : vector<34x34xf32> to vector<32x32xf32>
    %c2_67 = arith.constant 2 : index
    %685 = memref.load %arg9[%c2_67] : memref<36xf32, #tpu.memory_space<smem>>
    %686 = vector.broadcast %685 : f32 to vector<32x32xf32>
    %687 = arith.mulf %686, %684 : vector<32x32xf32>
    %688 = arith.addf %679, %687 : vector<32x32xf32>
    %c20_68 = arith.constant 20 : index
    %689 = memref.load %arg9[%c20_68] : memref<36xf32, #tpu.memory_space<smem>>
    %690 = vector.broadcast %689 : f32 to vector<32x32xf32>
    %691 = arith.mulf %690, %684 : vector<32x32xf32>
    %692 = arith.addf %683, %691 : vector<32x32xf32>
    %693 = vector.extract_strided_slice %665 {offsets = [1, 0], sizes = [32, 32], strides = [1, 1]} : vector<34x34xf32> to vector<32x32xf32>
    %c3_69 = arith.constant 3 : index
    %694 = memref.load %arg9[%c3_69] : memref<36xf32, #tpu.memory_space<smem>>
    %695 = vector.broadcast %694 : f32 to vector<32x32xf32>
    %696 = arith.mulf %695, %693 : vector<32x32xf32>
    %697 = arith.addf %688, %696 : vector<32x32xf32>
    %c21_70 = arith.constant 21 : index
    %698 = memref.load %arg9[%c21_70] : memref<36xf32, #tpu.memory_space<smem>>
    %699 = vector.broadcast %698 : f32 to vector<32x32xf32>
    %700 = arith.mulf %699, %693 : vector<32x32xf32>
    %701 = arith.addf %692, %700 : vector<32x32xf32>
    %702 = vector.extract_strided_slice %665 {offsets = [1, 1], sizes = [32, 32], strides = [1, 1]} : vector<34x34xf32> to vector<32x32xf32>
    %c4_71 = arith.constant 4 : index
    %703 = memref.load %arg9[%c4_71] : memref<36xf32, #tpu.memory_space<smem>>
    %704 = vector.broadcast %703 : f32 to vector<32x32xf32>
    %705 = arith.mulf %704, %702 : vector<32x32xf32>
    %706 = arith.addf %697, %705 : vector<32x32xf32>
    %c22_72 = arith.constant 22 : index
    %707 = memref.load %arg9[%c22_72] : memref<36xf32, #tpu.memory_space<smem>>
    %708 = vector.broadcast %707 : f32 to vector<32x32xf32>
    %709 = arith.mulf %708, %702 : vector<32x32xf32>
    %710 = arith.addf %701, %709 : vector<32x32xf32>
    %711 = vector.extract_strided_slice %665 {offsets = [1, 2], sizes = [32, 32], strides = [1, 1]} : vector<34x34xf32> to vector<32x32xf32>
    %c5_73 = arith.constant 5 : index
    %712 = memref.load %arg9[%c5_73] : memref<36xf32, #tpu.memory_space<smem>>
    %713 = vector.broadcast %712 : f32 to vector<32x32xf32>
    %714 = arith.mulf %713, %711 : vector<32x32xf32>
    %715 = arith.addf %706, %714 : vector<32x32xf32>
    %c23_74 = arith.constant 23 : index
    %716 = memref.load %arg9[%c23_74] : memref<36xf32, #tpu.memory_space<smem>>
    %717 = vector.broadcast %716 : f32 to vector<32x32xf32>
    %718 = arith.mulf %717, %711 : vector<32x32xf32>
    %719 = arith.addf %710, %718 : vector<32x32xf32>
    %720 = vector.extract_strided_slice %665 {offsets = [2, 0], sizes = [32, 32], strides = [1, 1]} : vector<34x34xf32> to vector<32x32xf32>
    %c6_75 = arith.constant 6 : index
    %721 = memref.load %arg9[%c6_75] : memref<36xf32, #tpu.memory_space<smem>>
    %722 = vector.broadcast %721 : f32 to vector<32x32xf32>
    %723 = arith.mulf %722, %720 : vector<32x32xf32>
    %724 = arith.addf %715, %723 : vector<32x32xf32>
    %c24_76 = arith.constant 24 : index
    %725 = memref.load %arg9[%c24_76] : memref<36xf32, #tpu.memory_space<smem>>
    %726 = vector.broadcast %725 : f32 to vector<32x32xf32>
    %727 = arith.mulf %726, %720 : vector<32x32xf32>
    %728 = arith.addf %719, %727 : vector<32x32xf32>
    %729 = vector.extract_strided_slice %665 {offsets = [2, 1], sizes = [32, 32], strides = [1, 1]} : vector<34x34xf32> to vector<32x32xf32>
    %c7_77 = arith.constant 7 : index
    %730 = memref.load %arg9[%c7_77] : memref<36xf32, #tpu.memory_space<smem>>
    %731 = vector.broadcast %730 : f32 to vector<32x32xf32>
    %732 = arith.mulf %731, %729 : vector<32x32xf32>
    %733 = arith.addf %724, %732 : vector<32x32xf32>
    %c25_78 = arith.constant 25 : index
    %734 = memref.load %arg9[%c25_78] : memref<36xf32, #tpu.memory_space<smem>>
    %735 = vector.broadcast %734 : f32 to vector<32x32xf32>
    %736 = arith.mulf %735, %729 : vector<32x32xf32>
    %737 = arith.addf %728, %736 : vector<32x32xf32>
    %738 = vector.extract_strided_slice %665 {offsets = [2, 2], sizes = [32, 32], strides = [1, 1]} : vector<34x34xf32> to vector<32x32xf32>
    %c8_79 = arith.constant 8 : index
    %739 = memref.load %arg9[%c8_79] : memref<36xf32, #tpu.memory_space<smem>>
    %740 = vector.broadcast %739 : f32 to vector<32x32xf32>
    %741 = arith.mulf %740, %738 : vector<32x32xf32>
    %742 = arith.addf %733, %741 : vector<32x32xf32>
    %c26_80 = arith.constant 26 : index
    %743 = memref.load %arg9[%c26_80] : memref<36xf32, #tpu.memory_space<smem>>
    %744 = vector.broadcast %743 : f32 to vector<32x32xf32>
    %745 = arith.mulf %744, %738 : vector<32x32xf32>
    %746 = arith.addf %737, %745 : vector<32x32xf32>
    %c0_81 = arith.constant 0 : index
    %c1_82 = arith.constant 1 : index
    %c0_83 = arith.constant 0 : index
    %c0_84 = arith.constant 0 : index
    %747 = vector.load %arg6[%c0_81, %c1_82, %c0_83, %c0_84] : memref<1x2x16x16xf32, #tpu.memory_space<vmem>>, vector<1x1x16x16xf32>
    %748 = vector.shape_cast %747 : vector<1x1x16x16xf32> to vector<16x16xf32>
    %cst_85 = arith.constant dense<0.000000e+00> : vector<16x34xf32>
    %749 = tpu.matmul %748, %659, %cst_85 {dimension_numbers = #tpu.dot_dimension_numbers<[1], [0], [0], [1], [0, 0, 1, 1], [], []>} : vector<16x16xf32>, vector<16x34xf32>, vector<16x34xf32> -> vector<16x34xf32>
    %cst_86 = arith.constant dense<0.000000e+00> : vector<34x34xf32>
    %750 = tpu.matmul %658, %749, %cst_86 {dimension_numbers = #tpu.dot_dimension_numbers<[1], [0], [0], [1], [0, 0, 1, 1], [], []>} : vector<34x16xf32>, vector<16x34xf32>, vector<34x34xf32> -> vector<34x34xf32>
    %751 = vector.extract_strided_slice %750 {offsets = [0, 0], sizes = [32, 32], strides = [1, 1]} : vector<34x34xf32> to vector<32x32xf32>
    %c9_87 = arith.constant 9 : index
    %752 = memref.load %arg9[%c9_87] : memref<36xf32, #tpu.memory_space<smem>>
    %753 = vector.broadcast %752 : f32 to vector<32x32xf32>
    %754 = arith.mulf %753, %751 : vector<32x32xf32>
    %755 = arith.addf %742, %754 : vector<32x32xf32>
    %c27_88 = arith.constant 27 : index
    %756 = memref.load %arg9[%c27_88] : memref<36xf32, #tpu.memory_space<smem>>
    %757 = vector.broadcast %756 : f32 to vector<32x32xf32>
    %758 = arith.mulf %757, %751 : vector<32x32xf32>
    %759 = arith.addf %746, %758 : vector<32x32xf32>
    %760 = vector.extract_strided_slice %750 {offsets = [0, 1], sizes = [32, 32], strides = [1, 1]} : vector<34x34xf32> to vector<32x32xf32>
    %c10_89 = arith.constant 10 : index
    %761 = memref.load %arg9[%c10_89] : memref<36xf32, #tpu.memory_space<smem>>
    %762 = vector.broadcast %761 : f32 to vector<32x32xf32>
    %763 = arith.mulf %762, %760 : vector<32x32xf32>
    %764 = arith.addf %755, %763 : vector<32x32xf32>
    %c28_90 = arith.constant 28 : index
    %765 = memref.load %arg9[%c28_90] : memref<36xf32, #tpu.memory_space<smem>>
    %766 = vector.broadcast %765 : f32 to vector<32x32xf32>
    %767 = arith.mulf %766, %760 : vector<32x32xf32>
    %768 = arith.addf %759, %767 : vector<32x32xf32>
    %769 = vector.extract_strided_slice %750 {offsets = [0, 2], sizes = [32, 32], strides = [1, 1]} : vector<34x34xf32> to vector<32x32xf32>
    %c11_91 = arith.constant 11 : index
    %770 = memref.load %arg9[%c11_91] : memref<36xf32, #tpu.memory_space<smem>>
    %771 = vector.broadcast %770 : f32 to vector<32x32xf32>
    %772 = arith.mulf %771, %769 : vector<32x32xf32>
    %773 = arith.addf %764, %772 : vector<32x32xf32>
    %c29_92 = arith.constant 29 : index
    %774 = memref.load %arg9[%c29_92] : memref<36xf32, #tpu.memory_space<smem>>
    %775 = vector.broadcast %774 : f32 to vector<32x32xf32>
    %776 = arith.mulf %775, %769 : vector<32x32xf32>
    %777 = arith.addf %768, %776 : vector<32x32xf32>
    %778 = vector.extract_strided_slice %750 {offsets = [1, 0], sizes = [32, 32], strides = [1, 1]} : vector<34x34xf32> to vector<32x32xf32>
    %c12_93 = arith.constant 12 : index
    %779 = memref.load %arg9[%c12_93] : memref<36xf32, #tpu.memory_space<smem>>
    %780 = vector.broadcast %779 : f32 to vector<32x32xf32>
    %781 = arith.mulf %780, %778 : vector<32x32xf32>
    %782 = arith.addf %773, %781 : vector<32x32xf32>
    %c30_94 = arith.constant 30 : index
    %783 = memref.load %arg9[%c30_94] : memref<36xf32, #tpu.memory_space<smem>>
    %784 = vector.broadcast %783 : f32 to vector<32x32xf32>
    %785 = arith.mulf %784, %778 : vector<32x32xf32>
    %786 = arith.addf %777, %785 : vector<32x32xf32>
    %787 = vector.extract_strided_slice %750 {offsets = [1, 1], sizes = [32, 32], strides = [1, 1]} : vector<34x34xf32> to vector<32x32xf32>
    %c13_95 = arith.constant 13 : index
    %788 = memref.load %arg9[%c13_95] : memref<36xf32, #tpu.memory_space<smem>>
    %789 = vector.broadcast %788 : f32 to vector<32x32xf32>
    %790 = arith.mulf %789, %787 : vector<32x32xf32>
    %791 = arith.addf %782, %790 : vector<32x32xf32>
    %c31_96 = arith.constant 31 : index
    %792 = memref.load %arg9[%c31_96] : memref<36xf32, #tpu.memory_space<smem>>
    %793 = vector.broadcast %792 : f32 to vector<32x32xf32>
    %794 = arith.mulf %793, %787 : vector<32x32xf32>
    %795 = arith.addf %786, %794 : vector<32x32xf32>
    %796 = vector.extract_strided_slice %750 {offsets = [1, 2], sizes = [32, 32], strides = [1, 1]} : vector<34x34xf32> to vector<32x32xf32>
    %c14_97 = arith.constant 14 : index
    %797 = memref.load %arg9[%c14_97] : memref<36xf32, #tpu.memory_space<smem>>
    %798 = vector.broadcast %797 : f32 to vector<32x32xf32>
    %799 = arith.mulf %798, %796 : vector<32x32xf32>
    %800 = arith.addf %791, %799 : vector<32x32xf32>
    %c32_98 = arith.constant 32 : index
    %801 = memref.load %arg9[%c32_98] : memref<36xf32, #tpu.memory_space<smem>>
    %802 = vector.broadcast %801 : f32 to vector<32x32xf32>
    %803 = arith.mulf %802, %796 : vector<32x32xf32>
    %804 = arith.addf %795, %803 : vector<32x32xf32>
    %805 = vector.extract_strided_slice %750 {offsets = [2, 0], sizes = [32, 32], strides = [1, 1]} : vector<34x34xf32> to vector<32x32xf32>
    %c15_99 = arith.constant 15 : index
    %806 = memref.load %arg9[%c15_99] : memref<36xf32, #tpu.memory_space<smem>>
    %807 = vector.broadcast %806 : f32 to vector<32x32xf32>
    %808 = arith.mulf %807, %805 : vector<32x32xf32>
    %809 = arith.addf %800, %808 : vector<32x32xf32>
    %c33_100 = arith.constant 33 : index
    %810 = memref.load %arg9[%c33_100] : memref<36xf32, #tpu.memory_space<smem>>
    %811 = vector.broadcast %810 : f32 to vector<32x32xf32>
    %812 = arith.mulf %811, %805 : vector<32x32xf32>
    %813 = arith.addf %804, %812 : vector<32x32xf32>
    %814 = vector.extract_strided_slice %750 {offsets = [2, 1], sizes = [32, 32], strides = [1, 1]} : vector<34x34xf32> to vector<32x32xf32>
    %c16_101 = arith.constant 16 : index
    %815 = memref.load %arg9[%c16_101] : memref<36xf32, #tpu.memory_space<smem>>
    %816 = vector.broadcast %815 : f32 to vector<32x32xf32>
    %817 = arith.mulf %816, %814 : vector<32x32xf32>
    %818 = arith.addf %809, %817 : vector<32x32xf32>
    %c34_102 = arith.constant 34 : index
    %819 = memref.load %arg9[%c34_102] : memref<36xf32, #tpu.memory_space<smem>>
    %820 = vector.broadcast %819 : f32 to vector<32x32xf32>
    %821 = arith.mulf %820, %814 : vector<32x32xf32>
    %822 = arith.addf %813, %821 : vector<32x32xf32>
    %823 = vector.extract_strided_slice %750 {offsets = [2, 2], sizes = [32, 32], strides = [1, 1]} : vector<34x34xf32> to vector<32x32xf32>
    %c17_103 = arith.constant 17 : index
    %824 = memref.load %arg9[%c17_103] : memref<36xf32, #tpu.memory_space<smem>>
    %825 = vector.broadcast %824 : f32 to vector<32x32xf32>
    %826 = arith.mulf %825, %823 : vector<32x32xf32>
    %827 = arith.addf %818, %826 : vector<32x32xf32>
    %c35_104 = arith.constant 35 : index
    %828 = memref.load %arg9[%c35_104] : memref<36xf32, #tpu.memory_space<smem>>
    %829 = vector.broadcast %828 : f32 to vector<32x32xf32>
    %830 = arith.mulf %829, %823 : vector<32x32xf32>
    %831 = arith.addf %822, %830 : vector<32x32xf32>
    %c0_105 = arith.constant 0 : index
    %832 = memref.load %arg10[%c0_105] : memref<2xf32, #tpu.memory_space<smem>>
    %833 = vector.broadcast %832 : f32 to vector<32x32xf32>
    %834 = arith.addf %827, %833 : vector<32x32xf32>
    %c0_106 = arith.constant 0 : index
    %c0_107 = arith.constant 0 : index
    %c0_108 = arith.constant 0 : index
    %c0_109 = arith.constant 0 : index
    %835 = vector.load %arg12[%c0_106, %c0_107, %c0_108, %c0_109] : memref<1x2x32x32xf32, #tpu.memory_space<vmem>>, vector<1x1x32x32xf32>
    %836 = vector.shape_cast %835 : vector<1x1x32x32xf32> to vector<32x32xf32>
    %837 = vector.shape_cast %834 : vector<32x32xf32> to vector<1x1x32x32xf32>
    tpu.vector_store %arg12[%c0_106, %c0_107, %c0_108, %c0_109], %837 {strides = array<i32>} : memref<1x2x32x32xf32, #tpu.memory_space<vmem>>, vector<1x1x32x32xf32>,
    %c1_110 = arith.constant 1 : index
    %838 = memref.load %arg10[%c1_110] : memref<2xf32, #tpu.memory_space<smem>>
    %839 = vector.broadcast %838 : f32 to vector<32x32xf32>
    %840 = arith.addf %831, %839 : vector<32x32xf32>
    %c0_111 = arith.constant 0 : index
    %c1_112 = arith.constant 1 : index
    %c0_113 = arith.constant 0 : index
    %c0_114 = arith.constant 0 : index
    %841 = vector.load %arg12[%c0_111, %c1_112, %c0_113, %c0_114] : memref<1x2x32x32xf32, #tpu.memory_space<vmem>>, vector<1x1x32x32xf32>
    %842 = vector.shape_cast %841 : vector<1x1x32x32xf32> to vector<32x32xf32>
    %843 = vector.shape_cast %840 : vector<32x32xf32> to vector<1x1x32x32xf32>
    tpu.vector_store %arg12[%c0_111, %c1_112, %c0_113, %c0_114], %843 {strides = array<i32>} : memref<1x2x32x32xf32, #tpu.memory_space<vmem>>, vector<1x1x32x32xf32>,
    return
  }
  func.func @transform_0(%arg0: i32) -> (i32, i32, i32, i32) {
    %c0_i32 = arith.constant 0 : i32
    %c0_i32_0 = arith.constant 0 : i32
    %c0_i32_1 = arith.constant 0 : i32
    %c0_i32_2 = arith.constant 0 : i32
    return %arg0, %c0_i32, %c0_i32_0, %c0_i32_1 : i32, i32, i32, i32
  }
  func.func @transform_1(%arg0: i32) -> (i32, i32) {
    %c0_i32 = arith.constant 0 : i32
    %c0_i32_0 = arith.constant 0 : i32
    %c0_i32_1 = arith.constant 0 : i32
    return %c0_i32, %c0_i32_0 : i32, i32
  }
  func.func @transform_2(%arg0: i32) -> (i32, i32) {
    %c0_i32 = arith.constant 0 : i32
    %c0_i32_0 = arith.constant 0 : i32
    %c0_i32_1 = arith.constant 0 : i32
    return %c0_i32, %c0_i32_0 : i32, i32
  }
  func.func @transform_3(%arg0: i32) -> i32 {
    %c0_i32 = arith.constant 0 : i32
    %c0_i32_0 = arith.constant 0 : i32
    return %c0_i32 : i32
  }
  func.func @transform_4(%arg0: i32) -> i32 {
    %c0_i32 = arith.constant 0 : i32
    %c0_i32_0 = arith.constant 0 : i32
    return %c0_i32 : i32
  }
  func.func @transform_5(%arg0: i32) -> (i32, i32, i32, i32) {
    %c0_i32 = arith.constant 0 : i32
    %c0_i32_0 = arith.constant 0 : i32
    %c0_i32_1 = arith.constant 0 : i32
    %c0_i32_2 = arith.constant 0 : i32
    return %arg0, %c0_i32, %c0_i32_0, %c0_i32_1 : i32, i32, i32, i32
  }
  func.func @transform_6(%arg0: i32) -> (i32, i32) {
    %c0_i32 = arith.constant 0 : i32
    %c0_i32_0 = arith.constant 0 : i32
    %c0_i32_1 = arith.constant 0 : i32
    return %c0_i32, %c0_i32_0 : i32, i32
  }
  func.func @transform_7(%arg0: i32) -> (i32, i32) {
    %c0_i32 = arith.constant 0 : i32
    %c0_i32_0 = arith.constant 0 : i32
    %c0_i32_1 = arith.constant 0 : i32
    return %c0_i32, %c0_i32_0 : i32, i32
  }
  func.func @transform_8(%arg0: i32) -> i32 {
    %c0_i32 = arith.constant 0 : i32
    %c0_i32_0 = arith.constant 0 : i32
    return %c0_i32 : i32
  }
  func.func @transform_9(%arg0: i32) -> i32 {
    %c0_i32 = arith.constant 0 : i32
    %c0_i32_0 = arith.constant 0 : i32
    return %c0_i32 : i32
  }
  func.func @transform_10(%arg0: i32) -> (i32, i32, i32, i32) {
    %c0_i32 = arith.constant 0 : i32
    %c0_i32_0 = arith.constant 0 : i32
    %c0_i32_1 = arith.constant 0 : i32
    %c0_i32_2 = arith.constant 0 : i32
    return %arg0, %c0_i32, %c0_i32_0, %c0_i32_1 : i32, i32, i32, i32
  }
  func.func @transform_11(%arg0: i32) -> (i32, i32, i32, i32) {
    %c0_i32 = arith.constant 0 : i32
    %c0_i32_0 = arith.constant 0 : i32
    %c0_i32_1 = arith.constant 0 : i32
    %c0_i32_2 = arith.constant 0 : i32
    return %arg0, %c0_i32, %c0_i32_0, %c0_i32_1 : i32, i32, i32, i32
  }
}

</mosaic_0001>

<bundles_post_ra>
// kernel: up_forward.1
= control target key start
LH: loop header
LB: loop body
LE: loop exit
PB: predicated region body
PF: predicated region fallthrough
CT: control target
= control target key end

     0   :  { %s16282_s0 = inlined_call_operand.vmem [shape: f32[2,4,16,16], index: 0, kind: input, shape index: {}]   ;;  %s16283_s1 = inlined_call_operand.vmem [shape: f32[34,16], index: 1, kind: input, shape index: {}, may-alias: {1,6}]   ;;  %s16284_s2 = inlined_call_operand.vmem [shape: f32[16,34], index: 2, kind: input, shape index: {}, may-alias: {2,7}]   ;;  %s16285_s3 = inlined_call_operand.vmem [shape: f32[144], index: 3, kind: input, shape index: {}]   ;;  %s16286_s4 = inlined_call_operand.vmem [shape: f32[4], index: 4, kind: input, shape index: {}]   ;;  %s16287_s5 = inlined_call_operand.vmem [shape: f32[2,2,16,16], index: 5, kind: input, shape index: {}]   ;;  %s16288_s6 = inlined_call_operand.vmem [shape: f32[34,16], index: 6, kind: input, shape index: {}, may-alias: {1,6}]   ;;  %s16289_s7 = inlined_call_operand.vmem [shape: f32[16,34], index: 7, kind: input, shape index: {}, may-alias: {2,7}]   ;;  %s16290_s8 = inlined_call_operand.vmem [shape: f32[36], index: 8, kind: input, shape index: {}]   ;;  %s16291_s9 = inlined_call_operand.vmem [shape: f32[2], index: 9, kind: input, shape index: {}]   ;;  %s16292_s10 = inlined_call_operand.hbm [shape: f32[2,4,32,32], index: 10, kind: output, shape index: {0}]   ;;  %s16293_s11 = inlined_call_operand.hbm [shape: f32[2,2,32,32], index: 11, kind: output, shape index: {1}]  }
   0x1   :  { %16938 = sst [smem:[#allocation204_spill]] %s16282_s0 }
   0x2   :  { %16939 = sst [smem:[#allocation205_spill]] %s16284_s2 }
   0x3   :  { %16940 = sst [smem:[#allocation206_spill]] %s16285_s3 }
   0x4   :  { %16941 = sst [smem:[#allocation207_spill]] %s16286_s4 }
   0x5   :  { %16942 = sst [smem:[#allocation208_spill]] %s16290_s8 }
   0x6   :  { %16943 = sst [smem:[#allocation209_spill]] %s16291_s9 }
   0x7   :  { %17 = vsyncpa [#allocation4], 0 }
   0x8   :  { %18 = vsyncpa [#allocation6], 0 }
   0x9   :  { %19 = vsyncpa [#allocation9], 0 }
   0xa   :  { %20 = vsyncpa [#allocation3], 0 }
   0xb   :  { %22 = vsyncpa [#allocation3 + $0x1], 0 }
   0xc   :  { %23 = vsyncpa [#allocation12], 0 }
   0xd   :  { %25 = vsyncpa [#allocation12 + $0x1], 0  ;;  %s8043_s17 = smov 0   ;;  %s8045_s18 = smov 0  }
   0xe   :  { %s8047_s19 = smov 0   ;;  %s8049_s20 = smov 0  }
   0xf LB: > { %s8064_s21 = sadd.s32 4294967295, %s7968_s20   ;;  %s7164_s22 = sadd.s32 4294967294, %s7968_s20   ;;  %s7968_s20 = sphi %s8049_s20, %s19018_s20   ;;  %s7964_s19 = sphi %s8047_s19, %s19017_s19   ;;  %s7960_s18 = sphi %s8045_s18, %s19016_s18   ;;  %s7956_s17 = sphi %s8043_s17, %s19015_s17  }
  0x10   : > { %s8068_s23 = sadd.s32 1, %s7968_s20   ;;  %s258_s24 = sadd.s32 1, %s7964_s19 }
  0x11   : > { %s255_s25 = ssub.s32 %s7968_s20, %s8068_s23  ;;  %p268_p0 = scmp.ne.s32.totalorder %s7964_s19, %s7960_s18 }
  0x12   : > { %p256_p1 = scmp.eq.s32.totalorder %s255_s25, 0  ;;  %p269_p2 = scmp.eq.s32.totalorder %s8064_s21, 1 }
  0x13   : > { %p274_p3 = scmp.ne.s32.totalorder %s7960_s18, %s7956_s17  ;;  %p275_p4 = scmp.eq.s32.totalorder %s7164_s22, 1 }
  0x14   : > { %s8079_s26 = scalar_select %p256_p1, %s7964_s19, %s258_s24  }
  0x15   : > { %p8081_p5 = por %p269_p2, %p268_p0  ;;  %p8085_p6 = por %p275_p4, %p274_p3 }
  0x16   : > { %16944 = sst [smem:[#allocation18_spill]] %s8079_s26  ;;  %p7165_p7 = scmp.ge.s32.totalorder %s7968_s20, 1 }
  0x17   : > { %s16945_s27 = scalar_select %p8081_p5, 1, 0 }
  0x18   : > { %s16946_s28 = scalar_select %p8085_p6, 1, 0 }
  0x19   : > { %p308_p8 = scmp.lt.s32.totalorder %s7968_s20, 3  ;;  %p16294_p9 = scmp.eq.s32.totalorder %s8064_s21, 0 }
  0x1a   : > { %s16948_s4 = sld [smem:[#allocation207_spill]]  ;;  %s16949_s3 = sld [smem:[#allocation206_spill]] }
  0x1b   : > { %p8092_p10 = pnand %p7165_p7, %p308_p8  ;;  %s16951_s8 = sld [smem:[#allocation208_spill]] }
  0x1c   : > { %s16952_s9 = sld [smem:[#allocation209_spill]] }
  0x1d   : > { %s16947_s29 = scalar_select %p8092_p10, 1, 0 }
  0x1e   : > { %p7726_p11 = pneg %p8092_p10 }
  0x20   : > { %s338_s13 = sshll.u32 %s16948_s4, 4  ;;  %s327_s16 = sshll.u32 %s16949_s3, 4  ;;  %s339_s13 = int_to_ptr.vmem [resolvable:$true] %s338_s13  ;;  %s328_s16 = int_to_ptr.vmem [resolvable:$true] %s327_s16 }
  0x21   : > { %p8106_p12 = pnand %p16294_p9, %p7726_p11  ;;  %s355_s30 = sshll.u32 %s16951_s8, 4  ;;  %s8113_s30 = int_to_ptr.vmem [resolvable:$true] %s355_s30 }
  0x22   : > { %s366_s26 = sshll.u32 %s16952_s9, 4  ;;  %s7802_s14 = scalar_lea.vmem %s339_s13, 16  ;;  %s367_s26 = int_to_ptr.vmem [resolvable:$true] %s366_s26 }
  0x23   : > { %p7803_p13 = scmp.ne.s32.totalorder %s339_s13, %s7802_s14  ;;  %p7804_p0 = pneg %p8106_p12 }
  0x24   : > { %p7810_p3 = scmp.lt.s32.totalorder %s339_s13, %s339_s13  ;;  %p7811_p4 = scmp.lt.s32.totalorder %s7802_s14, %s7802_s14 }
  0x25   : > { %p7805_p1 = pnand %p7804_p0, %p7803_p13 }
  0x26   : > { %p7812_p7 = por %p7811_p4, %p7810_p3 }
  0x27   : > { %p7806_p2 = pneg %p7805_p1 }
  0x29   : > { %p7813_p8 = pnand %p7812_p7, %p7806_p2 }
  0x2b   : > { %7816 = shalt.err (!%p7813_p8)
}
  0x2c   : > { %s7970_s15 = smov [#allocation5]   ;;  %s7817_s4 = scalar_lea.vmem %s328_s16, 32 }
  0x2d   : > { %7732 = dma.vmem_to_smem (!%p8106_p12), %s339_s13, 16, %s7970_s15, [#allocation6]  }
  0x2e   : > { %p7818_p11 = scmp.ne.s32.totalorder %s328_s16, %s7817_s4  ;;  %p7825_p5 = scmp.lt.s32.totalorder %s328_s16, %s328_s16 }
  0x2f   : > { %p7826_p10 = scmp.lt.s32.totalorder %s7817_s4, %s7817_s4 }
  0x30   : > { %p7820_p9 = pnand %p7818_p11, %p7804_p0 }
  0x31   : > { %p7827_p13 = por %p7826_p10, %p7825_p5 }
  0x32   : > { %p7821_p6 = pneg %p7820_p9 }
  0x34   : > { %p7828_p1 = pnand %p7827_p13, %p7821_p6 }
  0x36   : > { %7831 = shalt.err (!%p7828_p1)
}
  0x37   : > { %s7971_s24 = smov [#allocation2]   ;;  %s7832_s13 = scalar_lea.vmem %s8113_s30, 16 }
  0x38   : > { %7729 = dma.vmem_to_smem (!%p8106_p12), %s328_s16, 32, %s7971_s24, [#allocation4]  }
  0x39   : > { %p7833_p2 = scmp.ne.s32.totalorder %s8113_s30, %s7832_s13  ;;  %p7840_p9 = scmp.lt.s32.totalorder %s8113_s30, %s8113_s30 }
  0x3a   : > { %p7841_p7 = scmp.lt.s32.totalorder %s7832_s13, %s7832_s13 }
  0x3b   : > { %p7835_p3 = pnand %p7833_p2, %p7804_p0 }
  0x3c   : > { %p7842_p5 = por %p7841_p7, %p7840_p9 }
  0x3d   : > { %p7836_p4 = pneg %p7835_p3 }
  0x3f   : > { %p7843_p6 = pnand %p7842_p5, %p7836_p4 }
  0x41   : > { %7846 = shalt.err (!%p7843_p6)
}
  0x42   : > { %s7972_s25 = smov [#allocation7]   ;;  %s7847_s14 = scalar_lea.vmem %s367_s26, 16 }
  0x43   : > { %7735 = dma.vmem_to_smem (!%p8106_p12), %s8113_s30, 16, %s7972_s25, [#allocation6]  }
  0x44   : > { %p7848_p10 = scmp.ne.s32.totalorder %s367_s26, %s7847_s14  ;;  %p7855_p13 = scmp.lt.s32.totalorder %s367_s26, %s367_s26 }
  0x45   : > { %p7856_p1 = scmp.lt.s32.totalorder %s7847_s14, %s7847_s14 }
  0x46   : > { %p7850_p8 = pnand %p7848_p10, %p7804_p0 }
  0x47   : > { %p7857_p2 = por %p7856_p1, %p7855_p13 }
  0x48   : > { %p7851_p11 = pneg %p7850_p8 }
  0x4a   : > { %p7858_p3 = pnand %p7857_p2, %p7851_p11 }
  0x4c   : > { %7861 = shalt.err (!%p7858_p3)
}
  0x4d   : > { %s7973_s15 = smov [#allocation8]   ;;  %p16953_p4 = scmp.ne.s32.totalorder %s16947_s29, 0 }
  0x4e   : > { %7738 = dma.vmem_to_smem (!%p8106_p12), %s367_s26, 16, %s7973_s15, [#allocation9]  }
  0x4f   : > { %395 = sbr.rel (%p16953_p4) target bundleno = 1703 (0x6a7), region = 60 }
  0x56   : > { %p16954_p9 = scmp.eq.s32.totalorder %s8064_s21, 0 }
  0x58   : > { %7935 = dma.done.wait (%p16954_p9), [#allocation4], 32   ;;  %p16955_p7 = pmov %p16954_p9 }
  0x5a   : > { %7937 = vsyncadd (%p16955_p7), [#allocation4], 4294967264  ;;  %p16956_p0 = pmov %p16955_p7 }
  0x5c   : > { %7939 = dma.done.wait (%p16956_p0), [#allocation6], 32   ;;  %p16957_p5 = pmov %p16956_p0 }
  0x5d   : > { %p16958_p6 = pmov %p16956_p0 }
  0x5e   : > { %7941 = vsyncadd (%p16957_p5), [#allocation6], 4294967264 }
  0x5f   : > { %7943 = dma.done.wait (%p16958_p6), [#allocation9], 16   ;;  %p16959_p12 = pmov %p16956_p0 }
  0x61   : > { %7945 = vsyncadd (%p16959_p12), [#allocation9], 4294967280 }
  0x62   : > { %413 = sfence }
  0x63   : > { %s16960_s2 = sld [smem:[#allocation205_spill]]  ;;  %p458_p10 = scmp.lt.s32.totalorder %s8064_s21, 1  ;;  %vm477_vm0 = vcmask 130048   ;;  %v16299_v7 = vmov 0.0|0.0   ;;  %vm7975_vm1 = vmmov 0   ;;  %v16307_v8 = vmov 0.0  }
  0x64   : > { %s16961_s0 = sld [smem:[#allocation204_spill]]  ;;  %v8196_v15 = vld [vmem:[%s16283_s1] sm:$0xff]  ;;  %v8207_v16 = vld [vmem:[%s16283_s1 + $0x8] sm:$0xff]  ;;  %v8222_v17 = vld [vmem:[%s16283_s1 + $0x10] sm:$0xff]  ;;  %s7192_s16 = sld [smem:[#allocation2 + $0x1]]  ;;  %vm924_vm2 = vcmask 1046528  }
  0x65   : > { %s8171_s4 = scalar_select %p458_p10, %s8064_s21, 1  ;;  %v8235_v18 = vld [vmem:[%s16283_s1 + $0x18] sm:$0xff]  ;;  %v8248_v19 = vld [vmem:[%s16283_s1 + $0x20] sm:$0x3]  ;;  %vm1337_vm3 = vcmask 1045504   ;;  %vm5482_vm4 = vcmask 261120  }
  0x66   : > { %s7193_s14 = sld [smem:[#allocation2 + $0x25]]  ;;  %s7194_s15 = sld [smem:[#allocation2 + $0x49]] }
  0x67   : > { %s7438_s24 = sshll.u32 %s8171_s4, 6  ;;  %s8268_s26 = sld [smem:[#allocation2 + $0x6d]] }
  0x68   : > { %s8270_s29 = sld [smem:[#allocation2 + $0x2]]  ;;  %s7204_s22 = sld [smem:[#allocation2 + $0x4]] }
  0x69   : > { %v473_v0 = vld [vmem:[%s16960_s2] sm:$0xff]  ;;  %v474_v1 = vld [vmem:[%s16960_s2 + $0x8] sm:$0xff]  ;;  %s8276_s30 = sld [smem:[#allocation2 + $0x4a]]  ;;  %s7206_s13 = sld [smem:[#allocation2 + $0x4c]] }
  0x6a   : > { %v7664_v2 = vpack.c.bf16 %v474_v1, %v473_v0  ;;  %s8177_s12 = scalar_lea.vmem %s16961_s0, %s7438_s24  ;;  %v8272_v24 = vstv %s7192_s16  ;;  %s7205_s24 = sld [smem:[#allocation2 + $0x28]] }
  0x6b   : > { %v475_v3 = vld [vmem:[%s8177_s12] sm:$0xff]  ;;  %v476_v4 = vld [vmem:[%s8177_s12 + $0x8] sm:$0xff]  ;;  %v7224_v5 = vld [vmem:[%s8177_s12 + $0x10] sm:$0xff]  ;;  %16962 = vst [vmem:[#allocation19_spill] sm:$0xff] %v8272_v24  ;;  %s8286_s25 = sld [smem:[#allocation2 + $0x70]]  ;;  %s16297_s16 = smov 127  }
  0x6c   : > { %7665 = vmatprep.subr.bf16.mxu1 %v7664_v2  ;;  %7672 = vmatprep.subr.bf16.mxu0 %v7664_v2  ;;  %v7225_v6 = vld [vmem:[%s8177_s12 + $0x18] sm:$0xff]  ;;  %v7269_v20 = vld [vmem:[%s8177_s12 + $0x20] sm:$0xff]  ;;  %v7314_v21 = vld [vmem:[%s8177_s12 + $0x30] sm:$0xff]  ;;  %v8284_v30 = vstv %s7193_s14  ;;  %s8293_s0 = sld [smem:[#allocation2 + $0x5]]  ;;  %s8301_s14 = sld [smem:[#allocation2 + $0x6e]] }
  0x6d   : > { %7667 = vmatpush3.bf16.msra.mxu1 %v7664_v2  ;;  %7674 = vmatpush3.bf16.msra.mxu0 %v7664_v2  ;;  %v7270_v22 = vld [vmem:[%s8177_s12 + $0x28] sm:$0xff]  ;;  %v7315_v23 = vld [vmem:[%s8177_s12 + $0x38] sm:$0xff]  ;;  %s8274_s12 = sld [smem:[#allocation2 + $0x26]]  ;;  %16964 = vst [vmem:[#allocation21_spill] sm:$0xff] %v8284_v30  ;;  %v8299_v37 = vstv %s7194_s15  ;;  %s16969_s2 = smov 127   ;;  %v8310_v39 = vstv %s8268_s26 }
  0x6e   : > { %7512 = vmatprep.mubr.msk.f32.mxu1 %vm477_vm0, %v475_v3  ;;  %7538 = vmatprep.mubr.msk.f32.mxu0 %vm477_vm0, %v7224_v5  ;;  %16967 = vst [vmem:[#allocation24_spill] sm:$0xff] %v8299_v37  ;;  %v8303_v38 = vstv %s7204_s22  ;;  %16970 = vst [vmem:[#allocation26_spill] sm:$0xff] %v8310_v39  ;;  %s8314_s3 = sld [smem:[#allocation2 + $0x4d]]  ;;  %s8316_s8 = sld [smem:[#allocation2 + $0x71]]  ;;  %v8321_v42 = vstv %s8270_s29 }
  0x6f   : > { %7668 = vmatprep.subr.bf16.mxu1 %v16299_v7  ;;  %7675 = vmatprep.subr.bf16.mxu0 %v16299_v7  ;;  %16968 = vst [vmem:[#allocation25_spill] sm:$0xff] %v8303_v38  ;;  %16973 = vst [vmem:[#allocation29_spill] sm:$0xff] %v8321_v42  ;;  %v8327_v44 = vstv %s8276_s30  ;;  %v8331_v46 = vstv %s7206_s13  ;;  %s8333_s15 = sld [smem:[#allocation2 + $0x7]]  ;;  %s8354_s26 = sld [smem:[#allocation2 + $0x2b]] }
  0x70   : > { %7513 = vmatmul.mubr.msk.f32.vlgmr.msra.gmra.mrb[0].mxu1 %vm477_vm0, %v476_v4  ;;  %7539 = vmatmul.mubr.msk.f32.vlgmr.msra.gmra.mrb[0].mxu0 %vm477_vm0, %v7225_v6  ;;  %v8312_v40 = vstv %s7205_s24  ;;  %16975 = vst [vmem:[#allocation31_spill] sm:$0xff] %v8327_v44  ;;  %16977 = vst [vmem:[#allocation33_spill] sm:$0xff] %v8331_v46  ;;  %s8365_s29 = sld [smem:[#allocation2 + $0x4f]]  ;;  %s8404_s22 = sld [smem:[#allocation2 + $0x2e]] }
  0x71   : > { %7519 = vmatprep.mubr.msk.f32.mxu1 %vm7975_vm1, %v16307_v8  ;;  %7545 = vmatprep.mubr.msk.f32.mxu0 %vm7975_vm1, %v16307_v8  ;;  %16971 = vst [vmem:[#allocation27_spill] sm:$0xff] %v8312_v40  ;;  %v8352_v55 = vstv %s8286_s25  ;;  %s8406_s30 = sld [smem:[#allocation2 + $0x52]]  ;;  %s8453_s24 = sld [smem:[#allocation2 + $0xb]] }
  0x72   : > { %16978 = vst [vmem:[#allocation34_spill] sm:$0xff] %v8352_v55  ;;  %v8375_v0 = vstv %s8293_s0  ;;  %s8390_s0 = sld [smem:[#allocation2 + $0xa]]  ;;  %s8455_s13 = sld [smem:[#allocation2 + $0x2f]] }
  0x73   : > { %v8324_v43 = vstv %s8274_s12  ;;  %s8367_s12 = sld [smem:[#allocation2 + $0x73]]  ;;  %s8476_s25 = sld [smem:[#allocation2 + $0x8]] }
  0x74   : > { %16974 = vst [vmem:[#allocation30_spill] sm:$0xff] %v8324_v43  ;;  %s8619_s9 = sld [smem:[#allocation2 + $0x79]]  ;;  %p19000_p11 = scmp.ne.s32.totalorder %s16945_s27, 0 }
 0x143   : > { %v7514_v9 = vpop.f32.mrb[0].mxu1  ;;  %v7540_v10 = vpop.f32.mrb[0].mxu0 }
 0x144   : > { %v550_v11 = vpop.f32.mrb[1].mxu1  ;;  %v1813_v12 = vpop.f32.mrb[1].mxu0 }
 0x145   : > { %v7669_v13 = vpack.c.bf16 %v7514_v9, %v550_v11  ;;  %v7676_v14 = vpack.c.bf16 %v7540_v10, %v1813_v12  ;;  %v8388_v10 = vstv %s8301_s14  ;;  %s8510_s14 = sld [smem:[#allocation2 + $0x77]] }
 0x146   : > { %16981 = vst [vmem:[#allocation37_spill] sm:$0xff] %v8388_v10 }
 0x147   : > { %7670 = vmatpush3.bf16.msra.mxu1 %v7669_v13  ;;  %7677 = vmatpush3.bf16.msra.mxu0 %v7676_v14 }
 0x148   : > { %7679 = vmatprep.subr.bf16.mxu1 %v7664_v2  ;;  %7686 = vmatprep.subr.bf16.mxu0 %v7664_v2 }
 0x14a   : > { %7520 = vmatmul.mubr.msk.f32.vlgmr.msra.gmra.mrb[2].mxu1 %vm477_vm0, %v8196_v15  ;;  %7546 = vmatmul.mubr.msk.f32.vlgmr.msra.gmra.mrb[2].mxu0 %vm477_vm0, %v8196_v15 }
 0x14b   : > { %7522 = vmatprep.mubr.msk.f32.mxu1 %vm7975_vm1, %v16307_v8  ;;  %7548 = vmatprep.mubr.msk.f32.mxu0 %vm7975_vm1, %v16307_v8 }
 0x14c   : > { %7681 = vmatpush3.bf16.msra.mxu1 %v7664_v2  ;;  %7688 = vmatpush3.bf16.msra.mxu0 %v7664_v2 }
 0x14d   : > { %7682 = vmatprep.subr.bf16.mxu1 %v16299_v7  ;;  %7689 = vmatprep.subr.bf16.mxu0 %v16299_v7 }
 0x14e   : > { %7523 = vmatmul.mubr.msk.f32.gmra.mrb[4].mxu1 %vm477_vm0, %v8207_v16  ;;  %7549 = vmatmul.mubr.msk.f32.gmra.mrb[4].mxu0 %vm477_vm0, %v8207_v16 }
 0x14f   : > { %7525 = vmatprep.mubr.msk.f32.mxu1 %vm7975_vm1, %v16307_v8  ;;  %7551 = vmatprep.mubr.msk.f32.mxu0 %vm7975_vm1, %v16307_v8 }
 0x152   : > { %7526 = vmatmul.mubr.msk.f32.gmra.mrb[6].mxu1 %vm477_vm0, %v8222_v17  ;;  %7552 = vmatmul.mubr.msk.f32.gmra.mrb[6].mxu0 %vm477_vm0, %v8222_v17 }
 0x153   : > { %7528 = vmatprep.mubr.msk.f32.mxu1 %vm7975_vm1, %v16307_v8  ;;  %7554 = vmatprep.mubr.msk.f32.mxu0 %vm7975_vm1, %v16307_v8 }
 0x156   : > { %7529 = vmatmul.mubr.msk.f32.gmra.mrb[8].mxu1 %vm477_vm0, %v8235_v18  ;;  %7555 = vmatmul.mubr.msk.f32.gmra.mrb[8].mxu0 %vm477_vm0, %v8235_v18 }
 0x157   : > { %7531 = vmatprep.mubr.msk.f32.mxu1 %vm7975_vm1, %v16307_v8  ;;  %7557 = vmatprep.mubr.msk.f32.mxu0 %vm7975_vm1, %v16307_v8 }
 0x15a   : > { %7532 = vmatmul.mubr.msk.f32.gmra.mrb[10].mxu1 %vm477_vm0, %v8248_v19  ;;  %7558 = vmatmul.mubr.msk.f32.gmra.mrb[10].mxu0 %vm477_vm0, %v8248_v19 }
 0x15b   : > { %7564 = vmatprep.mubr.msk.f32.mxu1 %vm477_vm0, %v7269_v20  ;;  %7590 = vmatprep.mubr.msk.f32.mxu0 %vm477_vm0, %v7314_v21  ;;  %v8418_v21 = vstv %s8314_s3  ;;  %s8441_s3 = sld [smem:[#allocation2 + $0x76]] }
 0x15e   : > { %7565 = vmatmul.mubr.msk.f32.vlgmr.msra.gmra.mrb[12].mxu1 %vm477_vm0, %v7270_v22  ;;  %7591 = vmatmul.mubr.msk.f32.vlgmr.msra.gmra.mrb[12].mxu0 %vm477_vm0, %v7315_v23  ;;  %v8421_v22 = vstv %s8316_s8  ;;  %s7978_s8 = smov 126  }
 0x15f   : > { %7571 = vmatprep.mubr.msk.f32.mxu1 %vm7975_vm1, %v16307_v8  ;;  %7597 = vmatprep.mubr.msk.f32.mxu0 %vm7975_vm1, %v16307_v8 }
 0x21d   : > { %v8278_v25 = vpop.f32.mrb[2].mxu1  ;;  %v8280_v26 = vpop.f32.mrb[2].mxu0 }
 0x21e   : > { %16963 = vst [vmem:[#allocation20_spill] sm:$0xff] %v8280_v26  ;;  %v7521_v27 = vpop.f32.mrb[3].mxu1  ;;  %v706_v28 = vmul.f32 %v8272_v24, %v8278_v25  ;;  %v7547_v29 = vpop.f32.mrb[3].mxu0  ;;  %v732_v34 = vmul.f32 %v8284_v30, %v8278_v25  ;;  %v758_v47 = vmul.f32 %v8299_v37, %v8278_v25  ;;  %v1031_v50 = vmul.f32 %v8303_v38, %v8278_v25 }
 0x21f   : > { %v1068_v53 = vmul.f32 %v8312_v40, %v8278_v25  ;;  %v1105_v58 = vmul.f32 %v8331_v46, %v8278_v25  ;;  %v784_v60 = vmul.f32 %v8310_v39, %v8278_v25  ;;  %v1142_v12 = vmul.f32 %v8352_v55, %v8278_v25 }
 0x220   : > { %714 = vrot.lane.b32.xlu0 %v706_v28, %s16297_s16  ;;  %s8305_s16 = sld [smem:[#allocation2 + $0x29]]  ;;  %v1041_v56 = vrot.slane %v1031_v50, 1  ;;  %v810_v23 = vmul.f32 %v8321_v42, %v8278_v25  ;;  %v1179_v28 = vmul.f32 %v8375_v0, %v8278_v25 }
 0x221   : > { %v8289_v31 = vpop.f32.mrb[4].mxu1  ;;  %v8291_v32 = vpop.f32.mrb[4].mxu0  ;;  %v1078_v62 = vrot.slane %v1068_v53, 1  ;;  %v1115_v5 = vrot.slane %v1105_v58, 1  ;;  %v8449_v53 = vstv %s8354_s26  ;;  %v8463_v58 = vstv %s8365_s29  ;;  %s8533_s26 = sld [smem:[#allocation2]]  ;;  %s8535_s29 = sld [smem:[#allocation2 + $0x24]] }
 0x222   : > { %16965 = vst [vmem:[#allocation22_spill] sm:$0xff] %v8289_v31  ;;  %16966 = vst [vmem:[#allocation23_spill] sm:$0xff] %v8291_v32  ;;  %v7524_v33 = vpop.f32.mrb[5].mxu1  ;;  %v733_v35 = vmul.f32 %v8284_v30, %v8289_v31  ;;  %v7550_v36 = vpop.f32.mrb[5].mxu0  ;;  %v759_v48 = vmul.f32 %v8299_v37, %v8289_v31  ;;  %v8343_v51 = vmul.f32 %v8303_v38, %v8289_v31  ;;  %v8610_v30 = vstv %s8510_s14  ;;  %s8661_s14 = sld [smem:[#allocation2 + $0x32]] }
 0x223   : > { %v8349_v54 = vmul.f32 %v8312_v40, %v8289_v31  ;;  %v8363_v59 = vmul.f32 %v8331_v46, %v8289_v31  ;;  %v785_v2 = vmul.f32 %v8310_v39, %v8289_v31  ;;  %v8415_v20 = vmul.f32 %v8352_v55, %v8289_v31  ;;  %16998 = vst [vmem:[#allocation53_spill] sm:$0xff] %v8610_v30 }
 0x224   : > { %740 = vrot.lane.b32.xlu0 %v732_v34, %s16969_s2  ;;  %742 = vrot.lane.b32.xlu1 %v733_v35, %s16969_s2  ;;  %v16306_v57 = vrot.slane %v8343_v51, 1  ;;  %v8431_v29 = vmul.f32 %v8375_v0, %v8289_v31  ;;  %v8434_v33 = vstv %s8333_s15  ;;  %v811_v34 = vmul.f32 %v8321_v42, %v8289_v31  ;;  %s8520_s15 = sld [smem:[#allocation2 + $0x2c]] }
 0x225   : > { %v8318_v41 = vpop.f32.mrb[6].mxu1  ;;  %v8329_v45 = vpop.f32.mrb[6].mxu0  ;;  %v16305_v63 = vrot.slane %v8349_v54, 1  ;;  %v16304_v6 = vrot.slane %v8363_v59, 1  ;;  %v1152_v36 = vrot.slane %v1142_v12, 1  ;;  %v836_v12 = vmul.f32 %v8324_v43, %v8278_v25 }
 0x226   : > { %16972 = vst [vmem:[#allocation28_spill] sm:$0xff] %v8318_v41  ;;  %16976 = vst [vmem:[#allocation32_spill] sm:$0xff] %v8329_v45  ;;  %v7527_v49 = vpop.f32.mrb[7].mxu1  ;;  %v7553_v52 = vpop.f32.mrb[7].mxu0  ;;  %v8384_v3 = vsel %vm924_vm2, %v1041_v56, %v16306_v57  ;;  %v8400_v13 = vstv %s8305_s16  ;;  %v16301_v50 = vrot.slane %v8431_v29, 1  ;;  %v8498_v7 = vmul.f32 %v8421_v22, %v8289_v31  ;;  %s8508_s16 = sld [smem:[#allocation2 + $0x53]] }
 0x227   : > { %v8395_v11 = vsel %vm924_vm2, %v1078_v62, %v16305_v63  ;;  %v8411_v14 = vsel %vm924_vm2, %v1115_v5, %v16304_v6  ;;  %v1189_v49 = vrot.slane %v1179_v28, 1  ;;  %v8446_v52 = vmul.f32 %v8400_v13, %v8289_v31 }
 0x228   : > { %766 = vrot.lane.b32.xlu0 %v758_v47, %s16969_s2  ;;  %768 = vrot.lane.b32.xlu1 %v759_v48, %s16969_s2  ;;  %v16302_v47 = vrot.slane %v8415_v20, 1  ;;  %v1216_v48 = vmul.f32 %v8400_v13, %v8278_v25  ;;  %v1481_v6 = vmul.f32 %v8449_v53, %v8278_v25  ;;  %v8538_v63 = vstv %s8441_s3  ;;  %s8582_s3 = sld [smem:[#allocation2 + $0xd]] }
 0x229   : > { %v8371_v61 = vpop.f32.mrb[8].mxu1  ;;  %v8377_v1 = vpop.f32.mrb[8].mxu0  ;;  %v16303_v5 = vrot.slane %v8446_v52, 1  ;;  %16987 = vst [vmem:[#allocation43_spill] sm:$0xff] %v8538_v63 }
 0x22a   : > { %16979 = vst [vmem:[#allocation35_spill] sm:$0xff] %v8371_v61  ;;  %16980 = vst [vmem:[#allocation36_spill] sm:$0xff] %v8377_v1  ;;  %v7530_v4 = vpop.f32.mrb[9].mxu1  ;;  %v7556_v9 = vpop.f32.mrb[9].mxu0  ;;  %v8460_v56 = vsel %vm924_vm2, %v1152_v36, %v16302_v47  ;;  %v8489_v36 = vstv %s8390_s0  ;;  %v8506_v47 = vstv %s8406_s30  ;;  %s8548_s0 = sld [smem:[#allocation2 + $0x50]]  ;;  %s8564_s30 = sld [smem:[#allocation2 + $0x74]]  ;;  %v8630_v45 = vstv %s8520_s15 }
 0x22b   : > { %v1226_v4 = vrot.slane %v1216_v48, 1  ;;  %v1253_v9 = vmul.f32 %v8418_v21, %v8278_v25  ;;  %16983 = vst [vmem:[#allocation39_spill] sm:$0xff] %v8489_v36  ;;  %16985 = vst [vmem:[#allocation41_spill] sm:$0xff] %v8506_v47  ;;  %v1491_v42 = vrot.slane %v1481_v6, 2  ;;  %v1955_v6 = vmul.f32 %v8489_v36, %v8291_v32  ;;  %s8671_s15 = sld [smem:[#allocation2 + $0x56]] }
 0x22c   : > { %792 = vrot.lane.b32.xlu0 %v784_v60, %s16969_s2  ;;  %794 = vrot.lane.b32.xlu1 %v785_v2, %s16969_s2  ;;  %v8466_v60 = vstv %s8367_s12  ;;  %v8471_v2 = vsel %vm924_vm2, %v1189_v49, %v16301_v50  ;;  %v8503_v50 = vstv %s8404_s22  ;;  %s8546_s12 = sld [smem:[#allocation2 + $0x48]]  ;;  %s8562_s22 = sld [smem:[#allocation2 + $0x6c]]  ;;  %17002 = vst [vmem:[#allocation56_spill] sm:$0xff] %v8630_v45 }
 0x22d   : > { %v8425_v27 = vpop.f32.mrb[10].mxu1  ;;  %v8494_v49 = vsel %vm924_vm2, %v1226_v4, %v16303_v5  ;;  %16984 = vst [vmem:[#allocation40_spill] sm:$0xff] %v8503_v50  ;;  %v16312_v5 = vrot.slane %v8498_v7, 1  ;;  %v1555_v1 = vmul.f32 %v8466_v60, %v8278_v25 }
 0x22e   : > { %16982 = vst [vmem:[#allocation38_spill] sm:$0xff] %v8425_v27  ;;  %v7533_v35 = vpop.f32.mrb[11].mxu1  ;;  %v8598_v27 = vmul.f32 %v8466_v60, %v8289_v31 }
 0x22f   : > { %v1290_v35 = vmul.f32 %v8421_v22, %v8278_v25  ;;  %v1565_v61 = vrot.slane %v1555_v1, 2  ;;  %v8651_v1 = vstv %s8535_s29  ;;  %s8711_s29 = sld [smem:[#allocation2 + $0x10]] }
 0x230   : > { %818 = vrot.lane.b32.xlu0 %v810_v23, %s7978_s8  ;;  %820 = vrot.lane.b32.xlu1 %v811_v34, %s7978_s8  ;;  %v837_v23 = vmul.f32 %v8324_v43, %v8289_v31  ;;  %v8484_v34 = vmul.f32 %v8418_v21, %v8289_v31  ;;  %v888_v43 = vmul.f32 %v8388_v10, %v8278_v25 }
 0x231   : > { %v7566_v62 = vpop.f32.mrb[12].mxu1  ;;  %16996 = vst [vmem:[#allocation51_spill] sm:$0xff] %v8598_v27  ;;  %17006 = vst [vmem:[#allocation60_spill] sm:$0xff] %v8651_v1 }
 0x232   : > { %v3059_v28 = vpop.f32.mrb[13].mxu1  ;;  %v16311_v4 = vrot.slane %v8484_v34, 1 }
 0x233   : > { %v7683_v48 = vpack.c.bf16 %v7566_v62, %v3059_v28  ;;  %v1263_v62 = vrot.slane %v1253_v9, 1  ;;  %v1300_v28 = vrot.slane %v1290_v35, 1  ;;  %v862_v9 = vmul.f32 %v8327_v44, %v8278_v25 }
 0x234   : > { %844 = vrot.lane.b32.xlu0 %v836_v12, %s7978_s8  ;;  %846 = vrot.lane.b32.xlu1 %v837_v23, %s7978_s8  ;;  %v1444_v12 = vmul.f32 %v8434_v33, %v8278_v25  ;;  %v8518_v23 = vmul.f32 %v8434_v33, %v8289_v31 }
 0x235   : > { %7684 = vmatpush3.bf16.msra.mxu1 %v7683_v48  ;;  %v863_v48 = vmul.f32 %v8327_v44, %v8289_v31  ;;  %v8529_v35 = vsel %vm924_vm2, %v1263_v62, %v16311_v4  ;;  %v8543_v57 = vsel %vm924_vm2, %v1300_v28, %v16312_v5  ;;  %v8553_v62 = vstv %s8453_s24  ;;  %s8584_s24 = sld [smem:[#allocation2 + $0x3]] }
 0x236   : > { %16986 = vst [vmem:[#allocation42_spill] sm:$0xff] %v8518_v23  ;;  %16988 = vst [vmem:[#allocation44_spill] sm:$0xff] %v8543_v57  ;;  %v1454_v8 = vrot.slane %v1444_v12, 2  ;;  %v16315_v44 = vrot.slane %v8518_v23, 2  ;;  %v8556_v4 = vstv %s8455_s13  ;;  %v8560_v28 = vmul.f32 %v8449_v53, %v8289_v31  ;;  %s8600_s13 = sld [smem:[#allocation2 + $0x31]] }
 0x237   : > { %16989 = vst [vmem:[#allocation45_spill] sm:$0xff] %v8553_v62  ;;  %16990 = vst [vmem:[#allocation46_spill] sm:$0xff] %v8556_v4  ;;  %v8580_v5 = vstv %s8476_s25  ;;  %s8617_s25 = sld [smem:[#allocation2 + $0x55]]  ;;  %v1981_v57 = vmul.f32 %v8503_v50, %v8291_v32  ;;  %v8808_v23 = vstv %s8711_s29 }
 0x238   : > { %870 = vrot.lane.b32.xlu0 %v862_v9, %s7978_s8  ;;  %872 = vrot.lane.b32.xlu1 %v863_v48, %s7978_s8  ;;  %16991 = vst [vmem:[#allocation47_spill] sm:$0xff] %v8560_v28  ;;  %v8571_v12 = vsel %vm1337_vm3, %v1454_v8, %v16315_v44  ;;  %v1518_v9 = vmul.f32 %v8463_v58, %v8278_v25  ;;  %16994 = vst [vmem:[#allocation50_spill] sm:$0xff] %v8580_v5  ;;  %v16995_v44 = vmov 0.0   ;;  %v16330_v39 = vrot.slane %v8560_v28, 2  ;;  %s8884_s29 = sld [smem:[#allocation2 + $0x7d]] }
 0x239   : > { %7572 = vmatmul.mubr.msk.f32.vlgmr.msra.gmra.mrb[14].mxu1 %vm477_vm0, %v8196_v15  ;;  %16992 = vst [vmem:[#allocation48_spill] sm:$0xff] %v8571_v12  ;;  %v8577_v48 = vmul.f32 %v8463_v58, %v8289_v31  ;;  %v889_v8 = vmul.f32 %v8388_v10, %v8289_v31  ;;  %v16333_v12 = vrot.slane %v8598_v27, 2  ;;  %17032 = vst [vmem:[#allocation84_spill] sm:$0xff] %v8808_v23 }
 0x23a   : > { %7574 = vmatprep.mubr.msk.f32.mxu1 %vm7975_vm1, %v16995_v44  ;;  %v1528_v37 = vrot.slane %v1518_v9, 2  ;;  %v8607_v9 = vstv %s8508_s16  ;;  %v8615_v10 = vsel %vm1337_vm3, %v1491_v42, %v16330_v39  ;;  %v1954_v42 = vmul.f32 %v8489_v36, %v8280_v26  ;;  %s8659_s16 = sld [smem:[#allocation2 + $0xe]] }
 0x23b   : > { %16993 = vst [vmem:[#allocation49_spill] sm:$0xff] %v8577_v48  ;;  %16997 = vst [vmem:[#allocation52_spill] sm:$0xff] %v8607_v9  ;;  %v8635_v39 = vstv %s8533_s26  ;;  %v8657_v36 = vstv %s8548_s0  ;;  %s8683_s26 = sld [smem:[#allocation2 + $0x7a]]  ;;  %s8723_s0 = sld [smem:[#allocation2 + $0x58]] }
 0x23c   : > { %896 = vrot.lane.b32.xlu0 %v888_v43, %s7978_s8  ;;  %898 = vrot.lane.b32.xlu1 %v889_v8, %s7978_s8  ;;  %16999 = vst [vmem:[#allocation54_spill] sm:$0xff] %v8615_v10  ;;  %v17000_v43 = vrot.slane %v8577_v48, 2  ;;  %17003 = vst [vmem:[#allocation57_spill] sm:$0xff] %v8635_v39  ;;  %v1592_v10 = vmul.f32 %v8580_v5, %v8278_v25  ;;  %v1666_v27 = vmul.f32 %v8657_v36, %v8278_v25 }
 0x23d   : > { %7575 = vmatmul.mubr.msk.f32.gmra.mrb[16].mxu1 %vm477_vm0, %v8207_v16  ;;  %v8641_v16 = vmul.f32 %v8580_v5, %v8289_v31  ;;  %17008 = vst [vmem:[#allocation62_spill] sm:$0xff] %v8657_v36  ;;  %v8706_v48 = vmul.f32 %v8657_v36, %v8289_v31  ;;  %v8709_v39 = vstv %s8600_s13  ;;  %s8810_s13 = sld [smem:[#allocation2 + $0x2a]] }
 0x23e   : > { %v8626_v8 = vsel %vm1337_vm3, %v1528_v37, %v17000_v43  ;;  %7577 = vmatprep.mubr.msk.f32.mxu1 %vm7975_vm1, %v16995_v44  ;;  %v8648_v37 = vsel %vm1337_vm3, %v1565_v61, %v16333_v12  ;;  %v8654_v43 = vstv %s8546_s12  ;;  %v1629_v61 = vmul.f32 %v8630_v45, %v8278_v25  ;;  %17017 = vst [vmem:[#allocation70_spill] sm:$0xff] %v8709_v39  ;;  %s8721_s12 = sld [smem:[#allocation2 + $0x34]] }
 0x23f   : > { %17001 = vst [vmem:[#allocation55_spill] sm:$0xff] %v8626_v8  ;;  %17004 = vst [vmem:[#allocation58_spill] sm:$0xff] %v8641_v16  ;;  %v1602_v8 = vrot.slane %v1592_v10, 2  ;;  %v8669_v12 = vstv %s8562_s22  ;;  %v8688_v10 = vstv %s8584_s24  ;;  %s8733_s22 = sld [smem:[#allocation2 + $0x7c]]  ;;  %s8786_s24 = sld [smem:[#allocation2 + $0x6]] }
 0x240   : > { %17005 = vst [vmem:[#allocation59_spill] sm:$0xff] %v8648_v37  ;;  %17007 = vst [vmem:[#allocation61_spill] sm:$0xff] %v8654_v43  ;;  %1962 = vrot.lane.b32.xlu0 %v1954_v42, %s16969_s2  ;;  %1964 = vrot.lane.b32.xlu1 %v1955_v6, %s16969_s2  ;;  %v8675_v37 = vmul.f32 %v8630_v45, %v8289_v31  ;;  %v8678_v43 = vstv %s8564_s30  ;;  %v8681_v42 = vstv %s8582_s3  ;;  %s8766_s30 = sld [smem:[#allocation2 + $0x4b]]  ;;  %s8774_s3 = sld [smem:[#allocation2 + $0x6f]] }
 0x241   : > { %17009 = vst [vmem:[#allocation63_spill] sm:$0xff] %v8669_v12  ;;  %17011 = vst [vmem:[#allocation65_spill] sm:$0xff] %v8678_v43  ;;  %7578 = vmatmul.mubr.msk.f32.gmra.mrb[18].mxu1 %vm477_vm0, %v8222_v17  ;;  %v1980_v6 = vmul.f32 %v8503_v50, %v8280_v26  ;;  %v17014_v12 = vrot.slane %v8641_v16, 2  ;;  %v1639_v17 = vrot.slane %v1629_v61, 2  ;;  %v1676_v50 = vrot.slane %v1666_v27, 2 }
 0x242   : > { %17010 = vst [vmem:[#allocation64_spill] sm:$0xff] %v8675_v37  ;;  %17012 = vst [vmem:[#allocation66_spill] sm:$0xff] %v8681_v42  ;;  %7580 = vmatprep.mubr.msk.f32.mxu1 %vm7975_vm1, %v16995_v44  ;;  %v16345_v1 = vrot.slane %v8675_v37, 2  ;;  %v2007_v37 = vmul.f32 %v8506_v47, %v8291_v32  ;;  %v8743_v27 = vmul.f32 %v8678_v43, %v8289_v31 }
 0x243   : > { %17013 = vst [vmem:[#allocation67_spill] sm:$0xff] %v8688_v10  ;;  %v8697_v45 = vsel %vm1337_vm3, %v1602_v8, %v17014_v12  ;;  %17016 = vst [vmem:[#allocation69_spill] sm:$0xff] %v8706_v48  ;;  %v8716_v12 = vstv %s8617_s25  ;;  %v8719_v8 = vstv %s8619_s9  ;;  %s8764_s9 = sld [smem:[#allocation2 + $0x27]]  ;;  %s8824_s25 = sld [smem:[#allocation2 + $0x11]] }
 0x244   : > { %17015 = vst [vmem:[#allocation68_spill] sm:$0xff] %v8697_v45  ;;  %1988 = vrot.lane.b32.xlu0 %v1980_v6, %s16969_s2  ;;  %1990 = vrot.lane.b32.xlu1 %v1981_v57, %s16969_s2  ;;  %17018 = vst [vmem:[#allocation71_spill] sm:$0xff] %v8716_v12  ;;  %v8728_v61 = vsel %vm1337_vm3, %v1639_v17, %v16345_v1  ;;  %v16349_v6 = vrot.slane %v8706_v48, 2  ;;  %v1703_v57 = vmul.f32 %v8678_v43, %v8278_v25 }
 0x245   : > { %17019 = vst [vmem:[#allocation72_spill] sm:$0xff] %v8719_v8  ;;  %17020 = vst [vmem:[#allocation73_spill] sm:$0xff] %v8728_v61  ;;  %7581 = vmatmul.mubr.msk.f32.gmra.mrb[20].mxu1 %vm477_vm0, %v8235_v18  ;;  %v2006_v45 = vmul.f32 %v8506_v47, %v8280_v26  ;;  %v2278_v17 = vmul.f32 %v8681_v42, %v8280_v26  ;;  %v8756_v1 = vmul.f32 %v8681_v42, %v8291_v32 }
 0x246   : > { %17021 = vst [vmem:[#allocation74_spill] sm:$0xff] %v8743_v27  ;;  %7583 = vmatprep.mubr.msk.f32.mxu1 %vm7975_vm1, %v16995_v44  ;;  %v8752_v18 = vsel %vm1337_vm3, %v1676_v50, %v16349_v6  ;;  %v8759_v47 = vstv %s8659_s16  ;;  %v8762_v61 = vstv %s8661_s14  ;;  %v1713_v48 = vrot.slane %v1703_v57, 2  ;;  %s8826_s16 = sld [smem:[#allocation2 + $0x4e]]  ;;  %s8842_s14 = sld [smem:[#allocation2 + $0x72]] }
 0x247   : > { %17022 = vst [vmem:[#allocation75_spill] sm:$0xff] %v8752_v18  ;;  %17023 = vst [vmem:[#allocation76_spill] sm:$0xff] %v8756_v1  ;;  %v16361_v50 = vrot.slane %v8743_v27, 2  ;;  %v2288_v6 = vrot.slane %v2278_v17, 1  ;;  %v8772_v18 = vstv %s8671_s15  ;;  %v2315_v42 = vmul.f32 %v8709_v39, %v8280_v26  ;;  %s8856_s15 = sld [smem:[#allocation2 + $0x35]] }
 0x248   : > { %17024 = vst [vmem:[#allocation77_spill] sm:$0xff] %v8759_v47  ;;  %17025 = vst [vmem:[#allocation78_spill] sm:$0xff] %v8762_v61  ;;  %2014 = vrot.lane.b32.xlu0 %v2006_v45, %s16969_s2  ;;  %2016 = vrot.lane.b32.xlu1 %v2007_v37, %s16969_s2  ;;  %v8781_v43 = vmul.f32 %v8709_v39, %v8291_v32  ;;  %v8784_v45 = vstv %s8683_s26  ;;  %v2032_v37 = vmul.f32 %v8538_v63, %v8280_v26  ;;  %s8868_s26 = sld [smem:[#allocation2 + $0x59]] }
 0x249   : > { %17026 = vst [vmem:[#allocation79_spill] sm:$0xff] %v8772_v18  ;;  %17028 = vst [vmem:[#allocation81_spill] sm:$0xff] %v8784_v45  ;;  %7584 = vmatmul.mubr.msk.f32.gmra.mrb[22].mxu1 %vm477_vm0, %v8248_v19  ;;  %v2033_v57 = vmul.f32 %v8538_v63, %v8291_v32  ;;  %v8797_v17 = vsel %vm1337_vm3, %v1713_v48, %v16361_v50  ;;  %v2352_v16 = vmul.f32 %v8716_v12, %v8280_v26 }
 0x24a   : > { %17027 = vst [vmem:[#allocation80_spill] sm:$0xff] %v8781_v43  ;;  %17029 = vst [vmem:[#allocation82_spill] sm:$0xff] %v8797_v17  ;;  %v17030_v39 = vrot.slane %v8756_v1, 1  ;;  %v2325_v19 = vrot.slane %v2315_v42, 1  ;;  %v16364_v28 = vrot.slane %v8781_v43, 1  ;;  %v8816_v48 = vmul.f32 %v8716_v12, %v8291_v32 }
 0x24b   : > { %v2362_v50 = vrot.slane %v2352_v16, 1  ;;  %v8819_v63 = vstv %s8721_s12  ;;  %v8837_v16 = vmul.f32 %v8719_v8, %v8291_v32  ;;  %v8854_v43 = vmul.f32 %v8759_v47, %v8291_v32  ;;  %s8941_s12 = sld [smem:[#allocation2 + $0xc]] }
 0x24c   : > { %v8804_v36 = vsel %vm924_vm2, %v2288_v6, %v17030_v39  ;;  %2040 = vrot.lane.b32.xlu0 %v2032_v37, %s16969_s2  ;;  %2042 = vrot.lane.b32.xlu1 %v2033_v57, %s16969_s2  ;;  %17033 = vst [vmem:[#allocation85_spill] sm:$0xff] %v8816_v48  ;;  %17034 = vst [vmem:[#allocation86_spill] sm:$0xff] %v8819_v63  ;;  %v8822_v39 = vstv %s8723_s0  ;;  %v8831_v42 = vsel %vm924_vm2, %v2325_v19, %v16364_v28  ;;  %s8943_s0 = sld [smem:[#allocation2 + $0x30]] }
 0x24d   : > { %17031 = vst [vmem:[#allocation83_spill] sm:$0xff] %v8804_v36  ;;  %17035 = vst [vmem:[#allocation87_spill] sm:$0xff] %v8822_v39  ;;  %v2389_v6 = vmul.f32 %v8719_v8, %v8280_v26  ;;  %v8840_v37 = vstv %s8733_s22  ;;  %v2058_v57 = vmul.f32 %v8553_v62, %v8280_v26  ;;  %v2059_v19 = vmul.f32 %v8553_v62, %v8291_v32  ;;  %s8967_s22 = sld [smem:[#allocation2 + $0x54]] }
 0x24e   : > { %17036 = vst [vmem:[#allocation88_spill] sm:$0xff] %v8831_v42  ;;  %17037 = vst [vmem:[#allocation89_spill] sm:$0xff] %v8837_v16  ;;  %v16374_v28 = vrot.slane %v8816_v48, 1  ;;  %v2426_v42 = vmul.f32 %v8759_v47, %v8280_v26  ;;  %v8859_v1 = vstv %s8764_s9  ;;  %v8871_v17 = vstv %s8766_s30  ;;  %s9138_s9 = sld [smem:[#allocation2 + $0x78]]  ;;  %s9152_s30 = sld [smem:[#allocation2 + $0xf]] }
 0x24f   : > { %17038 = vst [vmem:[#allocation90_spill] sm:$0xff] %v8840_v37  ;;  %v2399_v36 = vrot.slane %v2389_v6, 1  ;;  %17039 = vst [vmem:[#allocation91_spill] sm:$0xff] %v8854_v43  ;;  %v8874_v47 = vstv %s8774_s3  ;;  %v17044_v27 = vrot.slane %v8837_v16, 1  ;;  %v8906_v16 = vmul.f32 %v8772_v18, %v8291_v32  ;;  %s9154_s3 = sld [smem:[#allocation2 + $0x33]] }
 0x250   : > { %17040 = vst [vmem:[#allocation92_spill] sm:$0xff] %v8859_v1  ;;  %2066 = vrot.lane.b32.xlu0 %v2058_v57, %s7978_s8  ;;  %2068 = vrot.lane.b32.xlu1 %v2059_v19, %s7978_s8  ;;  %v8866_v62 = vsel %vm924_vm2, %v2362_v50, %v16374_v28  ;;  %v2436_v6 = vrot.slane %v2426_v42, 1  ;;  %17042 = vst [vmem:[#allocation94_spill] sm:$0xff] %v8871_v17  ;;  %v16384_v57 = vrot.slane %v8854_v43, 1  ;;  %v8887_v42 = vstv %s8786_s24  ;;  %s9160_s24 = sld [smem:[#allocation2 + $0x57]] }
 0x251   : > { %17041 = vst [vmem:[#allocation93_spill] sm:$0xff] %v8866_v62  ;;  %17043 = vst [vmem:[#allocation95_spill] sm:$0xff] %v8874_v47  ;;  %v8879_v8 = vsel %vm924_vm2, %v2399_v36, %v17044_v27  ;;  %v2463_v50 = vmul.f32 %v8762_v61, %v8280_v26  ;;  %v2084_v19 = vmul.f32 %v8556_v4, %v8280_v26  ;;  %v8909_v48 = vstv %s8810_s13  ;;  %s7298_s13 = sld [smem:[#allocation2 + $0x17]] }
 0x252   : > { %17045 = vst [vmem:[#allocation96_spill] sm:$0xff] %v8879_v8  ;;  %17046 = vst [vmem:[#allocation97_spill] sm:$0xff] %v8887_v42  ;;  %v2085_v28 = vmul.f32 %v8556_v4, %v8291_v32  ;;  %v8895_v36 = vmul.f32 %v8762_v61, %v8291_v32  ;;  %v2500_v27 = vmul.f32 %v8772_v18, %v8280_v26  ;;  %v8915_v12 = vstv %s8824_s25  ;;  %s7299_s25 = sld [smem:[#allocation2 + $0x3b]] }
 0x253   : > { %v8902_v8 = vsel %vm924_vm2, %v2436_v6, %v16384_v57  ;;  %v2473_v62 = vrot.slane %v2463_v50, 1  ;;  %17049 = vst [vmem:[#allocation100_spill] sm:$0xff] %v8906_v16  ;;  %17050 = vst [vmem:[#allocation101_spill] sm:$0xff] %v8909_v48  ;;  %v8918_v43 = vstv %s8826_s16  ;;  %v2537_v50 = vmul.f32 %v8784_v45, %v8280_v26 }
 0x254   : > { %17047 = vst [vmem:[#allocation98_spill] sm:$0xff] %v8895_v36  ;;  %17048 = vst [vmem:[#allocation99_spill] sm:$0xff] %v8902_v8  ;;  %2092 = vrot.lane.b32.xlu0 %v2084_v19, %s7978_s8  ;;  %2094 = vrot.lane.b32.xlu1 %v2085_v28, %s7978_s8  ;;  %v16394_v4 = vrot.slane %v8895_v36, 1  ;;  %v2510_v61 = vrot.slane %v2500_v27, 1  ;;  %v8925_v57 = vmul.f32 %v8784_v45, %v8291_v32  ;;  %v8928_v19 = vstv %s8842_s14  ;;  %s7234_s14 = sld [smem:[#allocation2 + $0x2d]] }
 0x255   : > { %17051 = vst [vmem:[#allocation102_spill] sm:$0xff] %v8915_v12  ;;  %17052 = vst [vmem:[#allocation103_spill] sm:$0xff] %v8918_v43  ;;  %v2110_v28 = vmul.f32 %v8607_v9, %v8280_v26  ;;  %v2111_v27 = vmul.f32 %v8607_v9, %v8291_v32  ;;  %v2690_v8 = vmul.f32 %v8808_v23, %v8280_v26  ;;  %v17056_v45 = vrot.slane %v8906_v16, 1 }
 0x256   : > { %17053 = vst [vmem:[#allocation104_spill] sm:$0xff] %v8925_v57  ;;  %17054 = vst [vmem:[#allocation105_spill] sm:$0xff] %v8928_v19  ;;  %v8937_v6 = vsel %vm924_vm2, %v2473_v62, %v16394_v4  ;;  %v2547_v5 = vrot.slane %v2537_v50, 1  ;;  %v16396_v9 = vrot.slane %v8925_v57, 1  ;;  %v8952_v36 = vstv %s8856_s15  ;;  %s7235_s15 = sld [smem:[#allocation2 + $0x51]] }
 0x257   : > { %17055 = vst [vmem:[#allocation106_spill] sm:$0xff] %v8937_v6  ;;  %v8948_v18 = vsel %vm924_vm2, %v2510_v61, %v17056_v45  ;;  %17058 = vst [vmem:[#allocation108_spill] sm:$0xff] %v8952_v36  ;;  %v8958_v62 = vmul.f32 %v8303_v38, %v8318_v41  ;;  %v8962_v4 = vmul.f32 %v8808_v23, %v8291_v32  ;;  %v2700_v6 = vrot.slane %v2690_v8, 2  ;;  %v8999_v23 = vpop.f32.mrb[10].mxu0 }
 0x258   : > { %17057 = vst [vmem:[#allocation107_spill] sm:$0xff] %v8948_v18  ;;  %2118 = vrot.lane.b32.xlu0 %v2110_v28, %s7978_s8  ;;  %2120 = vrot.lane.b32.xlu1 %v2111_v27, %s7978_s8  ;;  %v8965_v61 = vstv %s8868_s26  ;;  %v8972_v45 = vsel %vm924_vm2, %v2547_v5, %v16396_v9  ;;  %v2727_v50 = vmul.f32 %v8819_v63, %v8280_v26  ;;  %v8981_v27 = vstv %s8884_s29  ;;  %s10708_s26 = sld [smem:[#allocation2 + $0x75]]  ;;  %s7278_s29 = sld [smem:[#allocation2 + $0x12]] }
 0x259   : > { %17059 = vst [vmem:[#allocation109_spill] sm:$0xff] %v8958_v62  ;;  %17060 = vst [vmem:[#allocation110_spill] sm:$0xff] %v8962_v4  ;;  %v8978_v28 = vmul.f32 %v8819_v63, %v8291_v32  ;;  %v2136_v8 = vmul.f32 %v8610_v30, %v8280_v26  ;;  %v2137_v18 = vmul.f32 %v8610_v30, %v8291_v32 }
 0x25a   : > { %17061 = vst [vmem:[#allocation111_spill] sm:$0xff] %v8965_v61  ;;  %17062 = vst [vmem:[#allocation112_spill] sm:$0xff] %v8972_v45  ;;  %v2764_v5 = vmul.f32 %v8822_v39, %v8280_v26  ;;  %v8992_v9 = vmul.f32 %v8312_v40, %v8318_v41  ;;  %v2737_v45 = vrot.slane %v2727_v50, 2  ;;  %v8997_v63 = vmul.f32 %v8822_v39, %v8291_v32  ;;  %v7559_v39 = vpop.f32.mrb[11].mxu0 }
 0x25b   : > { %17063 = vst [vmem:[#allocation113_spill] sm:$0xff] %v8978_v28  ;;  %17064 = vst [vmem:[#allocation114_spill] sm:$0xff] %v8981_v27  ;;  %v708_v57 = vmul.f32 %v8272_v24, %v8318_v41  ;;  %v17068_v50 = vrot.slane %v8962_v4, 2  ;;  %v9013_v38 = vmul.f32 %v8331_v46, %v8318_v41  ;;  %v2801_v30 = vmul.f32 %v8840_v37, %v8280_v26 }
 0x25c   : > { %17065 = vst [vmem:[#allocation115_spill] sm:$0xff] %v8992_v9  ;;  %17066 = vst [vmem:[#allocation116_spill] sm:$0xff] %v8997_v63  ;;  %2144 = vrot.lane.b32.xlu0 %v2136_v8, %s7978_s8  ;;  %2146 = vrot.lane.b32.xlu1 %v2137_v18, %s7978_s8  ;;  %v2774_v40 = vrot.slane %v2764_v5, 2  ;;  %v17071_v8 = vrot.slane %v8978_v28, 2  ;;  %v9027_v39 = vmul.f32 %v8840_v37, %v8291_v32  ;;  %v9030_v5 = vstv %s8941_s12  ;;  %s7279_s12 = sld [smem:[#allocation2 + $0x36]] }
 0x25d   : > { %17067 = vst [vmem:[#allocation117_spill] sm:$0xff] %v8999_v23  ;;  %v9009_v16 = vsel %vm1337_vm3, %v2700_v6, %v17068_v50  ;;  %17070 = vst [vmem:[#allocation119_spill] sm:$0xff] %v9013_v38  ;;  %v16415_v23 = vrot.slane %v8997_v63, 2  ;;  %v707_v6 = vmul.f32 %v8272_v24, %v8289_v31  ;;  %v9033_v50 = vstv %s8943_s0  ;;  %v9043_v24 = vpop.f32.mrb[12].mxu0  ;;  %s9494_s0 = sld [smem:[#allocation2 + $0x7b]] }
 0x25e   : > { %17069 = vst [vmem:[#allocation118_spill] sm:$0xff] %v9009_v16  ;;  %v9018_v18 = vsel %vm1337_vm3, %v2737_v45, %v17071_v8  ;;  %17073 = vst [vmem:[#allocation121_spill] sm:$0xff] %v9027_v39  ;;  %v2838_v16 = vmul.f32 %v8915_v12, %v8280_v26  ;;  %v17077_v28 = vrot.slane %v8958_v62, 1  ;;  %v17078_v4 = vrot.slane %v8343_v51, 1 }
 0x25f   : > { %17072 = vst [vmem:[#allocation120_spill] sm:$0xff] %v9018_v18  ;;  %17074 = vst [vmem:[#allocation122_spill] sm:$0xff] %v9030_v5  ;;  %v9039_v8 = vsel %vm1337_vm3, %v2774_v40, %v16415_v23  ;;  %v2811_v18 = vrot.slane %v2801_v30, 2  ;;  %v16426_v63 = vrot.slane %v9027_v39, 2  ;;  %v9055_v30 = vmul.f32 %v8915_v12, %v8291_v32  ;;  %v9057_v40 = vpop.f32.mrb[13].mxu0 }
 0x260   : > { %17075 = vst [vmem:[#allocation123_spill] sm:$0xff] %v9033_v50  ;;  %17076 = vst [vmem:[#allocation124_spill] sm:$0xff] %v9039_v8  ;;  %716 = vrot.lane.b32.xlu0 %v707_v6, %s16969_s2  ;;  %718 = vrot.lane.b32.xlu1 %v708_v57, %s16969_s2  ;;  %v1045_v45 = vsel %vm924_vm2, %v17078_v4, %v17077_v28  ;;  %v9060_v23 = vstv %s8967_s22  ;;  %v2848_v8 = vrot.slane %v2838_v16, 2  ;;  %v17084_v6 = vrot.slane %v8992_v9, 1  ;;  %s10914_s22 = sld [smem:[#allocation2 + $0x7e]] }
 0x261   : > { %17079 = vst [vmem:[#allocation125_spill] sm:$0xff] %v9055_v30  ;;  %17080 = vst [vmem:[#allocation126_spill] sm:$0xff] %v9060_v23  ;;  %v914_v57 = vmul.f32 %v8688_v10, %v8278_v25  ;;  %v915_v51 = vmul.f32 %v8688_v10, %v8289_v31  ;;  %v9069_v4 = vmul.f32 %v8352_v55, %v8318_v41  ;;  %v16427_v62 = vrot.slane %v9055_v30, 2 }
 0x262   : > { %v9074_v28 = vsel %vm1337_vm3, %v2811_v18, %v16426_v63  ;;  %v9079_v16 = vmul.f32 %v8688_v10, %v8318_v41  ;;  %v17085_v12 = vrot.slane %v8349_v54, 1  ;;  %v2875_v39 = vmul.f32 %v8952_v36, %v8280_v26 }
 0x263   : > { %17081 = vst [vmem:[#allocation127_spill] sm:$0xff] %v9069_v4  ;;  %17082 = vst [vmem:[#allocation128_spill] sm:$0xff] %v9074_v28  ;;  %v925_v46 = vrot.slane %v914_v57, 1  ;;  %v926_v55 = vrot.slane %v915_v51, 1  ;;  %v9093_v18 = vmul.f32 %v8375_v0, %v8318_v41  ;;  %v9098_v54 = vsel %vm1337_vm3, %v2848_v8, %v16427_v62 }
 0x264   : > { %17083 = vst [vmem:[#allocation129_spill] sm:$0xff] %v9079_v16  ;;  %v1082_v37 = vsel %vm924_vm2, %v17085_v12, %v17084_v6  ;;  %1050 = vrot.lane.b32.xlu0 %v8384_v3, %s16969_s2  ;;  %1052 = vrot.lane.b32.xlu1 %v1045_v45, %s16969_s2  ;;  %17087 = vst [vmem:[#allocation131_spill] sm:$0xff] %v9098_v54  ;;  %v16430_v12 = vrot.slane %v9079_v16, 1  ;;  %v9103_v6 = vmul.f32 %v8952_v36, %v8291_v32  ;;  %v17238_v36 = vld [vmem:[#allocation79_spill] sm:$0xff] }
 0x265   : > { %17086 = vst [vmem:[#allocation130_spill] sm:$0xff] %v9093_v18  ;;  %v17089_v57 = vrot.slane %v9013_v38, 1  ;;  %v17090_v3 = vrot.slane %v8363_v59, 1  ;;  %v9111_v51 = vsel %vm924_vm2, %v925_v46, %v926_v55  ;;  %v2885_v63 = vrot.slane %v2875_v39, 2 }
 0x266   : > { %17088 = vst [vmem:[#allocation132_spill] sm:$0xff] %v9103_v6  ;;  %v944_v8 = vmul.f32 %v8859_v1, %v8278_v25  ;;  %v9119_v9 = vsel %vm924_vm2, %v926_v55, %v16430_v12  ;;  %v16432_v38 = vrot.slane %v9103_v6, 2  ;;  %v945_v59 = vmul.f32 %v8859_v1, %v8289_v31 }
 0x267   : > { %v1119_v45 = vsel %vm924_vm2, %v17090_v3, %v17089_v57  ;;  %17091 = vst [vmem:[#allocation133_spill] sm:$0xff] %v9119_v9  ;;  %v9126_v46 = vmul.f32 %v8400_v13, %v8318_v41  ;;  %v9130_v39 = vmul.f32 %v8859_v1, %v8318_v41  ;;  %v2912_v57 = vmul.f32 %v8965_v61, %v8280_v26  ;;  %v17170_v1 = vld [vmem:[#allocation48_spill] sm:$0xff] }
 0x268   : > { %v9136_v55 = vmul.f32 %v8965_v61, %v8291_v32  ;;  %1087 = vrot.lane.b32.xlu0 %v8395_v11, %s16969_s2  ;;  %1089 = vrot.lane.b32.xlu1 %v1082_v37, %s16969_s2  ;;  %v9145_v3 = vmul.f32 %v8418_v21, %v8318_v41  ;;  %v9150_v12 = vsel %vm1337_vm3, %v2885_v63, %v16432_v38  ;;  %v954_v62 = vrot.slane %v944_v8, 1 }
 0x269   : > { %17092 = vst [vmem:[#allocation134_spill] sm:$0xff] %v9126_v46  ;;  %17093 = vst [vmem:[#allocation135_spill] sm:$0xff] %v9130_v39  ;;  %v955_v9 = vrot.slane %v945_v59, 1  ;;  %v16435_v54 = vrot.slane %v9130_v39, 1  ;;  %v2922_v11 = vrot.slane %v2912_v57, 2  ;;  %v973_v28 = vmul.f32 %v8871_v17, %v8278_v25 }
 0x26a   : > { %17094 = vst [vmem:[#allocation136_spill] sm:$0xff] %v9136_v55  ;;  %17095 = vst [vmem:[#allocation137_spill] sm:$0xff] %v9145_v3  ;;  %v16434_v37 = vrot.slane %v9136_v55, 2  ;;  %v974_v8 = vmul.f32 %v8871_v17, %v8289_v31  ;;  %v9170_v59 = vmul.f32 %v8871_v17, %v8318_v41  ;;  %v9242_v55 = vstv %s9154_s3  ;;  %s7296_s3 = sld [smem:[#allocation2 + $0x5e]] }
 0x26b   : > { %17096 = vst [vmem:[#allocation138_spill] sm:$0xff] %v9150_v12  ;;  %v9164_v63 = vsel %vm924_vm2, %v954_v62, %v955_v9  ;;  %v9176_v38 = vsel %vm924_vm2, %v955_v9, %v16435_v54  ;;  %v2949_v62 = vmul.f32 %v8981_v27, %v8280_v26  ;;  %v983_v12 = vrot.slane %v973_v28, 1  ;;  %17108 = vst [vmem:[#allocation148_spill] sm:$0xff] %v9242_v55 }
 0x26c   : > { %17097 = vst [vmem:[#allocation139_spill] sm:$0xff] %v9170_v59  ;;  %v9181_v6 = vsel %vm1337_vm3, %v2922_v11, %v16434_v37  ;;  %1124 = vrot.lane.b32.xlu0 %v8411_v14, %s16969_s2  ;;  %1126 = vrot.lane.b32.xlu1 %v1119_v45, %s16969_s2  ;;  %v984_v57 = vrot.slane %v974_v8, 1  ;;  %v16436_v39 = vrot.slane %v9170_v59, 1  ;;  %v9191_v9 = vmul.f32 %v8981_v27, %v8291_v32 }
 0x26d   : > { %17098 = vst [vmem:[#allocation140_spill] sm:$0xff] %v9181_v6  ;;  %v2959_v37 = vrot.slane %v2949_v62, 2  ;;  %v7690_v54 = vpack.c.bf16 %v9043_v24, %v9057_v40  ;;  %v1002_v14 = vmul.f32 %v8874_v47, %v8278_v25  ;;  %v1003_v62 = vmul.f32 %v8874_v47, %v8289_v31 }
 0x26e   : > { %17099 = vst [vmem:[#allocation141_spill] sm:$0xff] %v9191_v9  ;;  %v9199_v45 = vsel %vm924_vm2, %v983_v12, %v984_v57  ;;  %v9204_v28 = vsel %vm924_vm2, %v984_v57, %v16436_v39  ;;  %v16443_v8 = vrot.slane %v9191_v9, 2  ;;  %v17100_v24 = vrot.slane %v9069_v4, 1 }
 0x26f   : > { %v17101_v40 = vrot.slane %v8415_v20, 1  ;;  %v9216_v11 = vmul.f32 %v8421_v22, %v8318_v41  ;;  %v9220_v57 = vmul.f32 %v8874_v47, %v8318_v41  ;;  %7691 = vmatpush3.bf16.msra.mxu0 %v7690_v54  ;;  %v9223_v39 = vstv %s9138_s9  ;;  %s7294_s9 = sld [smem:[#allocation2 + $0x16]] }
 0x270   : > { %17104 = vst [vmem:[#allocation144_spill] sm:$0xff] %v9223_v39  ;;  %1161 = vrot.lane.b32.xlu0 %v8460_v56, %s16969_s2  ;;  %v9230_v20 = vmul.f32 %v8434_v33, %v8318_v41  ;;  %v1013_v4 = vrot.slane %v1003_v62, 1  ;;  %v9239_v6 = vstv %s9152_s30  ;;  %v9245_v56 = vstv %s9160_s24  ;;  %s7439_s24 = sshll.u32 %s8171_s4, 5  ;;  %s7233_s4 = sld [smem:[#allocation2 + $0x9]] }
 0x271   : > { %v1156_v12 = vsel %vm924_vm2, %v17101_v40, %v17100_v24  ;;  %17102 = vst [vmem:[#allocation142_spill] sm:$0xff] %v9216_v11  ;;  %17103 = vst [vmem:[#allocation143_spill] sm:$0xff] %v9220_v57  ;;  %v9235_v24 = vsel %vm1337_vm3, %v2959_v37, %v16443_v8  ;;  %v1012_v40 = vrot.slane %v1002_v14, 1  ;;  %v17111_v59 = vrot.slane %v8431_v29, 1  ;;  %s10640_s16 = scalar_lea.vmem %s16287_s5, %s7439_s24  ;;  %s7295_s30 = sld [smem:[#allocation2 + $0x3a]] }
 0x272   : > { %1163 = vrot.lane.b32.xlu1 %v1156_v12, %s16969_s2  ;;  %17105 = vst [vmem:[#allocation145_spill] sm:$0xff] %v9230_v20  ;;  %17106 = vst [vmem:[#allocation146_spill] sm:$0xff] %v9235_v24  ;;  %v17110_v12 = vrot.slane %v9093_v18, 1  ;;  %v17112_v9 = vrot.slane %v9126_v46, 1  ;;  %v17113_v37 = vrot.slane %v8446_v52, 1  ;;  %v17114_v62 = vrot.slane %v9145_v3, 1  ;;  %7598 = vmatmul.mubr.msk.f32.vlgmr.msra.gmra.mrb[14].mxu0 %vm477_vm0, %v8196_v15 }
 0x273   : > { %17107 = vst [vmem:[#allocation147_spill] sm:$0xff] %v9239_v6  ;;  %17109 = vst [vmem:[#allocation149_spill] sm:$0xff] %v9245_v56  ;;  %v17115_v8 = vrot.slane %v8484_v34, 1  ;;  %v9263_v24 = vsel %vm924_vm2, %v1012_v40, %v1013_v4  ;;  %7600 = vmatprep.mubr.msk.f32.mxu0 %vm7975_vm1, %v16995_v44  ;;  %v1327_v34 = vmul.f32 %v8887_v42, %v8278_v25  ;;  %v17132_v18 = vrot.slane %v8498_v7, 1  ;;  %s7297_s24 = sld [smem:[#allocation2 + $0x82]] }
 0x274   : > { %v1193_v47 = vsel %vm924_vm2, %v17111_v59, %v17110_v12  ;;  %v1230_v14 = vsel %vm924_vm2, %v17113_v37, %v17112_v9  ;;  %17116 = vst [vmem:[#allocation150_spill] sm:$0xff] %v9263_v24  ;;  %v17117_v59 = vrot.slane %v9220_v57, 1  ;;  %v1328_v9 = vmul.f32 %v8887_v42, %v8289_v31  ;;  %1198 = vrot.lane.b32.xlu0 %v8471_v2, %s7978_s8 }
 0x275   : > { %v1267_v54 = vsel %vm924_vm2, %v17115_v8, %v17114_v62  ;;  %v9289_v8 = vmul.f32 %v8463_v58, %v8318_v41  ;;  %v9293_v40 = vmul.f32 %v8887_v42, %v8318_v41  ;;  %v1338_v12 = vrot.slane %v1327_v34, 2  ;;  %v7801_v42 = vld [vmem:[%s16283_s1 + $0x20] sm:$0x3] }
 0x276   : > { %v9271_v52 = vsel %vm924_vm2, %v1013_v4, %v17117_v59  ;;  %1200 = vrot.lane.b32.xlu1 %v1193_v47, %s7978_s8  ;;  %v9285_v4 = vmul.f32 %v8449_v53, %v8318_v41  ;;  %v1339_v37 = vrot.slane %v1328_v9, 2  ;;  %v1357_v2 = vmul.f32 %v8909_v48, %v8278_v25  ;;  %v7798_v59 = vld [vmem:[%s16283_s1 + $0x8] sm:$0xff] }
 0x277   : > { %17118 = vst [vmem:[#allocation151_spill] sm:$0xff] %v9271_v52  ;;  %17120 = vst [vmem:[#allocation153_spill] sm:$0xff] %v9289_v8  ;;  %v1358_v47 = vmul.f32 %v8909_v48, %v8289_v31  ;;  %v9301_v62 = vmul.f32 %v8466_v60, %v8318_v41  ;;  %7601 = vmatmul.mubr.msk.f32.gmra.mrb[16].mxu0 %vm477_vm0, %v7798_v59  ;;  %v9310_v34 = vmul.f32 %v8909_v48, %v8318_v41  ;;  %v17236_v52 = vld [vmem:[#allocation68_spill] sm:$0xff] }
 0x278   : > { %17119 = vst [vmem:[#allocation152_spill] sm:$0xff] %v9285_v4  ;;  %17121 = vst [vmem:[#allocation154_spill] sm:$0xff] %v9293_v40  ;;  %v1386_v9 = vmul.f32 %v8918_v43, %v8278_v25  ;;  %7603 = vmatprep.mubr.msk.f32.mxu0 %vm7975_vm1, %v16995_v44  ;;  %v9317_v29 = vsel %vm1337_vm3, %v1338_v12, %v1339_v37  ;;  %v1367_v3 = vrot.slane %v1357_v2, 2  ;;  %1235 = vrot.lane.b32.xlu0 %v8494_v49, %s7978_s8 }
 0x279   : > { %17122 = vst [vmem:[#allocation155_spill] sm:$0xff] %v9301_v62  ;;  %17123 = vst [vmem:[#allocation156_spill] sm:$0xff] %v9310_v34  ;;  %v1368_v46 = vrot.slane %v1358_v47, 2  ;;  %v1387_v59 = vmul.f32 %v8918_v43, %v8289_v31  ;;  %v17125_v57 = vrot.slane %v9293_v40, 2  ;;  %v16450_v12 = vrot.slane %v9310_v34, 2 }
 0x27a   : > { %17124 = vst [vmem:[#allocation157_spill] sm:$0xff] %v9317_v29  ;;  %1237 = vrot.lane.b32.xlu1 %v1230_v14, %s7978_s8  ;;  %v1396_v47 = vrot.slane %v1386_v9, 2  ;;  %v9337_v49 = vmul.f32 %v8918_v43, %v8318_v41  ;;  %v7799_v14 = vld [vmem:[%s16283_s1 + $0x10] sm:$0xff]  ;;  %v9354_v9 = vmul.f32 %v8928_v19, %v8318_v41  ;;  %v17145_v15 = vrot.slane %v9289_v8, 2 }
 0x27b   : > { %v9329_v48 = vsel %vm1337_vm3, %v1339_v37, %v17125_v57  ;;  %v9333_v2 = vsel %vm1337_vm3, %v1367_v3, %v1368_v46  ;;  %v1397_v29 = vrot.slane %v1387_v59, 2  ;;  %7604 = vmatmul.mubr.msk.f32.gmra.mrb[18].mxu0 %vm477_vm0, %v7799_v14  ;;  %v9346_v57 = vsel %vm1337_vm3, %v1368_v46, %v16450_v12  ;;  %v17157_v8 = vld [vmem:[#allocation61_spill] sm:$0xff] }
 0x27c   : > { %17126 = vst [vmem:[#allocation158_spill] sm:$0xff] %v9329_v48  ;;  %17127 = vst [vmem:[#allocation159_spill] sm:$0xff] %v9333_v2  ;;  %v1415_v3 = vmul.f32 %v8928_v19, %v8278_v25  ;;  %v1416_v37 = vmul.f32 %v8928_v19, %v8289_v31  ;;  %v17131_v59 = vrot.slane %v9216_v11, 1  ;;  %7606 = vmatprep.mubr.msk.f32.mxu0 %vm7975_vm1, %v16995_v44  ;;  %1272 = vrot.lane.b32.xlu0 %v8529_v35, %s7978_s8  ;;  %v17134_v11 = vld [vmem:[#allocation50_spill] sm:$0xff]  ;;  %v17140_v48 = vld [vmem:[#allocation47_spill] sm:$0xff] }
 0x27d   : > { %17128 = vst [vmem:[#allocation160_spill] sm:$0xff] %v9337_v49  ;;  %17129 = vst [vmem:[#allocation161_spill] sm:$0xff] %v9346_v57  ;;  %v9363_v46 = vsel %vm1337_vm3, %v1396_v47, %v1397_v29  ;;  %v9373_v7 = vmul.f32 %v17134_v11, %v8318_v41  ;;  %v17136_v47 = vrot.slane %v9230_v20, 2  ;;  %v17139_v2 = vrot.slane %v9285_v4, 2  ;;  %v17142_v19 = vld [vmem:[#allocation57_spill] sm:$0xff] }
 0x27e   : > { %17130 = vst [vmem:[#allocation162_spill] sm:$0xff] %v9354_v9  ;;  %v1304_v14 = vsel %vm924_vm2, %v17132_v18, %v17131_v59  ;;  %17133 = vst [vmem:[#allocation163_spill] sm:$0xff] %v9363_v46  ;;  %1274 = vrot.lane.b32.xlu1 %v1267_v54, %s7978_s8  ;;  %v1425_v18 = vrot.slane %v1415_v3, 2  ;;  %v1426_v59 = vrot.slane %v1416_v37, 2  ;;  %v17137_v46 = vld [vmem:[#allocation42_spill] sm:$0xff]  ;;  %v17141_v35 = vrot.slane %v17140_v48, 2 }
 0x27f   : > { %17135 = vst [vmem:[#allocation50_spill] sm:$0xff] %v9373_v7  ;;  %v17138_v12 = vrot.slane %v17137_v46, 2  ;;  %v9388_v34 = vmul.f32 %v17142_v19, %v8278_v25  ;;  %v17143_v3 = vrot.slane %v9337_v49, 2  ;;  %v17146_v46 = vld [vmem:[#allocation49_spill] sm:$0xff]  ;;  %v17148_v48 = vld [vmem:[#allocation60_spill] sm:$0xff]  ;;  %v2192_v40 = vmul.f32 %v9033_v50, %v8291_v32 }
 0x280   : > { %v1495_v54 = vsel %vm1337_vm3, %v17141_v35, %v17139_v2  ;;  %v17147_v20 = vrot.slane %v17146_v46, 2  ;;  %v9407_v2 = vsel %vm1337_vm3, %v1425_v18, %v1426_v59  ;;  %v17150_v35 = vrot.slane %v9354_v9, 2 }
 0x281   : > { %v1458_v57 = vsel %vm1337_vm3, %v17138_v12, %v17136_v47  ;;  %v9393_v37 = vsel %vm1337_vm3, %v1397_v29, %v17143_v3  ;;  %v9404_v47 = vmul.f32 %v17148_v48, %v8278_v25  ;;  %17149 = vst [vmem:[#allocation47_spill] sm:$0xff] %v9407_v2  ;;  %v7800_v29 = vld [vmem:[%s16283_s1 + $0x18] sm:$0xff]  ;;  %v9427_v18 = vmul.f32 %v17148_v48, %v8289_v31 }
 0x282   : > { %17144 = vst [vmem:[#allocation42_spill] sm:$0xff] %v9393_v37  ;;  %v9400_v12 = vsel %vm1337_vm3, %v17147_v20, %v17145_v15  ;;  %v9412_v4 = vsel %vm1337_vm3, %v1426_v59, %v17150_v35  ;;  %7607 = vmatmul.mubr.msk.f32.gmra.mrb[20].mxu0 %vm477_vm0, %v7800_v29  ;;  %v17152_v20 = vrot.slane %v9301_v62, 2  ;;  %v17153_v15 = vld [vmem:[#allocation51_spill] sm:$0xff]  ;;  %v17155_v59 = vld [vmem:[#allocation56_spill] sm:$0xff]  ;;  %1311 = vrot.lane.b32.xlu1 %v1304_v14, %s7978_s8  ;;  %v17161_v62 = vld [vmem:[#allocation65_spill] sm:$0xff]  ;;  %v2202_v30 = vrot.slane %v2192_v40, 1 }
 0x283   : > { %17151 = vst [vmem:[#allocation49_spill] sm:$0xff] %v9412_v4  ;;  %v17154_v3 = vrot.slane %v17153_v15, 2  ;;  %v9431_v35 = vmul.f32 %v17155_v59, %v8318_v41  ;;  %v9435_v4 = vmul.f32 %v17157_v8, %v8278_v25  ;;  %7609 = vmatprep.mubr.msk.f32.mxu0 %vm7975_vm1, %v16995_v44  ;;  %v17158_v29 = vld [vmem:[#allocation44_spill] sm:$0xff]  ;;  %v9445_v15 = vmul.f32 %v17157_v8, %v8289_v31  ;;  %v17164_v37 = vld [vmem:[#allocation66_spill] sm:$0xff] }
 0x284   : > { %1309 = vrot.lane.b32.xlu0 %v17158_v29, %s7978_s8  ;;  %v9453_v2 = vmul.f32 %v17161_v62, %v8318_v41  ;;  %v17163_v44 = vld [vmem:[#allocation32_spill] sm:$0xff]  ;;  %v2162_v14 = vmul.f32 %v9030_v5, %v8280_v26  ;;  %v2163_v29 = vmul.f32 %v9030_v5, %v8291_v32  ;;  %v17167_v8 = vld [vmem:[#allocation70_spill] sm:$0xff]  ;;  %v2220_v16 = vmul.f32 %v9060_v23, %v8280_v26 }
 0x285   : > { %v9423_v46 = vsel %vm1337_vm3, %v17154_v3, %v17152_v20  ;;  %17156 = vst [vmem:[#allocation51_spill] sm:$0xff] %v9431_v35  ;;  %v17159_v3 = vld [vmem:[#allocation62_spill] sm:$0xff]  ;;  %v9457_v9 = vmul.f32 %v17164_v37, %v17163_v44  ;;  %v9465_v20 = vmul.f32 %v9030_v5, %v17163_v44  ;;  %v9469_v49 = vmul.f32 %v17167_v8, %v17163_v44 }
 0x286   : > { %v9449_v48 = vmul.f32 %v17159_v3, %v8318_v41  ;;  %17162 = vst [vmem:[#allocation44_spill] sm:$0xff] %v9453_v2  ;;  %v2191_v41 = vmul.f32 %v9033_v50, %v8280_v26  ;;  %v9477_v43 = vmul.f32 %v9033_v50, %v17163_v44  ;;  %7610 = vmatmul.mubr.msk.f32.gmra.mrb[22].mxu0 %vm477_vm0, %v7801_v42  ;;  %v2172_v5 = vrot.slane %v2162_v14, 1  ;;  %v17171_v50 = vld [vmem:[#allocation71_spill] sm:$0xff] }
 0x287   : > { %17165 = vst [vmem:[#allocation62_spill] sm:$0xff] %v9457_v9  ;;  %17166 = vst [vmem:[#allocation65_spill] sm:$0xff] %v9465_v20  ;;  %v2173_v27 = vrot.slane %v2163_v29, 1  ;;  %v16487_v17 = vrot.slane %v9465_v20, 1  ;;  %1465 = vrot.lane.b32.xlu1 %v1458_v57, %s16969_s2  ;;  %v9491_v10 = vmul.f32 %v17171_v50, %v17163_v44  ;;  %v2230_v57 = vrot.slane %v2220_v16, 1  ;;  %v17175_v50 = vld [vmem:[#allocation72_spill] sm:$0xff] }
 0x288   : > { %17160 = vst [vmem:[#allocation56_spill] sm:$0xff] %v9449_v48  ;;  %17168 = vst [vmem:[#allocation32_spill] sm:$0xff] %v9469_v49  ;;  %1463 = vrot.lane.b32.xlu0 %v17170_v1, %s16969_s2  ;;  %v2201_v61 = vrot.slane %v2191_v41, 1  ;;  %v16488_v42 = vrot.slane %v9477_v43, 1  ;;  %v2221_v1 = vmul.f32 %v9060_v23, %v8291_v32  ;;  %v9508_v41 = vmul.f32 %v17175_v50, %v17163_v44 }
 0x289   : > { %17169 = vst [vmem:[#allocation164_spill] sm:$0xff] %v9477_v43  ;;  %17172 = vst [vmem:[#allocation48_spill] sm:$0xff] %v9491_v10  ;;  %v9497_v14 = vsel %vm924_vm2, %v2172_v5, %v2173_v27  ;;  %v9502_v29 = vsel %vm924_vm2, %v2173_v27, %v16487_v17  ;;  %v9520_v27 = vmul.f32 %v9060_v23, %v17163_v44  ;;  %v17184_v23 = vld [vmem:[#allocation58_spill] sm:$0xff] }
 0x28a   : > { %17173 = vst [vmem:[#allocation165_spill] sm:$0xff] %v9497_v14  ;;  %17174 = vst [vmem:[#allocation166_spill] sm:$0xff] %v9502_v29  ;;  %v9511_v40 = vsel %vm924_vm2, %v2201_v61, %v2202_v30  ;;  %v9516_v5 = vsel %vm924_vm2, %v2202_v30, %v16488_v42  ;;  %v2231_v17 = vrot.slane %v2221_v1, 1  ;;  %v2249_v16 = vmul.f32 %v9223_v39, %v8280_v26  ;;  %v17197_v42 = vld [vmem:[#allocation69_spill] sm:$0xff] }
 0x28b   : > { %17176 = vst [vmem:[#allocation167_spill] sm:$0xff] %v9508_v41  ;;  %17177 = vst [vmem:[#allocation168_spill] sm:$0xff] %v9511_v40  ;;  %v2250_v29 = vmul.f32 %v9223_v39, %v8291_v32  ;;  %v9528_v61 = vmul.f32 %v9223_v39, %v17163_v44  ;;  %v17181_v40 = vld [vmem:[#allocation54_spill] sm:$0xff]  ;;  %1502 = vrot.lane.b32.xlu1 %v1495_v54, %s16969_s2  ;;  %v17185_v54 = vrot.slane %v17184_v23, 2 }
 0x28c   : > { %17178 = vst [vmem:[#allocation169_spill] sm:$0xff] %v9516_v5  ;;  %17179 = vst [vmem:[#allocation170_spill] sm:$0xff] %v9520_v27  ;;  %1500 = vrot.lane.b32.xlu0 %v17181_v40, %s16969_s2  ;;  %v16495_v5 = vrot.slane %v9520_v27, 1  ;;  %v9538_v14 = vsel %vm924_vm2, %v2230_v57, %v2231_v17  ;;  %v2259_v43 = vrot.slane %v2249_v16, 1  ;;  %v17183_v40 = vrot.slane %v9373_v7, 2 }
 0x28d   : > { %17180 = vst [vmem:[#allocation171_spill] sm:$0xff] %v9528_v61  ;;  %17182 = vst [vmem:[#allocation54_spill] sm:$0xff] %v9538_v14  ;;  %v2260_v20 = vrot.slane %v2250_v29, 1  ;;  %v17188_v23 = vrot.slane %v9528_v61, 1  ;;  %v2575_v7 = vmul.f32 %v9239_v6, %v8291_v32  ;;  %v17218_v61 = vld [vmem:[#allocation59_spill] sm:$0xff] }
 0x28e   : > { %v1606_v30 = vsel %vm1337_vm3, %v17185_v54, %v17183_v40  ;;  %v9551_v57 = vsel %vm924_vm2, %v2231_v17, %v16495_v5  ;;  %v17190_v54 = vld [vmem:[#allocation55_spill] sm:$0xff]  ;;  %v17191_v17 = vrot.slane %v9431_v35, 2  ;;  %v17192_v5 = vld [vmem:[#allocation64_spill] sm:$0xff] }
 0x28f   : > { %17186 = vst [vmem:[#allocation58_spill] sm:$0xff] %v9551_v57  ;;  %v9556_v39 = vsel %vm924_vm2, %v2259_v43, %v2260_v20  ;;  %v9561_v40 = vsel %vm924_vm2, %v2260_v20, %v17188_v23  ;;  %1539 = vrot.lane.b32.xlu1 %v9400_v12, %s16969_s2  ;;  %v17193_v16 = vrot.slane %v17192_v5, 2  ;;  %v17194_v43 = vld [vmem:[#allocation63_spill] sm:$0xff]  ;;  %v9581_v23 = vstv %s9494_s0  ;;  %s7280_s0 = sld [smem:[#allocation2 + $0x5a]] }
 0x290   : > { %17187 = vst [vmem:[#allocation172_spill] sm:$0xff] %v9556_v39  ;;  %17189 = vst [vmem:[#allocation173_spill] sm:$0xff] %v9561_v40  ;;  %1537 = vrot.lane.b32.xlu0 %v17190_v54, %s16969_s2  ;;  %v9574_v1 = vmul.f32 %v17194_v43, %v8278_v25  ;;  %v9578_v20 = vmul.f32 %v17194_v43, %v8289_v31  ;;  %v17196_v54 = vrot.slane %v9449_v48, 2  ;;  %v17198_v12 = vrot.slane %v17197_v42, 2  ;;  %v17203_v40 = vld [vmem:[#allocation76_spill] sm:$0xff] }
 0x291   : > { %v1643_v29 = vsel %vm1337_vm3, %v17193_v16, %v17191_v17  ;;  %17195 = vst [vmem:[#allocation55_spill] sm:$0xff] %v9581_v23  ;;  %v17199_v5 = vrot.slane %v9453_v2, 2  ;;  %v17200_v16 = vld [vmem:[#allocation74_spill] sm:$0xff]  ;;  %v2574_v43 = vmul.f32 %v9239_v6, %v8280_v26  ;;  %v17202_v48 = vrot.slane %v9457_v9, 1  ;;  %v17206_v2 = vld [vmem:[#allocation80_spill] sm:$0xff] }
 0x292   : > { %v9588_v35 = vsel %vm1337_vm3, %v17198_v12, %v17196_v54  ;;  %v17201_v17 = vrot.slane %v17200_v16, 2  ;;  %v17204_v42 = vrot.slane %v17203_v40, 1  ;;  %v17205_v12 = vrot.slane %v9469_v49, 1  ;;  %v17210_v40 = vld [vmem:[#allocation85_spill] sm:$0xff] }
 0x293   : > { %v17207_v16 = vrot.slane %v17206_v2, 1  ;;  %v2603_v39 = vmul.f32 %v9242_v55, %v8280_v26  ;;  %v17209_v9 = vrot.slane %v9491_v10, 1  ;;  %v17211_v57 = vrot.slane %v17210_v40, 1  ;;  %v17213_v2 = vld [vmem:[#allocation89_spill] sm:$0xff]  ;;  %1576 = vrot.lane.b32.xlu1 %v9423_v46, %s16969_s2  ;;  %v17221_v40 = vld [vmem:[#allocation35_spill] sm:$0xff] }
 0x294   : > { %v9595_v25 = vsel %vm1337_vm3, %v17201_v17, %v17199_v5  ;;  %v9606_v54 = vsel %vm924_vm2, %v17204_v42, %v17202_v48  ;;  %v9617_v17 = vmul.f32 %v9239_v6, %v17163_v44  ;;  %v17212_v42 = vrot.slane %v9508_v41, 1  ;;  %1574 = vrot.lane.b32.xlu0 %v17218_v61, %s16969_s2  ;;  %v17224_v10 = vld [vmem:[#allocation27_spill] sm:$0xff] }
 0x295   : > { %v9613_v5 = vsel %vm924_vm2, %v17207_v16, %v17205_v12  ;;  %v9626_v48 = vsel %vm924_vm2, %v17211_v57, %v17209_v9  ;;  %v17214_v49 = vrot.slane %v17213_v2, 1  ;;  %v17216_v16 = vld [vmem:[#allocation77_spill] sm:$0xff]  ;;  %v2584_v6 = vrot.slane %v2574_v43, 2  ;;  %v17219_v9 = vld [vmem:[#allocation78_spill] sm:$0xff] }
 0x296   : > { %17208 = vst [vmem:[#allocation64_spill] sm:$0xff] %v9617_v17  ;;  %v9637_v14 = vmul.f32 %v17216_v16, %v17163_v44  ;;  %v9645_v57 = vmul.f32 %v17219_v9, %v17163_v44  ;;  %v17222_v2 = vld [vmem:[#allocation25_spill] sm:$0xff]  ;;  %v9654_v43 = vmul.f32 %v17224_v10, %v17221_v40  ;;  %v2604_v61 = vmul.f32 %v9242_v55, %v8291_v32  ;;  %v9662_v9 = vpop.permute.xlu0 %714 }
 0x297   : > { %v9633_v12 = vsel %vm924_vm2, %v17214_v49, %v17212_v42  ;;  %v9649_v41 = vmul.f32 %v17222_v2, %v17221_v40  ;;  %v2585_v49 = vrot.slane %v2575_v7, 2  ;;  %v2613_v27 = vrot.slane %v2603_v39, 2  ;;  %v17227_v16 = vld [vmem:[#allocation33_spill] sm:$0xff]  ;;  %v17229_v7 = vld [vmem:[#allocation34_spill] sm:$0xff]  ;;  %1613 = vrot.lane.b32.xlu1 %v1606_v30, %s7978_s8 }
 0x298   : > { %17215 = vst [vmem:[#allocation69_spill] sm:$0xff] %v9633_v12  ;;  %17217 = vst [vmem:[#allocation74_spill] sm:$0xff] %v9637_v14  ;;  %v9660_v46 = vmul.f32 %v9242_v55, %v17163_v44  ;;  %v9666_v50 = vmul.f32 %v17227_v16, %v17221_v40  ;;  %v9670_v42 = vmul.f32 %v17229_v7, %v17221_v40  ;;  %v17232_v31 = vrot.slane %v9617_v17, 2  ;;  %v9714_v14 = vpop.permute.xlu1 %742 }
 0x299   : > { %17220 = vst [vmem:[#allocation76_spill] sm:$0xff] %v9645_v57  ;;  %17223 = vst [vmem:[#allocation80_spill] sm:$0xff] %v9649_v41  ;;  %v9673_v19 = vsel %vm1337_vm3, %v2584_v6, %v2585_v49  ;;  %v9682_v55 = vmul.f32 %v8375_v0, %v17221_v40  ;;  %v9686_v8 = vmul.f32 %v8400_v13, %v17221_v40  ;;  %v2614_v37 = vrot.slane %v2604_v61, 2 }
 0x29a   : > { %17225 = vst [vmem:[#allocation85_spill] sm:$0xff] %v9654_v43  ;;  %17226 = vst [vmem:[#allocation89_spill] sm:$0xff] %v9660_v46  ;;  %v9678_v39 = vsel %vm1337_vm3, %v2585_v49, %v17232_v31  ;;  %1611 = vrot.lane.b32.xlu0 %v17236_v52, %s7978_s8  ;;  %v2632_v31 = vmul.f32 %v9245_v56, %v8280_v26  ;;  %v2633_v49 = vmul.f32 %v9245_v56, %v8291_v32  ;;  %v741_v17 = vpop.permute.xlu0 %740 }
 0x29b   : > { %17228 = vst [vmem:[#allocation59_spill] sm:$0xff] %v9666_v50  ;;  %17230 = vst [vmem:[#allocation35_spill] sm:$0xff] %v9670_v42  ;;  %v9707_v52 = vsel %vm1337_vm3, %v2613_v27, %v2614_v37  ;;  %v17241_v30 = vrot.slane %v9660_v46, 2  ;;  %1650 = vrot.lane.b32.xlu1 %v1643_v29, %s7978_s8 }
 0x29c   : > { %17231 = vst [vmem:[#allocation25_spill] sm:$0xff] %v9673_v19  ;;  %17233 = vst [vmem:[#allocation27_spill] sm:$0xff] %v9678_v39  ;;  %v9699_v39 = vmul.f32 %v9245_v56, %v17163_v44  ;;  %v9704_v19 = vmul.f32 %v17238_v36, %v17163_v44  ;;  %v2642_v61 = vrot.slane %v2632_v31, 2  ;;  %v2643_v57 = vrot.slane %v2633_v49, 2  ;;  %v9742_v56 = vpop.permute.xlu1 %768 }
 0x29d   : > { %17234 = vst [vmem:[#allocation33_spill] sm:$0xff] %v9682_v55  ;;  %17235 = vst [vmem:[#allocation34_spill] sm:$0xff] %v9686_v8  ;;  %v9712_v6 = vsel %vm1337_vm3, %v2614_v37, %v17241_v30  ;;  %v17244_v37 = vld [vmem:[#allocation73_spill] sm:$0xff]  ;;  %v17245_v30 = vld [vmem:[#allocation38_spill] sm:$0xff] }
 0x29e   : > { %17237 = vst [vmem:[#allocation68_spill] sm:$0xff] %v9699_v39  ;;  %17239 = vst [vmem:[#allocation174_spill] sm:$0xff] %v9704_v19  ;;  %1648 = vrot.lane.b32.xlu0 %v17244_v37, %s7978_s8  ;;  %v1035_v24 = vmul.f32 %v17222_v2, %v17245_v30  ;;  %v1072_v31 = vmul.f32 %v17224_v10, %v17245_v30  ;;  %v1109_v27 = vmul.f32 %v17227_v16, %v17245_v30  ;;  %v767_v2 = vpop.permute.xlu0 %766 }
 0x29f   : > { %17240 = vst [vmem:[#allocation175_spill] sm:$0xff] %v9707_v52  ;;  %17242 = vst [vmem:[#allocation176_spill] sm:$0xff] %v9712_v6  ;;  %v9723_v52 = vmul.f32 %v8418_v21, %v17221_v40  ;;  %v1146_v36 = vmul.f32 %v17229_v7, %v17245_v30  ;;  %v1183_v37 = vmul.f32 %v8375_v0, %v17245_v30  ;;  %1687 = vrot.lane.b32.xlu1 %v9588_v35, %s7978_s8 }
 0x2a0   : > { %v1220_v29 = vmul.f32 %v8400_v13, %v17245_v30  ;;  %v1048_v10 = vrot.slane %v1035_v24, 1  ;;  %v1085_v6 = vrot.slane %v1072_v31, 1  ;;  %v1257_v49 = vmul.f32 %v8418_v21, %v17245_v30  ;;  %v17248_v13 = vld [vmem:[#allocation75_spill] sm:$0xff] }
 0x2a1   : > { %17243 = vst [vmem:[#allocation177_spill] sm:$0xff] %v9723_v52  ;;  %v9747_v12 = vsel %vm1337_vm3, %v2642_v61, %v2643_v57  ;;  %v1122_v16 = vrot.slane %v1109_v27, 1  ;;  %v1159_v46 = vrot.slane %v1146_v36, 1  ;;  %v9752_v0 = vmul.f32 %v8421_v22, %v17221_v40 }
 0x2a2   : > { %17246 = vst [vmem:[#allocation73_spill] sm:$0xff] %v9747_v12  ;;  %1685 = vrot.lane.b32.xlu0 %v17248_v13, %s7978_s8  ;;  %v17249_v24 = vrot.slane %v9649_v41, 1  ;;  %v17251_v61 = vrot.slane %v9654_v43, 1  ;;  %v1196_v27 = vrot.slane %v1183_v37, 1  ;;  %v2661_v31 = vmul.f32 %v9581_v23, %v8280_v26  ;;  %v17257_v37 = vld [vmem:[#allocation81_spill] sm:$0xff] }
 0x2a3   : > { %17247 = vst [vmem:[#allocation38_spill] sm:$0xff] %v9752_v0  ;;  %v17253_v7 = vrot.slane %v9666_v50, 1  ;;  %v17255_v35 = vrot.slane %v9670_v42, 1  ;;  %1724 = vrot.lane.b32.xlu1 %v9595_v25, %s7978_s8  ;;  %v9834_v25 = vmul.f32 %v8449_v53, %v17221_v40  ;;  %v17377_v41 = vld [vmem:[#allocation129_spill] sm:$0xff] }
 0x2a4   : > { %v9761_v21 = vsel %vm924_vm2, %v17249_v24, %v1048_v10  ;;  %v9766_v36 = vsel %vm924_vm2, %v17251_v61, %v1085_v6  ;;  %v1233_v10 = vrot.slane %v1220_v29, 1  ;;  %v1270_v24 = vrot.slane %v1257_v49, 1  ;;  %v9782_v6 = vpop.permute.xlu1 %794 }
 0x2a5   : > { %17250 = vst [vmem:[#allocation75_spill] sm:$0xff] %v9761_v21  ;;  %17252 = vst [vmem:[#allocation178_spill] sm:$0xff] %v9766_v36  ;;  %v9773_v13 = vsel %vm924_vm2, %v17253_v7, %v1122_v16  ;;  %v9778_v12 = vsel %vm924_vm2, %v17255_v35, %v1159_v46  ;;  %v9780_v21 = vpop.permute.xlu0 %792  ;;  %v9786_v61 = vmul.f32 %v17257_v37, %v17163_v44  ;;  %v17259_v36 = vrot.slane %v9682_v55, 1 }
 0x2a6   : > { %17254 = vst [vmem:[#allocation179_spill] sm:$0xff] %v9773_v13  ;;  %17256 = vst [vmem:[#allocation180_spill] sm:$0xff] %v9778_v12  ;;  %v17261_v7 = vrot.slane %v9699_v39, 2  ;;  %v1294_v49 = vmul.f32 %v8421_v22, %v17245_v30  ;;  %v17263_v29 = vrot.slane %v9686_v8, 1  ;;  %v17265_v55 = vrot.slane %v9723_v52, 1  ;;  %v17270_v12 = vld [vmem:[#allocation84_spill] sm:$0xff] }
 0x2a7   : > { %17258 = vst [vmem:[#allocation81_spill] sm:$0xff] %v9786_v61  ;;  %v9791_v16 = vsel %vm924_vm2, %v17259_v36, %v1196_v27  ;;  %v9813_v27 = vmul.f32 %v8434_v33, %v17221_v40  ;;  %17272 = vst [vmem:[#allocation186_spill] sm:$0xff] %v9834_v25  ;;  %v1485_v8 = vmul.f32 %v8449_v53, %v17245_v30  ;;  %2299 = vrot.lane.b32.xlu1 %v9606_v54, %s16969_s2  ;;  %v17369_v13 = vld [vmem:[#allocation67_spill] sm:$0xff] }
 0x2a8   : > { %17260 = vst [vmem:[#allocation181_spill] sm:$0xff] %v9791_v16  ;;  %v9796_v46 = vsel %vm1337_vm3, %v2643_v57, %v17261_v7  ;;  %v9803_v35 = vsel %vm924_vm2, %v17263_v29, %v1233_v10  ;;  %v9809_v36 = vsel %vm924_vm2, %v17265_v55, %v1270_v24  ;;  %v17268_v57 = vld [vmem:[#allocation82_spill] sm:$0xff]  ;;  %v1307_v22 = vrot.slane %v1294_v49, 1 }
 0x2a9   : > { %17262 = vst [vmem:[#allocation182_spill] sm:$0xff] %v9796_v46  ;;  %17264 = vst [vmem:[#allocation183_spill] sm:$0xff] %v9803_v35  ;;  %1722 = vrot.lane.b32.xlu0 %v17268_v57, %s7978_s8  ;;  %v2662_v10 = vmul.f32 %v9581_v23, %v8291_v32  ;;  %v2671_v7 = vrot.slane %v2661_v31, 2  ;;  %v9823_v29 = vmul.f32 %v9581_v23, %v17163_v44  ;;  %v819_v49 = vpop.permute.xlu0 %818  ;;  %v17273_v31 = vrot.slane %v9752_v0, 1  ;;  %v17275_v0 = vld [vmem:[#allocation83_spill] sm:$0xff] }
 0x2aa   : > { %17266 = vst [vmem:[#allocation184_spill] sm:$0xff] %v9809_v36  ;;  %17267 = vst [vmem:[#allocation185_spill] sm:$0xff] %v9813_v27  ;;  %v726_v55 = vadd.f32 %v9662_v9, %v9388_v34  ;;  %v752_v24 = vadd.f32 %v741_v17, %v9404_v47  ;;  %v9830_v57 = vmul.f32 %v17270_v12, %v17163_v44  ;;  %v9836_v36 = vpop.permute.xlu1 %820  ;;  %v16530_v16 = vrot.slane %v9813_v27, 2 }
 0x2ab   : > { %17269 = vst [vmem:[#allocation82_spill] sm:$0xff] %v9823_v29  ;;  %v9841_v35 = vsel %vm924_vm2, %v17273_v31, %v1307_v22  ;;  %v2672_v52 = vrot.slane %v2662_v10, 2  ;;  %v16531_v34 = vrot.slane %v9823_v29, 2  ;;  %v1448_v47 = vmul.f32 %v8434_v33, %v17245_v30  ;;  %2336 = vrot.lane.b32.xlu1 %v9613_v5, %s16969_s2 }
 0x2ac   : > { %17271 = vst [vmem:[#allocation84_spill] sm:$0xff] %v9830_v57  ;;  %17274 = vst [vmem:[#allocation187_spill] sm:$0xff] %v9841_v35  ;;  %v753_v17 = vadd.f32 %v9714_v14, %v9427_v18  ;;  %v830_v9 = vadd.f32 %v819_v49, %v726_v55  ;;  %v9865_v14 = vmul.f32 %v8463_v58, %v17221_v40  ;;  %v1498_v10 = vrot.slane %v1485_v8, 2  ;;  %v17359_v35 = vld [vmem:[#allocation111_spill] sm:$0xff] }
 0x2ad   : > { %2297 = vrot.lane.b32.xlu0 %v17275_v0, %s16969_s2  ;;  %v9856_v22 = vsel %vm1337_vm3, %v2671_v7, %v2672_v52  ;;  %v9861_v33 = vsel %vm1337_vm3, %v2672_v52, %v16531_v34  ;;  %v1461_v18 = vrot.slane %v1448_v47, 2  ;;  %v16529_v0 = vrot.slane %v9834_v25, 2  ;;  %v845_v55 = vpop.permute.xlu0 %844  ;;  %v17348_v25 = vld [vmem:[#allocation57_spill] sm:$0xff] }
 0x2ae   : > { %17276 = vst [vmem:[#allocation83_spill] sm:$0xff] %v9856_v22  ;;  %17277 = vst [vmem:[#allocation188_spill] sm:$0xff] %v9861_v33  ;;  %v9868_v53 = vadd.f32 %v9111_v51, %v830_v9  ;;  %v9873_v54 = vmul.f32 %v8466_v60, %v17221_v40  ;;  %v778_v7 = vadd.f32 %v767_v2, %v9435_v4  ;;  %v847_v52 = vpop.permute.xlu1 %846  ;;  %v17361_v33 = vld [vmem:[#allocation78_spill] sm:$0xff] }
 0x2af   : > { %17278 = vst [vmem:[#allocation189_spill] sm:$0xff] %v9865_v14  ;;  %v9879_v49 = vsel %vm1337_vm3, %v16530_v16, %v1461_v18  ;;  %v1522_v51 = vmul.f32 %v8463_v58, %v17245_v30  ;;  %v9885_v31 = vmul.f32 %v17134_v11, %v17221_v40  ;;  %v856_v8 = vadd.f32 %v845_v55, %v752_v24  ;;  %v17283_v18 = vld [vmem:[#allocation88_spill] sm:$0xff] }
 0x2b0   : > { %17279 = vst [vmem:[#allocation190_spill] sm:$0xff] %v9873_v54  ;;  %17280 = vst [vmem:[#allocation191_spill] sm:$0xff] %v9879_v49  ;;  %v857_v47 = vadd.f32 %v847_v52, %v753_v17  ;;  %v9890_v4 = vsel %vm1337_vm3, %v16529_v0, %v1498_v10  ;;  %v1559_v2 = vmul.f32 %v8466_v60, %v17245_v30  ;;  %v16526_v58 = vrot.slane %v9865_v14, 2 }
 0x2b1   : > { %17281 = vst [vmem:[#allocation192_spill] sm:$0xff] %v9885_v31  ;;  %17282 = vst [vmem:[#allocation193_spill] sm:$0xff] %v9890_v4  ;;  %v779_v9 = vadd.f32 %v9742_v56, %v9445_v15  ;;  %2334 = vrot.lane.b32.xlu0 %v17283_v18, %s16969_s2  ;;  %v1535_v24 = vrot.slane %v1522_v51, 2  ;;  %v1596_v17 = vmul.f32 %v17134_v11, %v17245_v30  ;;  %v16528_v56 = vrot.slane %v9873_v54, 2  ;;  %v871_v55 = vpop.permute.xlu0 %870  ;;  %v17342_v54 = vld [vmem:[#allocation113_spill] sm:$0xff]  ;;  %v17345_v4 = vld [vmem:[#allocation116_spill] sm:$0xff] }
 0x2b2   : > { %v9904_v10 = vadd.f32 %v9164_v63, %v856_v8  ;;  %v9907_v60 = vadd.f32 %v9176_v38, %v857_v47  ;;  %v1572_v15 = vrot.slane %v1559_v2, 2  ;;  %v873_v52 = vpop.permute.xlu1 %872  ;;  %v16527_v51 = vrot.slane %v9885_v31, 2  ;;  %v17288_v47 = vld [vmem:[#allocation86_spill] sm:$0xff]  ;;  %2373 = vrot.lane.b32.xlu1 %v9626_v48, %s16969_s2  ;;  %v17331_v31 = vld [vmem:[#allocation36_spill] sm:$0xff] }
 0x2b3   : > { %v9913_v5 = vsel %vm1337_vm3, %v16526_v58, %v1535_v24  ;;  %v9918_v11 = vmul.f32 %v17155_v59, %v17221_v40  ;;  %v1609_v63 = vrot.slane %v1596_v17, 2  ;;  %v882_v8 = vadd.f32 %v871_v55, %v778_v7  ;;  %v17291_v24 = vld [vmem:[#allocation93_spill] sm:$0xff] }
 0x2b4   : > { %17284 = vst [vmem:[#allocation88_spill] sm:$0xff] %v9904_v10  ;;  %17285 = vst [vmem:[#allocation194_spill] sm:$0xff] %v9907_v60  ;;  %v883_v38 = vadd.f32 %v873_v52, %v779_v9  ;;  %v9922_v18 = vmul.f32 %v17288_v47, %v17163_v44  ;;  %v9927_v2 = vsel %vm1337_vm3, %v16528_v56, %v1572_v15  ;;  %v17346_v14 = vrot.slane %v17345_v4, 2  ;;  %v17353_v4 = vld [vmem:[#allocation72_spill] sm:$0xff] }
 0x2b5   : > { %17286 = vst [vmem:[#allocation195_spill] sm:$0xff] %v9913_v5  ;;  %17287 = vst [vmem:[#allocation196_spill] sm:$0xff] %v9918_v11  ;;  %2371 = vrot.lane.b32.xlu0 %v17291_v24, %s16969_s2  ;;  %v9937_v7 = vsel %vm1337_vm3, %v16527_v51, %v1609_v63  ;;  %v9941_v9 = vmul.f32 %v17159_v3, %v17221_v40  ;;  %v1633_v17 = vmul.f32 %v17155_v59, %v17245_v30  ;;  %v897_v63 = vpop.permute.xlu0 %896  ;;  %v17296_v51 = vld [vmem:[#allocation87_spill] sm:$0xff] }
 0x2b6   : > { %17289 = vst [vmem:[#allocation86_spill] sm:$0xff] %v9922_v18  ;;  %17290 = vst [vmem:[#allocation197_spill] sm:$0xff] %v9927_v2  ;;  %v804_v15 = vadd.f32 %v9780_v21, %v9574_v1  ;;  %v805_v48 = vadd.f32 %v9782_v6, %v9578_v20  ;;  %v9950_v55 = vadd.f32 %v9199_v45, %v882_v8  ;;  %v899_v24 = vpop.permute.xlu1 %898  ;;  %v16533_v59 = vrot.slane %v9918_v11, 2  ;;  %v17298_v45 = vld [vmem:[#allocation90_spill] sm:$0xff]  ;;  %v17301_v8 = vld [vmem:[#allocation96_spill] sm:$0xff] }
 0x2b7   : > { %17292 = vst [vmem:[#allocation93_spill] sm:$0xff] %v9937_v7  ;;  %17293 = vst [vmem:[#allocation198_spill] sm:$0xff] %v9941_v9  ;;  %v9953_v52 = vadd.f32 %v9204_v28, %v883_v38  ;;  %v9957_v56 = vmul.f32 %v17296_v51, %v17163_v44  ;;  %v1646_v0 = vrot.slane %v1633_v17, 2  ;;  %v1670_v1 = vmul.f32 %v17159_v3, %v17245_v30  ;;  %v17302_v38 = vld [vmem:[#allocation69_spill] sm:$0xff]  ;;  %v17303_v17 = vld [vmem:[#allocation102_spill] sm:$0xff] }
 0x2b8   : > { %17294 = vst [vmem:[#allocation199_spill] sm:$0xff] %v9950_v55  ;;  %v908_v21 = vadd.f32 %v897_v63, %v804_v15  ;;  %v909_v20 = vadd.f32 %v899_v24, %v805_v48  ;;  %v9964_v6 = vmul.f32 %v17298_v45, %v17163_v44  ;;  %v9968_v28 = vmul.f32 %v17161_v62, %v17221_v40  ;;  %v17306_v24 = vld [vmem:[#allocation150_spill] sm:$0xff] }
 0x2b9   : > { %17295 = vst [vmem:[#allocation200_spill] sm:$0xff] %v9953_v52  ;;  %17297 = vst [vmem:[#allocation87_spill] sm:$0xff] %v9957_v56  ;;  %2408 = vrot.lane.b32.xlu0 %v17301_v8, %s16969_s2  ;;  %2410 = vrot.lane.b32.xlu1 %v17302_v38, %s16969_s2  ;;  %v9976_v16 = vmul.f32 %v17303_v17, %v17163_v44  ;;  %v9982_v15 = vsel %vm1337_vm3, %v16533_v59, %v1646_v0  ;;  %v1683_v48 = vrot.slane %v1670_v1, 2  ;;  %v17308_v8 = vld [vmem:[#allocation151_spill] sm:$0xff]  ;;  %v9993_v7 = vpop.permute.xlu0 %1962  ;;  %v17319_v1 = vld [vmem:[#allocation76_spill] sm:$0xff] }
 0x2ba   : > { %17299 = vst [vmem:[#allocation90_spill] sm:$0xff] %v9964_v6  ;;  %17300 = vst [vmem:[#allocation201_spill] sm:$0xff] %v9968_v28  ;;  %v9986_v34 = vadd.f32 %v17306_v24, %v908_v21  ;;  %v9989_v58 = vadd.f32 %v17308_v8, %v909_v20  ;;  %v1707_v38 = vmul.f32 %v17161_v62, %v17245_v30  ;;  %v9995_v3 = vpop.permute.xlu1 %1964  ;;  %v17312_v59 = vrot.slane %v9941_v9, 2  ;;  %v17314_v20 = vld [vmem:[#allocation74_spill] sm:$0xff]  ;;  %v17316_v8 = vld [vmem:[#allocation91_spill] sm:$0xff] }
 0x2bb   : > { %17304 = vst [vmem:[#allocation96_spill] sm:$0xff] %v9976_v16  ;;  %17305 = vst [vmem:[#allocation69_spill] sm:$0xff] %v9982_v15  ;;  %v17315_v24 = vrot.slane %v17314_v20, 1  ;;  %v17317_v63 = vrot.slane %v17316_v8, 1  ;;  %v17318_v0 = vld [vmem:[#allocation99_spill] sm:$0xff]  ;;  %v17320_v9 = vrot.slane %v17319_v1, 1  ;;  %v10109_v27 = vmul.f32 %v17359_v35, %v17163_v44 }
 0x2bc   : > { %17307 = vst [vmem:[#allocation102_spill] sm:$0xff] %v9986_v34  ;;  %17309 = vst [vmem:[#allocation150_spill] sm:$0xff] %v9989_v58  ;;  %v10003_v21 = vsel %vm1337_vm3, %v17312_v59, %v1683_v48  ;;  %v1720_v11 = vrot.slane %v1707_v38, 2  ;;  %v17321_v59 = vld [vmem:[#allocation98_spill] sm:$0xff]  ;;  %v17323_v8 = vrot.slane %v9704_v19, 1  ;;  %v17326_v38 = vld [vmem:[#allocation108_spill] sm:$0xff]  ;;  %v10113_v22 = vmul.f32 %v17361_v33, %v17331_v31 }
 0x2bd   : > { %17310 = vst [vmem:[#allocation151_spill] sm:$0xff] %v9993_v7  ;;  %17311 = vst [vmem:[#allocation202_spill] sm:$0xff] %v9995_v3  ;;  %v2440_v62 = vsel %vm924_vm2, %v17317_v63, %v17315_v24  ;;  %2445 = vrot.lane.b32.xlu0 %v17318_v0, %s7978_s8  ;;  %v17322_v48 = vrot.slane %v17321_v59, 1  ;;  %v10028_v2 = vmul.f32 %v17326_v38, %v17163_v44  ;;  %v17328_v0 = vrot.slane %v9786_v61, 1  ;;  %v10048_v19 = vpop.permute.xlu0 %1988  ;;  %v17374_v7 = vld [vmem:[#allocation92_spill] sm:$0xff]  ;;  %v17383_v52 = vld [vmem:[#allocation135_spill] sm:$0xff] }
 0x2be   : > { %17313 = vst [vmem:[#allocation203_spill] sm:$0xff] %v10003_v21  ;;  %2447 = vrot.lane.b32.xlu1 %v2440_v62, %s7978_s8  ;;  %v17324_v21 = vld [vmem:[#allocation100_spill] sm:$0xff]  ;;  %17336 = vst [vmem:[#allocation98_spill] sm:$0xff] %v10048_v19  ;;  %v10050_v61 = vpop.permute.xlu1 %1990  ;;  %v10131_v46 = vmul.f32 %v17270_v12, %v17331_v31  ;;  %v917_v42 = vmul.f32 %v17369_v13, %v17221_v40  ;;  %v10156_v19 = vmul.f32 %v17303_v17, %v17331_v31 }
 0x2bf   : > { %v2477_v20 = vsel %vm924_vm2, %v17322_v48, %v17320_v9  ;;  %v17325_v63 = vrot.slane %v17324_v21, 1  ;;  %17327 = vst [vmem:[#allocation91_spill] sm:$0xff] %v10028_v2  ;;  %v17329_v62 = vld [vmem:[#allocation104_spill] sm:$0xff]  ;;  %v17332_v9 = vld [vmem:[#allocation66_spill] sm:$0xff]  ;;  %v17333_v21 = vrot.slane %v9968_v28, 2  ;;  %17337 = vst [vmem:[#allocation100_spill] sm:$0xff] %v10050_v61  ;;  %v10160_v43 = vmul.f32 %v17326_v38, %v17331_v31 }
 0x2c0   : > { %v17330_v1 = vrot.slane %v17329_v62, 1  ;;  %v10037_v48 = vmul.f32 %v17332_v9, %v17331_v31  ;;  %v17338_v62 = vrot.slane %v9830_v57, 2  ;;  %v17341_v28 = vrot.slane %v9922_v18, 2  ;;  %v17347_v57 = vld [vmem:[#allocation22_spill] sm:$0xff]  ;;  %17360 = vst [vmem:[#allocation108_spill] sm:$0xff] %v10109_v27 }
 0x2c1   : > { %v2514_v24 = vsel %vm924_vm2, %v17325_v63, %v17323_v8  ;;  %v10042_v8 = vsel %vm1337_vm3, %v17333_v21, %v1720_v11  ;;  %v17335_v63 = vld [vmem:[#allocation70_spill] sm:$0xff]  ;;  %v17343_v11 = vrot.slane %v17342_v54, 2  ;;  %17372 = vst [vmem:[#allocation22_spill] sm:$0xff] %v10156_v19  ;;  %v930_v50 = vrot.slane %v917_v42, 1  ;;  %v17381_v42 = vld [vmem:[#allocation112_spill] sm:$0xff] }
 0x2c2   : > { %v2551_v59 = vsel %vm924_vm2, %v17330_v1, %v17328_v0  ;;  %17334 = vst [vmem:[#allocation99_spill] sm:$0xff] %v10042_v8  ;;  %v10046_v15 = vmul.f32 %v17335_v63, %v17331_v31  ;;  %v17339_v1 = vld [vmem:[#allocation110_spill] sm:$0xff]  ;;  %v17344_v8 = vrot.slane %v9957_v56, 2  ;;  %v10090_v56 = vmul.f32 %v17353_v4, %v17331_v31  ;;  %2484 = vrot.lane.b32.xlu1 %v2477_v20, %s7978_s8 }
 0x2c3   : > { %v17340_v0 = vrot.slane %v17339_v1, 2  ;;  %v10064_v21 = vsel %vm1337_vm3, %v17343_v11, %v17341_v28  ;;  %v10075_v1 = vmul.f32 %v17348_v25, %v17347_v57  ;;  %v17352_v28 = vld [vmem:[#allocation71_spill] sm:$0xff]  ;;  %v17355_v57 = vld [vmem:[#allocation106_spill] sm:$0xff]  ;;  %v10127_v25 = vpop.permute.xlu1 %2016  ;;  %17366 = vst [vmem:[#allocation70_spill] sm:$0xff] %v10131_v46  ;;  %v10139_v20 = vmul.f32 %v17296_v51, %v17331_v31 }
 0x2c4   : > { %v10071_v49 = vsel %vm1337_vm3, %v17346_v14, %v17344_v8  ;;  %v10086_v11 = vmul.f32 %v17352_v28, %v17331_v31  ;;  %v17354_v14 = vld [vmem:[#allocation77_spill] sm:$0xff]  ;;  %2482 = vrot.lane.b32.xlu0 %v17355_v57, %s7978_s8  ;;  %17365 = vst [vmem:[#allocation66_spill] sm:$0xff] %v10127_v25  ;;  %v10135_v57 = vmul.f32 %v17288_v47, %v17331_v31  ;;  %v17378_v34 = vrot.slane %v17377_v41, 1  ;;  %v17387_v41 = vld [vmem:[#allocation114_spill] sm:$0xff] }
 0x2c5   : > { %v10057_v5 = vsel %vm1337_vm3, %v17340_v0, %v17338_v62  ;;  %v17349_v62 = vrot.slane %v9964_v6, 2  ;;  %v17350_v0 = vld [vmem:[#allocation121_spill] sm:$0xff]  ;;  %v10094_v8 = vmul.f32 %v17354_v14, %v17331_v31  ;;  %17368 = vst [vmem:[#allocation113_spill] sm:$0xff] %v10139_v20  ;;  %v10148_v25 = vmul.f32 %v17298_v45, %v17331_v31 }
 0x2c6   : > { %v17351_v18 = vrot.slane %v17350_v0, 2  ;;  %17367 = vst [vmem:[#allocation110_spill] sm:$0xff] %v10135_v57  ;;  %2521 = vrot.lane.b32.xlu1 %v2514_v24, %s7978_s8  ;;  %17373 = vst [vmem:[#allocation121_spill] sm:$0xff] %v10160_v43  ;;  %v918_v24 = vmul.f32 %v17369_v13, %v17245_v30  ;;  %v10180_v3 = vsel %vm924_vm2, %v17378_v34, %v930_v50  ;;  %v17384_v26 = vrot.slane %v17383_v52, 1 }
 0x2c7   : > { %17370 = vst [vmem:[#allocation116_spill] sm:$0xff] %v10148_v25  ;;  %v10172_v32 = vpop.permute.xlu1 %2042  ;;  %17379 = vst [vmem:[#allocation77_spill] sm:$0xff] %v10180_v3  ;;  %v10195_v34 = vmul.f32 %v17359_v35, %v17331_v31  ;;  %v10212_v58 = vmul.f32 %v17387_v41, %v17331_v31 }
 0x2c8   : > { %v10082_v54 = vsel %vm1337_vm3, %v17351_v18, %v17349_v62  ;;  %v17356_v18 = vrot.slane %v9976_v16, 2  ;;  %v17357_v62 = vld [vmem:[#allocation125_spill] sm:$0xff]  ;;  %v17362_v16 = vld [vmem:[#allocation79_spill] sm:$0xff]  ;;  %17376 = vst [vmem:[#allocation72_spill] sm:$0xff] %v10172_v32  ;;  %v932_v13 = vrot.slane %v918_v24, 1  ;;  %v948_v24 = vmul.f32 %v17374_v7, %v17245_v30 }
 0x2c9   : > { %v17358_v0 = vrot.slane %v17357_v62, 2  ;;  %v10119_v62 = vmul.f32 %v17362_v16, %v17331_v31  ;;  %17382 = vst [vmem:[#allocation106_spill] sm:$0xff] %v10195_v34  ;;  %17388 = vst [vmem:[#allocation78_spill] sm:$0xff] %v10212_v58 }
 0x2ca   : > { %2558 = vrot.lane.b32.xlu1 %v2551_v59, %s7978_s8  ;;  %v10207_v59 = vsel %vm924_vm2, %v930_v50, %v932_v13 }
 0x2cb   : > { %v10104_v6 = vsel %vm1337_vm3, %v17358_v0, %v17356_v18  ;;  %v10123_v18 = vmul.f32 %v17257_v37, %v17331_v31  ;;  %v10125_v0 = vpop.permute.xlu0 %2014  ;;  %17386 = vst [vmem:[#allocation111_spill] sm:$0xff] %v10207_v59  ;;  %v10216_v60 = vpop.permute.xlu1 %2068 }
 0x2cc   : > { %17364 = vst [vmem:[#allocation36_spill] sm:$0xff] %v10125_v0  ;;  %v17371_v0 = vld [vmem:[#allocation107_spill] sm:$0xff]  ;;  %17390 = vst [vmem:[#allocation67_spill] sm:$0xff] %v10216_v60 }
 0x2cd   : > { %17363 = vst [vmem:[#allocation104_spill] sm:$0xff] %v10123_v18  ;;  %2519 = vrot.lane.b32.xlu0 %v17371_v0, %s7978_s8  ;;  %v10166_v0 = vmul.f32 %v17374_v7, %v17221_v40  ;;  %v17391_v7 = vld [vmem:[#allocation117_spill] sm:$0xff] }
 0x2ce   : > { %v2282_v39 = vmul.f32 %v17332_v9, %v17391_v7  ;;  %v2356_v50 = vmul.f32 %v17352_v28, %v17391_v7  ;;  %v2393_v52 = vmul.f32 %v17353_v4, %v17391_v7  ;;  %v2430_v13 = vmul.f32 %v17354_v14, %v17391_v7  ;;  %2711 = vrot.lane.b32.xlu1 %v10057_v5, %s16969_s2 }
 0x2cf   : > { %v10170_v61 = vpop.permute.xlu0 %2040  ;;  %v16558_v55 = vrot.slane %v10166_v0, 1  ;;  %v2541_v9 = vmul.f32 %v17257_v37, %v17391_v7  ;;  %v17393_v37 = vrot.slane %v10037_v48, 1  ;;  %v17395_v5 = vrot.slane %v10086_v11, 1 }
 0x2d0   : > { %17375 = vst [vmem:[#allocation71_spill] sm:$0xff] %v10170_v61  ;;  %v17380_v61 = vld [vmem:[#allocation94_spill] sm:$0xff]  ;;  %v2295_v28 = vrot.slane %v2282_v39, 1  ;;  %v2369_v59 = vrot.slane %v2356_v50, 1  ;;  %v2443_v14 = vrot.slane %v2430_v13, 1  ;;  %v17397_v50 = vrot.slane %v10094_v8, 1 }
 0x2d1   : > { %v10186_v29 = vmul.f32 %v17380_v61, %v17221_v40  ;;  %2556 = vrot.lane.b32.xlu0 %v17381_v42, %s7978_s8  ;;  %v10204_v3 = vsel %vm924_vm2, %v17384_v26, %v16558_v55  ;;  %v2319_v26 = vmul.f32 %v17335_v63, %v17391_v7  ;;  %v2467_v55 = vmul.f32 %v17361_v33, %v17391_v7  ;;  %v17392_v63 = vld [vmem:[#allocation118_spill] sm:$0xff] }
 0x2d2   : > { %17385 = vst [vmem:[#allocation125_spill] sm:$0xff] %v10204_v3  ;;  %v2504_v42 = vmul.f32 %v17362_v16, %v17391_v7  ;;  %v2406_v3 = vrot.slane %v2393_v52, 1  ;;  %v2554_v33 = vrot.slane %v2541_v9, 1  ;;  %v10240_v16 = vpop.permute.xlu1 %2094  ;;  %v10245_v10 = vsel %vm924_vm2, %v17393_v37, %v2295_v28  ;;  %v17404_v37 = vld [vmem:[#allocation120_spill] sm:$0xff]  ;;  %2748 = vrot.lane.b32.xlu1 %v10064_v21, %s16969_s2  ;;  %v17405_v21 = vld [vmem:[#allocation95_spill] sm:$0xff] }
 0x2d3   : > { %v10214_v32 = vpop.permute.xlu0 %2066  ;;  %v2332_v4 = vrot.slane %v2319_v26, 1  ;;  %v2480_v60 = vrot.slane %v2467_v55, 1  ;;  %v10255_v55 = vsel %vm924_vm2, %v17395_v5, %v2369_v59  ;;  %v10265_v52 = vsel %vm924_vm2, %v17397_v50, %v2443_v14 }
 0x2d4   : > { %17389 = vst [vmem:[#allocation79_spill] sm:$0xff] %v10214_v32  ;;  %v2517_v32 = vrot.slane %v2504_v42, 1  ;;  %v17396_v42 = vrot.slane %v10090_v56, 1  ;;  %v17398_v13 = vrot.slane %v10113_v22, 1  ;;  %v17400_v28 = vrot.slane %v10119_v62, 1 }
 0x2d5   : > { %2709 = vrot.lane.b32.xlu0 %v17392_v63, %s16969_s2  ;;  %v17394_v63 = vrot.slane %v10046_v15, 1  ;;  %v2731_v14 = vmul.f32 %v17288_v47, %v17391_v7  ;;  %v2842_v5 = vmul.f32 %v17303_v17, %v17391_v7  ;;  %v1005_v50 = vmul.f32 %v17405_v21, %v17221_v40 }
 0x2d6   : > { %v10260_v26 = vsel %vm924_vm2, %v17396_v42, %v2406_v3  ;;  %v10270_v9 = vsel %vm924_vm2, %v17398_v13, %v2480_v60  ;;  %v10275_v59 = vsel %vm924_vm2, %v17400_v28, %v2517_v32  ;;  %v2694_v60 = vmul.f32 %v17270_v12, %v17391_v7  ;;  %v10302_v13 = vpop.permute.xlu1 %2120  ;;  %2785 = vrot.lane.b32.xlu1 %v10071_v49, %s16969_s2 }
 0x2d7   : > { %v10238_v23 = vpop.permute.xlu0 %2092  ;;  %v10250_v39 = vsel %vm924_vm2, %v17394_v63, %v2332_v4  ;;  %17399 = vst [vmem:[#allocation107_spill] sm:$0xff] %v10270_v9  ;;  %17401 = vst [vmem:[#allocation92_spill] sm:$0xff] %v10275_v59  ;;  %v17402_v4 = vrot.slane %v10123_v18, 1  ;;  %v2768_v32 = vmul.f32 %v17296_v51, %v17391_v7  ;;  %v961_v63 = vrot.slane %v948_v24, 1  ;;  %v17410_v9 = vld [vmem:[#allocation124_spill] sm:$0xff] }
 0x2d8   : > { %v2879_v42 = vmul.f32 %v17326_v38, %v17391_v7  ;;  %v2707_v47 = vrot.slane %v2694_v60, 2  ;;  %v2744_v28 = vrot.slane %v2731_v14, 2  ;;  %v17406_v24 = vrot.slane %v10186_v29, 1 }
 0x2d9   : > { %v10280_v3 = vsel %vm924_vm2, %v17402_v4, %v2554_v33  ;;  %2746 = vrot.lane.b32.xlu0 %v17404_v37, %s16969_s2  ;;  %v2805_v33 = vmul.f32 %v17298_v45, %v17391_v7  ;;  %v2781_v51 = vrot.slane %v2768_v32, 2  ;;  %v17407_v4 = vld [vmem:[#allocation139_spill] sm:$0xff]  ;;  %v17409_v59 = vrot.slane %v10166_v0, 1 }
 0x2da   : > { %17403 = vst [vmem:[#allocation129_spill] sm:$0xff] %v10280_v3  ;;  %v17408_v45 = vrot.slane %v17407_v4, 1  ;;  %v2855_v3 = vrot.slane %v2842_v5, 2  ;;  %v2892_v38 = vrot.slane %v2879_v42, 2  ;;  %v17411_v60 = vrot.slane %v10131_v46, 2  ;;  %v10355_v4 = vpop.permute.xlu1 %2146  ;;  %2822 = vrot.lane.b32.xlu1 %v10082_v54, %s16969_s2 }
 0x2db   : > { %v10300_v12 = vpop.permute.xlu0 %2118  ;;  %v2818_v17 = vrot.slane %v2805_v33, 2  ;;  %v10314_v18 = vsel %vm924_vm2, %v17409_v59, %v961_v63  ;;  %v17413_v32 = vrot.slane %v10135_v57, 2  ;;  %v17415_v0 = vrot.slane %v10139_v20, 2 }
 0x2dc   : > { %v10309_v37 = vsel %vm924_vm2, %v17408_v45, %v17406_v24  ;;  %v10323_v14 = vsel %vm1337_vm3, %v17411_v60, %v2707_v47  ;;  %v17417_v63 = vrot.slane %v10148_v25, 2  ;;  %v17419_v5 = vrot.slane %v10156_v19, 2  ;;  %v17472_v19 = vld [vmem:[#allocation65_spill] sm:$0xff] }
 0x2dd   : > { %2783 = vrot.lane.b32.xlu0 %v17410_v9, %s16969_s2  ;;  %17412 = vst [vmem:[#allocation94_spill] sm:$0xff] %v10323_v14  ;;  %v10328_v33 = vsel %vm1337_vm3, %v17413_v32, %v2744_v28  ;;  %v10333_v59 = vsel %vm1337_vm3, %v17415_v0, %v2781_v51  ;;  %v17421_v47 = vrot.slane %v10160_v43, 2  ;;  %v2916_v51 = vmul.f32 %v17359_v35, %v17391_v7  ;;  %v17423_v0 = vld [vmem:[#allocation97_spill] sm:$0xff] }
 0x2de   : > { %17414 = vst [vmem:[#allocation112_spill] sm:$0xff] %v10328_v33  ;;  %17416 = vst [vmem:[#allocation135_spill] sm:$0xff] %v10333_v59  ;;  %v10339_v49 = vsel %vm1337_vm3, %v17417_v63, %v2818_v17  ;;  %v10344_v42 = vsel %vm1337_vm3, %v17419_v5, %v2855_v3  ;;  %v1017_v17 = vrot.slane %v1005_v50, 1  ;;  %v977_v60 = vmul.f32 %v17380_v61, %v17245_v30  ;;  %v17424_v63 = vld [vmem:[#allocation101_spill] sm:$0xff]  ;;  %v17426_v61 = vld [vmem:[#allocation143_spill] sm:$0xff]  ;;  %v10384_v54 = vpop.permute.xlu1 %718 }
 0x2df   : > { %17418 = vst [vmem:[#allocation114_spill] sm:$0xff] %v10339_v49  ;;  %17420 = vst [vmem:[#allocation117_spill] sm:$0xff] %v10344_v42  ;;  %v10349_v28 = vsel %vm1337_vm3, %v17421_v47, %v2892_v38  ;;  %v10353_v24 = vpop.permute.xlu0 %2144  ;;  %v2953_v3 = vmul.f32 %v17387_v41, %v17391_v7  ;;  %v2929_v32 = vrot.slane %v2916_v51, 2  ;;  %v1006_v38 = vmul.f32 %v17405_v21, %v17245_v30  ;;  %v17425_v47 = vld [vmem:[#allocation128_spill] sm:$0xff] }
 0x2e0   : > { %17422 = vst [vmem:[#allocation118_spill] sm:$0xff] %v10349_v28  ;;  %v1330_v35 = vmul.f32 %v17423_v0, %v17221_v40  ;;  %v1360_v5 = vmul.f32 %v17424_v63, %v17221_v40  ;;  %v17427_v50 = vrot.slane %v17426_v61, 1  ;;  %v990_v51 = vrot.slane %v977_v60, 1  ;;  %2859 = vrot.lane.b32.xlu1 %v10104_v6, %s7978_s8 }
 0x2e1   : > { %2820 = vrot.lane.b32.xlu0 %v17425_v47, %s16969_s2  ;;  %v2966_v9 = vrot.slane %v2953_v3, 2  ;;  %v1331_v21 = vmul.f32 %v17423_v0, %v17245_v30  ;;  %v17428_v28 = vrot.slane %v10195_v34, 2  ;;  %v1019_v49 = vrot.slane %v1006_v38, 1 }
 0x2e2   : > { %v10375_v45 = vsel %vm924_vm2, %v17427_v50, %v1017_v17  ;;  %v1343_v47 = vrot.slane %v1330_v35, 2  ;;  %v1372_v59 = vrot.slane %v1360_v5, 2  ;;  %v17430_v61 = vrot.slane %v10186_v29, 1  ;;  %v17435_v5 = vld [vmem:[#allocation154_spill] sm:$0xff] }
 0x2e3   : > { %v10382_v42 = vsel %vm1337_vm3, %v17428_v28, %v2929_v32  ;;  %v717_v33 = vpop.permute.xlu0 %716  ;;  %v17431_v60 = vrot.slane %v10212_v58, 2  ;;  %v1345_v0 = vrot.slane %v1331_v21, 2  ;;  %v17433_v28 = vld [vmem:[#allocation103_spill] sm:$0xff]  ;;  %v10401_v35 = vmul.f32 %v17387_v41, %v17163_v44  ;;  %v17439_v21 = vld [vmem:[#allocation156_spill] sm:$0xff] }
 0x2e4   : > { %17429 = vst [vmem:[#allocation120_spill] sm:$0xff] %v10382_v42  ;;  %v10389_v50 = vsel %vm924_vm2, %v17430_v61, %v990_v51  ;;  %v1389_v32 = vmul.f32 %v17433_v28, %v17221_v40  ;;  %v727_v38 = vadd.f32 %v717_v33, %v10075_v1  ;;  %v10404_v29 = vsel %vm924_vm2, %v1017_v17, %v1019_v49  ;;  %v17451_v42 = vld [vmem:[#allocation138_spill] sm:$0xff] }
 0x2e5   : > { %v10394_v3 = vsel %vm1337_vm3, %v17431_v60, %v2966_v9  ;;  %17434 = vst [vmem:[#allocation139_spill] sm:$0xff] %v10401_v35  ;;  %v17436_v51 = vrot.slane %v17435_v5, 2  ;;  %v17438_v9 = vld [vmem:[#allocation131_spill] sm:$0xff]  ;;  %v17440_v1 = vrot.slane %v17439_v21, 2  ;;  %v10421_v41 = vsel %vm1337_vm3, %v1343_v47, %v1345_v0  ;;  %v17446_v21 = vld [vmem:[#allocation105_spill] sm:$0xff]  ;;  %v10435_v0 = vpop.permute.xlu1 %1052 }
 0x2e6   : > { %17432 = vst [vmem:[#allocation95_spill] sm:$0xff] %v10394_v3  ;;  %2857 = vrot.lane.b32.xlu0 %v17438_v9, %s7978_s8  ;;  %17442 = vst [vmem:[#allocation101_spill] sm:$0xff] %v10421_v41  ;;  %v1401_v49 = vrot.slane %v1389_v32, 2  ;;  %v1361_v17 = vmul.f32 %v17424_v63, %v17245_v30  ;;  %v831_v60 = vadd.f32 %v9836_v36, %v727_v38  ;;  %v17443_v5 = vrot.slane %v10028_v2, 2  ;;  %v17447_v63 = vld [vmem:[#allocation160_spill] sm:$0xff]  ;;  %v17453_v32 = vld [vmem:[#allocation162_spill] sm:$0xff] }
 0x2e7   : > { %v10409_v61 = vsel %vm1337_vm3, %v17436_v51, %v1343_v47  ;;  %v10418_v33 = vsel %vm1337_vm3, %v17440_v1, %v1372_v59  ;;  %v17444_v51 = vld [vmem:[#allocation132_spill] sm:$0xff]  ;;  %v1390_v1 = vmul.f32 %v17433_v28, %v17245_v30  ;;  %v1051_v47 = vpop.permute.xlu0 %1050  ;;  %v17448_v41 = vrot.slane %v17447_v63, 2 }
 0x2e8   : > { %17437 = vst [vmem:[#allocation124_spill] sm:$0xff] %v10409_v61  ;;  %17441 = vst [vmem:[#allocation97_spill] sm:$0xff] %v10418_v33  ;;  %v17445_v9 = vrot.slane %v17444_v51, 2  ;;  %v1418_v61 = vmul.f32 %v17446_v21, %v17221_v40  ;;  %v1374_v38 = vrot.slane %v1361_v17, 2  ;;  %v17450_v51 = vld [vmem:[#allocation133_spill] sm:$0xff]  ;;  %v16562_v33 = vrot.slane %v10401_v35, 2 }
 0x2e9   : > { %v10441_v36 = vsel %vm1337_vm3, %v17448_v41, %v1401_v49  ;;  %v1403_v28 = vrot.slane %v1390_v1, 2  ;;  %v17454_v17 = vrot.slane %v17453_v32, 2 }
 0x2ea   : > { %v2889_v6 = vsel %vm1337_vm3, %v17445_v9, %v17443_v5  ;;  %17449 = vst [vmem:[#allocation128_spill] sm:$0xff] %v10441_v36  ;;  %v1419_v5 = vmul.f32 %v17446_v21, %v17245_v30  ;;  %v939_v9 = vadd.f32 %v17450_v51, %v831_v60  ;;  %v1430_v3 = vrot.slane %v1418_v61, 2  ;;  %2894 = vrot.lane.b32.xlu0 %v17451_v42, %s7978_s8  ;;  %v10461_v61 = vpop.permute.xlu1 %1089  ;;  %v17458_v42 = vld [vmem:[#allocation136_spill] sm:$0xff]  ;;  %v17463_v51 = vld [vmem:[#allocation122_spill] sm:$0xff] }
 0x2eb   : > { %2896 = vrot.lane.b32.xlu1 %v2889_v6, %s7978_s8  ;;  %v10451_v63 = vsel %vm1337_vm3, %v1372_v59, %v1374_v38  ;;  %v10459_v30 = vsel %vm1337_vm3, %v1401_v49, %v1403_v28  ;;  %v1088_v60 = vpop.permute.xlu0 %1087  ;;  %v17457_v21 = vrot.slane %v10109_v27, 2  ;;  %v17459_v1 = vrot.slane %v17458_v42, 2  ;;  %v17460_v59 = vld [vmem:[#allocation28_spill] sm:$0xff]  ;;  %v17461_v38 = vld [vmem:[#allocation21_spill] sm:$0xff] }
 0x2ec   : > { %17452 = vst [vmem:[#allocation143_spill] sm:$0xff] %v10451_v63  ;;  %v1432_v41 = vrot.slane %v1419_v5, 2  ;;  %v10456_v36 = vsel %vm1337_vm3, %v17454_v17, %v1430_v3  ;;  %17456 = vst [vmem:[#allocation154_spill] sm:$0xff] %v10459_v30  ;;  %v734_v5 = vmul.f32 %v17461_v38, %v17460_v59  ;;  %v2165_v17 = vmul.f32 %v17463_v51, %v17331_v31  ;;  %v17464_v49 = vld [vmem:[#allocation141_spill] sm:$0xff]  ;;  %v17468_v63 = vld [vmem:[#allocation123_spill] sm:$0xff] }
 0x2ed   : > { %17455 = vst [vmem:[#allocation103_spill] sm:$0xff] %v10456_v36  ;;  %v2926_v6 = vsel %vm1337_vm3, %v17459_v1, %v17457_v21  ;;  %v17465_v28 = vrot.slane %v17464_v49, 2  ;;  %v17466_v36 = vld [vmem:[#allocation19_spill] sm:$0xff]  ;;  %v17467_v21 = vld [vmem:[#allocation24_spill] sm:$0xff] }
 0x2ee   : > { %v10471_v32 = vsel %vm1337_vm3, %v1430_v3, %v1432_v41  ;;  %v709_v42 = vmul.f32 %v17466_v36, %v17221_v40  ;;  %v10484_v1 = vmul.f32 %v17467_v21, %v17460_v59  ;;  %v2194_v3 = vmul.f32 %v17468_v63, %v17331_v31  ;;  %v17469_v41 = vld [vmem:[#allocation140_spill] sm:$0xff]  ;;  %v5525_v49 = vld [vmem:[%s16289_s7] sm:$0xff] }
 0x2ef   : > { %17462 = vst [vmem:[#allocation131_spill] sm:$0xff] %v10471_v32  ;;  %v2963_v30 = vsel %vm1337_vm3, %v17465_v28, %v16562_v33  ;;  %2931 = vrot.lane.b32.xlu0 %v17469_v41, %s7978_s8  ;;  %2933 = vrot.lane.b32.xlu1 %v2926_v6, %s7978_s8  ;;  %v5526_v36 = vld [vmem:[%s16289_s7 + $0x8] sm:$0xff]  ;;  %v2177_v28 = vrot.slane %v2165_v17, 1  ;;  %v2166_v33 = vmul.f32 %v17463_v51, %v17391_v7  ;;  %v17470_v32 = vld [vmem:[#allocation126_spill] sm:$0xff]  ;;  %v10507_v43 = vpop.permute.xlu0 %1124  ;;  %v10509_v17 = vpop.permute.xlu1 %1126  ;;  %v17473_v51 = vrot.slane %v17472_v19, 1 }
 0x2f0   : > { %v2223_v35 = vmul.f32 %v17470_v32, %v17331_v31  ;;  %v2195_v41 = vmul.f32 %v17468_v63, %v17391_v7  ;;  %v7692_v58 = vpack.c.bf16 %v5526_v36, %v5525_v49  ;;  %v2206_v6 = vrot.slane %v2194_v3, 1  ;;  %v17471_v27 = vld [vmem:[#allocation144_spill] sm:$0xff]  ;;  %v17478_v19 = vld [vmem:[#allocation146_spill] sm:$0xff] }
 0x2f1   : > { %v2252_v34 = vmul.f32 %v17471_v27, %v17331_v31  ;;  %v2224_v2 = vmul.f32 %v17470_v32, %v17391_v7  ;;  %v10514_v25 = vsel %vm924_vm2, %v17473_v51, %v2177_v28  ;;  %v2179_v20 = vrot.slane %v2166_v33, 1  ;;  %v17475_v32 = vld [vmem:[#allocation164_spill] sm:$0xff] }
 0x2f2   : > { %17474 = vst [vmem:[#allocation156_spill] sm:$0xff] %v10514_v25  ;;  %v2235_v14 = vrot.slane %v2223_v35, 1  ;;  %v2208_v63 = vrot.slane %v2195_v41, 1  ;;  %v1062_v3 = vadd.f32 %v1051_v47, %v9868_v53  ;;  %v735_v49 = vmul.f32 %v17461_v38, %v17221_v40  ;;  %7693 = vmatprep.subr.bf16.mxu1 %v7692_v58  ;;  %7700 = vmatprep.subr.bf16.mxu0 %v7692_v58  ;;  %v17480_v53 = vld [vmem:[#allocation170_spill] sm:$0xff] }
 0x2f3   : > { %v17476_v36 = vrot.slane %v17475_v32, 1  ;;  %v2264_v46 = vrot.slane %v2252_v34, 1  ;;  %2968 = vrot.lane.b32.xlu0 %v17478_v19, %s7978_s8  ;;  %2970 = vrot.lane.b32.xlu1 %v2963_v30, %s7978_s8  ;;  %v10528_v35 = vsel %vm924_vm2, %v2177_v28, %v2179_v20  ;;  %v17481_v33 = vrot.slane %v17480_v53, 1  ;;  %v17484_v34 = vld [vmem:[#allocation171_spill] sm:$0xff]  ;;  %v10549_v19 = vpop.permute.xlu1 %1163  ;;  %v17490_v53 = vld [vmem:[#allocation149_spill] sm:$0xff] }
 0x2f4   : > { %17479 = vst [vmem:[#allocation105_spill] sm:$0xff] %v10528_v35  ;;  %v10536_v38 = vsel %vm924_vm2, %v2206_v6, %v2208_v63  ;;  %v2237_v41 = vrot.slane %v2224_v2, 1  ;;  %7695 = vmatpush3.bf16.msra.mxu1 %v7692_v58  ;;  %7702 = vmatpush3.bf16.msra.mxu0 %v7692_v58  ;;  %v17485_v51 = vrot.slane %v17484_v34, 1  ;;  %v2253_v20 = vmul.f32 %v17471_v27, %v17391_v7  ;;  %v17487_v30 = vld [vmem:[#allocation147_spill] sm:$0xff]  ;;  %v17489_v58 = vld [vmem:[#allocation148_spill] sm:$0xff] }
 0x2f5   : > { %v10522_v57 = vsel %vm924_vm2, %v17476_v36, %v2206_v6  ;;  %v10533_v47 = vsel %vm924_vm2, %v17481_v33, %v2235_v14  ;;  %17483 = vst [vmem:[#allocation133_spill] sm:$0xff] %v10536_v38  ;;  %v2577_v28 = vmul.f32 %v17487_v30, %v17331_v31  ;;  %v10547_v36 = vpop.permute.xlu0 %1161  ;;  %v2606_v2 = vmul.f32 %v17489_v58, %v17331_v31 }
 0x2f6   : > { %17477 = vst [vmem:[#allocation132_spill] sm:$0xff] %v10522_v57  ;;  %17482 = vst [vmem:[#allocation160_spill] sm:$0xff] %v10533_v47  ;;  %v10541_v32 = vsel %vm924_vm2, %v17485_v51, %v2264_v46  ;;  %v10552_v6 = vsel %vm924_vm2, %v2235_v14, %v2237_v41  ;;  %v2578_v63 = vmul.f32 %v17487_v30, %v17391_v7  ;;  %v17491_v27 = vmov 0.0|0.0   ;;  %v17492_v51 = vld [vmem:[#allocation88_spill] sm:$0xff]  ;;  %v17505_v57 = vld [vmem:[#allocation194_spill] sm:$0xff] }
 0x2f7   : > { %17486 = vst [vmem:[#allocation138_spill] sm:$0xff] %v10541_v32  ;;  %17488 = vst [vmem:[#allocation162_spill] sm:$0xff] %v10552_v6  ;;  %v2635_v33 = vmul.f32 %v17490_v53, %v17331_v31  ;;  %7696 = vmatprep.subr.bf16.mxu1 %v17491_v27  ;;  %v1063_v34 = vadd.f32 %v10435_v0, %v939_v9  ;;  %v1099_v32 = vadd.f32 %v1088_v60, %v17492_v51  ;;  %v17494_v0 = vld [vmem:[#allocation64_spill] sm:$0xff] }
 0x2f8   : > { %v2266_v38 = vrot.slane %v2253_v20, 1  ;;  %v2589_v47 = vrot.slane %v2577_v28, 2  ;;  %7703 = vmatprep.subr.bf16.mxu0 %v17491_v27  ;;  %744 = vrot.lane.b32.xlu0 %v734_v5, %s16969_s2  ;;  %v2618_v14 = vrot.slane %v2606_v2, 2  ;;  %v2591_v41 = vrot.slane %v2578_v63, 2  ;;  %v17497_v20 = vld [vmem:[#allocation55_spill] sm:$0xff]  ;;  %v1201_v2 = vpop.permute.xlu1 %1200  ;;  %v17498_v63 = vld [vmem:[#allocation89_spill] sm:$0xff] }
 0x2f9   : > { %720 = vrot.lane.b32.xlu1 %v709_v42, %s16969_s2  ;;  %v2647_v30 = vrot.slane %v2635_v33, 2  ;;  %v2607_v6 = vmul.f32 %v17489_v58, %v17391_v7  ;;  %v17495_v9 = vrot.slane %v17494_v0, 2  ;;  %v2664_v28 = vmul.f32 %v17497_v20, %v17331_v31  ;;  %v1199_v42 = vpop.permute.xlu0 %1198 }
 0x2fa   : > { %v10569_v35 = vsel %vm924_vm2, %v2264_v46, %v2266_v38  ;;  %v2636_v5 = vmul.f32 %v17490_v53, %v17391_v7  ;;  %v17499_v33 = vrot.slane %v17498_v63, 2  ;;  %v10586_v46 = vsel %vm1337_vm3, %v2589_v47, %v2591_v41  ;;  %v17502_v38 = vld [vmem:[#allocation68_spill] sm:$0xff] }
 0x2fb   : > { %17493 = vst [vmem:[#allocation136_spill] sm:$0xff] %v10569_v35  ;;  %v10574_v60 = vsel %vm1337_vm3, %v17495_v9, %v2589_v47  ;;  %17501 = vst [vmem:[#allocation122_spill] sm:$0xff] %v10586_v46  ;;  %v17503_v27 = vrot.slane %v17502_v38, 2  ;;  %v2620_v0 = vrot.slane %v2607_v6, 2  ;;  %v1210_v9 = vadd.f32 %v1199_v42, %v1062_v3  ;;  %v17507_v6 = vld [vmem:[#allocation157_spill] sm:$0xff]  ;;  %v17513_v42 = vld [vmem:[#allocation26_spill] sm:$0xff] }
 0x2fc   : > { %17496 = vst [vmem:[#allocation28_spill] sm:$0xff] %v10574_v60  ;;  %v10583_v58 = vsel %vm1337_vm3, %v17499_v33, %v2618_v14  ;;  %v1211_v60 = vadd.f32 %v1201_v2, %v1063_v34  ;;  %v2676_v35 = vrot.slane %v2664_v28, 2  ;;  %v2649_v53 = vrot.slane %v2636_v5, 2  ;;  %770 = vrot.lane.b32.xlu0 %v10484_v1, %s16969_s2  ;;  %v17508_v34 = vld [vmem:[#allocation158_spill] sm:$0xff] }
 0x2fd   : > { %17500 = vst [vmem:[#allocation21_spill] sm:$0xff] %v10583_v58  ;;  %v10591_v51 = vsel %vm1337_vm3, %v17503_v27, %v2647_v30  ;;  %v1100_v25 = vadd.f32 %v10461_v61, %v17505_v57  ;;  %746 = vrot.lane.b32.xlu1 %v735_v49, %s16969_s2  ;;  %v10599_v47 = vsel %vm1337_vm3, %v2618_v14, %v2620_v0  ;;  %v17509_v5 = vld [vmem:[#allocation82_spill] sm:$0xff]  ;;  %v1236_v49 = vpop.permute.xlu0 %1235  ;;  %v1238_v14 = vpop.permute.xlu1 %1237  ;;  %v17516_v27 = vld [vmem:[#allocation200_spill] sm:$0xff]  ;;  %v10745_v58 = vstv %s10708_s26  ;;  %s7307_s26 = sld [smem:[#allocation2 + $0x3d]] }
 0x2fe   : > { %17504 = vst [vmem:[#allocation141_spill] sm:$0xff] %v10591_v51  ;;  %17506 = vst [vmem:[#allocation19_spill] sm:$0xff] %v10599_v47  ;;  %v2665_v41 = vmul.f32 %v17497_v20, %v17391_v7  ;;  %v10604_v3 = vadd.f32 %v17507_v6, %v1210_v9  ;;  %v10607_v28 = vadd.f32 %v17508_v34, %v1211_v60  ;;  %v17510_v57 = vrot.slane %v17509_v5, 2  ;;  %v17517_v9 = vld [vmem:[#allocation159_spill] sm:$0xff]  ;;  %v5528_v34 = vld [vmem:[%s10640_s16 + $0x8] sm:$0xff] }
 0x2ff   : > { %v10615_v1 = vsel %vm1337_vm3, %v2647_v30, %v2649_v53  ;;  %v786_v2 = vmul.f32 %v17513_v42, %v17460_v59  ;;  %v761_v7 = vmul.f32 %v17467_v21, %v17221_v40  ;;  %v1247_v63 = vadd.f32 %v1236_v49, %v1099_v32  ;;  %v17515_v30 = vld [vmem:[#allocation199_spill] sm:$0xff]  ;;  %v17518_v21 = vld [vmem:[#allocation161_spill] sm:$0xff]  ;;  %v17520_v49 = vld [vmem:[#allocation102_spill] sm:$0xff] }
 0x300   : > { %v10612_v61 = vsel %vm1337_vm3, %v17510_v57, %v2676_v35  ;;  %17512 = vst [vmem:[#allocation123_spill] sm:$0xff] %v10615_v1  ;;  %v2678_v20 = vrot.slane %v2665_v41, 2  ;;  %v1248_v60 = vadd.f32 %v1238_v14, %v1100_v25  ;;  %v1136_v38 = vadd.f32 %v10507_v43, %v17515_v30  ;;  %v17519_v43 = vld [vmem:[#allocation29_spill] sm:$0xff]  ;;  %v5527_v6 = vld [vmem:[%s10640_s16] sm:$0xff] }
 0x301   : > { %17511 = vst [vmem:[#allocation24_spill] sm:$0xff] %v10612_v61  ;;  %796 = vrot.lane.b32.xlu0 %v786_v2, %s16969_s2  ;;  %772 = vrot.lane.b32.xlu1 %v761_v7, %s16969_s2  ;;  %v1137_v0 = vadd.f32 %v10509_v17, %v17516_v27  ;;  %v10632_v53 = vadd.f32 %v17517_v9, %v1247_v63  ;;  %v1273_v25 = vpop.permute.xlu0 %1272  ;;  %v17521_v2 = vld [vmem:[#allocation150_spill] sm:$0xff]  ;;  %v17534_v1 = vld [vmem:[#allocation23_spill] sm:$0xff] }
 0x302   : > { %v10625_v33 = vsel %vm1337_vm3, %v2676_v35, %v2678_v20  ;;  %v10635_v32 = vadd.f32 %v17518_v21, %v1248_v60  ;;  %v1275_v35 = vpop.permute.xlu1 %1274  ;;  %v812_v41 = vmul.f32 %v17519_v43, %v17460_v59  ;;  %v787_v17 = vmul.f32 %v17513_v42, %v17221_v40  ;;  %7616 = vmatprep.mubr.msk.f32.mxu1 %vm477_vm0, %v5527_v6  ;;  %v17522_v20 = vld [vmem:[#allocation163_spill] sm:$0xff]  ;;  %v17523_v42 = vld [vmem:[#allocation42_spill] sm:$0xff] }
 0x303   : > { %17514 = vst [vmem:[#allocation140_spill] sm:$0xff] %v10625_v33  ;;  %v1284_v5 = vadd.f32 %v1273_v25, %v1136_v38  ;;  %v1285_v57 = vadd.f32 %v1275_v35, %v1137_v0  ;;  %v1173_v14 = vadd.f32 %v10547_v36, %v17520_v49  ;;  %v1174_v7 = vadd.f32 %v10549_v19, %v17521_v2  ;;  %v17524_v27 = vld [vmem:[#allocation30_spill] sm:$0xff]  ;;  %v17526_v25 = vld [vmem:[#allocation47_spill] sm:$0xff]  ;;  %v17529_v2 = vld [vmem:[#allocation37_spill] sm:$0xff] }
 0x304   : > { %7617 = vmatmul.mubr.msk.f32.vlgmr.msra.gmra.mrb[24].mxu1 %vm477_vm0, %v5528_v34  ;;  %v838_v0 = vmul.f32 %v17524_v27, %v17460_v59  ;;  %v813_v9 = vmul.f32 %v17519_v43, %v17221_v40  ;;  %v17525_v36 = vmov 0.0   ;;  %v17528_v43 = vld [vmem:[#allocation31_spill] sm:$0xff] }
 0x305   : > { %822 = vrot.lane.b32.xlu0 %v812_v41, %s7978_s8  ;;  %798 = vrot.lane.b32.xlu1 %v787_v17, %s16969_s2  ;;  %v10656_v63 = vadd.f32 %v17522_v20, %v1284_v5  ;;  %v10659_v60 = vadd.f32 %v17523_v42, %v1285_v57  ;;  %v1310_v30 = vpop.permute.xlu0 %1309  ;;  %v17527_v41 = vld [vmem:[#allocation49_spill] sm:$0xff]  ;;  %v864_v5 = vmul.f32 %v17528_v43, %v17460_v59 }
 0x306   : > { %v1312_v38 = vpop.permute.xlu1 %1311  ;;  %7623 = vmatprep.mubr.msk.f32.mxu1 %vm7975_vm1, %v17525_v36  ;;  %v1321_v19 = vadd.f32 %v1310_v30, %v1173_v14  ;;  %v839_v57 = vmul.f32 %v17524_v27, %v17221_v40  ;;  %v865_v20 = vmul.f32 %v17528_v43, %v17221_v40  ;;  %v7398_v42 = vld [vmem:[%s10640_s16 + $0x10] sm:$0xff]  ;;  %v7399_v30 = vld [vmem:[%s10640_s16 + $0x18] sm:$0xff]  ;;  %s7300_s16 = sld [smem:[#allocation2 + $0x5f]] }
 0x307   : > { %v1322_v21 = vadd.f32 %v1312_v38, %v1174_v7  ;;  %v890_v7 = vmul.f32 %v17529_v2, %v17460_v59  ;;  %7642 = vmatprep.mubr.msk.f32.mxu0 %vm477_vm0, %v7398_v42 }
 0x308   : > { %v10671_v35 = vadd.f32 %v17526_v25, %v1321_v19  ;;  %7643 = vmatmul.mubr.msk.f32.vlgmr.msra.gmra.mrb[24].mxu0 %vm477_vm0, %v7399_v30  ;;  %v891_v19 = vmul.f32 %v17529_v2, %v17221_v40  ;;  %v17532_v30 = vld [vmem:[#allocation41_spill] sm:$0xff] }
 0x309   : > { %848 = vrot.lane.b32.xlu0 %v838_v0, %s7978_s8  ;;  %824 = vrot.lane.b32.xlu1 %v813_v9, %s7978_s8  ;;  %v10674_v17 = vadd.f32 %v17527_v41, %v1322_v21  ;;  %v1464_v6 = vpop.permute.xlu0 %1463  ;;  %v17530_v0 = vld [vmem:[#allocation39_spill] sm:$0xff]  ;;  %v17531_v41 = vld [vmem:[#allocation40_spill] sm:$0xff]  ;;  %v2009_v51 = vmul.f32 %v17532_v30, %v17331_v31 }
 0x30a   : > { %v1466_v34 = vpop.permute.xlu1 %1465  ;;  %v1956_v9 = vmul.f32 %v17530_v0, %v17163_v44  ;;  %7649 = vmatprep.mubr.msk.f32.mxu0 %vm7975_vm1, %v17525_v36  ;;  %v1982_v43 = vmul.f32 %v17531_v41, %v17163_v44  ;;  %v1475_v2 = vadd.f32 %v1464_v6, %v10604_v3 }
 0x30d   : > { %874 = vrot.lane.b32.xlu0 %v864_v5, %s7978_s8  ;;  %850 = vrot.lane.b32.xlu1 %v839_v57, %s7978_s8  ;;  %v1501_v49 = vpop.permute.xlu0 %1500  ;;  %v1957_v5 = vmul.f32 %v17530_v0, %v17331_v31  ;;  %v10706_v57 = vstv %s7233_s4  ;;  %v1983_v0 = vmul.f32 %v17531_v41, %v17331_v31  ;;  %s7301_s4 = sld [smem:[#allocation2 + $0x83]] }
 0x30e   : > { %v1503_v14 = vpop.permute.xlu1 %1502  ;;  %v1915_v61 = vmul.f32 %v10706_v57, %v17534_v1  ;;  %v1512_v6 = vadd.f32 %v1501_v49, %v10632_v53  ;;  %v17537_v53 = vld [vmem:[#allocation151_spill] sm:$0xff] }
 0x311   : > { %900 = vrot.lane.b32.xlu0 %v890_v7, %s7978_s8  ;;  %876 = vrot.lane.b32.xlu1 %v865_v20, %s7978_s8  ;;  %v1538_v38 = vpop.permute.xlu0 %1537  ;;  %v1476_v7 = vadd.f32 %v1466_v34, %v10607_v28  ;;  %v10724_v28 = vstv %s7235_s15  ;;  %v1513_v34 = vadd.f32 %v1503_v14, %v10635_v32  ;;  %v17538_v32 = vld [vmem:[#allocation202_spill] sm:$0xff]  ;;  %s11236_s15 = sld [smem:[#allocation2 + $0x13]] }
 0x312   : > { %v1540_v27 = vpop.permute.xlu1 %1539  ;;  %17535 = vst [vmem:[#allocation126_spill] sm:$0xff] %v10724_v28 }
 0x315   : > { %1966 = vrot.lane.b32.xlu0 %v1956_v9, %s16969_s2  ;;  %902 = vrot.lane.b32.xlu1 %v891_v19, %s7978_s8  ;;  %v1575_v21 = vpop.permute.xlu0 %1574  ;;  %v2008_v9 = vmul.f32 %v17532_v30, %v17163_v44  ;;  %v10716_v19 = vstv %s7234_s14  ;;  %v10747_v30 = vpop.f32.mrb[14].mxu1  ;;  %s7306_s14 = sld [smem:[#allocation2 + $0x19]] }
 0x316   : > { %v1577_v25 = vpop.permute.xlu1 %1576 }
 0x319   : > { %1992 = vrot.lane.b32.xlu0 %v1982_v43, %s16969_s2  ;;  %1968 = vrot.lane.b32.xlu1 %v1957_v5, %s16969_s2  ;;  %v1612_v20 = vpop.permute.xlu0 %1611  ;;  %v17533_v43 = vld [vmem:[#allocation20_spill] sm:$0xff] }
 0x31a   : > { %v1614_v42 = vpop.permute.xlu1 %1613  ;;  %v1914_v5 = vmul.f32 %v10706_v57, %v17533_v43  ;;  %v1623_v33 = vadd.f32 %v1612_v20, %v1475_v2  ;;  %v1924_v2 = vmul.f32 %v10716_v19, %v17533_v43  ;;  %v1934_v46 = vmul.f32 %v10724_v28, %v17533_v43 }
 0x31b   : > { %v1624_v3 = vadd.f32 %v1614_v42, %v1476_v7  ;;  %v1925_v7 = vmul.f32 %v10716_v19, %v17534_v1 }
 0x31c   : > { %v1918_v41 = vadd.f32 %v1914_v5, %v1623_v33  ;;  %v1549_v5 = vadd.f32 %v1538_v38, %v10656_v63  ;;  %v7573_v63 = vpop.f32.mrb[15].mxu1 }
 0x31d   : > { %2018 = vrot.lane.b32.xlu0 %v2008_v9, %s16969_s2  ;;  %1994 = vrot.lane.b32.xlu1 %v1983_v0, %s16969_s2  ;;  %v1919_v47 = vadd.f32 %v1915_v61, %v1624_v3  ;;  %v1649_v20 = vpop.permute.xlu0 %1648  ;;  %v17536_v9 = vld [vmem:[#allocation43_spill] sm:$0xff]  ;;  %v1550_v3 = vadd.f32 %v1540_v27, %v10659_v60  ;;  %v1586_v60 = vadd.f32 %v1575_v21, %v10671_v35  ;;  %v17544_v35 = vld [vmem:[#allocation165_spill] sm:$0xff]  ;;  %v10765_v36 = vpop.f32.mrb[16].mxu1 }
 0x31e   : > { %v1651_v42 = vpop.permute.xlu1 %1650  ;;  %v2034_v0 = vmul.f32 %v17536_v9, %v17163_v44  ;;  %v1974_v49 = vadd.f32 %v17537_v53, %v1918_v41  ;;  %v1660_v61 = vadd.f32 %v1649_v20, %v1512_v6 }
 0x31f   : > { %v1975_v33 = vadd.f32 %v17538_v32, %v1919_v47  ;;  %v1661_v14 = vadd.f32 %v1651_v42, %v1513_v34  ;;  %v17539_v47 = vld [vmem:[#allocation79_spill] sm:$0xff]  ;;  %v17541_v42 = vld [vmem:[#allocation45_spill] sm:$0xff]  ;;  %v2035_v32 = vmul.f32 %v17536_v9, %v17331_v31 }
 0x320   : > { %v1928_v41 = vadd.f32 %v1924_v2, %v1660_v61  ;;  %v2078_v6 = vadd.f32 %v17539_v47, %v1974_v49  ;;  %v17540_v34 = vld [vmem:[#allocation67_spill] sm:$0xff]  ;;  %v17542_v2 = vld [vmem:[#allocation98_spill] sm:$0xff]  ;;  %v17543_v61 = vld [vmem:[#allocation100_spill] sm:$0xff]  ;;  %v1587_v47 = vadd.f32 %v1577_v25, %v10674_v17  ;;  %v1944_v17 = vmul.f32 %v10745_v58, %v17533_v43 }
 0x321   : > { %2044 = vrot.lane.b32.xlu0 %v2034_v0, %s16969_s2  ;;  %2020 = vrot.lane.b32.xlu1 %v2009_v51, %s16969_s2  ;;  %v1929_v53 = vadd.f32 %v1925_v7, %v1661_v14  ;;  %v2079_v20 = vadd.f32 %v17540_v34, %v1975_v33  ;;  %v1686_v38 = vpop.permute.xlu0 %1685  ;;  %v1935_v51 = vmul.f32 %v10724_v28, %v17534_v1  ;;  %v17545_v34 = vld [vmem:[#allocation166_spill] sm:$0xff]  ;;  %v17549_v43 = vld [vmem:[#allocation168_spill] sm:$0xff] }
 0x322   : > { %v1688_v27 = vpop.permute.xlu1 %1687  ;;  %v2060_v0 = vmul.f32 %v17541_v42, %v17163_v44  ;;  %v2000_v7 = vadd.f32 %v17542_v2, %v1928_v41  ;;  %v1697_v14 = vadd.f32 %v1686_v38, %v1549_v5  ;;  %v2185_v21 = vadd.f32 %v17544_v35, %v2078_v6  ;;  %v7576_v5 = vpop.f32.mrb[17].mxu1  ;;  %v17546_v6 = vld [vmem:[#allocation46_spill] sm:$0xff]  ;;  %v17551_v35 = vld [vmem:[#allocation52_spill] sm:$0xff] }
 0x323   : > { %v2001_v49 = vadd.f32 %v17543_v61, %v1929_v53  ;;  %v1698_v33 = vadd.f32 %v1688_v27, %v1550_v3  ;;  %v2186_v63 = vadd.f32 %v17545_v34, %v2079_v20  ;;  %v1945_v3 = vmul.f32 %v10745_v58, %v17534_v1  ;;  %v17550_v1 = vld [vmem:[#allocation169_spill] sm:$0xff]  ;;  %v17552_v34 = vld [vmem:[#allocation71_spill] sm:$0xff]  ;;  %v17553_v5 = vld [vmem:[#allocation72_spill] sm:$0xff] }
 0x324   : > { %v1938_v28 = vadd.f32 %v1934_v46, %v1697_v14  ;;  %v2104_v41 = vadd.f32 %v10238_v23, %v2000_v7  ;;  %v2086_v20 = vmul.f32 %v17546_v6, %v17163_v44  ;;  %v2061_v46 = vmul.f32 %v17541_v42, %v17331_v31  ;;  %v17548_v23 = vld [vmem:[#allocation66_spill] sm:$0xff] }
 0x325   : > { %2070 = vrot.lane.b32.xlu0 %v2060_v0, %s7978_s8  ;;  %2046 = vrot.lane.b32.xlu1 %v2035_v32, %s16969_s2  ;;  %v1939_v9 = vadd.f32 %v1935_v51, %v1698_v33  ;;  %v2105_v53 = vadd.f32 %v10240_v16, %v2001_v49  ;;  %v1723_v25 = vpop.permute.xlu0 %1722  ;;  %v17547_v51 = vld [vmem:[#allocation36_spill] sm:$0xff] }
 0x326   : > { %v1725_v38 = vpop.permute.xlu1 %1724  ;;  %v2026_v27 = vadd.f32 %v17547_v51, %v1938_v28  ;;  %v1734_v16 = vadd.f32 %v1723_v25, %v1586_v60  ;;  %v2214_v2 = vadd.f32 %v17549_v43, %v2104_v41  ;;  %v2112_v60 = vmul.f32 %v17551_v35, %v17163_v44  ;;  %v17559_v43 = vld [vmem:[#allocation80_spill] sm:$0xff] }
 0x327   : > { %v2027_v0 = vadd.f32 %v17548_v23, %v1939_v9  ;;  %v1735_v32 = vadd.f32 %v1725_v38, %v1587_v47  ;;  %v2215_v7 = vadd.f32 %v17550_v1, %v2105_v53  ;;  %v2087_v47 = vmul.f32 %v17546_v6, %v17331_v31  ;;  %v17554_v53 = vld [vmem:[#allocation54_spill] sm:$0xff]  ;;  %v17556_v6 = vld [vmem:[#allocation53_spill] sm:$0xff] }
 0x328   : > { %v1948_v61 = vadd.f32 %v1944_v17, %v1734_v16  ;;  %v2130_v14 = vadd.f32 %v10300_v12, %v2026_v27  ;;  %v17555_v17 = vld [vmem:[#allocation58_spill] sm:$0xff]  ;;  %v2113_v51 = vmul.f32 %v17551_v35, %v17331_v31  ;;  %v17557_v27 = vld [vmem:[#allocation172_spill] sm:$0xff]  ;;  %v17560_v1 = vrot.slane %v17559_v43, 1  ;;  %v17571_v43 = vld [vmem:[#allocation119_spill] sm:$0xff] }
 0x329   : > { %2096 = vrot.lane.b32.xlu0 %v2086_v20, %s7978_s8  ;;  %2072 = vrot.lane.b32.xlu1 %v2061_v46, %s7978_s8  ;;  %v1949_v49 = vadd.f32 %v1945_v3, %v1735_v32  ;;  %v2131_v42 = vadd.f32 %v10302_v13, %v2027_v0  ;;  %v2298_v33 = vpop.permute.xlu0 %2297  ;;  %v2138_v46 = vmul.f32 %v17556_v6, %v17163_v44  ;;  %v17558_v0 = vld [vmem:[#allocation173_spill] sm:$0xff] }
 0x32a   : > { %v2300_v28 = vpop.permute.xlu1 %2299  ;;  %v2052_v9 = vadd.f32 %v17552_v34, %v1948_v61  ;;  %v2243_v12 = vadd.f32 %v17554_v53, %v2130_v14  ;;  %v17561_v61 = vld [vmem:[#allocation109_spill] sm:$0xff]  ;;  %v17565_v34 = vld [vmem:[#allocation115_spill] sm:$0xff] }
 0x32b   : > { %v2053_v41 = vadd.f32 %v17553_v5, %v1949_v49  ;;  %v2244_v13 = vadd.f32 %v17555_v17, %v2131_v42  ;;  %v17562_v49 = vrot.slane %v17561_v61, 1  ;;  %v17568_v53 = vld [vmem:[#allocation75_spill] sm:$0xff] }
 0x32c   : > { %v2156_v25 = vadd.f32 %v10353_v24, %v2052_v9  ;;  %v17566_v9 = vrot.slane %v17565_v34, 1 }
 0x32d   : > { %2122 = vrot.lane.b32.xlu0 %v2112_v60, %s7978_s8  ;;  %2098 = vrot.lane.b32.xlu1 %v2087_v47, %s7978_s8  ;;  %v2157_v3 = vadd.f32 %v10355_v4, %v2053_v41  ;;  %v2335_v38 = vpop.permute.xlu0 %2334  ;;  %v2139_v4 = vmul.f32 %v17556_v6, %v17331_v31  ;;  %v1047_v14 = vsel %vm924_vm2, %v17562_v49, %v17560_v1  ;;  %v17563_v60 = vld [vmem:[#allocation85_spill] sm:$0xff]  ;;  %v10819_v41 = vpop.f32.mrb[18].mxu1  ;;  %v17572_v1 = vrot.slane %v17571_v43, 1  ;;  %v17573_v49 = vld [vmem:[#allocation178_spill] sm:$0xff] }
 0x32e   : > { %v2337_v20 = vpop.permute.xlu1 %2336  ;;  %v2272_v23 = vadd.f32 %v17557_v27, %v2156_v25  ;;  %v17564_v47 = vrot.slane %v17563_v60, 1  ;;  %17567 = vst [vmem:[#allocation144_spill] sm:$0xff] %v10819_v41  ;;  %v7579_v17 = vpop.f32.mrb[19].mxu1  ;;  %v2309_v25 = vadd.f32 %v2298_v33, %v2185_v21 }
 0x32f   : > { %v2273_v16 = vadd.f32 %v17558_v0, %v2157_v3  ;;  %v2310_v3 = vadd.f32 %v2300_v28, %v2186_v63  ;;  %v17569_v0 = vld [vmem:[#allocation59_spill] sm:$0xff]  ;;  %v2347_v60 = vadd.f32 %v2337_v20, %v2215_v7 }
 0x330   : > { %v1084_v5 = vsel %vm924_vm2, %v17566_v9, %v17564_v47  ;;  %v17574_v47 = vld [vmem:[#allocation25_spill] sm:$0xff]  ;;  %v17575_v63 = vld [vmem:[#allocation27_spill] sm:$0xff] }
 0x331   : > { %2148 = vrot.lane.b32.xlu0 %v2138_v46, %s7978_s8  ;;  %2124 = vrot.lane.b32.xlu1 %v2113_v51, %s7978_s8  ;;  %v2372_v32 = vpop.permute.xlu0 %2371 }
 0x332   : > { %v2374_v24 = vpop.permute.xlu1 %2373 }
 0x333   : > { %v2384_v7 = vadd.f32 %v2374_v24, %v2244_v13 }
 0x335   : > { %1054 = vrot.lane.b32.xlu0 %v1047_v14, %s16969_s2  ;;  %2150 = vrot.lane.b32.xlu1 %v2139_v4, %s7978_s8  ;;  %v2409_v42 = vpop.permute.xlu0 %2408  ;;  %v17570_v4 = vrot.slane %v17569_v0, 1  ;;  %v2346_v14 = vadd.f32 %v2335_v38, %v2214_v2  ;;  %v2383_v2 = vadd.f32 %v2372_v32, %v2243_v12  ;;  %v17581_v38 = vld [vmem:[#allocation175_spill] sm:$0xff]  ;;  %v17588_v32 = vld [vmem:[#allocation73_spill] sm:$0xff] }
 0x336   : > { %v2411_v35 = vpop.permute.xlu1 %2410  ;;  %v2420_v12 = vadd.f32 %v2409_v42, %v2272_v23  ;;  %v17594_v23 = vld [vmem:[#allocation181_spill] sm:$0xff] }
 0x337   : > { %v1121_v61 = vsel %vm924_vm2, %v17572_v1, %v17570_v4  ;;  %v2421_v13 = vadd.f32 %v2411_v35, %v2273_v16  ;;  %v17595_v16 = vld [vmem:[#allocation83_spill] sm:$0xff]  ;;  %v17596_v35 = vld [vmem:[#allocation188_spill] sm:$0xff] }
 0x339   : > { %1091 = vrot.lane.b32.xlu0 %v1084_v5, %s16969_s2  ;;  %1056 = vrot.lane.b32.xlu1 %v17568_v53, %s16969_s2  ;;  %v2446_v6 = vpop.permute.xlu0 %2445  ;;  %v17576_v53 = vld [vmem:[#allocation35_spill] sm:$0xff] }
 0x33a   : > { %v2448_v46 = vpop.permute.xlu1 %2447  ;;  %v2457_v51 = vadd.f32 %v2446_v6, %v2309_v25  ;;  %v17577_v17 = vrot.slane %v17576_v53, 1  ;;  %v17578_v25 = vld [vmem:[#allocation127_spill] sm:$0xff] }
 0x33b   : > { %v2458_v27 = vadd.f32 %v2448_v46, %v2310_v3  ;;  %v17579_v3 = vrot.slane %v17578_v25, 1  ;;  %v17580_v46 = vld [vmem:[#allocation179_spill] sm:$0xff]  ;;  %v17590_v25 = vld [vmem:[#allocation34_spill] sm:$0xff] }
 0x33c   : > { %v2597_v21 = vadd.f32 %v17574_v47, %v2457_v51  ;;  %v17582_v51 = vld [vmem:[#allocation176_spill] sm:$0xff] }
 0x33d   : > { %1128 = vrot.lane.b32.xlu0 %v1121_v61, %s16969_s2  ;;  %1093 = vrot.lane.b32.xlu1 %v17573_v49, %s16969_s2  ;;  %v2598_v33 = vadd.f32 %v17575_v63, %v2458_v27  ;;  %v2483_v28 = vpop.permute.xlu0 %2482  ;;  %v1158_v6 = vsel %vm924_vm2, %v17579_v3, %v17577_v17  ;;  %v17583_v61 = vld [vmem:[#allocation33_spill] sm:$0xff]  ;;  %v17587_v63 = vld [vmem:[#allocation180_spill] sm:$0xff]  ;;  %v17591_v3 = vrot.slane %v17590_v25, 1 }
 0x33e   : > { %v2485_v34 = vpop.permute.xlu1 %2484  ;;  %v2494_v9 = vadd.f32 %v2483_v28, %v2346_v14  ;;  %v17584_v49 = vrot.slane %v17583_v61, 1  ;;  %v17585_v14 = vld [vmem:[#allocation130_spill] sm:$0xff]  ;;  %v17609_v25 = vld [vmem:[#allocation145_spill] sm:$0xff] }
 0x33f   : > { %v2495_v5 = vadd.f32 %v2485_v34, %v2347_v60  ;;  %v17586_v60 = vrot.slane %v17585_v14, 1  ;;  %v17589_v28 = vld [vmem:[#allocation182_spill] sm:$0xff] }
 0x340   : > { %v2626_v20 = vadd.f32 %v17581_v38, %v2494_v9 }
 0x341   : > { %1165 = vrot.lane.b32.xlu0 %v1158_v6, %s16969_s2  ;;  %1130 = vrot.lane.b32.xlu1 %v17580_v46, %s16969_s2  ;;  %v2627_v27 = vadd.f32 %v17582_v51, %v2495_v5  ;;  %v2520_v0 = vpop.permute.xlu0 %2519  ;;  %v1195_v47 = vsel %vm924_vm2, %v17586_v60, %v17584_v49  ;;  %v17592_v6 = vld [vmem:[#allocation134_spill] sm:$0xff]  ;;  %v17601_v49 = vld [vmem:[#allocation183_spill] sm:$0xff] }
 0x342   : > { %v2522_v4 = vpop.permute.xlu1 %2521  ;;  %v2531_v43 = vadd.f32 %v2520_v0, %v2383_v2  ;;  %v17593_v46 = vrot.slane %v17592_v6, 1  ;;  %v17597_v0 = vld [vmem:[#allocation177_spill] sm:$0xff] }
 0x343   : > { %v2532_v1 = vadd.f32 %v2522_v4, %v2384_v7  ;;  %v17598_v4 = vrot.slane %v17597_v0, 1 }
 0x344   : > { %v10853_v24 = vadd.f32 %v17588_v32, %v2531_v43  ;;  %v1232_v2 = vsel %vm924_vm2, %v17593_v46, %v17591_v3  ;;  %v17599_v43 = vld [vmem:[#allocation137_spill] sm:$0xff]  ;;  %v17610_v3 = vrot.slane %v17609_v25, 2  ;;  %v17611_v46 = vld [vmem:[#allocation187_spill] sm:$0xff] }
 0x345   : > { %1202 = vrot.lane.b32.xlu0 %v1195_v47, %s7978_s8  ;;  %1167 = vrot.lane.b32.xlu1 %v17587_v63, %s16969_s2  ;;  %v10856_v34 = vadd.f32 %v17589_v28, %v2532_v1  ;;  %v2557_v9 = vpop.permute.xlu0 %2556  ;;  %v17600_v1 = vrot.slane %v17599_v43, 1  ;;  %v17602_v47 = vld [vmem:[#allocation38_spill] sm:$0xff]  ;;  %v17606_v28 = vld [vmem:[#allocation184_spill] sm:$0xff] }
 0x346   : > { %v2559_v5 = vpop.permute.xlu1 %2558  ;;  %v2568_v53 = vadd.f32 %v2557_v9, %v2420_v12  ;;  %v17603_v63 = vrot.slane %v17602_v47, 1  ;;  %v17604_v12 = vld [vmem:[#allocation142_spill] sm:$0xff] }
 0x347   : > { %v2569_v17 = vadd.f32 %v2559_v5, %v2421_v13  ;;  %v1269_v61 = vsel %vm924_vm2, %v17600_v1, %v17598_v4  ;;  %v17605_v13 = vrot.slane %v17604_v12, 1  ;;  %v17615_v4 = vld [vmem:[#allocation152_spill] sm:$0xff] }
 0x348   : > { %v10867_v42 = vadd.f32 %v17595_v16, %v2568_v53  ;;  %v17607_v53 = vld [vmem:[#allocation185_spill] sm:$0xff]  ;;  %v10896_v16 = vstv %s7278_s29  ;;  %v17616_v43 = vrot.slane %v17615_v4, 2  ;;  %s11257_s29 = sld [smem:[#allocation2 + $0x37]] }
 0x349   : > { %1239 = vrot.lane.b32.xlu0 %v1232_v2, %s7978_s8  ;;  %1204 = vrot.lane.b32.xlu1 %v17594_v23, %s7978_s8  ;;  %v10870_v7 = vadd.f32 %v17596_v35, %v2569_v17  ;;  %v2710_v38 = vpop.permute.xlu0 %2709  ;;  %v1306_v32 = vsel %vm924_vm2, %v17605_v13, %v17603_v63  ;;  %v17608_v17 = vrot.slane %v17607_v53, 2  ;;  %17612 = vst [vmem:[#allocation65_spill] sm:$0xff] %v10896_v16  ;;  %v17613_v35 = vld [vmem:[#allocation186_spill] sm:$0xff]  ;;  %v10906_v63 = vpop.f32.mrb[14].mxu0  ;;  %v10912_v53 = vstv %s7279_s12  ;;  %s11259_s12 = sld [smem:[#allocation2 + $0x5b]] }
 0x34a   : > { %v2712_v51 = vpop.permute.xlu1 %2711  ;;  %v17614_v0 = vrot.slane %v17613_v35, 2  ;;  %v3160_v12 = vmul.f32 %v10896_v16, %v10747_v30  ;;  %v3161_v13 = vmul.f32 %v10896_v16, %v10765_v36  ;;  %17618 = vst [vmem:[#allocation164_spill] sm:$0xff] %v10912_v53 }
 0x34b   : > { %v1460_v6 = vsel %vm1337_vm3, %v17610_v3, %v17608_v17  ;;  %v2722_v47 = vadd.f32 %v2712_v51, %v2598_v33  ;;  %v17619_v3 = vld [vmem:[#allocation189_spill] sm:$0xff]  ;;  %v7599_v51 = vpop.f32.mrb[15].mxu0 }
 0x34c   : > { %v1497_v1 = vsel %vm1337_vm3, %v17616_v43, %v17614_v0  ;;  %v17623_v0 = vld [vmem:[#allocation193_spill] sm:$0xff]  ;;  %v10924_v4 = vpop.f32.mrb[16].mxu0 }
 0x34d   : > { %1276 = vrot.lane.b32.xlu0 %v1269_v61, %s7978_s8  ;;  %1241 = vrot.lane.b32.xlu1 %v17601_v49, %s7978_s8  ;;  %v2747_v14 = vpop.permute.xlu0 %2746  ;;  %v17617_v61 = vld [vmem:[#allocation191_spill] sm:$0xff]  ;;  %v2721_v49 = vadd.f32 %v2710_v38, %v2597_v21  ;;  %v17621_v21 = vld [vmem:[#allocation153_spill] sm:$0xff] }
 0x34e   : > { %v2749_v60 = vpop.permute.xlu1 %2748  ;;  %v17622_v33 = vrot.slane %v17621_v21, 2  ;;  %v17631_v21 = vld [vmem:[#allocation195_spill] sm:$0xff] }
 0x34f   : > { %v2759_v35 = vadd.f32 %v2749_v60, %v2627_v27  ;;  %v10934_v27 = vstv %s7280_s0  ;;  %s11262_s0 = sld [smem:[#allocation2 + $0x7f]] }
 0x350   : > { %17626 = vst [vmem:[#allocation171_spill] sm:$0xff] %v10934_v27  ;;  %v3180_v51 = vmul.f32 %v10934_v27, %v10747_v30 }
 0x351   : > { %1313 = vrot.lane.b32.xlu0 %v1306_v32, %s7978_s8  ;;  %1278 = vrot.lane.b32.xlu1 %v17606_v28, %s7978_s8  ;;  %v2784_v9 = vpop.permute.xlu0 %2783 }
 0x352   : > { %v2786_v5 = vpop.permute.xlu1 %2785 }
 0x355   : > { %1467 = vrot.lane.b32.xlu0 %v1460_v6, %s16969_s2  ;;  %1315 = vrot.lane.b32.xlu1 %v17611_v46, %s7978_s8  ;;  %v2821_v2 = vpop.permute.xlu0 %2820  ;;  %v17620_v6 = vrot.slane %v17619_v3, 2  ;;  %v2758_v46 = vadd.f32 %v2747_v14, %v2626_v20  ;;  %v17629_v3 = vld [vmem:[#allocation155_spill] sm:$0xff] }
 0x356   : > { %v2823_v23 = vpop.permute.xlu1 %2822 }
 0x357   : > { %v1534_v38 = vsel %vm1337_vm3, %v17622_v33, %v17620_v6  ;;  %v7602_v6 = vpop.f32.mrb[17].mxu0 }
 0x358   : > { %v10946_v33 = vpop.f32.mrb[18].mxu0 }
 0x359   : > { %1504 = vrot.lane.b32.xlu0 %v1497_v1, %s16969_s2  ;;  %1469 = vrot.lane.b32.xlu1 %v17617_v61, %s16969_s2  ;;  %v2858_v32 = vpop.permute.xlu0 %2857  ;;  %v3170_v1 = vmul.f32 %v10912_v53, %v10747_v30  ;;  %17632 = vst [vmem:[#allocation147_spill] sm:$0xff] %v10946_v33  ;;  %v17753_v33 = vld [vmem:[#allocation91_spill] sm:$0xff] }
 0x35a   : > { %v2860_v28 = vpop.permute.xlu1 %2859  ;;  %v2869_v17 = vadd.f32 %v2858_v32, %v2721_v49  ;;  %v3171_v49 = vmul.f32 %v10912_v53, %v10765_v36  ;;  %v17627_v32 = vld [vmem:[#allocation190_spill] sm:$0xff]  ;;  %v17741_v53 = vld [vmem:[#allocation87_spill] sm:$0xff] }
 0x35b   : > { %v2870_v25 = vadd.f32 %v2860_v28, %v2722_v47  ;;  %v17628_v28 = vrot.slane %v17627_v32, 2  ;;  %v17638_v32 = vld [vmem:[#allocation50_spill] sm:$0xff]  ;;  %v17742_v16 = vrot.slane %v17741_v53, 2 }
 0x35c   : > { %v10926_v43 = vadd.f32 %v3160_v12, %v2869_v17  ;;  %v17630_v12 = vrot.slane %v17629_v3, 2  ;;  %v2832_v3 = vadd.f32 %v2821_v2, %v10867_v42 }
 0x35d   : > { %1541 = vrot.lane.b32.xlu0 %v1534_v38, %s16969_s2  ;;  %1506 = vrot.lane.b32.xlu1 %v17623_v0, %s16969_s2  ;;  %v10930_v61 = vadd.f32 %v3161_v13, %v2870_v25  ;;  %v2895_v47 = vpop.permute.xlu0 %2894  ;;  %v2795_v13 = vadd.f32 %v2784_v9, %v10853_v24  ;;  %v2796_v25 = vadd.f32 %v2786_v5, %v10856_v34  ;;  %v10957_v34 = vstv %s10914_s22  ;;  %s11270_s22 = sld [smem:[#allocation2 + $0x14]] }
 0x35e   : > { %17624 = vst [vmem:[#allocation146_spill] sm:$0xff] %v10926_v43  ;;  %v2897_v20 = vpop.permute.xlu1 %2896  ;;  %v2906_v14 = vadd.f32 %v2895_v47, %v2758_v46  ;;  %v1571_v17 = vsel %vm1337_vm3, %v17630_v12, %v17628_v28  ;;  %17635 = vst [vmem:[#allocation88_spill] sm:$0xff] %v10957_v34  ;;  %v17636_v47 = vld [vmem:[#allocation192_spill] sm:$0xff]  ;;  %v17639_v28 = vrot.slane %v17638_v32, 2  ;;  %v17650_v32 = vld [vmem:[#allocation198_spill] sm:$0xff] }
 0x35f   : > { %17625 = vst [vmem:[#allocation170_spill] sm:$0xff] %v10930_v61  ;;  %v2907_v60 = vadd.f32 %v2897_v20, %v2759_v35  ;;  %v3181_v35 = vmul.f32 %v10934_v27, %v10765_v36  ;;  %v17637_v20 = vrot.slane %v17636_v47, 2 }
 0x360   : > { %v10948_v38 = vadd.f32 %v3170_v1, %v2906_v14  ;;  %v7605_v14 = vpop.f32.mrb[19].mxu0 }
 0x361   : > { %1578 = vrot.lane.b32.xlu0 %v1571_v17, %s16969_s2  ;;  %1543 = vrot.lane.b32.xlu1 %v17631_v21, %s16969_s2  ;;  %v10952_v46 = vadd.f32 %v3171_v49, %v2907_v60  ;;  %v2932_v24 = vpop.permute.xlu0 %2931  ;;  %v1608_v1 = vsel %vm1337_vm3, %v17639_v28, %v17637_v20  ;;  %v2833_v49 = vadd.f32 %v2823_v23, %v10870_v7  ;;  %v17640_v60 = vld [vmem:[#allocation197_spill] sm:$0xff]  ;;  %v17643_v7 = vld [vmem:[#allocation196_spill] sm:$0xff]  ;;  %v17651_v28 = vrot.slane %v17650_v32, 2  ;;  %v17662_v32 = vld [vmem:[#allocation62_spill] sm:$0xff] }
 0x362   : > { %17633 = vst [vmem:[#allocation148_spill] sm:$0xff] %v10948_v38  ;;  %v2934_v9 = vpop.permute.xlu1 %2933  ;;  %v2943_v5 = vadd.f32 %v2932_v24, %v2795_v13  ;;  %v3190_v17 = vmul.f32 %v10957_v34, %v10747_v30  ;;  %v3191_v13 = vmul.f32 %v10957_v34, %v10765_v36  ;;  %v17644_v23 = vrot.slane %v17643_v7, 2  ;;  %v17645_v24 = vld [vmem:[#allocation51_spill] sm:$0xff]  ;;  %v17733_v34 = vld [vmem:[#allocation94_spill] sm:$0xff] }
 0x363   : > { %17634 = vst [vmem:[#allocation149_spill] sm:$0xff] %v10952_v46  ;;  %v2944_v0 = vadd.f32 %v2934_v9, %v2796_v25  ;;  %v17646_v9 = vrot.slane %v17645_v24, 2  ;;  %v17659_v7 = vld [vmem:[#allocation203_spill] sm:$0xff]  ;;  %v17723_v46 = vld [vmem:[#allocation129_spill] sm:$0xff] }
 0x364   : > { %v10969_v12 = vadd.f32 %v3180_v51, %v2943_v5  ;;  %v17647_v51 = vld [vmem:[#allocation93_spill] sm:$0xff] }
 0x365   : > { %1615 = vrot.lane.b32.xlu0 %v1608_v1, %s7978_s8  ;;  %1580 = vrot.lane.b32.xlu1 %v17640_v60, %s16969_s2  ;;  %v10973_v6 = vadd.f32 %v3181_v35, %v2944_v0  ;;  %v2969_v25 = vpop.permute.xlu0 %2968  ;;  %v1645_v47 = vsel %vm1337_vm3, %v17646_v9, %v17644_v23  ;;  %v17652_v1 = vld [vmem:[#allocation56_spill] sm:$0xff]  ;;  %v17660_v9 = vld [vmem:[#allocation57_spill] sm:$0xff] }
 0x366   : > { %17641 = vst [vmem:[#allocation64_spill] sm:$0xff] %v10969_v12  ;;  %v2971_v21 = vpop.permute.xlu1 %2970  ;;  %v2980_v42 = vadd.f32 %v2969_v25, %v2832_v3  ;;  %v17653_v14 = vrot.slane %v17652_v1, 2  ;;  %v11230_v12 = vstv %s7301_s4  ;;  %s11427_s4 = sld [smem:[#allocation2 + $0x3e]] }
 0x367   : > { %17642 = vst [vmem:[#allocation55_spill] sm:$0xff] %v10973_v6  ;;  %v2981_v2 = vadd.f32 %v2971_v21, %v2833_v49  ;;  %v17654_v49 = vld [vmem:[#allocation69_spill] sm:$0xff]  ;;  %17724 = vst [vmem:[#allocation43_spill] sm:$0xff] %v11230_v12 }
 0x368   : > { %v10985_v35 = vadd.f32 %v3190_v17, %v2980_v42  ;;  %v1682_v3 = vsel %vm1337_vm3, %v17653_v14, %v17651_v28  ;;  %v17655_v21 = vld [vmem:[#allocation201_spill] sm:$0xff]  ;;  %v17657_v42 = vld [vmem:[#allocation44_spill] sm:$0xff]  ;;  %v17663_v28 = vrot.slane %v17662_v32, 1  ;;  %v11012_v14 = vpop.f32.mrb[20].mxu1 }
 0x369   : > { %1652 = vrot.lane.b32.xlu0 %v1645_v47, %s7978_s8  ;;  %1617 = vrot.lane.b32.xlu1 %v17647_v51, %s7978_s8  ;;  %v10987_v5 = vadd.f32 %v3191_v13, %v2981_v2  ;;  %v17656_v17 = vrot.slane %v17655_v21, 2  ;;  %v17658_v13 = vrot.slane %v17657_v42, 2  ;;  %v668_v47 = vmul.f32 %v17660_v9, %v17460_v59  ;;  %17664 = vst [vmem:[#allocation194_spill] sm:$0xff] %v11012_v14  ;;  %v17668_v32 = vld [vmem:[#allocation32_spill] sm:$0xff] }
 0x36a   : > { %17648 = vst [vmem:[#allocation89_spill] sm:$0xff] %v10985_v35  ;;  %v745_v0 = vpop.permute.xlu0 %744  ;;  %v17661_v51 = vrot.slane %v10037_v48, 1  ;;  %v17666_v48 = vld [vmem:[#allocation60_spill] sm:$0xff] }
 0x36b   : > { %17649 = vst [vmem:[#allocation68_spill] sm:$0xff] %v10987_v5  ;;  %v721_v20 = vpop.permute.xlu1 %720  ;;  %v1719_v2 = vsel %vm1337_vm3, %v17658_v13, %v17656_v17  ;;  %v728_v21 = vadd.f32 %v10384_v54, %v668_v47  ;;  %v678_v13 = vmul.f32 %v17666_v48, %v17460_v59  ;;  %v11035_v5 = vstv %s7294_s9  ;;  %s11305_s9 = sld [smem:[#allocation2 + $0x61]] }
 0x36c   : > { %v2294_v1 = vsel %vm924_vm2, %v17663_v28, %v17661_v51  ;;  %v17667_v51 = vrot.slane %v10046_v15, 1  ;;  %v17669_v28 = vrot.slane %v17668_v32, 1  ;;  %17671 = vst [vmem:[#allocation157_spill] sm:$0xff] %v11035_v5  ;;  %v11043_v32 = vmul.f32 %v11035_v5, %v10765_v36 }
 0x36d   : > { %1689 = vrot.lane.b32.xlu0 %v1682_v3, %s7978_s8  ;;  %1654 = vrot.lane.b32.xlu1 %v17654_v49, %s7978_s8  ;;  %v17665_v3 = vld [vmem:[#allocation99_spill] sm:$0xff]  ;;  %v7582_v49 = vpop.f32.mrb[21].mxu1  ;;  %v754_v54 = vadd.f32 %v745_v0, %v678_v13  ;;  %v17673_v13 = vrot.slane %v10086_v11, 1 }
 0x36e   : > { %v771_v60 = vpop.permute.xlu0 %770  ;;  %v16577_v6 = vrot.slane %v11043_v32, 1 }
 0x36f   : > { %v747_v25 = vpop.permute.xlu1 %746 }
 0x371   : > { %1726 = vrot.lane.b32.xlu0 %v1719_v2, %s7978_s8  ;;  %1691 = vrot.lane.b32.xlu1 %v17659_v7, %s7978_s8  ;;  %v669_v2 = vmul.f32 %v17660_v9, %v17221_v40  ;;  %v17672_v9 = vld [vmem:[#allocation61_spill] sm:$0xff] }
 0x372   : > { %v688_v15 = vmul.f32 %v17672_v9, %v17460_v59 }
 0x373   : > { %v797_v23 = vpop.permute.xlu0 %796  ;;  %v773_v24 = vpop.permute.xlu1 %772  ;;  %v729_v47 = vadd.f32 %v721_v20, %v669_v2  ;;  %v17674_v2 = vld [vmem:[#allocation48_spill] sm:$0xff] }
 0x375   : > { %2301 = vrot.lane.b32.xlu0 %v2294_v1, %s16969_s2  ;;  %1728 = vrot.lane.b32.xlu1 %v17665_v3, %s7978_s8  ;;  %v2331_v1 = vsel %vm924_vm2, %v17669_v28, %v17667_v51  ;;  %v17670_v3 = vld [vmem:[#allocation77_spill] sm:$0xff]  ;;  %v3524_v51 = vmul.f32 %v11035_v5, %v10747_v30 }
 0x377   : > { %v823_v17 = vpop.permute.xlu0 %822  ;;  %v11018_v42 = vpop.permute.xlu1 %798 }
 0x378   : > { %v832_v7 = vadd.f32 %v823_v17, %v728_v21 }
 0x379   : > { %2338 = vrot.lane.b32.xlu0 %v2331_v1, %s16969_s2  ;;  %2303 = vrot.lane.b32.xlu1 %v10245_v10, %s16969_s2  ;;  %v679_v10 = vmul.f32 %v17666_v48, %v17221_v40  ;;  %v780_v1 = vadd.f32 %v771_v60, %v688_v15  ;;  %v17676_v48 = vld [vmem:[#allocation125_spill] sm:$0xff] }
 0x37a   : > { %v11033_v49 = vadd.f32 %v17670_v3, %v832_v7  ;;  %v17675_v7 = vrot.slane %v17674_v2, 1  ;;  %v3534_v3 = vrot.slane %v3524_v51, 1  ;;  %v17682_v2 = vld [vmem:[#allocation167_spill] sm:$0xff] }
 0x37b   : > { %v849_v21 = vpop.permute.xlu0 %848  ;;  %v825_v17 = vpop.permute.xlu1 %824  ;;  %v755_v35 = vadd.f32 %v747_v25, %v679_v10  ;;  %v689_v10 = vmul.f32 %v17672_v9, %v17221_v40 }
 0x37c   : > { %v858_v0 = vadd.f32 %v849_v21, %v754_v54  ;;  %v833_v20 = vadd.f32 %v825_v17, %v729_v47  ;;  %v2368_v28 = vsel %vm924_vm2, %v17675_v7, %v17673_v13  ;;  %v17677_v47 = vld [vmem:[#allocation111_spill] sm:$0xff]  ;;  %v11062_v21 = vstv %s7295_s30  ;;  %s11324_s30 = sld [smem:[#allocation2 + $0x38]] }
 0x37d   : > { %2375 = vrot.lane.b32.xlu0 %v2368_v28, %s16969_s2  ;;  %2340 = vrot.lane.b32.xlu1 %v10250_v39, %s16969_s2  ;;  %17678 = vst [vmem:[#allocation158_spill] sm:$0xff] %v11062_v21  ;;  %v17679_v17 = vld [vmem:[#allocation63_spill] sm:$0xff]  ;;  %v11069_v39 = vsel %vm924_vm2, %v3534_v3, %v16577_v6  ;;  %v3561_v25 = vmul.f32 %v11062_v21, %v10747_v30  ;;  %v17683_v7 = vrot.slane %v17682_v2, 1 }
 0x37e   : > { %v11057_v54 = vadd.f32 %v17676_v48, %v858_v0  ;;  %v11060_v11 = vadd.f32 %v17677_v47, %v833_v20  ;;  %v698_v60 = vmul.f32 %v17679_v17, %v17460_v59  ;;  %17680 = vst [vmem:[#allocation82_spill] sm:$0xff] %v11069_v39  ;;  %v11075_v51 = vmul.f32 %v11062_v21, %v10765_v36 }
 0x37f   : > { %v875_v15 = vpop.permute.xlu0 %874  ;;  %v851_v13 = vpop.permute.xlu1 %850  ;;  %v17681_v59 = vrot.slane %v10090_v56, 1  ;;  %v3571_v48 = vrot.slane %v3561_v25, 1  ;;  %v781_v6 = vadd.f32 %v773_v24, %v689_v10  ;;  %v17687_v25 = vld [vmem:[#allocation74_spill] sm:$0xff] }
 0x380   : > { %v884_v0 = vadd.f32 %v875_v15, %v780_v1  ;;  %v859_v20 = vadd.f32 %v851_v13, %v755_v35  ;;  %v806_v3 = vadd.f32 %v797_v23, %v698_v60  ;;  %v16581_v47 = vrot.slane %v11075_v51, 1 }
 0x381   : > { %v2405_v28 = vsel %vm924_vm2, %v17683_v7, %v17681_v59  ;;  %2377 = vrot.lane.b32.xlu1 %v10255_v55, %s16969_s2  ;;  %v11094_v35 = vstv %s7296_s3  ;;  %v17686_v13 = vrot.slane %v10094_v8, 1  ;;  %v17688_v10 = vrot.slane %v17687_v25, 1  ;;  %s11348_s3 = sld [smem:[#allocation2 + $0x5c]] }
 0x382   : > { %2412 = vrot.lane.b32.xlu0 %v2405_v28, %s16969_s2  ;;  %v11089_v9 = vadd.f32 %v10309_v37, %v884_v0  ;;  %v11092_v56 = vadd.f32 %v10314_v18, %v859_v20  ;;  %17684 = vst [vmem:[#allocation26_spill] sm:$0xff] %v11094_v35  ;;  %v11099_v23 = vsel %vm924_vm2, %v3571_v48, %v16581_v47 }
 0x383   : > { %v901_v1 = vpop.permute.xlu0 %900  ;;  %v877_v15 = vpop.permute.xlu1 %876  ;;  %17685 = vst [vmem:[#allocation199_spill] sm:$0xff] %v11099_v23  ;;  %v3598_v55 = vmul.f32 %v11094_v35, %v10747_v30  ;;  %v11105_v24 = vmul.f32 %v11094_v35, %v10765_v36  ;;  %v699_v18 = vmul.f32 %v17679_v17, %v17221_v40  ;;  %v2442_v0 = vsel %vm924_vm2, %v17688_v10, %v17686_v13  ;;  %v17701_v10 = vld [vmem:[#allocation174_spill] sm:$0xff] }
 0x384   : > { %v910_v37 = vadd.f32 %v901_v1, %v806_v3  ;;  %v885_v60 = vadd.f32 %v877_v15, %v781_v6  ;;  %v11125_v6 = vstv %s7297_s24  ;;  %v17693_v3 = vld [vmem:[#allocation76_spill] sm:$0xff]  ;;  %s11361_s24 = sld [smem:[#allocation2 + $0x80]] }
 0x385   : > { %2414 = vrot.lane.b32.xlu1 %v10260_v26, %s16969_s2  ;;  %v3608_v20 = vrot.slane %v3598_v55, 1  ;;  %v16580_v59 = vrot.slane %v11105_v24, 1  ;;  %v807_v2 = vadd.f32 %v11018_v42, %v699_v18  ;;  %17689 = vst [vmem:[#allocation200_spill] sm:$0xff] %v11125_v6  ;;  %v3635_v28 = vmul.f32 %v11125_v6, %v10747_v30 }
 0x386   : > { %2449 = vrot.lane.b32.xlu0 %v2442_v0, %s7978_s8  ;;  %v11120_v40 = vadd.f32 %v10375_v45, %v910_v37  ;;  %v11123_v8 = vadd.f32 %v10389_v50, %v885_v60  ;;  %v11138_v45 = vmul.f32 %v11125_v6, %v10765_v36  ;;  %v17692_v50 = vrot.slane %v10113_v22, 1 }
 0x387   : > { %v11127_v17 = vpop.permute.xlu0 %1966  ;;  %v903_v7 = vpop.permute.xlu1 %902  ;;  %v11132_v26 = vsel %vm924_vm2, %v3608_v20, %v16580_v59  ;;  %v17694_v48 = vrot.slane %v17693_v3, 1  ;;  %v3645_v15 = vrot.slane %v3635_v28, 1  ;;  %v11152_v37 = vstv %s7298_s13  ;;  %s11379_s13 = sld [smem:[#allocation2 + $0x85]] }
 0x388   : > { %17690 = vst [vmem:[#allocation159_spill] sm:$0xff] %v11127_v17  ;;  %17691 = vst [vmem:[#allocation161_spill] sm:$0xff] %v11132_v26  ;;  %v911_v42 = vadd.f32 %v903_v7, %v807_v2  ;;  %v16579_v55 = vrot.slane %v11138_v45, 1  ;;  %v11167_v25 = vmul.f32 %v11152_v37, %v10765_v36  ;;  %v17702_v0 = vrot.slane %v17701_v10, 1  ;;  %v17703_v2 = vld [vmem:[#allocation107_spill] sm:$0xff]  ;;  %v17749_v26 = vld [vmem:[#allocation96_spill] sm:$0xff] }
 0x389   : > { %v2479_v1 = vsel %vm924_vm2, %v17694_v48, %v17692_v50  ;;  %2451 = vrot.lane.b32.xlu1 %v10265_v52, %s7978_s8  ;;  %17695 = vst [vmem:[#allocation29_spill] sm:$0xff] %v11152_v37  ;;  %v3672_v52 = vmul.f32 %v11152_v37, %v10747_v30  ;;  %v17750_v23 = vrot.slane %v17749_v26, 2  ;;  %v17758_v26 = vld [vmem:[#allocation108_spill] sm:$0xff]  ;;  %v11676_v17 = vpop.f32.mrb[20].mxu0 }
 0x38a   : > { %2486 = vrot.lane.b32.xlu0 %v2479_v1, %s7978_s8  ;;  %v11150_v18 = vadd.f32 %v10404_v29, %v911_v42  ;;  %v11161_v13 = vsel %vm924_vm2, %v3645_v15, %v16579_v55  ;;  %17699 = vst [vmem:[#allocation42_spill] sm:$0xff] %v11167_v25  ;;  %v17700_v29 = vrot.slane %v10119_v62, 1  ;;  %v16578_v28 = vrot.slane %v11167_v25, 1  ;;  %v17709_v15 = vld [vmem:[#allocation104_spill] sm:$0xff]  ;;  %17830 = vst [vmem:[#allocation195_spill] sm:$0xff] %v11676_v17 }
 0x38b   : > { %v11154_v60 = vpop.permute.xlu0 %1992  ;;  %v11156_v22 = vpop.permute.xlu1 %1968  ;;  %17698 = vst [vmem:[#allocation163_spill] sm:$0xff] %v11161_v13  ;;  %v3682_v7 = vrot.slane %v3672_v52, 1  ;;  %v11178_v42 = vstv %s7299_s25  ;;  %v17710_v52 = vrot.slane %v17709_v15, 1  ;;  %v17745_v13 = vld [vmem:[#allocation90_spill] sm:$0xff]  ;;  %s11398_s25 = sld [smem:[#allocation2 + $0x1c]] }
 0x38c   : > { %17696 = vst [vmem:[#allocation102_spill] sm:$0xff] %v11154_v60  ;;  %17697 = vst [vmem:[#allocation150_spill] sm:$0xff] %v11156_v22  ;;  %v2516_v20 = vsel %vm924_vm2, %v17702_v0, %v17700_v29  ;;  %v3709_v48 = vmul.f32 %v11178_v42, %v10747_v30  ;;  %v11193_v1 = vmul.f32 %v11178_v42, %v10765_v36  ;;  %v17711_v29 = vld [vmem:[#allocation81_spill] sm:$0xff]  ;;  %v17746_v14 = vrot.slane %v17745_v13, 2 }
 0x38d   : > { %2488 = vrot.lane.b32.xlu1 %v17703_v2, %s7978_s8  ;;  %17704 = vst [vmem:[#allocation30_spill] sm:$0xff] %v11178_v42  ;;  %v11187_v62 = vsel %vm924_vm2, %v3682_v7, %v16578_v28  ;;  %v17712_v10 = vrot.slane %v17711_v29, 1  ;;  %v11204_v28 = vstv %s7300_s16  ;;  %v17759_v13 = vrot.slane %v17758_v26, 2  ;;  %s11425_s16 = sld [smem:[#allocation2 + $0x1a]] }
 0x38e   : > { %2523 = vrot.lane.b32.xlu0 %v2516_v20, %s7978_s8  ;;  %17707 = vst [vmem:[#allocation31_spill] sm:$0xff] %v11187_v62  ;;  %17708 = vst [vmem:[#allocation37_spill] sm:$0xff] %v11193_v1  ;;  %v17713_v20 = vld [vmem:[#allocation92_spill] sm:$0xff]  ;;  %v3719_v2 = vrot.slane %v3709_v48, 1  ;;  %v16582_v7 = vrot.slane %v11193_v1, 1  ;;  %v11219_v29 = vmul.f32 %v11204_v28, %v10765_v36  ;;  %v17719_v48 = vld [vmem:[#allocation70_spill] sm:$0xff]  ;;  %v11346_v26 = vstv %s11236_s15 }
 0x38f   : > { %v11180_v50 = vpop.permute.xlu0 %2018  ;;  %v11182_v3 = vpop.permute.xlu1 %1994  ;;  %v2553_v0 = vsel %vm924_vm2, %v17712_v10, %v17710_v52  ;;  %17714 = vst [vmem:[#allocation39_spill] sm:$0xff] %v11204_v28  ;;  %v3746_v52 = vmul.f32 %v11204_v28, %v10747_v30  ;;  %v17720_v10 = vrot.slane %v17719_v48, 2  ;;  %17770 = vst [vmem:[#allocation71_spill] sm:$0xff] %v11346_v26  ;;  %s11457_s15 = sld [smem:[#allocation2 + $0x40]] }
 0x390   : > { %17705 = vst [vmem:[#allocation47_spill] sm:$0xff] %v11180_v50  ;;  %17706 = vst [vmem:[#allocation49_spill] sm:$0xff] %v11182_v3  ;;  %v11213_v15 = vsel %vm924_vm2, %v3719_v2, %v16582_v7  ;;  %v16585_v7 = vrot.slane %v11219_v29, 1  ;;  %v11523_v50 = vstv %s11427_s4  ;;  %s11763_s4 = sld [smem:[#allocation2 + $0x67]] }
 0x391   : > { %2525 = vrot.lane.b32.xlu1 %v17713_v20, %s7978_s8  ;;  %17717 = vst [vmem:[#allocation20_spill] sm:$0xff] %v11213_v15  ;;  %17718 = vst [vmem:[#allocation23_spill] sm:$0xff] %v11219_v29  ;;  %v3756_v2 = vrot.slane %v3746_v52, 1  ;;  %v17729_v52 = vld [vmem:[#allocation110_spill] sm:$0xff]  ;;  %v17743_v15 = vld [vmem:[#allocation116_spill] sm:$0xff]  ;;  %v11544_v28 = vstv %s11398_s25  ;;  %s11748_s25 = sld [smem:[#allocation2 + $0x41]] }
 0x392   : > { %2560 = vrot.lane.b32.xlu0 %v2553_v0, %s7978_s8  ;;  %v17721_v0 = vld [vmem:[#allocation84_spill] sm:$0xff]  ;;  %v17744_v62 = vrot.slane %v17743_v15, 2  ;;  %17801 = vst [vmem:[#allocation73_spill] sm:$0xff] %v11523_v50  ;;  %17803 = vst [vmem:[#allocation34_spill] sm:$0xff] %v11544_v28  ;;  %v11604_v60 = vmul.f32 %v11544_v28, %v10924_v4 }
 0x393   : > { %v11206_v55 = vpop.permute.xlu0 %2044  ;;  %v11208_v59 = vpop.permute.xlu1 %2020  ;;  %v17722_v20 = vrot.slane %v17721_v0, 2  ;;  %v11241_v48 = vsel %vm924_vm2, %v3756_v2, %v16585_v7  ;;  %v17731_v0 = vld [vmem:[#allocation86_spill] sm:$0xff] }
 0x394   : > { %17715 = vst [vmem:[#allocation40_spill] sm:$0xff] %v11206_v55  ;;  %17716 = vst [vmem:[#allocation41_spill] sm:$0xff] %v11208_v59 }
 0x395   : > { %v2706_v47 = vsel %vm1337_vm3, %v17722_v20, %v17720_v10  ;;  %2562 = vrot.lane.b32.xlu1 %v17723_v46, %s7978_s8  ;;  %17727 = vst [vmem:[#allocation79_spill] sm:$0xff] %v11241_v48  ;;  %v11247_v46 = vmul.f32 %v11230_v12, %v10765_v36  ;;  %v17730_v10 = vrot.slane %v17729_v52, 2  ;;  %v17732_v20 = vrot.slane %v17731_v0, 2  ;;  %17813 = vst [vmem:[#allocation183_spill] sm:$0xff] %v11604_v60 }
 0x396   : > { %2713 = vrot.lane.b32.xlu0 %v2706_v47, %s16969_s2  ;;  %v3783_v47 = vmul.f32 %v11230_v12, %v10747_v30  ;;  %v11264_v52 = vstv %s7306_s14  ;;  %s11445_s14 = sld [smem:[#allocation2 + $0x62]] }
 0x397   : > { %v11232_v61 = vpop.permute.xlu0 %2070  ;;  %v11234_v38 = vpop.permute.xlu1 %2046  ;;  %17728 = vst [vmem:[#allocation67_spill] sm:$0xff] %v11247_v46  ;;  %v2743_v43 = vsel %vm1337_vm3, %v17732_v20, %v17730_v10  ;;  %v16593_v7 = vrot.slane %v11247_v46, 1  ;;  %17734 = vst [vmem:[#allocation45_spill] sm:$0xff] %v11264_v52  ;;  %v17739_v20 = vld [vmem:[#allocation113_spill] sm:$0xff] }
 0x398   : > { %17725 = vst [vmem:[#allocation151_spill] sm:$0xff] %v11232_v61  ;;  %17726 = vst [vmem:[#allocation202_spill] sm:$0xff] %v11234_v38  ;;  %v3793_v2 = vrot.slane %v3783_v47, 1  ;;  %v11281_v47 = vmul.f32 %v11264_v52, %v10765_v36  ;;  %v17740_v27 = vrot.slane %v17739_v20, 2  ;;  %v17751_v46 = vld [vmem:[#allocation121_spill] sm:$0xff]  ;;  %v17754_v20 = vrot.slane %v17753_v33, 2 }
 0x399   : > { %2715 = vrot.lane.b32.xlu1 %v17733_v34, %s16969_s2  ;;  %v3936_v34 = vmul.f32 %v11264_v52, %v10747_v30  ;;  %v17752_v29 = vrot.slane %v17751_v46, 2 }
 0x39a   : > { %2750 = vrot.lane.b32.xlu0 %v2743_v43, %s16969_s2  ;;  %v11275_v43 = vsel %vm924_vm2, %v3793_v2, %v16593_v7  ;;  %17738 = vst [vmem:[#allocation166_spill] sm:$0xff] %v11281_v47  ;;  %v2780_v48 = vsel %vm1337_vm3, %v17742_v16, %v17740_v27  ;;  %v2817_v2 = vsel %vm1337_vm3, %v17746_v14, %v17744_v62  ;;  %v17747_v7 = vld [vmem:[#allocation22_spill] sm:$0xff]  ;;  %v17755_v16 = vld [vmem:[#allocation112_spill] sm:$0xff]  ;;  %v16597_v46 = vrot.slane %v11281_v47, 2 }
 0x39b   : > { %v11266_v0 = vpop.permute.xlu0 %2096  ;;  %v11268_v10 = vpop.permute.xlu1 %2072  ;;  %17737 = vst [vmem:[#allocation165_spill] sm:$0xff] %v11275_v43  ;;  %v17748_v43 = vrot.slane %v17747_v7, 2  ;;  %v11303_v53 = vsel %vm1337_vm3, %v17754_v20, %v17752_v29  ;;  %v17756_v27 = vld [vmem:[#allocation106_spill] sm:$0xff]  ;;  %v17762_v7 = vld [vmem:[#allocation139_spill] sm:$0xff]  ;;  %v11333_v20 = vmul.f32 %v10716_v19, %v17163_v44  ;;  %v11385_v47 = vstv %s11257_s29  ;;  %s11495_s29 = sld [smem:[#allocation2 + $0x86]] }
 0x39c   : > { %17735 = vst [vmem:[#allocation98_spill] sm:$0xff] %v11266_v0  ;;  %17736 = vst [vmem:[#allocation100_spill] sm:$0xff] %v11268_v10  ;;  %v17757_v14 = vrot.slane %v17756_v27, 2  ;;  %v17760_v62 = vld [vmem:[#allocation78_spill] sm:$0xff]  ;;  %v17763_v15 = vrot.slane %v17762_v7, 2  ;;  %v11339_v27 = vstv %s7307_s26  ;;  %s11482_s26 = sld [smem:[#allocation2 + $0x64]]  ;;  %v11556_v0 = vstv %s11445_s14 }
 0x39d   : > { %v2854_v39 = vsel %vm1337_vm3, %v17750_v23, %v17748_v43  ;;  %2752 = vrot.lane.b32.xlu1 %v17755_v16, %s16969_s2  ;;  %v17761_v33 = vrot.slane %v17760_v62, 2  ;;  %v11329_v43 = vmul.f32 %v10706_v57, %v17163_v44  ;;  %17765 = vst [vmem:[#allocation36_spill] sm:$0xff] %v11333_v20  ;;  %v11337_v16 = vmul.f32 %v10706_v57, %v17331_v31  ;;  %s11811_s14 = sld [smem:[#allocation2 + $0x8b]] }
 0x39e   : > { %2787 = vrot.lane.b32.xlu0 %v2780_v48, %s16969_s2  ;;  %v11315_v23 = vsel %vm1337_vm3, %v17759_v13, %v17757_v14  ;;  %v3946_v48 = vrot.slane %v3936_v34, 2  ;;  %17767 = vst [vmem:[#allocation168_spill] sm:$0xff] %v11339_v27  ;;  %v3973_v57 = vmul.f32 %v11339_v27, %v10747_v30  ;;  %v11359_v62 = vmul.f32 %v11339_v27, %v10765_v36 }
 0x39f   : > { %v11322_v29 = vsel %vm1337_vm3, %v17763_v15, %v17761_v33  ;;  %17764 = vst [vmem:[#allocation46_spill] sm:$0xff] %v11329_v43  ;;  %17766 = vst [vmem:[#allocation66_spill] sm:$0xff] %v11337_v16  ;;  %v11341_v14 = vpop.permute.xlu0 %2122  ;;  %v11343_v34 = vpop.permute.xlu1 %2098  ;;  %v17773_v33 = vld [vmem:[#allocation126_spill] sm:$0xff]  ;;  %v11369_v15 = vmul.f32 %v10716_v19, %v17331_v31  ;;  %v11388_v19 = vstv %s11259_s12  ;;  %v11393_v27 = vmul.f32 %v11346_v26, %v10747_v30  ;;  %s11512_s12 = sld [smem:[#allocation2 + $0x88]]  ;;  %v17819_v16 = vld [vmem:[#allocation120_spill] sm:$0xff] }
 0x3a0   : > { %17768 = vst [vmem:[#allocation169_spill] sm:$0xff] %v11341_v14  ;;  %17769 = vst [vmem:[#allocation52_spill] sm:$0xff] %v11343_v34  ;;  %v11353_v13 = vsel %vm1337_vm3, %v3946_v48, %v16597_v46  ;;  %v11365_v7 = vmul.f32 %v17773_v33, %v17163_v44  ;;  %v11373_v48 = vmul.f32 %v10745_v58, %v17163_v44  ;;  %v3983_v38 = vrot.slane %v3973_v57, 2 }
 0x3a1   : > { %17771 = vst [vmem:[#allocation72_spill] sm:$0xff] %v11353_v13  ;;  %17772 = vst [vmem:[#allocation54_spill] sm:$0xff] %v11359_v62  ;;  %v11377_v46 = vmul.f32 %v17773_v33, %v17331_v31  ;;  %v17778_v13 = vld [vmem:[#allocation135_spill] sm:$0xff]  ;;  %v11396_v33 = vstv %s11262_s0  ;;  %v11412_v44 = vstv %s11270_s22  ;;  %v17787_v55 = vrot.slane %v11359_v62, 2  ;;  %v17790_v62 = vld [vmem:[#allocation114_spill] sm:$0xff]  ;;  %s11537_s0 = sld [smem:[#allocation2 + $0x15]] }
 0x3a2   : > { %17774 = vst [vmem:[#allocation58_spill] sm:$0xff] %v11365_v7  ;;  %17775 = vst [vmem:[#allocation53_spill] sm:$0xff] %v11369_v15  ;;  %2824 = vrot.lane.b32.xlu0 %v2817_v2, %s16969_s2  ;;  %2789 = vrot.lane.b32.xlu1 %v17778_v13, %s16969_s2  ;;  %v11402_v2 = vmul.f32 %v10745_v58, %v17331_v31  ;;  %v11405_v13 = vstv %s11305_s9  ;;  %v11431_v58 = vmul.f32 %v11385_v47, %v10747_v30  ;;  %s11539_s22 = sld [smem:[#allocation2 + $0x39]]  ;;  %s11566_s9 = sld [smem:[#allocation2 + $0x1d]] }
 0x3a3   : > { %17776 = vst [vmem:[#allocation172_spill] sm:$0xff] %v11373_v48  ;;  %17777 = vst [vmem:[#allocation173_spill] sm:$0xff] %v11377_v46  ;;  %v11407_v59 = vpop.permute.xlu0 %2148  ;;  %v11409_v57 = vpop.permute.xlu1 %2124  ;;  %v11417_v52 = vsel %vm1337_vm3, %v3983_v38, %v17787_v55  ;;  %v4010_v34 = vmul.f32 %v11405_v13, %v10747_v30  ;;  %v11423_v31 = vmul.f32 %v11405_v13, %v10765_v36 }
 0x3a4   : > { %17779 = vst [vmem:[#allocation80_spill] sm:$0xff] %v11385_v47  ;;  %17780 = vst [vmem:[#allocation109_spill] sm:$0xff] %v11388_v19  ;;  %v11435_v38 = vmul.f32 %v11346_v26, %v10765_v36  ;;  %v11439_v55 = vmul.f32 %v11388_v19, %v10747_v30  ;;  %v11452_v26 = vmul.f32 %v11388_v19, %v10765_v36  ;;  %v11473_v19 = vstv %s11379_s13  ;;  %s11717_s13 = sld [smem:[#allocation2 + $0x43]] }
 0x3a5   : > { %17781 = vst [vmem:[#allocation85_spill] sm:$0xff] %v11396_v33  ;;  %17782 = vst [vmem:[#allocation115_spill] sm:$0xff] %v11402_v2  ;;  %v11480_v2 = vstv %s11348_s3  ;;  %v17795_v14 = vrot.slane %v11423_v31, 2  ;;  %v11493_v48 = vmul.f32 %v11473_v19, %v10765_v36  ;;  %v11503_v3 = vmul.f32 %v11412_v44, %v10765_v36  ;;  %s11678_s3 = sld [smem:[#allocation2 + $0x1f]] }
 0x3a6   : > { %17783 = vst [vmem:[#allocation75_spill] sm:$0xff] %v11405_v13  ;;  %17784 = vst [vmem:[#allocation59_spill] sm:$0xff] %v11407_v59  ;;  %2861 = vrot.lane.b32.xlu0 %v2854_v39, %s7978_s8  ;;  %2826 = vrot.lane.b32.xlu1 %v17790_v62, %s16969_s2  ;;  %v4020_v59 = vrot.slane %v4010_v34, 2  ;;  %v11466_v39 = vmul.f32 %v11412_v44, %v10747_v30  ;;  %v11470_v62 = vmul.f32 %v11396_v33, %v10765_v36 }
 0x3a7   : > { %17785 = vst [vmem:[#allocation119_spill] sm:$0xff] %v11409_v57  ;;  %17786 = vst [vmem:[#allocation178_spill] sm:$0xff] %v11412_v44  ;;  %v11455_v57 = vstv %s11324_s30  ;;  %v11475_v13 = vpop.permute.xlu0 %1054  ;;  %v11477_v34 = vpop.permute.xlu1 %2150  ;;  %v17804_v1 = vrot.slane %v11493_v48, 2  ;;  %v11564_v7 = vmul.f32 %v11480_v2, %v10765_v36  ;;  %s11581_s30 = sld [smem:[#allocation2 + $0x5d]]  ;;  %v11596_v22 = vmul.f32 %v11556_v0, %v10765_v36 }
 0x3a8   : > { %17788 = vst [vmem:[#allocation25_spill] sm:$0xff] %v11417_v52  ;;  %17789 = vst [vmem:[#allocation27_spill] sm:$0xff] %v11423_v31  ;;  %v11443_v52 = vmul.f32 %v11385_v47, %v10765_v36  ;;  %v11462_v47 = vmul.f32 %v11396_v33, %v10747_v30  ;;  %v11487_v46 = vsel %vm1337_vm3, %v4020_v59, %v17795_v14  ;;  %v11510_v14 = vstv %s11361_s24  ;;  %s11682_s24 = sld [smem:[#allocation2 + $0x81]] }
 0x3a9   : > { %17791 = vst [vmem:[#allocation35_spill] sm:$0xff] %v11455_v57  ;;  %17792 = vst [vmem:[#allocation127_spill] sm:$0xff] %v11473_v19  ;;  %v4047_v33 = vmul.f32 %v11473_v19, %v10747_v30  ;;  %v11507_v59 = vmul.f32 %v11455_v57, %v10765_v36  ;;  %v11520_v19 = vstv %s11425_s16  ;;  %v11560_v15 = vmul.f32 %v11510_v14, %v10747_v30  ;;  %s11761_s16 = sld [smem:[#allocation2 + $0x65]] }
 0x3aa   : > { %17793 = vst [vmem:[#allocation179_spill] sm:$0xff] %v11477_v34  ;;  %17794 = vst [vmem:[#allocation175_spill] sm:$0xff] %v11480_v2  ;;  %v11499_v34 = vmul.f32 %v11455_v57, %v10747_v30  ;;  %2898 = vrot.lane.b32.xlu0 %v11303_v53, %s7978_s8  ;;  %v11527_v57 = vmul.f32 %v11480_v2, %v10747_v30  ;;  %v4084_v12 = vmul.f32 %v11520_v19, %v10747_v30 }
 0x3ab   : > { %17796 = vst [vmem:[#allocation176_spill] sm:$0xff] %v11487_v46  ;;  %17797 = vst [vmem:[#allocation33_spill] sm:$0xff] %v11493_v48  ;;  %v17799_v46 = vld [vmem:[#allocation117_spill] sm:$0xff]  ;;  %v4057_v31 = vrot.slane %v4047_v33, 2  ;;  %v11533_v53 = vmul.f32 %v11520_v19, %v10765_v36  ;;  %v1092_v33 = vpop.permute.xlu0 %1091  ;;  %v11541_v44 = vpop.permute.xlu1 %1056  ;;  %v11578_v2 = vstv %s11457_s15  ;;  %v11622_v25 = vstv %s11512_s12  ;;  %s11849_s15 = sld [smem:[#allocation2 + $0x20]] }
 0x3ac   : > { %17798 = vst [vmem:[#allocation130_spill] sm:$0xff] %v11510_v14  ;;  %2863 = vrot.lane.b32.xlu1 %v17799_v46, %s7978_s8  ;;  %17800 = vst [vmem:[#allocation180_spill] sm:$0xff] %v11520_v19  ;;  %v4121_v46 = vmul.f32 %v11523_v50, %v10747_v30  ;;  %v11553_v19 = vmul.f32 %v11523_v50, %v10765_v36  ;;  %v4094_v48 = vrot.slane %v4084_v12, 2  ;;  %s11876_s12 = sld [smem:[#allocation2 + $0x68]] }
 0x3ad   : > { %17802 = vst [vmem:[#allocation182_spill] sm:$0xff] %v11533_v53  ;;  %v11549_v10 = vsel %vm1337_vm3, %v4057_v31, %v17804_v1  ;;  %17807 = vst [vmem:[#allocation83_spill] sm:$0xff] %v11556_v0  ;;  %v17808_v31 = vld [vmem:[#allocation118_spill] sm:$0xff]  ;;  %v11585_v1 = vmul.f32 %v11544_v28, %v10906_v63  ;;  %v16647_v28 = vrot.slane %v11596_v22, 2 }
 0x3ae   : > { %17805 = vst [vmem:[#allocation134_spill] sm:$0xff] %v11549_v10  ;;  %17806 = vst [vmem:[#allocation181_spill] sm:$0xff] %v11553_v19  ;;  %2935 = vrot.lane.b32.xlu0 %v11315_v23, %s7978_s8  ;;  %v11575_v10 = vmul.f32 %v11510_v14, %v10765_v36  ;;  %v4131_v50 = vrot.slane %v4121_v46, 2  ;;  %v17810_v23 = vrot.slane %v11533_v53, 2  ;;  %v4158_v14 = vmul.f32 %v11556_v0, %v10747_v30 }
 0x3af   : > { %17809 = vst [vmem:[#allocation188_spill] sm:$0xff] %v11578_v2  ;;  %17812 = vst [vmem:[#allocation137_spill] sm:$0xff] %v11596_v22  ;;  %v11598_v46 = vpop.permute.xlu0 %1128  ;;  %v11600_v12 = vpop.permute.xlu1 %1093  ;;  %v11607_v53 = vstv %s11482_s26  ;;  %v11619_v0 = vmul.f32 %v11578_v2, %v10906_v63  ;;  %s11851_s26 = sld [smem:[#allocation2 + $0x44]] }
 0x3b0   : > { %2900 = vrot.lane.b32.xlu1 %v17808_v31, %s7978_s8  ;;  %v11590_v31 = vsel %vm1337_vm3, %v4094_v48, %v17810_v23  ;;  %17814 = vst [vmem:[#allocation38_spill] sm:$0xff] %v11607_v53  ;;  %v17815_v48 = vrot.slane %v11553_v19, 2  ;;  %17818 = vst [vmem:[#allocation185_spill] sm:$0xff] %v11622_v25  ;;  %v4168_v61 = vrot.slane %v4158_v14, 2  ;;  %v11641_v14 = vmul.f32 %v11607_v53, %v10906_v63 }
 0x3b1   : > { %17811 = vst [vmem:[#allocation177_spill] sm:$0xff] %v11590_v31  ;;  %v11615_v31 = vstv %s11495_s29  ;;  %s11863_s29 = sld [smem:[#allocation2 + $0x89]] }
 0x3b2   : > { %v11612_v23 = vsel %vm1337_vm3, %v4131_v50, %v17815_v48  ;;  %17817 = vst [vmem:[#allocation184_spill] sm:$0xff] %v11615_v31  ;;  %2972 = vrot.lane.b32.xlu0 %v11322_v29, %s7978_s8  ;;  %v11631_v50 = vmul.f32 %v11578_v2, %v10924_v4  ;;  %v4195_v48 = vmul.f32 %v11615_v31, %v10747_v30  ;;  %17822 = vst [vmem:[#allocation186_spill] sm:$0xff] %v11641_v14 }
 0x3b3   : > { %17816 = vst [vmem:[#allocation142_spill] sm:$0xff] %v11612_v23  ;;  %v11637_v23 = vmul.f32 %v11615_v31, %v10765_v36  ;;  %v11646_v29 = vsel %vm1337_vm3, %v4168_v61, %v16647_v28  ;;  %v11652_v2 = vstv %s11539_s22  ;;  %v11654_v19 = vpop.permute.xlu0 %1165  ;;  %v11656_v20 = vpop.permute.xlu1 %1130  ;;  %v11660_v31 = vmul.f32 %v11622_v25, %v10906_v63  ;;  %s11941_s22 = sld [smem:[#allocation2 + $0x3c]] }
 0x3b4   : > { %2937 = vrot.lane.b32.xlu1 %v17819_v16, %s7978_s8  ;;  %17820 = vst [vmem:[#allocation145_spill] sm:$0xff] %v11631_v50  ;;  %17823 = vst [vmem:[#allocation152_spill] sm:$0xff] %v11646_v29  ;;  %v11649_v16 = vstv %s11537_s0  ;;  %v11664_v50 = vmul.f32 %v11607_v53, %v10924_v4  ;;  %v4205_v22 = vrot.slane %v4195_v48, 2  ;;  %v1064_v28 = vadd.f32 %v11475_v13, %v11033_v49  ;;  %v17831_v48 = vld [vmem:[#allocation95_spill] sm:$0xff]  ;;  %v7608_v13 = vpop.f32.mrb[21].mxu0  ;;  %s11939_s0 = sld [smem:[#allocation2 + $0x18]] }
 0x3b5   : > { %17821 = vst [vmem:[#allocation187_spill] sm:$0xff] %v11637_v23  ;;  %17824 = vst [vmem:[#allocation191_spill] sm:$0xff] %v11649_v16  ;;  %v16654_v61 = vrot.slane %v11637_v23, 2  ;;  %v11670_v29 = vstv %s11566_s9  ;;  %v11674_v14 = vmul.f32 %v11622_v25, %v10924_v4  ;;  %v3408_v53 = vmul.f32 %v11649_v16, %v10747_v30  ;;  %s11996_s9 = sld [smem:[#allocation2 + $0x60]] }
 0x3b6   : > { %17825 = vst [vmem:[#allocation189_spill] sm:$0xff] %v11652_v2  ;;  %17826 = vst [vmem:[#allocation153_spill] sm:$0xff] %v11660_v31  ;;  %3208 = vrot.lane.b32.xlu0 %v11393_v27, %s16969_s2  ;;  %v3409_v25 = vmul.f32 %v11649_v16, %v10765_v36  ;;  %v3437_v17 = vmul.f32 %v11652_v2, %v10747_v30  ;;  %v3438_v27 = vmul.f32 %v11652_v2, %v10765_v36 }
 0x3b7   : > { %17827 = vst [vmem:[#allocation193_spill] sm:$0xff] %v11664_v50  ;;  %17828 = vst [vmem:[#allocation190_spill] sm:$0xff] %v11670_v29  ;;  %v11691_v49 = vsel %vm1337_vm3, %v4205_v22, %v16654_v61  ;;  %v1101_v50 = vadd.f32 %v1092_v33, %v11057_v54  ;;  %v11705_v23 = vmul.f32 %v11649_v16, %v10819_v41  ;;  %v1203_v22 = vpop.permute.xlu0 %1202  ;;  %v11707_v13 = vpop.permute.xlu1 %1167 }
 0x3b8   : > { %17829 = vst [vmem:[#allocation155_spill] sm:$0xff] %v11674_v14  ;;  %2974 = vrot.lane.b32.xlu1 %v17831_v48, %s7978_s8  ;;  %17832 = vst [vmem:[#allocation192_spill] sm:$0xff] %v11691_v49  ;;  %v11698_v14 = vstv %s11581_s30  ;;  %v3418_v48 = vrot.slane %v3408_v53, 1  ;;  %v3419_v61 = vrot.slane %v3409_v25, 1  ;;  %v3447_v49 = vrot.slane %v3437_v17, 1  ;;  %s12053_s30 = sld [smem:[#allocation2 + $0x84]] }
 0x3b9   : > { %17833 = vst [vmem:[#allocation50_spill] sm:$0xff] %v11698_v14  ;;  %17834 = vst [vmem:[#allocation197_spill] sm:$0xff] %v11705_v23  ;;  %v3466_v31 = vmul.f32 %v11698_v14, %v10747_v30  ;;  %v11713_v54 = vmul.f32 %v11698_v14, %v10765_v36  ;;  %v1065_v53 = vadd.f32 %v11541_v44, %v11060_v11  ;;  %v3448_v16 = vrot.slane %v3438_v27, 1 }
 0x3ba   : > { %v1212_v33 = vadd.f32 %v1203_v22, %v1064_v28  ;;  %v16657_v43 = vrot.slane %v11705_v23, 1  ;;  %3234 = vrot.lane.b32.xlu0 %v11431_v58, %s16969_s2  ;;  %v11725_v17 = vsel %vm924_vm2, %v3418_v48, %v3419_v61  ;;  %v11730_v11 = vmul.f32 %v11652_v2, %v10819_v41  ;;  %v17837_v28 = vld [vmem:[#allocation124_spill] sm:$0xff] }
 0x3bb   : > { %17835 = vst [vmem:[#allocation196_spill] sm:$0xff] %v11725_v17  ;;  %v3476_v25 = vrot.slane %v3466_v31, 1  ;;  %v16658_v60 = vrot.slane %v11713_v54, 1  ;;  %v11736_v27 = vstv %s11678_s3  ;;  %v11739_v58 = vsel %vm924_vm2, %v3447_v49, %v3448_v16  ;;  %v1240_v48 = vpop.permute.xlu0 %1239  ;;  %v1205_v22 = vpop.permute.xlu1 %1204  ;;  %s12832_s3 = sld [smem:[#allocation2 + $0x6a]] }
 0x3bc   : > { %3210 = vrot.lane.b32.xlu1 %v11435_v38, %s16969_s2  ;;  %17836 = vst [vmem:[#allocation51_spill] sm:$0xff] %v11730_v11  ;;  %v11733_v44 = vadd.f32 %v17837_v28, %v1212_v33  ;;  %17838 = vst [vmem:[#allocation93_spill] sm:$0xff] %v11736_v27  ;;  %v11744_v38 = vsel %vm924_vm2, %v3419_v61, %v16657_v43  ;;  %v1138_v31 = vadd.f32 %v11598_v46, %v11089_v9 }
 0x3bd   : > { %17839 = vst [vmem:[#allocation198_spill] sm:$0xff] %v11739_v58  ;;  %17840 = vst [vmem:[#allocation56_spill] sm:$0xff] %v11744_v38  ;;  %v4770_v33 = vmul.f32 %v11736_v27, %v10906_v63  ;;  %v11754_v28 = vmul.f32 %v11736_v27, %v10924_v4  ;;  %v11759_v61 = vsel %vm924_vm2, %v3476_v25, %v16658_v60  ;;  %v11767_v46 = vstv %s11682_s24  ;;  %v17844_v60 = vld [vmem:[#allocation101_spill] sm:$0xff]  ;;  %s12889_s24 = sld [smem:[#allocation2 + $0x8e]] }
 0x3be   : > { %17841 = vst [vmem:[#allocation69_spill] sm:$0xff] %v11759_v61  ;;  %v1249_v49 = vadd.f32 %v1240_v48, %v1101_v50  ;;  %v1213_v43 = vadd.f32 %v1205_v22, %v1065_v53  ;;  %17842 = vst [vmem:[#allocation201_spill] sm:$0xff] %v11767_v46  ;;  %v1102_v38 = vadd.f32 %v11600_v12, %v11092_v56  ;;  %3260 = vrot.lane.b32.xlu0 %v11439_v55, %s16969_s2  ;;  %v17843_v48 = vld [vmem:[#allocation97_spill] sm:$0xff] }
 0x3bf   : > { %v4780_v25 = vrot.slane %v4770_v33, 1  ;;  %v16659_v50 = vrot.slane %v11754_v28, 1  ;;  %v3495_v53 = vmul.f32 %v11767_v46, %v10747_v30  ;;  %v11785_v61 = vstv %s11717_s13  ;;  %v1242_v12 = vpop.permute.xlu1 %1241  ;;  %s12960_s13 = sld [smem:[#allocation2 + $0x23]] }
 0x3c0   : > { %3236 = vrot.lane.b32.xlu1 %v11443_v52, %s16969_s2  ;;  %v11779_v22 = vadd.f32 %v17843_v48, %v1249_v49  ;;  %v11782_v9 = vadd.f32 %v17844_v60, %v1213_v43  ;;  %17845 = vst [vmem:[#allocation44_spill] sm:$0xff] %v11785_v61  ;;  %v17846_v56 = vrot.slane %v11730_v11, 1  ;;  %v1277_v52 = vpop.permute.xlu0 %1276  ;;  %v11794_v33 = vmul.f32 %v11670_v29, %v10906_v63 }
 0x3c1   : > { %v11799_v49 = vsel %vm924_vm2, %v4780_v25, %v16659_v50  ;;  %v4807_v60 = vmul.f32 %v11785_v61, %v10906_v63  ;;  %v11805_v43 = vmul.f32 %v11785_v61, %v10924_v4  ;;  %v1139_v48 = vadd.f32 %v11656_v20, %v11123_v8  ;;  %v17850_v20 = vld [vmem:[#allocation128_spill] sm:$0xff] }
 0x3c2   : > { %v11790_v55 = vsel %vm924_vm2, %v3448_v16, %v17846_v56  ;;  %17848 = vst [vmem:[#allocation57_spill] sm:$0xff] %v11799_v49  ;;  %v1175_v16 = vadd.f32 %v11654_v19, %v11120_v40  ;;  %v1286_v56 = vadd.f32 %v1277_v52, %v1138_v31  ;;  %3286 = vrot.lane.b32.xlu0 %v11462_v47, %s16969_s2  ;;  %v11833_v31 = vstv %s11763_s4  ;;  %v17867_v49 = vld [vmem:[#allocation131_spill] sm:$0xff]  ;;  %s7394_s4 = sld [smem:[#allocation7 + $0x7]] }
 0x3c3   : > { %17847 = vst [vmem:[#allocation203_spill] sm:$0xff] %v11790_v55  ;;  %v1250_v55 = vadd.f32 %v1242_v12, %v1102_v38  ;;  %v4817_v25 = vrot.slane %v4807_v60, 1  ;;  %v16660_v50 = vrot.slane %v11805_v43, 1  ;;  %v11820_v40 = vmul.f32 %v11767_v46, %v10765_v36  ;;  %v17851_v38 = vld [vmem:[#allocation143_spill] sm:$0xff]  ;;  %17852 = vst [vmem:[#allocation99_spill] sm:$0xff] %v11833_v31  ;;  %v1279_v12 = vpop.permute.xlu1 %1278 }
 0x3c4   : > { %3262 = vrot.lane.b32.xlu1 %v11452_v26, %s16969_s2  ;;  %v11824_v8 = vmul.f32 %v11698_v14, %v10819_v41  ;;  %v11827_v19 = vadd.f32 %v17850_v20, %v1286_v56  ;;  %v3505_v26 = vrot.slane %v3495_v53, 1  ;;  %v1314_v52 = vpop.permute.xlu0 %1313  ;;  %v11836_v60 = vstv %s11748_s25  ;;  %s13009_s25 = sld [smem:[#allocation2 + $0x47]] }
 0x3c5   : > { %v11830_v47 = vadd.f32 %v17851_v38, %v1250_v55  ;;  %17853 = vst [vmem:[#allocation60_spill] sm:$0xff] %v11836_v60  ;;  %v11841_v58 = vsel %vm924_vm2, %v4817_v25, %v16660_v50  ;;  %v4844_v17 = vmul.f32 %v11833_v31, %v10906_v63  ;;  %v11847_v56 = vmul.f32 %v11833_v31, %v10924_v4 }
 0x3c6   : > { %17849 = vst [vmem:[#allocation62_spill] sm:$0xff] %v11824_v8  ;;  %17854 = vst [vmem:[#allocation32_spill] sm:$0xff] %v11841_v58  ;;  %v1323_v53 = vadd.f32 %v1314_v52, %v1175_v16  ;;  %v1287_v55 = vadd.f32 %v1279_v12, %v1139_v48  ;;  %v11854_v20 = vstv %s11761_s16  ;;  %v1176_v25 = vadd.f32 %v11707_v13, %v11150_v18  ;;  %v17856_v48 = vld [vmem:[#allocation103_spill] sm:$0xff]  ;;  %v17857_v12 = vld [vmem:[#allocation154_spill] sm:$0xff]  ;;  %s13120_s16 = sld [smem:[#allocation2 + $0x6b]] }
 0x3c7   : > { %17855 = vst [vmem:[#allocation77_spill] sm:$0xff] %v11854_v20  ;;  %3312 = vrot.lane.b32.xlu0 %v11466_v39, %s7978_s8  ;;  %v4854_v50 = vrot.slane %v4844_v17, 1  ;;  %v16663_v58 = vrot.slane %v11847_v56, 1  ;;  %v11874_v18 = vstv %s11811_s14  ;;  %v17859_v39 = vrot.slane %v11820_v40, 1  ;;  %v1316_v17 = vpop.permute.xlu1 %1315  ;;  %s12363_s14 = sld [smem:[#allocation2 + $0x1e]] }
 0x3c8   : > { %3288 = vrot.lane.b32.xlu1 %v11470_v62, %s16969_s2  ;;  %v11868_v52 = vadd.f32 %v17856_v48, %v1323_v53  ;;  %v11871_v38 = vadd.f32 %v17857_v12, %v1287_v55  ;;  %17858 = vst [vmem:[#allocation61_spill] sm:$0xff] %v11874_v18  ;;  %v11883_v13 = vpop.permute.xlu0 %1467  ;;  %v11887_v53 = vmul.f32 %v11670_v29, %v10924_v4  ;;  %v17862_v29 = vrot.slane %v11824_v8, 1 }
 0x3c9   : > { %v11881_v62 = vsel %vm924_vm2, %v3505_v26, %v17859_v39  ;;  %v11892_v55 = vsel %vm924_vm2, %v4854_v50, %v16663_v58  ;;  %v4881_v48 = vmul.f32 %v11874_v18, %v10906_v63  ;;  %v11898_v26 = vmul.f32 %v11874_v18, %v10924_v4 }
 0x3ca   : > { %17860 = vst [vmem:[#allocation48_spill] sm:$0xff] %v11881_v62  ;;  %17861 = vst [vmem:[#allocation125_spill] sm:$0xff] %v11892_v55  ;;  %v1324_v12 = vadd.f32 %v1316_v17, %v1176_v25  ;;  %v11902_v39 = vmul.f32 %v11836_v60, %v10906_v63  ;;  %v11906_v16 = vmul.f32 %v11854_v20, %v10906_v63  ;;  %v17863_v50 = vrot.slane %v11713_v54, 1 }
 0x3cb   : > { %3338 = vrot.lane.b32.xlu0 %v11499_v34, %s7978_s8  ;;  %v4891_v25 = vrot.slane %v4881_v48, 1  ;;  %v16671_v17 = vrot.slane %v11898_v26, 1  ;;  %v11921_v62 = vstv %s11849_s15  ;;  %v11924_v55 = vstv %s11851_s26  ;;  %s12399_s15 = sld [smem:[#allocation2 + $0x42]]  ;;  %s12473_s26 = sld [smem:[#allocation2 + $0x66]] }
 0x3cc   : > { %v11913_v58 = vsel %vm924_vm2, %v17863_v50, %v17862_v29  ;;  %3314 = vrot.lane.b32.xlu1 %v11503_v3, %s7978_s8  ;;  %17865 = vst [vmem:[#allocation63_spill] sm:$0xff] %v11921_v62  ;;  %17866 = vst [vmem:[#allocation167_spill] sm:$0xff] %v11924_v55  ;;  %v11927_v8 = vadd.f32 %v17867_v49, %v1324_v12  ;;  %v11931_v29 = vmul.f32 %v11035_v5, %v10819_v41  ;;  %v11943_v54 = vpop.permute.xlu0 %1504  ;;  %v11945_v49 = vpop.permute.xlu1 %1469 }
 0x3cd   : > { %17864 = vst [vmem:[#allocation111_spill] sm:$0xff] %v11913_v58  ;;  %v4918_v34 = vmul.f32 %v11921_v62, %v10906_v63  ;;  %v11937_v3 = vmul.f32 %v11921_v62, %v10924_v4  ;;  %v11949_v48 = vmul.f32 %v11062_v21, %v10819_v41  ;;  %v11954_v12 = vsel %vm924_vm2, %v4891_v25, %v16671_v17 }
 0x3ce   : > { %17868 = vst [vmem:[#allocation74_spill] sm:$0xff] %v11931_v29  ;;  %17871 = vst [vmem:[#allocation107_spill] sm:$0xff] %v11954_v12  ;;  %v4955_v50 = vmul.f32 %v11924_v55, %v10906_v63  ;;  %v11960_v58 = vmul.f32 %v11924_v55, %v10924_v4  ;;  %v11964_v11 = vmul.f32 %v11094_v35, %v10819_v41  ;;  %v11980_v17 = vstv %s11863_s29  ;;  %s12564_s29 = sld [smem:[#allocation2 + $0x8c]] }
 0x3cf   : > { %17869 = vst [vmem:[#allocation76_spill] sm:$0xff] %v11937_v3  ;;  %17870 = vst [vmem:[#allocation174_spill] sm:$0xff] %v11949_v48  ;;  %v11968_v14 = vmul.f32 %v11125_v6, %v10819_v41  ;;  %v4928_v23 = vrot.slane %v4918_v34, 1  ;;  %v16680_v2 = vrot.slane %v11937_v3, 1  ;;  %3364 = vrot.lane.b32.xlu0 %v11527_v57, %s7978_s8  ;;  %v11977_v25 = vmul.f32 %v11836_v60, %v10924_v4 }
 0x3d0   : > { %17872 = vst [vmem:[#allocation104_spill] sm:$0xff] %v11960_v58  ;;  %17873 = vst [vmem:[#allocation81_spill] sm:$0xff] %v11964_v11  ;;  %3340 = vrot.lane.b32.xlu1 %v11507_v59, %s7978_s8  ;;  %v4965_v12 = vrot.slane %v4955_v50, 1  ;;  %v11990_v57 = vstv %s11876_s12  ;;  %v11994_v59 = vmul.f32 %v11767_v46, %v10819_v41  ;;  %v11998_v60 = vpop.permute.xlu0 %1541  ;;  %v12000_v50 = vpop.permute.xlu1 %1506  ;;  %v17879_v6 = vrot.slane %v11960_v58, 1  ;;  %s12586_s12 = sld [smem:[#allocation2 + $0x8a]] }
 0x3d1   : > { %17874 = vst [vmem:[#allocation92_spill] sm:$0xff] %v11968_v14  ;;  %17875 = vst [vmem:[#allocation70_spill] sm:$0xff] %v11980_v17  ;;  %v11987_v34 = vsel %vm924_vm2, %v4928_v23, %v16680_v2  ;;  %v4992_v23 = vmul.f32 %v11990_v57, %v10906_v63  ;;  %v12012_v2 = vmul.f32 %v11990_v57, %v10924_v4  ;;  %v12048_v58 = vstv %s11939_s0  ;;  %s13838_s0 = sld [smem:[#allocation2 + $0x8d]] }
 0x3d2   : > { %17876 = vst [vmem:[#allocation84_spill] sm:$0xff] %v11987_v34  ;;  %17877 = vst [vmem:[#allocation129_spill] sm:$0xff] %v11990_v57  ;;  %v12006_v21 = vsel %vm924_vm2, %v4965_v12, %v17879_v6  ;;  %v12016_v34 = vmul.f32 %v11854_v20, %v10924_v4  ;;  %v12022_v6 = vmul.f32 %v11152_v37, %v10819_v41  ;;  %v12024_v12 = vpop.f32.mrb[22].mxu1  ;;  %v12051_v3 = vstv %s11941_s22  ;;  %s7323_s22 = sld [smem:[#allocation2 + $0x1b]] }
 0x3d3   : > { %17878 = vst [vmem:[#allocation110_spill] sm:$0xff] %v11994_v59  ;;  %17880 = vst [vmem:[#allocation86_spill] sm:$0xff] %v12006_v21  ;;  %3390 = vrot.lane.b32.xlu0 %v11560_v15, %s7978_s8  ;;  %v12032_v20 = vmul.f32 %v11980_v17, %v10906_v63  ;;  %v5002_v21 = vrot.slane %v4992_v23, 1  ;;  %v7585_v46 = vpop.f32.mrb[23].mxu1  ;;  %v12038_v37 = vmul.f32 %v11980_v17, %v10924_v4  ;;  %v17884_v15 = vrot.slane %v11043_v32, 1 }
 0x3d4   : > { %17881 = vst [vmem:[#allocation94_spill] sm:$0xff] %v12022_v6  ;;  %17882 = vst [vmem:[#allocation113_spill] sm:$0xff] %v12024_v12  ;;  %3366 = vrot.lane.b32.xlu1 %v11564_v7, %s7978_s8  ;;  %v17883_v12 = vrot.slane %v11931_v29, 1  ;;  %v12055_v46 = vpop.permute.xlu0 %1578  ;;  %v12057_v23 = vpop.permute.xlu1 %1543  ;;  %v17888_v5 = vrot.slane %v11949_v48, 1  ;;  %v17889_v35 = vrot.slane %v11075_v51, 1  ;;  %v17890_v32 = vrot.slane %v12012_v2, 1 }
 0x3d5   : > { %17886 = vst [vmem:[#allocation116_spill] sm:$0xff] %v12048_v58  ;;  %17887 = vst [vmem:[#allocation90_spill] sm:$0xff] %v12051_v3  ;;  %v17893_v17 = vrot.slane %v11820_v40, 1  ;;  %v3820_v48 = vmul.f32 %v12048_v58, %v10747_v30  ;;  %v17895_v51 = vrot.slane %v11964_v11, 1 }
 0x3d6   : > { %v12045_v7 = vsel %vm924_vm2, %v17884_v15, %v17883_v12  ;;  %v12064_v29 = vsel %vm924_vm2, %v17889_v35, %v17888_v5  ;;  %v12069_v12 = vsel %vm924_vm2, %v5002_v21, %v17890_v32  ;;  %v17892_v15 = vrot.slane %v11994_v59, 1 }
 0x3d7   : > { %17885 = vst [vmem:[#allocation87_spill] sm:$0xff] %v12045_v7  ;;  %17891 = vst [vmem:[#allocation22_spill] sm:$0xff] %v12069_v12  ;;  %v17896_v5 = vrot.slane %v11105_v24, 1  ;;  %v17897_v21 = vrot.slane %v11968_v14, 1  ;;  %v17898_v32 = vrot.slane %v11138_v45, 1  ;;  %4454 = vrot.lane.b32.xlu0 %v11585_v1, %s16969_s2  ;;  %v3830_v24 = vrot.slane %v3820_v48, 2 }
 0x3d8   : > { %v12076_v7 = vsel %vm924_vm2, %v17893_v17, %v17892_v15  ;;  %v3821_v17 = vmul.f32 %v12048_v58, %v10765_v36  ;;  %v1477_v15 = vadd.f32 %v11883_v13, %v11733_v44  ;;  %3392 = vrot.lane.b32.xlu1 %v11575_v10, %s7978_s8  ;;  %v3849_v45 = vmul.f32 %v12051_v3, %v10747_v30  ;;  %v1616_v44 = vpop.permute.xlu0 %1615  ;;  %v12118_v10 = vpop.permute.xlu1 %1580 }
 0x3d9   : > { %17894 = vst [vmem:[#allocation96_spill] sm:$0xff] %v12076_v7  ;;  %v12085_v35 = vsel %vm924_vm2, %v17896_v5, %v17895_v51  ;;  %v12092_v12 = vsel %vm924_vm2, %v17898_v32, %v17897_v21  ;;  %v3850_v51 = vmul.f32 %v12051_v3, %v10765_v36  ;;  %v12109_v21 = vmul.f32 %v12048_v58, %v10819_v41 }
 0x3da   : > { %17899 = vst [vmem:[#allocation121_spill] sm:$0xff] %v12092_v12  ;;  %v3831_v5 = vrot.slane %v3821_v17, 2  ;;  %v12112_v32 = vstv %s11996_s9  ;;  %v12116_v1 = vmul.f32 %v12051_v3, %v10819_v41  ;;  %v12122_v13 = vmul.f32 %v11178_v42, %v10819_v41  ;;  %s12742_s9 = sld [smem:[#allocation2 + $0x22]] }
 0x3db   : > { %17900 = vst [vmem:[#allocation91_spill] sm:$0xff] %v12109_v21  ;;  %17901 = vst [vmem:[#allocation112_spill] sm:$0xff] %v12112_v32  ;;  %v3859_v48 = vrot.slane %v3849_v45, 2  ;;  %v3860_v40 = vrot.slane %v3850_v51, 2  ;;  %v3878_v17 = vmul.f32 %v12112_v32, %v10747_v30  ;;  %v1514_v14 = vadd.f32 %v11943_v54, %v11779_v22  ;;  %4480 = vrot.lane.b32.xlu0 %v11619_v0, %s16969_s2  ;;  %v17905_v45 = vld [vmem:[#allocation183_spill] sm:$0xff]  ;;  %v7618_v51 = vpop.f32.mrb[24].mxu1 }
 0x3dc   : > { %17902 = vst [vmem:[#allocation106_spill] sm:$0xff] %v12116_v1  ;;  %17903 = vst [vmem:[#allocation108_spill] sm:$0xff] %v12122_v13  ;;  %v1625_v11 = vadd.f32 %v1616_v44, %v1477_v15  ;;  %v12129_v7 = vsel %vm1337_vm3, %v3830_v24, %v3831_v5  ;;  %v16706_v3 = vrot.slane %v12109_v21, 2  ;;  %v1478_v58 = vadd.f32 %v11945_v49, %v11782_v9  ;;  %v17907_v15 = vld [vmem:[#allocation46_spill] sm:$0xff]  ;;  %v5601_v44 = vpop.f32.mrb[25].mxu1 }
 0x3dd   : > { %17904 = vst [vmem:[#allocation78_spill] sm:$0xff] %v12129_v7  ;;  %4456 = vrot.lane.b32.xlu1 %v17905_v45, %s16969_s2  ;;  %v12139_v59 = vsel %vm1337_vm3, %v3859_v48, %v3860_v40  ;;  %v3879_v22 = vmul.f32 %v12112_v32, %v10765_v36  ;;  %v3888_v54 = vrot.slane %v3878_v17, 2  ;;  %v16707_v0 = vrot.slane %v12116_v1, 2  ;;  %v1653_v45 = vpop.permute.xlu0 %1652  ;;  %v17910_v17 = vld [vmem:[#allocation159_spill] sm:$0xff] }
 0x3de   : > { %17906 = vst [vmem:[#allocation139_spill] sm:$0xff] %v12139_v59  ;;  %v1920_v24 = vadd.f32 %v17907_v15, %v1625_v11  ;;  %v12147_v9 = vsel %vm1337_vm3, %v3831_v5, %v16706_v3  ;;  %v12151_v49 = vstv %s12053_s30  ;;  %v1551_v48 = vadd.f32 %v11998_v60, %v11827_v19  ;;  %v1618_v59 = vpop.permute.xlu1 %1617  ;;  %v17912_v19 = vld [vmem:[#allocation186_spill] sm:$0xff]  ;;  %v17913_v60 = vld [vmem:[#allocation145_spill] sm:$0xff]  ;;  %s12772_s30 = sld [smem:[#allocation2 + $0x46]] }
 0x3df   : > { %17908 = vst [vmem:[#allocation126_spill] sm:$0xff] %v12147_v9  ;;  %17909 = vst [vmem:[#allocation135_spill] sm:$0xff] %v12151_v49  ;;  %v7697_v7 = vpack.c.bf16 %v7618_v51, %v5601_v44  ;;  %v3889_v42 = vrot.slane %v3879_v22, 2  ;;  %v3907_v11 = vmul.f32 %v12151_v49, %v10747_v30  ;;  %v1662_v21 = vadd.f32 %v1653_v45, %v1514_v14  ;;  %v17916_v51 = vld [vmem:[#allocation66_spill] sm:$0xff] }
 0x3e0   : > { %v1976_v15 = vadd.f32 %v17910_v17, %v1920_v24  ;;  %v1626_v12 = vadd.f32 %v1618_v59, %v1478_v58  ;;  %v12161_v5 = vsel %vm1337_vm3, %v3860_v40, %v16707_v0  ;;  %v1515_v3 = vadd.f32 %v12000_v50, %v11830_v47  ;;  %4506 = vrot.lane.b32.xlu0 %v17912_v19, %s16969_s2  ;;  %v17915_v59 = vld [vmem:[#allocation36_spill] sm:$0xff]  ;;  %v17917_v24 = vld [vmem:[#allocation151_spill] sm:$0xff]  ;;  %v17920_v17 = vld [vmem:[#allocation42_spill] sm:$0xff] }
 0x3e1   : > { %17911 = vst [vmem:[#allocation114_spill] sm:$0xff] %v12161_v5  ;;  %4482 = vrot.lane.b32.xlu1 %v17913_v60, %s16969_s2  ;;  %v12170_v30 = vsel %vm1337_vm3, %v3888_v54, %v3889_v42  ;;  %v12174_v14 = vmul.f32 %v12151_v49, %v10765_v36  ;;  %v3917_v58 = vrot.slane %v3907_v11, 2  ;;  %v1930_v40 = vadd.f32 %v17915_v59, %v1662_v21  ;;  %v1690_v44 = vpop.permute.xlu0 %1689  ;;  %v17922_v19 = vld [vmem:[#allocation102_spill] sm:$0xff]  ;;  %v17927_v0 = vld [vmem:[#allocation156_spill] sm:$0xff]  ;;  %v17945_v5 = vld [vmem:[#allocation155_spill] sm:$0xff] }
 0x3e2   : > { %17914 = vst [vmem:[#allocation117_spill] sm:$0xff] %v12170_v30  ;;  %v1921_v22 = vadd.f32 %v17916_v51, %v1626_v12  ;;  %v2080_v47 = vadd.f32 %v17917_v24, %v1976_v15  ;;  %7698 = vmatpush3.bf16.msra.mxu1 %v7697_v7  ;;  %v12181_v50 = vmul.f32 %v12112_v32, %v10819_v41  ;;  %v1655_v45 = vpop.permute.xlu1 %1654  ;;  %v17919_v36 = vrot.slane %v12022_v6, 1  ;;  %v12196_v7 = vld [vmem:[%s16288_s6] sm:$0xff]  ;;  %v12201_v24 = vpop.f32.mrb[22].mxu0  ;;  %v17946_v30 = vld [vmem:[#allocation132_spill] sm:$0xff] }
 0x3e3   : > { %v1588_v54 = vadd.f32 %v12055_v46, %v11868_v52  ;;  %v17921_v11 = vrot.slane %v17920_v17, 1  ;;  %v2002_v52 = vadd.f32 %v17922_v19, %v1930_v40  ;;  %v17923_v46 = vld [vmem:[#allocation150_spill] sm:$0xff]  ;;  %v1699_v59 = vadd.f32 %v1690_v44, %v1551_v48  ;;  %17924 = vst [vmem:[#allocation120_spill] sm:$0xff] %v12201_v24  ;;  %v17925_v17 = vld [vmem:[#allocation153_spill] sm:$0xff]  ;;  %v7611_v15 = vpop.f32.mrb[23].mxu0  ;;  %v17976_v32 = vld [vmem:[#allocation184_spill] sm:$0xff] }
 0x3e4   : > { %17918 = vst [vmem:[#allocation118_spill] sm:$0xff] %v12181_v50  ;;  %v1977_v60 = vadd.f32 %v17923_v46, %v1921_v22  ;;  %v1663_v51 = vadd.f32 %v1655_v45, %v1515_v3  ;;  %4532 = vrot.lane.b32.xlu0 %v17925_v17, %s16969_s2  ;;  %v12210_v12 = vadd.f32 %v17927_v0, %v2080_v47  ;;  %v17928_v40 = vrot.slane %v12174_v14, 2  ;;  %v17930_v22 = vld [vmem:[#allocation58_spill] sm:$0xff]  ;;  %v17933_v46 = vld [vmem:[#allocation100_spill] sm:$0xff] }
 0x3e5   : > { %v12190_v21 = vsel %vm924_vm2, %v17921_v11, %v17919_v36  ;;  %v1552_v36 = vadd.f32 %v12057_v23, %v11871_v38  ;;  %v17926_v11 = vld [vmem:[#allocation193_spill] sm:$0xff]  ;;  %v16710_v3 = vrot.slane %v12181_v50, 2  ;;  %v1940_v44 = vadd.f32 %v17930_v22, %v1699_v59  ;;  %v17932_v45 = vld [vmem:[#allocation98_spill] sm:$0xff]  ;;  %7624 = vmatmul.mubr.msk.f32.vlgmr.msra.gmra.mrb[26].mxu1 %vm477_vm0, %v12196_v7  ;;  %v1727_v0 = vpop.permute.xlu0 %1726  ;;  %v17937_v59 = vld [vmem:[#allocation39_spill] sm:$0xff] }
 0x3e6   : > { %4508 = vrot.lane.b32.xlu1 %v17926_v11, %s16969_s2  ;;  %v12215_v48 = vsel %vm1337_vm3, %v3917_v58, %v17928_v40  ;;  %v17931_v38 = vld [vmem:[#allocation53_spill] sm:$0xff]  ;;  %v2106_v19 = vadd.f32 %v17932_v45, %v2002_v52  ;;  %v2081_v17 = vadd.f32 %v17933_v46, %v1977_v60  ;;  %v1692_v47 = vpop.permute.xlu1 %1691  ;;  %v17934_v15 = vrot.slane %v12122_v13, 1  ;;  %v17939_v52 = vld [vmem:[#allocation43_spill] sm:$0xff] }
 0x3e7   : > { %17929 = vst [vmem:[#allocation95_spill] sm:$0xff] %v12215_v48  ;;  %v1931_v23 = vadd.f32 %v17931_v38, %v1663_v51  ;;  %v17935_v11 = vld [vmem:[#allocation37_spill] sm:$0xff]  ;;  %v12233_v22 = vmul.f32 %v17937_v59, %v10819_v41  ;;  %v12237_v51 = vmul.f32 %v17939_v52, %v10819_v41  ;;  %v17941_v60 = vmov 0.0   ;;  %v12244_v38 = vld [vmem:[%s16288_s6 + $0x8] sm:$0xff]  ;;  %v17943_v46 = vld [vmem:[#allocation47_spill] sm:$0xff] }
 0x3e8   : > { %v17936_v58 = vrot.slane %v17935_v11, 1  ;;  %7626 = vmatprep.mubr.msk.f32.mxu1 %vm7975_vm1, %v17941_v60  ;;  %v12249_v45 = vsel %vm1337_vm3, %v3889_v42, %v16710_v3  ;;  %v17944_v11 = vld [vmem:[#allocation49_spill] sm:$0xff]  ;;  %v1736_v13 = vadd.f32 %v1727_v0, %v1588_v54  ;;  %v1700_v6 = vadd.f32 %v1692_v47, %v1552_v36  ;;  %4558 = vrot.lane.b32.xlu0 %v11794_v33, %s7978_s8 }
 0x3e9   : > { %17938 = vst [vmem:[#allocation124_spill] sm:$0xff] %v12233_v22  ;;  %17940 = vst [vmem:[#allocation97_spill] sm:$0xff] %v12237_v51  ;;  %v1589_v48 = vadd.f32 %v12118_v10, %v11927_v8  ;;  %v12260_v9 = vadd.f32 %v17946_v30, %v2106_v19  ;;  %v17947_v42 = vld [vmem:[#allocation105_spill] sm:$0xff]  ;;  %v17951_v8 = vld [vmem:[#allocation52_spill] sm:$0xff]  ;;  %7627 = vmatmul.mubr.msk.f32.gmra.mrb[28].mxu1 %vm477_vm0, %v12244_v38 }
 0x3ea   : > { %v12229_v40 = vsel %vm924_vm2, %v17936_v58, %v17934_v15  ;;  %17942 = vst [vmem:[#allocation101_spill] sm:$0xff] %v12249_v45  ;;  %v2028_v15 = vadd.f32 %v17943_v46, %v1940_v44  ;;  %v2003_v58 = vadd.f32 %v17944_v11, %v1931_v23  ;;  %4534 = vrot.lane.b32.xlu1 %v17945_v5, %s16969_s2  ;;  %v7644_v44 = vpop.f32.mrb[24].mxu0  ;;  %v17948_v46 = vld [vmem:[#allocation172_spill] sm:$0xff]  ;;  %v17949_v54 = vld [vmem:[#allocation173_spill] sm:$0xff]  ;;  %v12271_v5 = vpop.permute.xlu0 %2301 }
 0x3eb   : > { %v12263_v3 = vadd.f32 %v17947_v42, %v2081_v17  ;;  %v1950_v23 = vadd.f32 %v17948_v46, %v1736_v13  ;;  %v1941_v36 = vadd.f32 %v17949_v54, %v1700_v6  ;;  %v17950_v0 = vld [vmem:[#allocation169_spill] sm:$0xff]  ;;  %v6326_v33 = vpop.f32.mrb[25].mxu0  ;;  %v1729_v30 = vpop.permute.xlu1 %1728  ;;  %7629 = vmatprep.mubr.msk.f32.mxu1 %vm7975_vm1, %v17941_v60 }
 0x3ec   : > { %v2132_v47 = vadd.f32 %v17950_v0, %v2028_v15  ;;  %v2107_v10 = vadd.f32 %v17951_v8, %v2003_v58  ;;  %v17952_v17 = vld [vmem:[#allocation45_spill] sm:$0xff]  ;;  %v7704_v13 = vpack.c.bf16 %v7644_v44, %v6326_v33  ;;  %v12287_v15 = vmul.f32 %v12151_v49, %v10819_v41  ;;  %v17955_v58 = vld [vmem:[#allocation40_spill] sm:$0xff]  ;;  %4584 = vrot.lane.b32.xlu0 %v11902_v39, %s7978_s8  ;;  %v17965_v39 = vld [vmem:[#allocation119_spill] sm:$0xff] }
 0x3ed   : > { %v12276_v11 = vmul.f32 %v17952_v17, %v10819_v41  ;;  %v12283_v6 = vld [vmem:[%s16288_s6 + $0x10] sm:$0xff]  ;;  %v2054_v42 = vadd.f32 %v17955_v58, %v1950_v23  ;;  %v1737_v0 = vadd.f32 %v1729_v30, %v1589_v48  ;;  %v17957_v8 = vld [vmem:[#allocation168_spill] sm:$0xff]  ;;  %v17961_v48 = vld [vmem:[#allocation75_spill] sm:$0xff] }
 0x3ee   : > { %17954 = vst [vmem:[#allocation143_spill] sm:$0xff] %v12287_v15  ;;  %v17956_v46 = vld [vmem:[#allocation41_spill] sm:$0xff]  ;;  %v12293_v19 = vmul.f32 %v17957_v8, %v10819_v41  ;;  %4560 = vrot.lane.b32.xlu1 %v11887_v53, %s7978_s8  ;;  %v17959_v44 = vld [vmem:[#allocation160_spill] sm:$0xff]  ;;  %v17963_v30 = vld [vmem:[#allocation115_spill] sm:$0xff]  ;;  %7630 = vmatmul.mubr.msk.f32.gmra.mrb[30].mxu1 %vm477_vm0, %v12283_v6 }
 0x3ef   : > { %17953 = vst [vmem:[#allocation128_spill] sm:$0xff] %v12276_v11  ;;  %v2029_v54 = vadd.f32 %v17956_v46, %v1941_v36  ;;  %v12300_v33 = vadd.f32 %v17959_v44, %v2132_v47  ;;  %v17960_v45 = vld [vmem:[#allocation133_spill] sm:$0xff]  ;;  %v12308_v36 = vmul.f32 %v17961_v48, %v10819_v41  ;;  %v1951_v58 = vadd.f32 %v17963_v30, %v1737_v0  ;;  %v17964_v46 = vld [vmem:[#allocation59_spill] sm:$0xff]  ;;  %v12318_v47 = vpop.permute.xlu1 %2303 }
 0x3f0   : > { %17958 = vst [vmem:[#allocation103_spill] sm:$0xff] %v12293_v19  ;;  %v12303_v24 = vadd.f32 %v17960_v45, %v2107_v10  ;;  %v2158_v49 = vadd.f32 %v17964_v46, %v2054_v42  ;;  %7705 = vmatpush3.bf16.msra.mxu0 %v7704_v13  ;;  %v12316_v45 = vpop.permute.xlu0 %2338  ;;  %v17966_v44 = vld [vmem:[#allocation127_spill] sm:$0xff]  ;;  %v17968_v42 = vld [vmem:[#allocation180_spill] sm:$0xff]  ;;  %7632 = vmatprep.mubr.msk.f32.mxu1 %vm7975_vm1, %v17941_v60  ;;  %v17972_v13 = vld [vmem:[#allocation202_spill] sm:$0xff] }
 0x3f1   : > { %17962 = vst [vmem:[#allocation154_spill] sm:$0xff] %v12308_v36  ;;  %v2133_v50 = vadd.f32 %v17965_v39, %v2029_v54  ;;  %v12323_v23 = vmul.f32 %v17966_v44, %v10819_v41  ;;  %v12327_v0 = vmul.f32 %v17968_v42, %v10819_v41  ;;  %v17970_v54 = vld [vmem:[#allocation73_spill] sm:$0xff]  ;;  %v2055_v46 = vadd.f32 %v17972_v13, %v1951_v58  ;;  %v17973_v39 = vld [vmem:[#allocation138_spill] sm:$0xff]  ;;  %v17974_v10 = vld [vmem:[#allocation83_spill] sm:$0xff] }
 0x3f2   : > { %v12331_v30 = vmul.f32 %v17970_v54, %v10819_v41  ;;  %v12337_v53 = vadd.f32 %v17973_v39, %v2158_v49  ;;  %v12341_v1 = vmul.f32 %v17974_v10, %v10819_v41  ;;  %v12345_v42 = vmul.f32 %v17976_v32, %v10819_v41  ;;  %4610 = vrot.lane.b32.xlu0 %v11906_v16, %s7978_s8  ;;  %v17978_v54 = vld [vmem:[#allocation162_spill] sm:$0xff]  ;;  %v17979_v58 = vld [vmem:[#allocation147_spill] sm:$0xff] }
 0x3f3   : > { %17967 = vst [vmem:[#allocation131_spill] sm:$0xff] %v12323_v23  ;;  %17969 = vst [vmem:[#allocation183_spill] sm:$0xff] %v12327_v0  ;;  %4586 = vrot.lane.b32.xlu1 %v11977_v25, %s7978_s8  ;;  %v12352_v44 = vadd.f32 %v17978_v54, %v2133_v50  ;;  %v12357_v13 = vmul.f32 %v11736_v27, %v17979_v58  ;;  %v12361_v39 = vmul.f32 %v11785_v61, %v17979_v58  ;;  %v17982_v32 = vld [vmem:[#allocation179_spill] sm:$0xff]  ;;  %v12382_v27 = vpop.permute.xlu1 %2340 }
 0x3f4   : > { %17971 = vst [vmem:[#allocation46_spill] sm:$0xff] %v12331_v30  ;;  %17975 = vst [vmem:[#allocation159_spill] sm:$0xff] %v12341_v1  ;;  %v2159_v16 = vadd.f32 %v17982_v32, %v2055_v46  ;;  %v12369_v25 = vmul.f32 %v11833_v31, %v17979_v58  ;;  %7650 = vmatmul.mubr.msk.f32.vlgmr.msra.gmra.mrb[26].mxu0 %vm477_vm0, %v12196_v7  ;;  %v17984_v50 = vrot.slane %v12287_v15, 2  ;;  %v17985_v54 = vrot.slane %v12174_v14, 2  ;;  %v12380_v61 = vpop.permute.xlu0 %2375  ;;  %v17988_v46 = vld [vmem:[#allocation23_spill] sm:$0xff] }
 0x3f5   : > { %17977 = vst [vmem:[#allocation186_spill] sm:$0xff] %v12345_v42  ;;  %17980 = vst [vmem:[#allocation145_spill] sm:$0xff] %v12357_v13  ;;  %v17987_v32 = vrot.slane %v12233_v22, 1  ;;  %v17989_v10 = vrot.slane %v17988_v46, 1  ;;  %v12395_v14 = vmul.f32 %v11874_v18, %v17979_v58  ;;  %7652 = vmatprep.mubr.msk.f32.mxu0 %vm7975_vm1, %v17941_v60  ;;  %v17993_v15 = vrot.slane %v12237_v51, 1  ;;  %v17994_v7 = vld [vmem:[#allocation67_spill] sm:$0xff] }
 0x3f6   : > { %17981 = vst [vmem:[#allocation36_spill] sm:$0xff] %v12361_v39  ;;  %17983 = vst [vmem:[#allocation66_spill] sm:$0xff] %v12369_v25  ;;  %v12378_v49 = vsel %vm1337_vm3, %v17985_v54, %v17984_v50  ;;  %v17991_v50 = vld [vmem:[#allocation136_spill] sm:$0xff]  ;;  %4636 = vrot.lane.b32.xlu0 %v12032_v20, %s7978_s8  ;;  %v17995_v22 = vrot.slane %v17994_v7, 1  ;;  %v18000_v51 = vld [vmem:[#allocation54_spill] sm:$0xff] }
 0x3f7   : > { %17986 = vst [vmem:[#allocation151_spill] sm:$0xff] %v12378_v49  ;;  %v12389_v31 = vsel %vm924_vm2, %v17989_v10, %v17987_v32  ;;  %17990 = vst [vmem:[#allocation42_spill] sm:$0xff] %v12395_v14  ;;  %v12402_v54 = vadd.f32 %v17991_v50, %v2159_v16  ;;  %v12408_v32 = vmul.f32 %v11921_v62, %v17979_v58  ;;  %4612 = vrot.lane.b32.xlu1 %v12016_v34, %s7978_s8  ;;  %v17997_v62 = vld [vmem:[#allocation166_spill] sm:$0xff]  ;;  %v18003_v50 = vld [vmem:[#allocation27_spill] sm:$0xff] }
 0x3f8   : > { %v12419_v16 = vsel %vm924_vm2, %v17995_v22, %v17993_v15  ;;  %v17996_v49 = vrot.slane %v12276_v11, 2  ;;  %v17998_v20 = vrot.slane %v17997_v62, 2  ;;  %v17999_v34 = vrot.slane %v12293_v19, 2  ;;  %7653 = vmatmul.mubr.msk.f32.gmra.mrb[28].mxu0 %vm477_vm0, %v12244_v38  ;;  %v12448_v62 = vpop.permute.xlu0 %2412 }
 0x3f9   : > { %17992 = vst [vmem:[#allocation102_spill] sm:$0xff] %v12408_v32  ;;  %v18001_v7 = vrot.slane %v18000_v51, 2  ;;  %v18002_v15 = vrot.slane %v12308_v36, 2  ;;  %v18004_v10 = vrot.slane %v18003_v50, 2  ;;  %v18005_v51 = vrot.slane %v12323_v23, 2  ;;  %v18009_v50 = vld [vmem:[#allocation182_spill] sm:$0xff]  ;;  %7655 = vmatprep.mubr.msk.f32.mxu0 %vm7975_vm1, %v17941_v60 }
 0x3fa   : > { %v12429_v18 = vsel %vm1337_vm3, %v17998_v20, %v17996_v49  ;;  %v12450_v49 = vpop.permute.xlu1 %2377  ;;  %v18006_v20 = vld [vmem:[#allocation33_spill] sm:$0xff]  ;;  %v12469_v36 = vmul.f32 %v11924_v55, %v17979_v58  ;;  %v12492_v19 = vmul.f32 %v11990_v57, %v17979_v58 }
 0x3fb   : > { %v12436_v22 = vsel %vm1337_vm3, %v18001_v7, %v17999_v34  ;;  %v12443_v46 = vsel %vm1337_vm3, %v18004_v10, %v18002_v15  ;;  %v18007_v34 = vrot.slane %v18006_v20, 2  ;;  %v18008_v10 = vrot.slane %v12327_v0, 2  ;;  %v18013_v20 = vld [vmem:[#allocation181_spill] sm:$0xff]  ;;  %4638 = vrot.lane.b32.xlu1 %v12038_v37, %s7978_s8 }
 0x3fc   : > { %v18010_v15 = vrot.slane %v18009_v50, 2  ;;  %18011 = vst [vmem:[#allocation150_spill] sm:$0xff] %v12469_v36  ;;  %18018 = vst [vmem:[#allocation153_spill] sm:$0xff] %v12492_v19  ;;  %7656 = vmatmul.mubr.msk.f32.gmra.mrb[30].mxu0 %vm477_vm0, %v12283_v6  ;;  %v12550_v6 = vstv %s12399_s15  ;;  %s13347_s15 = sld [smem:[#allocation2 + $0x8f]] }
 0x3fd   : > { %v12457_v7 = vsel %vm1337_vm3, %v18007_v34, %v18005_v51  ;;  %v18012_v51 = vrot.slane %v12331_v30, 2  ;;  %v18014_v34 = vrot.slane %v18013_v20, 2  ;;  %v18019_v30 = vld [vmem:[#allocation82_spill] sm:$0xff]  ;;  %v18021_v20 = vld [vmem:[#allocation187_spill] sm:$0xff]  ;;  %7658 = vmatprep.mubr.msk.f32.mxu0 %vm7975_vm1, %v17941_v60  ;;  %18037 = vst [vmem:[#allocation37_spill] sm:$0xff] %v12550_v6 }
 0x3fe   : > { %v12464_v11 = vsel %vm1337_vm3, %v18010_v15, %v18008_v10  ;;  %v18015_v10 = vrot.slane %v12341_v1, 2  ;;  %v18016_v15 = vld [vmem:[#allocation137_spill] sm:$0xff]  ;;  %3543 = vrot.lane.b32.xlu0 %v18019_v30, %s16969_s2  ;;  %v18027_v30 = vrot.slane %v12361_v39, 1  ;;  %v18028_v1 = vrot.slane %v11805_v43, 1 }
 0x3ff   : > { %v12480_v50 = vsel %vm1337_vm3, %v18014_v34, %v18012_v51  ;;  %v18017_v38 = vrot.slane %v18016_v15, 2  ;;  %v18020_v51 = vrot.slane %v12345_v42, 2  ;;  %v18022_v34 = vrot.slane %v18021_v20, 2 }
 0x400   : > { %v18025_v15 = vrot.slane %v11754_v28, 1  ;;  %v12517_v37 = vsel %vm924_vm2, %v18028_v1, %v18027_v30  ;;  %v12520_v42 = vstv %s12363_s14  ;;  %v18031_v20 = vrot.slane %v12369_v25, 1  ;;  %s7395_s14 = sld [smem:[#allocation7 + $0x19]] }
 0x401   : > { %v12487_v0 = vsel %vm1337_vm3, %v18017_v38, %v18015_v10  ;;  %v12503_v38 = vsel %vm1337_vm3, %v18022_v34, %v18020_v51  ;;  %v18024_v10 = vrot.slane %v12357_v13, 1  ;;  %18029 = vst [vmem:[#allocation58_spill] sm:$0xff] %v12517_v37  ;;  %18030 = vst [vmem:[#allocation53_spill] sm:$0xff] %v12520_v42  ;;  %v2311_v51 = vadd.f32 %v12271_v5, %v12210_v12 }
 0x402   : > { %18023 = vst [vmem:[#allocation193_spill] sm:$0xff] %v12503_v38  ;;  %v18032_v34 = vrot.slane %v11847_v56, 1  ;;  %v4654_v43 = vmul.f32 %v12520_v42, %v10906_v63  ;;  %v4655_v1 = vmul.f32 %v12520_v42, %v10924_v4  ;;  %v18034_v12 = vrot.slane %v12395_v14, 1  ;;  %v18040_v14 = vld [vmem:[#allocation76_spill] sm:$0xff] }
 0x403   : > { %v12510_v23 = vsel %vm924_vm2, %v18025_v15, %v18024_v10  ;;  %v2450_v10 = vpop.permute.xlu0 %2449  ;;  %v12537_v15 = vpop.permute.xlu1 %2414  ;;  %v18035_v5 = vrot.slane %v11898_v26, 1  ;;  %v18039_v25 = vrot.slane %v12408_v32, 1  ;;  %v18041_v39 = vrot.slane %v18040_v14, 1  ;;  %v18044_v14 = vld [vmem:[#allocation87_spill] sm:$0xff]  ;;  %v18049_v32 = vld [vmem:[#allocation104_spill] sm:$0xff] }
 0x404   : > { %18026 = vst [vmem:[#allocation156_spill] sm:$0xff] %v12510_v23  ;;  %v12529_v28 = vsel %vm924_vm2, %v18032_v34, %v18031_v20  ;;  %v12554_v20 = vmul.f32 %v12520_v42, %v17979_v58  ;;  %v2459_v34 = vadd.f32 %v2450_v10, %v2311_v51  ;;  %v2348_v30 = vadd.f32 %v12316_v45, %v12260_v9  ;;  %v18043_v51 = vld [vmem:[#allocation199_spill] sm:$0xff]  ;;  %v18127_v23 = vld [vmem:[#allocation165_spill] sm:$0xff] }
 0x405   : > { %18033 = vst [vmem:[#allocation98_spill] sm:$0xff] %v12529_v28  ;;  %v12544_v56 = vsel %vm924_vm2, %v18035_v5, %v18034_v12  ;;  %v12561_v26 = vsel %vm924_vm2, %v18041_v39, %v18039_v25  ;;  %v4664_v5 = vrot.slane %v4654_v43, 1  ;;  %v2312_v13 = vadd.f32 %v12318_v47, %v12263_v3  ;;  %3580 = vrot.lane.b32.xlu0 %v18043_v51, %s16969_s2  ;;  %v18045_v39 = vld [vmem:[#allocation71_spill] sm:$0xff]  ;;  %v18047_v12 = vld [vmem:[#allocation28_spill] sm:$0xff] }
 0x406   : > { %18036 = vst [vmem:[#allocation100_spill] sm:$0xff] %v12544_v56  ;;  %18038 = vst [vmem:[#allocation39_spill] sm:$0xff] %v12554_v20  ;;  %3545 = vrot.lane.b32.xlu1 %v18044_v14, %s16969_s2  ;;  %v12576_v25 = vmul.f32 %v18045_v39, %v10819_v41  ;;  %v4665_v10 = vrot.slane %v4655_v1, 1  ;;  %v12579_v43 = vadd.f32 %v18047_v12, %v2459_v34  ;;  %v18048_v14 = vrot.slane %v12469_v36, 1  ;;  %v18052_v34 = vld [vmem:[#allocation80_spill] sm:$0xff] }
 0x407   : > { %18042 = vst [vmem:[#allocation47_spill] sm:$0xff] %v12561_v26  ;;  %v4683_v9 = vmul.f32 %v12550_v6, %v10906_v63  ;;  %v4684_v3 = vmul.f32 %v12550_v6, %v10924_v4  ;;  %v2487_v47 = vpop.permute.xlu0 %2486  ;;  %v2452_v51 = vpop.permute.xlu1 %2451  ;;  %v18050_v42 = vrot.slane %v18049_v32, 1  ;;  %v12597_v12 = vmul.f32 %v18052_v34, %v10819_v41 }
 0x408   : > { %18046 = vst [vmem:[#allocation49_spill] sm:$0xff] %v12576_v25  ;;  %v12600_v25 = vsel %vm924_vm2, %v4664_v5, %v4665_v10  ;;  %v12603_v26 = vstv %s12473_s26  ;;  %v2496_v45 = vadd.f32 %v2487_v47, %v2348_v30  ;;  %v2460_v56 = vadd.f32 %v2452_v51, %v2312_v13  ;;  %v18059_v5 = vld [vmem:[#allocation161_spill] sm:$0xff]  ;;  %s13506_s26 = sld [smem:[#allocation2 + $0x21]] }
 0x409   : > { %v12593_v1 = vsel %vm924_vm2, %v18050_v42, %v18048_v14  ;;  %18053 = vst [vmem:[#allocation132_spill] sm:$0xff] %v12597_v12  ;;  %18054 = vst [vmem:[#allocation105_spill] sm:$0xff] %v12600_v25  ;;  %v18056_v28 = vrot.slane %v12492_v19, 1  ;;  %v18057_v36 = vrot.slane %v12012_v2, 1  ;;  %v4693_v42 = vrot.slane %v4683_v9, 1  ;;  %3617 = vrot.lane.b32.xlu0 %v18059_v5, %s16969_s2  ;;  %v18087_v25 = vld [vmem:[#allocation157_spill] sm:$0xff] }
 0x40a   : > { %18051 = vst [vmem:[#allocation155_spill] sm:$0xff] %v12593_v1  ;;  %18055 = vst [vmem:[#allocation172_spill] sm:$0xff] %v12603_v26  ;;  %v2385_v14 = vadd.f32 %v12380_v61, %v12300_v33  ;;  %v2349_v12 = vadd.f32 %v12382_v27, %v12303_v24  ;;  %3582 = vrot.lane.b32.xlu1 %v12064_v29, %s16969_s2  ;;  %v4694_v13 = vrot.slane %v4684_v3, 1  ;;  %v18060_v2 = vrot.slane %v12554_v20, 1  ;;  %v18063_v61 = vld [vmem:[#allocation122_spill] sm:$0xff]  ;;  %v18095_v20 = vld [vmem:[#allocation200_spill] sm:$0xff] }
 0x40b   : > { %v12610_v32 = vsel %vm924_vm2, %v18057_v36, %v18056_v28  ;;  %v18062_v28 = vld [vmem:[#allocation21_spill] sm:$0xff]  ;;  %v12629_v33 = vadd.f32 %v18063_v61, %v2460_v56  ;;  %v4712_v27 = vmul.f32 %v12603_v26, %v10906_v63  ;;  %v4713_v24 = vmul.f32 %v12603_v26, %v10924_v4  ;;  %v2524_v9 = vpop.permute.xlu0 %2523  ;;  %v2489_v29 = vpop.permute.xlu1 %2488  ;;  %v18064_v3 = vld [vmem:[#allocation194_spill] sm:$0xff] }
 0x40c   : > { %18058 = vst [vmem:[#allocation173_spill] sm:$0xff] %v12610_v32  ;;  %v12623_v36 = vsel %vm924_vm2, %v4665_v10, %v18060_v2  ;;  %v12626_v30 = vadd.f32 %v18062_v28, %v2496_v45  ;;  %v12637_v47 = vmul.f32 %v18045_v39, %v18064_v3  ;;  %v18066_v10 = vld [vmem:[#allocation109_spill] sm:$0xff]  ;;  %v12644_v45 = vsel %vm924_vm2, %v4693_v42, %v4694_v13  ;;  %v5523_v42 = vld [vmem:[%s16288_s6 + $0x18] sm:$0xff]  ;;  %v18124_v32 = vld [vmem:[#allocation164_spill] sm:$0xff] }
 0x40d   : > { %18061 = vst [vmem:[#allocation169_spill] sm:$0xff] %v12623_v36  ;;  %v12641_v51 = vmul.f32 %v18066_v10, %v10819_v41  ;;  %18068 = vst [vmem:[#allocation41_spill] sm:$0xff] %v12644_v45  ;;  %v12648_v56 = vmul.f32 %v12550_v6, %v17979_v58  ;;  %v2533_v5 = vadd.f32 %v2524_v9, %v2385_v14  ;;  %v12651_v28 = vstv %s12564_s29  ;;  %v18071_v36 = vld [vmem:[#allocation163_spill] sm:$0xff]  ;;  %s13733_s29 = sld [smem:[#allocation2 + $0x45]] }
 0x40e   : > { %18065 = vst [vmem:[#allocation52_spill] sm:$0xff] %v12637_v47  ;;  %v2497_v2 = vadd.f32 %v2489_v29, %v2349_v12  ;;  %18070 = vst [vmem:[#allocation133_spill] sm:$0xff] %v12651_v28  ;;  %v4722_v61 = vrot.slane %v4712_v27, 1  ;;  %v2422_v39 = vadd.f32 %v12448_v62, %v12337_v53  ;;  %v2386_v19 = vadd.f32 %v12450_v49, %v12352_v44  ;;  %v18072_v27 = vld [vmem:[#allocation141_spill] sm:$0xff]  ;;  %v18073_v53 = vld [vmem:[#allocation19_spill] sm:$0xff] }
 0x40f   : > { %18067 = vst [vmem:[#allocation40_spill] sm:$0xff] %v12641_v51  ;;  %18069 = vst [vmem:[#allocation160_spill] sm:$0xff] %v12648_v56  ;;  %3654 = vrot.lane.b32.xlu0 %v18071_v36, %s16969_s2  ;;  %3619 = vrot.lane.b32.xlu1 %v12085_v35, %s16969_s2  ;;  %v4723_v12 = vrot.slane %v4713_v24, 1  ;;  %v16748_v14 = vrot.slane %v12648_v56, 1  ;;  %v12666_v9 = vadd.f32 %v18072_v27, %v2533_v5  ;;  %v12674_v44 = vstv %s12586_s12  ;;  %v2561_v49 = vpop.permute.xlu0 %2560  ;;  %v2526_v36 = vpop.permute.xlu1 %2525  ;;  %v18100_v47 = vld [vmem:[#allocation20_spill] sm:$0xff]  ;;  %s13836_s12 = sld [smem:[#allocation2 + $0x69]] }
 0x410   : > { %v12669_v62 = vadd.f32 %v18073_v53, %v2497_v2  ;;  %7633 = vmatmul.mubr.msk.f32.gmra.mrb[32].mxu1 %vm477_vm0, %v5523_v42  ;;  %7659 = vmatmul.mubr.msk.f32.gmra.mrb[32].mxu0 %vm477_vm0, %v5523_v42  ;;  %18074 = vst [vmem:[#allocation115_spill] sm:$0xff] %v12674_v44  ;;  %v12678_v35 = vmul.f32 %v12603_v26, %v17979_v58  ;;  %v18079_v53 = vld [vmem:[#allocation85_spill] sm:$0xff] }
 0x411   : > { %v12682_v24 = vmul.f32 %v18052_v34, %v18064_v3  ;;  %v12685_v29 = vsel %vm924_vm2, %v4722_v61, %v4723_v12  ;;  %v12690_v5 = vsel %vm924_vm2, %v4694_v13, %v16748_v14  ;;  %v4741_v2 = vmul.f32 %v12674_v44, %v10906_v63  ;;  %7635 = vmatprep.mubr.msk.f32.mxu1 %vm7975_vm1, %v17941_v60  ;;  %v18081_v14 = vld [vmem:[#allocation31_spill] sm:$0xff] }
 0x412   : > { %18075 = vst [vmem:[#allocation59_spill] sm:$0xff] %v12678_v35  ;;  %18077 = vst [vmem:[#allocation202_spill] sm:$0xff] %v12685_v29  ;;  %v2570_v42 = vadd.f32 %v2561_v49, %v2422_v39  ;;  %v2534_v27 = vadd.f32 %v2526_v36, %v2386_v19  ;;  %v12698_v34 = vmul.f32 %v18079_v53, %v10819_v41  ;;  %7661 = vmatprep.mubr.msk.f32.mxu0 %vm7975_vm1, %v17941_v60  ;;  %v18084_v36 = vld [vmem:[#allocation24_spill] sm:$0xff]  ;;  %v18085_v60 = vld [vmem:[#allocation123_spill] sm:$0xff] }
 0x413   : > { %18076 = vst [vmem:[#allocation119_spill] sm:$0xff] %v12682_v24  ;;  %18078 = vst [vmem:[#allocation138_spill] sm:$0xff] %v12690_v5  ;;  %v4742_v61 = vmul.f32 %v12674_v44, %v10924_v4  ;;  %v2423_v13 = vadd.f32 %v12537_v15, %v12402_v54  ;;  %3691 = vrot.lane.b32.xlu0 %v18081_v14, %s7978_s8  ;;  %v18082_v5 = vld [vmem:[#allocation121_spill] sm:$0xff]  ;;  %v12712_v19 = vmul.f32 %v12651_v28, %v10924_v4  ;;  %v2714_v14 = vpop.permute.xlu0 %2713 }
 0x414   : > { %18080 = vst [vmem:[#allocation162_spill] sm:$0xff] %v12698_v34  ;;  %3656 = vrot.lane.b32.xlu1 %v18082_v5, %s16969_s2  ;;  %v4751_v39 = vrot.slane %v4741_v2, 1  ;;  %v12716_v29 = vadd.f32 %v18084_v36, %v2570_v42  ;;  %v12719_v45 = vadd.f32 %v18085_v60, %v2534_v27  ;;  %v12723_v15 = vmul.f32 %v12674_v44, %v17979_v58  ;;  %v2563_v5 = vpop.permute.xlu1 %2562  ;;  %v18089_v2 = vld [vmem:[#allocation158_spill] sm:$0xff]  ;;  %v18097_v24 = vld [vmem:[#allocation29_spill] sm:$0xff] }
 0x415   : > { %18083 = vst [vmem:[#allocation147_spill] sm:$0xff] %v12712_v19  ;;  %v4752_v54 = vrot.slane %v4742_v61, 1  ;;  %v12727_v56 = vmul.f32 %v18087_v25, %v18064_v3  ;;  %v12731_v49 = vmul.f32 %v18089_v2, %v18064_v3  ;;  %v18091_v42 = vld [vmem:[#allocation26_spill] sm:$0xff]  ;;  %v18093_v27 = vrot.slane %v12678_v35, 1 }
 0x416   : > { %18086 = vst [vmem:[#allocation179_spill] sm:$0xff] %v12723_v15  ;;  %v12735_v36 = vmul.f32 %v18091_v42, %v18064_v3  ;;  %v2571_v60 = vadd.f32 %v2563_v5, %v2423_v13  ;;  %v12746_v34 = vmul.f32 %v18095_v20, %v18064_v3  ;;  %v12750_v51 = vmul.f32 %v18097_v24, %v18064_v3  ;;  %v18102_v13 = vld [vmem:[#allocation178_spill] sm:$0xff] }
 0x417   : > { %18088 = vst [vmem:[#allocation23_spill] sm:$0xff] %v12727_v56  ;;  %18090 = vst [vmem:[#allocation136_spill] sm:$0xff] %v12731_v49  ;;  %v12740_v61 = vsel %vm924_vm2, %v4723_v12, %v18093_v27  ;;  %v12753_v44 = vsel %vm924_vm2, %v4751_v39, %v4752_v54  ;;  %3728 = vrot.lane.b32.xlu0 %v18100_v47, %s7978_s8  ;;  %v12761_v12 = vmul.f32 %v18066_v10, %v18064_v3  ;;  %v18104_v27 = vld [vmem:[#allocation30_spill] sm:$0xff]  ;;  %v18106_v47 = vld [vmem:[#allocation140_spill] sm:$0xff] }
 0x418   : > { %18092 = vst [vmem:[#allocation67_spill] sm:$0xff] %v12735_v36  ;;  %18094 = vst [vmem:[#allocation166_spill] sm:$0xff] %v12740_v61  ;;  %3693 = vrot.lane.b32.xlu1 %v12190_v21, %s7978_s8  ;;  %v12765_v5 = vmul.f32 %v18102_v13, %v10819_v41  ;;  %v12769_v61 = vmul.f32 %v18104_v27, %v18064_v3  ;;  %v12779_v21 = vmul.f32 %v18079_v53, %v18064_v3  ;;  %v18108_v10 = vld [vmem:[#allocation35_spill] sm:$0xff]  ;;  %v2716_v26 = vpop.permute.xlu1 %2715 }
 0x419   : > { %18096 = vst [vmem:[#allocation54_spill] sm:$0xff] %v12746_v34  ;;  %18098 = vst [vmem:[#allocation27_spill] sm:$0xff] %v12750_v51  ;;  %v12783_v35 = vmul.f32 %v18108_v10, %v10819_v41  ;;  %v18114_v39 = vld [vmem:[#allocation79_spill] sm:$0xff]  ;;  %v12824_v10 = vmul.f32 %v17961_v48, %v18064_v3  ;;  %v5029_v6 = vmul.f32 %v12651_v28, %v10906_v63 }
 0x41a   : > { %18099 = vst [vmem:[#allocation33_spill] sm:$0xff] %v12753_v44  ;;  %18101 = vst [vmem:[#allocation182_spill] sm:$0xff] %v12761_v12  ;;  %v12775_v44 = vadd.f32 %v18106_v47, %v2571_v60  ;;  %v2751_v12 = vpop.permute.xlu0 %2750  ;;  %v18111_v47 = vrot.slane %v12723_v15, 1  ;;  %v18121_v15 = vld [vmem:[#allocation180_spill] sm:$0xff]  ;;  %v12842_v1 = vmul.f32 %v18124_v32, %v10819_v41  ;;  %v2724_v48 = vadd.f32 %v2716_v26, %v12629_v33 }
 0x41b   : > { %18103 = vst [vmem:[#allocation181_spill] sm:$0xff] %v12765_v5  ;;  %18105 = vst [vmem:[#allocation137_spill] sm:$0xff] %v12769_v61  ;;  %v12787_v5 = vmul.f32 %v18102_v13, %v18064_v3  ;;  %3765 = vrot.lane.b32.xlu0 %v18114_v39, %s7978_s8  ;;  %v12815_v13 = vmul.f32 %v17952_v17, %v18064_v3  ;;  %v2723_v39 = vadd.f32 %v2714_v14, %v12579_v43  ;;  %v18123_v43 = vld [vmem:[#allocation65_spill] sm:$0xff] }
 0x41c   : > { %18107 = vst [vmem:[#allocation82_spill] sm:$0xff] %v12779_v21  ;;  %18109 = vst [vmem:[#allocation187_spill] sm:$0xff] %v12783_v35  ;;  %v12795_v53 = vsel %vm924_vm2, %v4752_v54, %v18111_v47  ;;  %3730 = vrot.lane.b32.xlu1 %v12229_v40, %s7978_s8  ;;  %v12811_v47 = vmul.f32 %v17939_v52, %v18064_v3  ;;  %v12819_v35 = vmul.f32 %v17957_v8, %v18064_v3  ;;  %v18119_v40 = vld [vmem:[#allocation127_spill] sm:$0xff]  ;;  %v18128_v52 = vld [vmem:[#allocation88_spill] sm:$0xff] }
 0x41d   : > { %18110 = vst [vmem:[#allocation76_spill] sm:$0xff] %v12787_v5  ;;  %18112 = vst [vmem:[#allocation199_spill] sm:$0xff] %v12795_v53  ;;  %v12802_v5 = vmul.f32 %v17937_v59, %v18064_v3  ;;  %v12828_v54 = vmul.f32 %v18119_v40, %v18064_v3  ;;  %v2753_v53 = vpop.permute.xlu1 %2752  ;;  %v12836_v21 = vmul.f32 %v18121_v15, %v18064_v3  ;;  %v12845_v40 = vstv %s12742_s9  ;;  %v18126_v8 = vld [vmem:[#allocation171_spill] sm:$0xff]  ;;  %s7324_s9 = sld [smem:[#allocation2 + $0x3f]] }
 0x41e   : > { %18115 = vst [vmem:[#allocation71_spill] sm:$0xff] %v12811_v47  ;;  %18116 = vst [vmem:[#allocation28_spill] sm:$0xff] %v12815_v13  ;;  %v2788_v60 = vpop.permute.xlu0 %2787  ;;  %v3162_v14 = vmul.f32 %v18123_v43, %v10819_v41  ;;  %v2760_v28 = vadd.f32 %v2751_v12, %v12626_v30  ;;  %v12851_v37 = vmul.f32 %v18126_v8, %v10819_v41  ;;  %v5039_v17 = vrot.slane %v5029_v6, 1 }
 0x41f   : > { %18113 = vst [vmem:[#allocation87_spill] sm:$0xff] %v12802_v5  ;;  %18117 = vst [vmem:[#allocation104_spill] sm:$0xff] %v12819_v35  ;;  %v12854_v15 = vadd.f32 %v2788_v60, %v12666_v9  ;;  %3802 = vrot.lane.b32.xlu0 %v18127_v23, %s7978_s8  ;;  %v12862_v38 = vmul.f32 %v18128_v52, %v10819_v41  ;;  %v5182_v26 = vmul.f32 %v12845_v40, %v10906_v63 }
 0x420   : > { %18118 = vst [vmem:[#allocation80_spill] sm:$0xff] %v12824_v10  ;;  %18120 = vst [vmem:[#allocation161_spill] sm:$0xff] %v12828_v54  ;;  %3767 = vrot.lane.b32.xlu1 %v12389_v31, %s7978_s8  ;;  %v12867_v30 = vstv %s12772_s30  ;;  %v12870_v6 = vadd.f32 %v2753_v53, %v12669_v62  ;;  %v18130_v33 = vrot.slane %v12712_v19, 1  ;;  %v5183_v31 = vmul.f32 %v12845_v40, %v10924_v4  ;;  %s7325_s30 = sld [smem:[#allocation2 + $0x63]] }
 0x421   : > { %18122 = vst [vmem:[#allocation21_spill] sm:$0xff] %v12836_v21  ;;  %18125 = vst [vmem:[#allocation122_spill] sm:$0xff] %v12845_v40  ;;  %v12881_v23 = vmul.f32 %v12845_v40, %v17979_v58  ;;  %v2790_v60 = vpop.permute.xlu1 %2789  ;;  %v3163_v41 = vmul.f32 %v18123_v43, %v18064_v3  ;;  %v5192_v57 = vrot.slane %v5182_v26, 2  ;;  %v5219_v62 = vmul.f32 %v12867_v30, %v10906_v63  ;;  %v18133_v43 = vld [vmem:[#allocation72_spill] sm:$0xff] }
 0x422   : > { %18129 = vst [vmem:[#allocation194_spill] sm:$0xff] %v12867_v30  ;;  %v12875_v9 = vsel %vm924_vm2, %v5039_v17, %v18130_v33  ;;  %v2825_v12 = vpop.permute.xlu0 %2824  ;;  %v5220_v17 = vmul.f32 %v12867_v30, %v10924_v4  ;;  %v12895_v33 = vadd.f32 %v2790_v60, %v12719_v45  ;;  %v12904_v40 = vmul.f32 %v12867_v30, %v17979_v58 }
 0x423   : > { %18131 = vst [vmem:[#allocation109_spill] sm:$0xff] %v12875_v9  ;;  %18132 = vst [vmem:[#allocation163_spill] sm:$0xff] %v12881_v23  ;;  %v12892_v53 = vadd.f32 %v2825_v12, %v12716_v29  ;;  %v5193_v9 = vrot.slane %v5183_v31, 2  ;;  %v16776_v19 = vrot.slane %v12881_v23, 2  ;;  %3955 = vrot.lane.b32.xlu0 %v18133_v43, %s16969_s2  ;;  %v5229_v26 = vrot.slane %v5219_v62, 2  ;;  %v18135_v29 = vld [vmem:[#allocation191_spill] sm:$0xff] }
 0x424   : > { %3804 = vrot.lane.b32.xlu1 %v12419_v16, %s7978_s8  ;;  %v5230_v55 = vrot.slane %v5220_v17, 2  ;;  %18134 = vst [vmem:[#allocation141_spill] sm:$0xff] %v12904_v40  ;;  %v12908_v12 = vmul.f32 %v18135_v29, %v18064_v3  ;;  %v12919_v60 = vstv %s12832_s3  ;;  %v18140_v16 = vld [vmem:[#allocation189_spill] sm:$0xff]  ;;  %v3173_v29 = vmul.f32 %v18124_v32, %v18064_v3  ;;  %s14120_s3 = sld [smem:[#allocation2 + $0x87]] }
 0x425   : > { %v12911_v45 = vsel %vm1337_vm3, %v5192_v57, %v5193_v9  ;;  %v12916_v31 = vsel %vm1337_vm3, %v5193_v9, %v16776_v19  ;;  %18139 = vst [vmem:[#allocation121_spill] sm:$0xff] %v12919_v60  ;;  %v12923_v62 = vmul.f32 %v18140_v16, %v18064_v3  ;;  %v2827_v43 = vpop.permute.xlu1 %2826  ;;  %v16778_v57 = vrot.slane %v12904_v40, 2  ;;  %v18142_v23 = vld [vmem:[#allocation25_spill] sm:$0xff] }
 0x426   : > { %18136 = vst [vmem:[#allocation19_spill] sm:$0xff] %v12908_v12  ;;  %18137 = vst [vmem:[#allocation85_spill] sm:$0xff] %v12911_v45  ;;  %v2862_v17 = vpop.permute.xlu0 %2861  ;;  %v12928_v30 = vsel %vm1337_vm3, %v5229_v26, %v5230_v55  ;;  %v16779_v45 = vrot.slane %v12908_v12, 1  ;;  %v12933_v19 = vadd.f32 %v2827_v43, %v12775_v44  ;;  %v5257_v16 = vmul.f32 %v12919_v60, %v10924_v4  ;;  %v18144_v44 = vld [vmem:[#allocation197_spill] sm:$0xff] }
 0x427   : > { %18138 = vst [vmem:[#allocation31_spill] sm:$0xff] %v12916_v31  ;;  %18141 = vst [vmem:[#allocation24_spill] sm:$0xff] %v12928_v30  ;;  %v2871_v9 = vadd.f32 %v2862_v17, %v2723_v39  ;;  %v5256_v31 = vmul.f32 %v12919_v60, %v10906_v63  ;;  %3992 = vrot.lane.b32.xlu0 %v18142_v23, %s16969_s2  ;;  %v12946_v32 = vsel %vm1337_vm3, %v5230_v55, %v16778_v57  ;;  %v18148_v57 = vld [vmem:[#allocation50_spill] sm:$0xff] }
 0x428   : > { %3957 = vrot.lane.b32.xlu1 %v12429_v18, %s16969_s2  ;;  %18143 = vst [vmem:[#allocation123_spill] sm:$0xff] %v12946_v32  ;;  %v18145_v39 = vrot.slane %v18144_v44, 1  ;;  %v16782_v17 = vrot.slane %v12923_v62, 1  ;;  %v12958_v23 = vmul.f32 %v12919_v60, %v17979_v58  ;;  %v5267_v55 = vrot.slane %v5257_v16, 2 }
 0x429   : > { %v12962_v18 = vadd.f32 %v3162_v14, %v2871_v9  ;;  %v5266_v43 = vrot.slane %v5256_v31, 2  ;;  %v12966_v32 = vmul.f32 %v18148_v57, %v18064_v3  ;;  %v2864_v30 = vpop.permute.xlu1 %2863  ;;  %v12979_v31 = vstv %s12889_s24  ;;  %s7388_s24 = sld [smem:[#allocation7 + $0x4]] }
 0x42a   : > { %v12953_v26 = vsel %vm924_vm2, %v18145_v39, %v16779_v45  ;;  %v2899_v44 = vpop.permute.xlu0 %2898  ;;  %v3183_v39 = vmul.f32 %v18126_v8, %v18064_v3  ;;  %v18149_v45 = vld [vmem:[#allocation51_spill] sm:$0xff]  ;;  %v16783_v14 = vrot.slane %v12958_v23, 2  ;;  %18152 = vst [vmem:[#allocation200_spill] sm:$0xff] %v12979_v31  ;;  %v2872_v9 = vadd.f32 %v2864_v30, %v2724_v48  ;;  %v18155_v8 = vld [vmem:[#allocation176_spill] sm:$0xff] }
 0x42b   : > { %18146 = vst [vmem:[#allocation157_spill] sm:$0xff] %v12953_v26  ;;  %18147 = vst [vmem:[#allocation158_spill] sm:$0xff] %v12962_v18  ;;  %v18150_v26 = vrot.slane %v18149_v45, 1  ;;  %v2908_v16 = vadd.f32 %v2899_v44, %v2760_v28  ;;  %v18153_v18 = vld [vmem:[#allocation113_spill] sm:$0xff]  ;;  %v12984_v40 = vsel %vm1337_vm3, %v5266_v43, %v5267_v55  ;;  %4029 = vrot.lane.b32.xlu0 %v18155_v8, %s16969_s2  ;;  %v16785_v28 = vrot.slane %v12966_v32, 1 }
 0x42c   : > { %v3528_v57 = vmul.f32 %v18087_v25, %v18153_v18  ;;  %18154 = vst [vmem:[#allocation29_spill] sm:$0xff] %v12984_v40  ;;  %3994 = vrot.lane.b32.xlu1 %v12436_v22, %s16969_s2  ;;  %v12993_v45 = vsel %vm1337_vm3, %v5267_v55, %v16783_v14  ;;  %v5293_v48 = vmul.f32 %v12979_v31, %v10906_v63  ;;  %v18159_v22 = vld [vmem:[#allocation201_spill] sm:$0xff]  ;;  %v18163_v40 = vrot.slane %v12727_v56, 1  ;;  %v18209_v56 = vld [vmem:[#allocation192_spill] sm:$0xff] }
 0x42d   : > { %v12975_v12 = vsel %vm924_vm2, %v18150_v26, %v16782_v17  ;;  %18156 = vst [vmem:[#allocation20_spill] sm:$0xff] %v12993_v45  ;;  %v5294_v25 = vmul.f32 %v12979_v31, %v10924_v4  ;;  %v13001_v26 = vadd.f32 %v12842_v1, %v2908_v16  ;;  %v13003_v43 = vadd.f32 %v3163_v41, %v2872_v9  ;;  %v2901_v8 = vpop.permute.xlu1 %2900 }
 0x42e   : > { %18151 = vst [vmem:[#allocation26_spill] sm:$0xff] %v12975_v12  ;;  %v3541_v30 = vrot.slane %v3528_v57, 1  ;;  %v13007_v44 = vmul.f32 %v18159_v22, %v18064_v3  ;;  %v2936_v55 = vpop.permute.xlu0 %2935  ;;  %v3193_v17 = vmul.f32 %v18128_v52, %v18064_v3  ;;  %v18160_v57 = vld [vmem:[#allocation62_spill] sm:$0xff]  ;;  %v5303_v41 = vrot.slane %v5293_v48, 2 }
 0x42f   : > { %18157 = vst [vmem:[#allocation178_spill] sm:$0xff] %v13001_v26  ;;  %18158 = vst [vmem:[#allocation30_spill] sm:$0xff] %v13003_v43  ;;  %v18161_v14 = vrot.slane %v18160_v57, 1  ;;  %v5304_v16 = vrot.slane %v5294_v25, 2  ;;  %v2945_v9 = vadd.f32 %v2936_v55, %v12854_v15  ;;  %v2909_v45 = vadd.f32 %v2901_v8, %v12870_v6  ;;  %v18165_v43 = vld [vmem:[#allocation134_spill] sm:$0xff] }
 0x430   : > { %v13025_v12 = vsel %vm924_vm2, %v18163_v40, %v3541_v30  ;;  %v3565_v52 = vmul.f32 %v18089_v2, %v18153_v18  ;;  %4066 = vrot.lane.b32.xlu0 %v18165_v43, %s16969_s2  ;;  %4031 = vrot.lane.b32.xlu1 %v12443_v46, %s16969_s2  ;;  %v16784_v15 = vrot.slane %v13007_v44, 1  ;;  %v13039_v6 = vmul.f32 %v12979_v31, %v17979_v58  ;;  %v18169_v55 = vld [vmem:[#allocation110_spill] sm:$0xff] }
 0x431   : > { %v13018_v1 = vsel %vm924_vm2, %v18161_v14, %v16785_v28  ;;  %18164 = vst [vmem:[#allocation79_spill] sm:$0xff] %v13025_v12  ;;  %v13034_v14 = vsel %vm1337_vm3, %v5303_v41, %v5304_v16  ;;  %v13042_v40 = vstv %s12960_s13  ;;  %v13045_v2 = vadd.f32 %v12851_v37, %v2945_v9  ;;  %v2938_v43 = vpop.permute.xlu1 %2937  ;;  %s7389_s13 = sld [smem:[#allocation7 + $0x16]] }
 0x432   : > { %18162 = vst [vmem:[#allocation140_spill] sm:$0xff] %v13018_v1  ;;  %18166 = vst [vmem:[#allocation65_spill] sm:$0xff] %v13034_v14  ;;  %v3578_v48 = vrot.slane %v3565_v52, 1  ;;  %v13047_v25 = vadd.f32 %v3173_v29, %v2909_v45  ;;  %v5330_v46 = vmul.f32 %v13042_v40, %v10906_v63  ;;  %v2973_v30 = vpop.permute.xlu0 %2972  ;;  %v18170_v8 = vrot.slane %v18169_v55, 1  ;;  %v18192_v1 = vld [vmem:[#allocation146_spill] sm:$0xff] }
 0x433   : > { %18167 = vst [vmem:[#allocation164_spill] sm:$0xff] %v13045_v2  ;;  %v16786_v41 = vrot.slane %v13039_v6, 2  ;;  %v5331_v37 = vmul.f32 %v13042_v40, %v10924_v4  ;;  %v13063_v29 = vmul.f32 %v13042_v40, %v17979_v58  ;;  %v2982_v45 = vadd.f32 %v2973_v30, %v12892_v53 }
 0x434   : > { %18168 = vst [vmem:[#allocation171_spill] sm:$0xff] %v13047_v25  ;;  %v13056_v57 = vsel %vm924_vm2, %v18170_v8, %v16784_v15  ;;  %v2946_v9 = vadd.f32 %v2938_v43, %v12895_v33  ;;  %v18172_v52 = vrot.slane %v12731_v49, 1  ;;  %v3602_v8 = vmul.f32 %v18091_v42, %v18153_v18  ;;  %v18174_v15 = vld [vmem:[#allocation177_spill] sm:$0xff]  ;;  %4068 = vrot.lane.b32.xlu1 %v12457_v7, %s16969_s2 }
 0x435   : > { %18171 = vst [vmem:[#allocation165_spill] sm:$0xff] %v13056_v57  ;;  %4103 = vrot.lane.b32.xlu0 %v18174_v15, %s7978_s8  ;;  %v13081_v53 = vsel %vm1337_vm3, %v5304_v16, %v16786_v41  ;;  %v5340_v33 = vrot.slane %v5330_v46, 2  ;;  %v5341_v30 = vrot.slane %v5331_v37, 2  ;;  %v16787_v43 = vrot.slane %v13063_v29, 2  ;;  %v2975_v15 = vpop.permute.xlu1 %2974  ;;  %v18178_v7 = vld [vmem:[#allocation73_spill] sm:$0xff]  ;;  %v18180_v16 = vld [vmem:[#allocation83_spill] sm:$0xff] }
 0x436   : > { %v13070_v55 = vsel %vm924_vm2, %v18172_v52, %v3578_v48  ;;  %18175 = vst [vmem:[#allocation72_spill] sm:$0xff] %v13081_v53  ;;  %v3615_v48 = vrot.slane %v3602_v8, 1  ;;  %v13085_v52 = vadd.f32 %v12862_v38, %v2982_v45  ;;  %v13087_v42 = vadd.f32 %v3183_v39, %v2946_v9  ;;  %v3209_v14 = vpop.permute.xlu0 %3208  ;;  %v18186_v41 = vld [vmem:[#allocation184_spill] sm:$0xff]  ;;  %v18201_v25 = vld [vmem:[#allocation61_spill] sm:$0xff] }
 0x437   : > { %18173 = vst [vmem:[#allocation88_spill] sm:$0xff] %v13070_v55  ;;  %v13090_v28 = vstv %s13009_s25  ;;  %v13094_v57 = vmul.f32 %v18178_v7, %v18064_v3  ;;  %v13098_v46 = vmul.f32 %v18180_v16, %v18064_v3  ;;  %v13101_v37 = vsel %vm1337_vm3, %v5340_v33, %v5341_v30  ;;  %v18188_v33 = vld [vmem:[#allocation142_spill] sm:$0xff]  ;;  %s7390_s25 = sld [smem:[#allocation7 + $0x5]] }
 0x438   : > { %18176 = vst [vmem:[#allocation25_spill] sm:$0xff] %v13085_v52  ;;  %18177 = vst [vmem:[#allocation197_spill] sm:$0xff] %v13087_v42  ;;  %v13106_v38 = vsel %vm1337_vm3, %v5341_v30, %v16787_v43  ;;  %v2983_v39 = vadd.f32 %v2975_v15, %v12933_v19  ;;  %v18184_v45 = vrot.slane %v12735_v36, 1  ;;  %v3639_v8 = vmul.f32 %v18095_v20, %v18153_v18  ;;  %v18193_v30 = vld [vmem:[#allocation152_spill] sm:$0xff]  ;;  %v18208_v36 = vld [vmem:[#allocation170_spill] sm:$0xff] }
 0x439   : > { %18179 = vst [vmem:[#allocation51_spill] sm:$0xff] %v13094_v57  ;;  %18181 = vst [vmem:[#allocation113_spill] sm:$0xff] %v13098_v46  ;;  %v13118_v53 = vmul.f32 %v18186_v41, %v18064_v3  ;;  %4140 = vrot.lane.b32.xlu0 %v18188_v33, %s7978_s8  ;;  %4105 = vrot.lane.b32.xlu1 %v12464_v11, %s7978_s8  ;;  %v13131_v20 = vmul.f32 %v13090_v28, %v10906_v63 }
 0x43a   : > { %18182 = vst [vmem:[#allocation176_spill] sm:$0xff] %v13101_v37  ;;  %18183 = vst [vmem:[#allocation201_spill] sm:$0xff] %v13106_v38  ;;  %v13112_v9 = vsel %vm924_vm2, %v18184_v45, %v3615_v48  ;;  %v3652_v15 = vrot.slane %v3639_v8, 1  ;;  %v13134_v43 = vadd.f32 %v3193_v17, %v2983_v39  ;;  %v13138_v33 = vmul.f32 %v13090_v28, %v10924_v4  ;;  %v3235_v11 = vpop.permute.xlu0 %3234  ;;  %v3211_v38 = vpop.permute.xlu1 %3210  ;;  %v18195_v37 = vld [vmem:[#allocation93_spill] sm:$0xff] }
 0x43b   : > { %18185 = vst [vmem:[#allocation62_spill] sm:$0xff] %v13112_v9  ;;  %18187 = vst [vmem:[#allocation134_spill] sm:$0xff] %v13118_v53  ;;  %v18190_v8 = vrot.slane %v12746_v34, 1  ;;  %v3676_v17 = vmul.f32 %v18097_v24, %v18153_v18  ;;  %v3220_v19 = vadd.f32 %v3209_v14, %v18192_v1  ;;  %v5377_v24 = vrot.slane %v13131_v20, 2  ;;  %v18199_v14 = vld [vmem:[#allocation99_spill] sm:$0xff]  ;;  %v18207_v34 = vld [vmem:[#allocation90_spill] sm:$0xff] }
 0x43c   : > { %18189 = vst [vmem:[#allocation110_spill] sm:$0xff] %v13134_v43  ;;  %v18197_v43 = vld [vmem:[#allocation44_spill] sm:$0xff]  ;;  %v13180_v20 = vmul.f32 %v13090_v28, %v17979_v58  ;;  %v13199_v12 = vmul.f32 %v18207_v34, %v18064_v3  ;;  %v3221_v49 = vadd.f32 %v3211_v38, %v18208_v36  ;;  %v18212_v38 = vld [vmem:[#allocation122_spill] sm:$0xff] }
 0x43d   : > { %v13147_v45 = vsel %vm924_vm2, %v18190_v8, %v3652_v15  ;;  %4177 = vrot.lane.b32.xlu0 %v18193_v30, %s7978_s8  ;;  %4142 = vrot.lane.b32.xlu1 %v12480_v50, %s7978_s8  ;;  %v3713_v15 = vmul.f32 %v18104_v27, %v18153_v18  ;;  %v18194_v8 = vld [vmem:[#allocation195_spill] sm:$0xff]  ;;  %v3689_v39 = vrot.slane %v3676_v17, 1  ;;  %v18203_v17 = vld [vmem:[#allocation116_spill] sm:$0xff]  ;;  %v18205_v50 = vrot.slane %v12750_v51, 1 }
 0x43e   : > { %18191 = vst [vmem:[#allocation177_spill] sm:$0xff] %v13147_v45  ;;  %v13162_v48 = vmul.f32 %v18195_v37, %v18194_v8  ;;  %v13167_v1 = vmul.f32 %v18197_v43, %v18194_v8  ;;  %v13171_v30 = vmul.f32 %v18199_v14, %v18194_v8  ;;  %v3261_v42 = vpop.permute.xlu0 %3260  ;;  %v3237_v52 = vpop.permute.xlu1 %3236  ;;  %v13176_v2 = vmul.f32 %v18201_v25, %v18194_v8  ;;  %v18204_v45 = vld [vmem:[#allocation148_spill] sm:$0xff]  ;;  %v18227_v14 = vld [vmem:[#allocation55_spill] sm:$0xff] }
 0x43f   : > { %v3726_v27 = vrot.slane %v3713_v15, 1  ;;  %v13184_v26 = vmul.f32 %v18203_v17, %v18064_v3  ;;  %v13187_v9 = vadd.f32 %v3235_v11, %v18204_v45  ;;  %v13192_v55 = vsel %vm924_vm2, %v18205_v50, %v3689_v39 }
 0x440   : > { %18196 = vst [vmem:[#allocation73_spill] sm:$0xff] %v13162_v48  ;;  %18198 = vst [vmem:[#allocation83_spill] sm:$0xff] %v13167_v1  ;;  %v13195_v15 = vstv %s13120_s16  ;;  %v18210_v45 = vrot.slane %v12769_v61, 1  ;;  %v3750_v39 = vmul.f32 %v17937_v59, %v18153_v18  ;;  %v18214_v59 = vld [vmem:[#allocation63_spill] sm:$0xff]  ;;  %v13231_v36 = vmul.f32 %v12919_v60, %v18194_v8  ;;  %v18222_v60 = vld [vmem:[#allocation193_spill] sm:$0xff]  ;;  %s7391_s16 = sld [smem:[#allocation7 + $0x17]] }
 0x441   : > { %18200 = vst [vmem:[#allocation184_spill] sm:$0xff] %v13171_v30  ;;  %18202 = vst [vmem:[#allocation142_spill] sm:$0xff] %v13176_v2  ;;  %4214 = vrot.lane.b32.xlu0 %v18209_v56, %s7978_s8  ;;  %4179 = vrot.lane.b32.xlu1 %v12487_v0, %s7978_s8  ;;  %v13218_v56 = vmul.f32 %v18212_v38, %v18194_v8  ;;  %v18213_v0 = vld [vmem:[#allocation194_spill] sm:$0xff]  ;;  %v13227_v50 = vmul.f32 %v18214_v59, %v18194_v8  ;;  %v18216_v30 = vld [vmem:[#allocation149_spill] sm:$0xff] }
 0x442   : > { %18206 = vst [vmem:[#allocation146_spill] sm:$0xff] %v13192_v55  ;;  %v13209_v11 = vsel %vm924_vm2, %v18210_v45, %v3726_v27  ;;  %v13222_v51 = vmul.f32 %v18213_v0, %v18194_v8  ;;  %v3287_v61 = vpop.permute.xlu0 %3286  ;;  %v3263_v27 = vpop.permute.xlu1 %3262  ;;  %v3763_v45 = vrot.slane %v3750_v39, 1  ;;  %v18215_v55 = vld [vmem:[#allocation64_spill] sm:$0xff]  ;;  %v13237_v1 = vadd.f32 %v3237_v52, %v18216_v30  ;;  %v18217_v0 = vld [vmem:[#allocation167_spill] sm:$0xff]  ;;  %v18219_v39 = vld [vmem:[#allocation129_spill] sm:$0xff] }
 0x443   : > { %18211 = vst [vmem:[#allocation152_spill] sm:$0xff] %v13209_v11  ;;  %v13234_v38 = vadd.f32 %v3261_v42, %v18215_v55  ;;  %v13241_v48 = vmul.f32 %v18217_v0, %v18194_v8  ;;  %v13245_v11 = vmul.f32 %v18219_v39, %v18194_v8  ;;  %v18221_v2 = vld [vmem:[#allocation57_spill] sm:$0xff]  ;;  %v18223_v55 = vrot.slane %v12802_v5, 1  ;;  %v18225_v52 = vld [vmem:[#allocation43_spill] sm:$0xff] }
 0x444   : > { %v3787_v30 = vmul.f32 %v18225_v52, %v18153_v18  ;;  %v16805_v0 = vrot.slane %v13218_v56, 2  ;;  %v18226_v39 = vld [vmem:[#allocation89_spill] sm:$0xff]  ;;  %v13269_v5 = vmul.f32 %v12979_v31, %v18194_v8  ;;  %v18228_v52 = vld [vmem:[#allocation163_spill] sm:$0xff] }
 0x445   : > { %18218 = vst [vmem:[#allocation195_spill] sm:$0xff] %v13241_v48  ;;  %18220 = vst [vmem:[#allocation116_spill] sm:$0xff] %v13245_v11  ;;  %4789 = vrot.lane.b32.xlu0 %v18221_v2, %s16969_s2  ;;  %4216 = vrot.lane.b32.xlu1 %v18222_v60, %s7978_s8  ;;  %v13254_v42 = vsel %vm924_vm2, %v18223_v55, %v3763_v45  ;;  %v13261_v25 = vadd.f32 %v3287_v61, %v18226_v39  ;;  %v18229_v43 = vrot.slane %v18228_v52, 2 }
 0x446   : > { %18224 = vst [vmem:[#allocation148_spill] sm:$0xff] %v13254_v42  ;;  %v13264_v2 = vadd.f32 %v3263_v27, %v18227_v14  ;;  %v3313_v45 = vpop.permute.xlu0 %3312  ;;  %v3289_v55 = vpop.permute.xlu1 %3288  ;;  %v3800_v42 = vrot.slane %v3787_v30, 1  ;;  %v18231_v61 = vrot.slane %v13222_v51, 2  ;;  %v18232_v14 = vld [vmem:[#allocation141_spill] sm:$0xff]  ;;  %v13287_v60 = vmul.f32 %v13042_v40, %v18194_v8  ;;  %v18235_v30 = vld [vmem:[#allocation68_spill] sm:$0xff] }
 0x447   : > { %v13276_v59 = vsel %vm1337_vm3, %v18229_v43, %v16805_v0  ;;  %v18233_v27 = vrot.slane %v18232_v14, 2  ;;  %v3324_v31 = vadd.f32 %v3313_v45, %v3220_v19  ;;  %v13290_v37 = vadd.f32 %v3289_v55, %v18235_v30  ;;  %v5524_v43 = vld [vmem:[%s16288_s6 + $0x20] sm:$0x3]  ;;  %v18240_v19 = vld [vmem:[#allocation156_spill] sm:$0xff]  ;;  %v18243_v30 = vld [vmem:[#allocation45_spill] sm:$0xff] }
 0x448   : > { %18230 = vst [vmem:[#allocation90_spill] sm:$0xff] %v13276_v59  ;;  %v18236_v52 = vrot.slane %v13231_v36, 2  ;;  %v18237_v0 = vrot.slane %v12958_v23, 2  ;;  %v18241_v45 = vrot.slane %v12811_v47, 1  ;;  %v16806_v23 = vrot.slane %v13287_v60, 2  ;;  %7636 = vmatmul.mubr.msk.f32.gmra.mrb[34].mxu1 %vm477_vm0, %v5524_v43  ;;  %7662 = vmatmul.mubr.msk.f32.gmra.mrb[34].mxu0 %vm477_vm0, %v5524_v43 }
 0x449   : > { %v13283_v39 = vsel %vm1337_vm3, %v18233_v27, %v18231_v61  ;;  %v18239_v27 = vld [vmem:[#allocation32_spill] sm:$0xff]  ;;  %4791 = vrot.lane.b32.xlu1 %v18240_v19, %s16969_s2  ;;  %v18248_v19 = vrot.slane %v13039_v6, 2  ;;  %v18250_v43 = vrot.slane %v13063_v29, 2  ;;  %v18254_v29 = vld [vmem:[#allocation125_spill] sm:$0xff] }
 0x44a   : > { %18234 = vst [vmem:[#allocation170_spill] sm:$0xff] %v13283_v39  ;;  %v13300_v14 = vsel %vm1337_vm3, %v18237_v0, %v18236_v52  ;;  %4826 = vrot.lane.b32.xlu0 %v18239_v27, %s16969_s2  ;;  %v13310_v55 = vsel %vm924_vm2, %v18241_v45, %v3800_v42  ;;  %v3940_v39 = vmul.f32 %v18243_v30, %v18153_v18  ;;  %v18244_v0 = vrot.slane %v13138_v33, 2  ;;  %v18246_v61 = vld [vmem:[#allocation196_spill] sm:$0xff] }
 0x44b   : > { %18238 = vst [vmem:[#allocation192_spill] sm:$0xff] %v13300_v14  ;;  %18242 = vst [vmem:[#allocation64_spill] sm:$0xff] %v13310_v55  ;;  %v13321_v27 = vadd.f32 %v18246_v61, %v3324_v31  ;;  %v18247_v42 = vrot.slane %v13269_v5, 2  ;;  %v13334_v30 = vmul.f32 %v13090_v28, %v18194_v8  ;;  %v3315_v31 = vpop.permute.xlu1 %3314 }
 0x44c   : > { %v13318_v52 = vsel %vm1337_vm3, %v5377_v24, %v18244_v0  ;;  %v5380_v24 = vrot.slane %v13180_v20, 2  ;;  %v3339_v0 = vpop.permute.xlu0 %3338  ;;  %v3953_v61 = vrot.slane %v3940_v39, 2  ;;  %v3325_v20 = vadd.f32 %v3315_v31, %v3221_v49  ;;  %v18258_v49 = vld [vmem:[#allocation168_spill] sm:$0xff] }
 0x44d   : > { %18245 = vst [vmem:[#allocation149_spill] sm:$0xff] %v13318_v52  ;;  %v13330_v45 = vsel %vm1337_vm3, %v18248_v19, %v18247_v42  ;;  %v13342_v52 = vsel %vm1337_vm3, %v18250_v43, %v16806_v23  ;;  %v5404_v42 = vmul.f32 %v13195_v15, %v10906_v63  ;;  %v3350_v19 = vadd.f32 %v3339_v0, %v13187_v9  ;;  %v18255_v43 = vld [vmem:[#allocation58_spill] sm:$0xff] }
 0x44e   : > { %18249 = vst [vmem:[#allocation57_spill] sm:$0xff] %v13330_v45  ;;  %18251 = vst [vmem:[#allocation193_spill] sm:$0xff] %v13342_v52  ;;  %v18252_v39 = vrot.slane %v13138_v33, 2  ;;  %4863 = vrot.lane.b32.xlu0 %v18254_v29, %s16969_s2  ;;  %4828 = vrot.lane.b32.xlu1 %v18255_v43, %s16969_s2  ;;  %v18256_v23 = vrot.slane %v12815_v13, 2  ;;  %v3977_v9 = vmul.f32 %v18258_v49, %v18153_v18  ;;  %v18259_v0 = vrot.slane %v13184_v26, 2  ;;  %v18260_v33 = vld [vmem:[#allocation91_spill] sm:$0xff] }
 0x44f   : > { %v18261_v31 = vrot.slane %v18260_v33, 2  ;;  %v5414_v45 = vrot.slane %v5404_v42, 2  ;;  %v18263_v29 = vld [vmem:[#allocation198_spill] sm:$0xff]  ;;  %v18264_v43 = vld [vmem:[#allocation56_spill] sm:$0xff]  ;;  %v5405_v49 = vmul.f32 %v13195_v15, %v10924_v4  ;;  %v3341_v33 = vpop.permute.xlu1 %3340  ;;  %v5406_v42 = vmul.f32 %v13195_v15, %v17979_v58 }
 0x450   : > { %v13354_v14 = vsel %vm1337_vm3, %v18252_v39, %v5380_v24  ;;  %v13363_v6 = vsel %vm1337_vm3, %v18256_v23, %v3953_v61  ;;  %v13378_v52 = vadd.f32 %v18264_v43, %v3325_v20  ;;  %v18265_v23 = vrot.slane %v13334_v30, 2  ;;  %v3365_v59 = vpop.permute.xlu0 %3364 }
 0x451   : > { %18253 = vst [vmem:[#allocation43_spill] sm:$0xff] %v13354_v14  ;;  %18257 = vst [vmem:[#allocation89_spill] sm:$0xff] %v13363_v6  ;;  %v13372_v39 = vsel %vm1337_vm3, %v18261_v31, %v18259_v0  ;;  %v13375_v14 = vadd.f32 %v18263_v29, %v3350_v19  ;;  %v3990_v6 = vrot.slane %v3977_v9, 2  ;;  %v13392_v19 = vmul.f32 %v13195_v15, %v18194_v8  ;;  %v18267_v29 = vld [vmem:[#allocation112_spill] sm:$0xff]  ;;  %v18268_v9 = vld [vmem:[#allocation107_spill] sm:$0xff] }
 0x452   : > { %18262 = vst [vmem:[#allocation55_spill] sm:$0xff] %v13372_v39  ;;  %v13383_v61 = vsel %vm1337_vm3, %v5380_v24, %v18265_v23  ;;  %v3376_v20 = vadd.f32 %v3365_v59, %v13234_v38  ;;  %v3351_v24 = vadd.f32 %v3341_v33, %v13237_v1  ;;  %v5415_v31 = vrot.slane %v5405_v49, 2  ;;  %4900 = vrot.lane.b32.xlu0 %v18268_v9, %s16969_s2  ;;  %v18269_v23 = vld [vmem:[#allocation98_spill] sm:$0xff]  ;;  %v18272_v38 = vld [vmem:[#allocation75_spill] sm:$0xff]  ;;  %v18277_v9 = vld [vmem:[#allocation69_spill] sm:$0xff] }
 0x453   : > { %18266 = vst [vmem:[#allocation163_spill] sm:$0xff] %v13383_v61  ;;  %v13398_v43 = vmul.f32 %v18267_v29, %v18064_v3  ;;  %4865 = vrot.lane.b32.xlu1 %v18269_v23, %s16969_s2  ;;  %v18270_v0 = vrot.slane %v12819_v35, 2  ;;  %v4014_v1 = vmul.f32 %v18272_v38, %v18153_v18  ;;  %v18273_v59 = vrot.slane %v13199_v12, 2  ;;  %v18274_v49 = vld [vmem:[#allocation106_spill] sm:$0xff]  ;;  %v18278_v23 = vld [vmem:[#allocation203_spill] sm:$0xff] }
 0x454   : > { %v18275_v33 = vrot.slane %v18274_v49, 2  ;;  %v5417_v55 = vrot.slane %v5406_v42, 2  ;;  %v13419_v13 = vadd.f32 %v18277_v9, %v3376_v20  ;;  %v13422_v47 = vadd.f32 %v18278_v23, %v3351_v24  ;;  %v3391_v38 = vpop.permute.xlu0 %3390  ;;  %v18287_v23 = vld [vmem:[#allocation118_spill] sm:$0xff] }
 0x455   : > { %v13407_v61 = vsel %vm1337_vm3, %v18270_v0, %v3990_v6  ;;  %v13425_v6 = vsel %vm1337_vm3, %v5414_v45, %v5415_v31  ;;  %v16810_v0 = vrot.slane %v13392_v19, 2  ;;  %v4027_v35 = vrot.slane %v4014_v1, 2  ;;  %v18282_v1 = vld [vmem:[#allocation84_spill] sm:$0xff] }
 0x456   : > { %18271 = vst [vmem:[#allocation141_spill] sm:$0xff] %v13407_v61  ;;  %v13416_v39 = vsel %vm1337_vm3, %v18275_v33, %v18273_v59  ;;  %18279 = vst [vmem:[#allocation32_spill] sm:$0xff] %v13425_v6  ;;  %v3367_v61 = vpop.permute.xlu1 %3366  ;;  %v13429_v49 = vsel %vm1337_vm3, %v5415_v31, %v5417_v55  ;;  %v16811_v59 = vrot.slane %v13398_v43, 2  ;;  %v13433_v42 = vstv %s13347_s15  ;;  %4937 = vrot.lane.b32.xlu0 %v18282_v1, %s7978_s8  ;;  %v18283_v31 = vld [vmem:[#allocation100_spill] sm:$0xff]  ;;  %s7396_s15 = sld [smem:[#allocation7 + $0x8]] }
 0x457   : > { %18276 = vst [vmem:[#allocation68_spill] sm:$0xff] %v13416_v39  ;;  %18280 = vst [vmem:[#allocation156_spill] sm:$0xff] %v13429_v49  ;;  %v3402_v20 = vadd.f32 %v3391_v38, %v13261_v25  ;;  %v3377_v24 = vadd.f32 %v3367_v61, %v13264_v2  ;;  %v13440_v45 = vsel %vm1337_vm3, %v5417_v55, %v16810_v0  ;;  %4902 = vrot.lane.b32.xlu1 %v18283_v31, %s16969_s2  ;;  %v18286_v2 = vld [vmem:[#allocation127_spill] sm:$0xff]  ;;  %v18290_v1 = vld [vmem:[#allocation48_spill] sm:$0xff] }
 0x458   : > { %18281 = vst [vmem:[#allocation45_spill] sm:$0xff] %v13440_v45  ;;  %v5441_v33 = vmul.f32 %v13433_v42, %v10906_v63  ;;  %v18284_v9 = vrot.slane %v12824_v10, 2  ;;  %v4051_v61 = vmul.f32 %v18286_v2, %v18153_v18  ;;  %v18288_v38 = vrot.slane %v18287_v23, 2  ;;  %v18292_v31 = vld [vmem:[#allocation111_spill] sm:$0xff]  ;;  %v13471_v2 = vpop.permute.xlu0 %4454 }
 0x459   : > { %v13464_v49 = vadd.f32 %v18290_v1, %v3402_v20  ;;  %v13467_v45 = vadd.f32 %v18292_v31, %v3377_v24  ;;  %18294 = vst [vmem:[#allocation91_spill] sm:$0xff] %v13471_v2  ;;  %v18295_v39 = vld [vmem:[#allocation135_spill] sm:$0xff]  ;;  %v13481_v20 = vmul.f32 %v13433_v42, %v18194_v8  ;;  %v18296_v1 = vld [vmem:[#allocation180_spill] sm:$0xff]  ;;  %v4125_v31 = vmul.f32 %v18178_v7, %v18153_v18 }
 0x45a   : > { %v13451_v25 = vsel %vm1337_vm3, %v18284_v9, %v4027_v35  ;;  %v13461_v0 = vsel %vm1337_vm3, %v18288_v38, %v16811_v59  ;;  %v5442_v35 = vmul.f32 %v13433_v42, %v10924_v4  ;;  %v5451_v9 = vrot.slane %v5441_v33, 2  ;;  %v3393_v55 = vpop.permute.xlu1 %3392  ;;  %v18297_v59 = vld [vmem:[#allocation86_spill] sm:$0xff]  ;;  %v18302_v2 = vld [vmem:[#allocation96_spill] sm:$0xff] }
 0x45b   : > { %18285 = vst [vmem:[#allocation196_spill] sm:$0xff] %v13451_v25  ;;  %18289 = vst [vmem:[#allocation125_spill] sm:$0xff] %v13461_v0  ;;  %v4064_v6 = vrot.slane %v4051_v61, 2  ;;  %v13475_v23 = vmul.f32 %v18295_v39, %v18064_v3  ;;  %v5443_v38 = vmul.f32 %v13433_v42, %v17979_v58  ;;  %v3403_v24 = vadd.f32 %v3393_v55, %v13290_v37  ;;  %v18298_v0 = vld [vmem:[#allocation47_spill] sm:$0xff] }
 0x45c   : > { %18291 = vst [vmem:[#allocation58_spill] sm:$0xff] %v13464_v49  ;;  %18293 = vst [vmem:[#allocation168_spill] sm:$0xff] %v13467_v45  ;;  %v4088_v33 = vmul.f32 %v18296_v1, %v18153_v18  ;;  %v4162_v61 = vmul.f32 %v18180_v16, %v18153_v18  ;;  %4974 = vrot.lane.b32.xlu0 %v18297_v59, %s7978_s8  ;;  %4939 = vrot.lane.b32.xlu1 %v18298_v0, %s7978_s8  ;;  %v18299_v25 = vrot.slane %v12828_v54, 2  ;;  %v18301_v55 = vld [vmem:[#allocation191_spill] sm:$0xff]  ;;  %v13508_v0 = vpop.permute.xlu0 %4480 }
 0x45d   : > { %v4199_v37 = vmul.f32 %v18186_v41, %v18153_v18  ;;  %v3412_v7 = vmul.f32 %v18301_v55, %v18153_v18  ;;  %v5452_v1 = vrot.slane %v5442_v35, 2  ;;  %v13504_v16 = vadd.f32 %v18302_v2, %v3403_v24  ;;  %v18304_v41 = vld [vmem:[#allocation189_spill] sm:$0xff]  ;;  %v18305_v55 = vld [vmem:[#allocation50_spill] sm:$0xff] }
 0x45e   : > { %v13497_v10 = vsel %vm1337_vm3, %v18299_v25, %v4064_v6  ;;  %v4101_v45 = vrot.slane %v4088_v33, 2  ;;  %v4138_v59 = vrot.slane %v4125_v31, 2  ;;  %v4175_v49 = vrot.slane %v4162_v61, 2  ;;  %v13510_v54 = vpop.permute.xlu1 %4456 }
 0x45f   : > { %18300 = vst [vmem:[#allocation198_spill] sm:$0xff] %v13497_v10  ;;  %18303 = vst [vmem:[#allocation56_spill] sm:$0xff] %v13510_v54  ;;  %v4212_v6 = vrot.slane %v4199_v37, 2  ;;  %v3425_v25 = vrot.slane %v3412_v7, 1  ;;  %v3441_v10 = vmul.f32 %v18304_v41, %v18153_v18  ;;  %v3470_v35 = vmul.f32 %v18305_v55, %v18153_v18  ;;  %v18312_v41 = vld [vmem:[#allocation22_spill] sm:$0xff]  ;;  %v18313_v55 = vld [vmem:[#allocation155_spill] sm:$0xff] }
 0x460   : > { %v18306_v2 = vrot.slane %v12836_v21, 2  ;;  %v18308_v33 = vrot.slane %v13094_v57, 2  ;;  %v18310_v61 = vrot.slane %v13098_v46, 2  ;;  %v3499_v7 = vmul.f32 %v18159_v22, %v18153_v18  ;;  %5011 = vrot.lane.b32.xlu0 %v18312_v41, %s7978_s8  ;;  %4976 = vrot.lane.b32.xlu1 %v18313_v55, %s7978_s8 }
 0x461   : > { %v3824_v22 = vmul.f32 %v18203_v17, %v18153_v18  ;;  %v13550_v41 = vsel %vm1337_vm3, %v5451_v9, %v5452_v1  ;;  %v3922_v55 = vrot.slane %v13475_v23, 2  ;;  %v3853_v17 = vmul.f32 %v18207_v34, %v18153_v18  ;;  %v18333_v34 = vld [vmem:[#allocation133_spill] sm:$0xff] }
 0x462   : > { %v13519_v24 = vsel %vm1337_vm3, %v18306_v2, %v4101_v45  ;;  %v13524_v31 = vsel %vm1337_vm3, %v18308_v33, %v4138_v59  ;;  %v13529_v37 = vsel %vm1337_vm3, %v18310_v61, %v4175_v49  ;;  %v18314_v45 = vrot.slane %v13118_v53, 2  ;;  %v18316_v59 = vld [vmem:[#allocation19_spill] sm:$0xff]  ;;  %18319 = vst [vmem:[#allocation69_spill] sm:$0xff] %v13550_v41  ;;  %v13553_v53 = vpop.permute.xlu0 %4506 }
 0x463   : > { %18307 = vst [vmem:[#allocation112_spill] sm:$0xff] %v13519_v24  ;;  %18309 = vst [vmem:[#allocation107_spill] sm:$0xff] %v13524_v31  ;;  %v18317_v33 = vrot.slane %v18316_v59, 1  ;;  %v3454_v49 = vrot.slane %v3441_v10, 1  ;;  %v3483_v61 = vrot.slane %v3470_v35, 1  ;;  %v18324_v10 = vrot.slane %v12966_v32, 1 }
 0x464   : > { %18311 = vst [vmem:[#allocation98_spill] sm:$0xff] %v13529_v37  ;;  %v13540_v2 = vsel %vm1337_vm3, %v18314_v45, %v4212_v6  ;;  %v3512_v37 = vrot.slane %v3499_v7, 1  ;;  %18320 = vst [vmem:[#allocation203_spill] sm:$0xff] %v13553_v53  ;;  %v13555_v6 = vpop.permute.xlu1 %4482  ;;  %v18322_v45 = vrot.slane %v12923_v62, 1  ;;  %v5454_v9 = vrot.slane %v5443_v38, 2  ;;  %v18328_v62 = vld [vmem:[#allocation143_spill] sm:$0xff] }
 0x465   : > { %18315 = vst [vmem:[#allocation75_spill] sm:$0xff] %v13540_v2  ;;  %v13545_v31 = vsel %vm924_vm2, %v18317_v33, %v3425_v25  ;;  %18321 = vst [vmem:[#allocation84_spill] sm:$0xff] %v13555_v6  ;;  %v13565_v35 = vsel %vm924_vm2, %v18324_v10, %v3483_v61  ;;  %v18326_v23 = vrot.slane %v13007_v44, 1  ;;  %v3837_v59 = vrot.slane %v3824_v22, 2  ;;  %v18331_v61 = vld [vmem:[#allocation173_spill] sm:$0xff]  ;;  %v18360_v2 = vld [vmem:[#allocation63_spill] sm:$0xff] }
 0x466   : > { %18318 = vst [vmem:[#allocation106_spill] sm:$0xff] %v13545_v31  ;;  %v13560_v25 = vsel %vm924_vm2, %v18322_v45, %v3454_v49  ;;  %18325 = vst [vmem:[#allocation127_spill] sm:$0xff] %v13565_v35  ;;  %v18329_v33 = vrot.slane %v18328_v62, 2  ;;  %v16815_v32 = vrot.slane %v13481_v20, 2  ;;  %5013 = vrot.lane.b32.xlu1 %v18331_v61, %s7978_s8  ;;  %v18332_v45 = vld [vmem:[#allocation49_spill] sm:$0xff]  ;;  %v13586_v44 = vmul.f32 %v18333_v34, %v18194_v8  ;;  %v18358_v31 = vld [vmem:[#allocation40_spill] sm:$0xff] }
 0x467   : > { %18323 = vst [vmem:[#allocation100_spill] sm:$0xff] %v13560_v25  ;;  %v13572_v7 = vsel %vm924_vm2, %v18326_v23, %v3512_v37  ;;  %3212 = vrot.lane.b32.xlu0 %v18332_v45, %s16969_s2  ;;  %v3866_v38 = vrot.slane %v3853_v17, 2  ;;  %v13589_v37 = vsel %vm1337_vm3, %v5452_v1, %v5454_v9  ;;  %v3882_v22 = vmul.f32 %v18267_v29, %v18153_v18  ;;  %v13608_v1 = vpop.permute.xlu0 %4532 }
 0x468   : > { %18327 = vst [vmem:[#allocation118_spill] sm:$0xff] %v13572_v7  ;;  %v13577_v49 = vsel %vm1337_vm3, %v18329_v33, %v3922_v55  ;;  %18334 = vst [vmem:[#allocation111_spill] sm:$0xff] %v13586_v44  ;;  %v18336_v10 = vrot.slane %v13184_v26, 2  ;;  %v13601_v62 = vsel %vm1337_vm3, %v5454_v9, %v16815_v32  ;;  %v3911_v33 = vmul.f32 %v18295_v39, %v18153_v18  ;;  %v13610_v61 = vpop.permute.xlu1 %4508  ;;  %v18343_v32 = vld [vmem:[#allocation53_spill] sm:$0xff]  ;;  %v18346_v26 = vld [vmem:[#allocation132_spill] sm:$0xff] }
 0x469   : > { %18330 = vst [vmem:[#allocation48_spill] sm:$0xff] %v13577_v49  ;;  %18335 = vst [vmem:[#allocation135_spill] sm:$0xff] %v13589_v37  ;;  %v13606_v17 = vstv %s13506_s26  ;;  %v3895_v9 = vrot.slane %v3882_v22, 2  ;;  %v13621_v18 = vmul.f32 %v18343_v32, %v18194_v8  ;;  %v18344_v39 = vld [vmem:[#allocation37_spill] sm:$0xff]  ;;  %v18348_v22 = vrot.slane %v13398_v43, 2  ;;  %v18355_v43 = vld [vmem:[#allocation44_spill] sm:$0xff] }
 0x46a   : > { %v13596_v23 = vsel %vm1337_vm3, %v18336_v10, %v3837_v59  ;;  %18338 = vst [vmem:[#allocation86_spill] sm:$0xff] %v13601_v62  ;;  %18339 = vst [vmem:[#allocation47_spill] sm:$0xff] %v13608_v1  ;;  %v18341_v59 = vrot.slane %v13199_v12, 2  ;;  %v3924_v10 = vrot.slane %v3911_v33, 2  ;;  %v13625_v37 = vmul.f32 %v18344_v39, %v18194_v8  ;;  %v18345_v62 = vld [vmem:[#allocation172_spill] sm:$0xff]  ;;  %v18356_v7 = vld [vmem:[#allocation99_spill] sm:$0xff] }
 0x46b   : > { %18337 = vst [vmem:[#allocation180_spill] sm:$0xff] %v13596_v23  ;;  %18340 = vst [vmem:[#allocation191_spill] sm:$0xff] %v13610_v61  ;;  %v13629_v29 = vmul.f32 %v18345_v62, %v18194_v8  ;;  %3238 = vrot.lane.b32.xlu0 %v18346_v26, %s16969_s2  ;;  %v18347_v12 = vld [vmem:[#allocation52_spill] sm:$0xff]  ;;  %v13639_v33 = vsel %vm1337_vm3, %v18348_v22, %v3895_v9  ;;  %v13655_v49 = vpop.permute.xlu0 %4558  ;;  %v18357_v22 = vld [vmem:[#allocation61_spill] sm:$0xff]  ;;  %s7397_s26 = sld [smem:[#allocation7 + $0x1a]] }
 0x46c   : > { %v13617_v45 = vsel %vm1337_vm3, %v18341_v59, %v3866_v38  ;;  %3214 = vrot.lane.b32.xlu1 %v18347_v12, %s16969_s2  ;;  %18349 = vst [vmem:[#allocation189_spill] sm:$0xff] %v13639_v33  ;;  %v18350_v59 = vld [vmem:[#allocation115_spill] sm:$0xff]  ;;  %v13650_v26 = vsel %vm1337_vm3, %v3922_v55, %v3924_v10  ;;  %v13657_v9 = vpop.permute.xlu1 %4534  ;;  %v13662_v33 = vmul.f32 %v13606_v17, %v10924_v4  ;;  %v18353_v10 = vld [vmem:[#allocation120_spill] sm:$0xff]  ;;  %v18354_v38 = vld [vmem:[#allocation93_spill] sm:$0xff] }
 0x46d   : > { %18342 = vst [vmem:[#allocation96_spill] sm:$0xff] %v13617_v45  ;;  %v13643_v41 = vmul.f32 %v18350_v59, %v18194_v8  ;;  %v13647_v45 = vmul.f32 %v13606_v17, %v10906_v63  ;;  %18351 = vst [vmem:[#allocation50_spill] sm:$0xff] %v13650_v26  ;;  %v13667_v55 = vmul.f32 %v13606_v17, %v17979_v58  ;;  %v18359_v23 = vld [vmem:[#allocation119_spill] sm:$0xff] }
 0x46e   : > { %18352 = vst [vmem:[#allocation22_spill] sm:$0xff] %v13657_v9  ;;  %v4774_v12 = vmul.f32 %v18354_v38, %v18353_v10  ;;  %v4811_v26 = vmul.f32 %v18355_v43, %v18353_v10  ;;  %v4848_v35 = vmul.f32 %v18356_v7, %v18353_v10  ;;  %v4885_v25 = vmul.f32 %v18357_v22, %v18353_v10  ;;  %v18361_v38 = vld [vmem:[#allocation167_spill] sm:$0xff]  ;;  %v18362_v43 = vld [vmem:[#allocation129_spill] sm:$0xff] }
 0x46f   : > { %3264 = vrot.lane.b32.xlu0 %v18358_v31, %s16969_s2  ;;  %v4922_v24 = vmul.f32 %v18360_v2, %v18353_v10  ;;  %v4959_v46 = vmul.f32 %v18361_v38, %v18353_v10  ;;  %v4996_v57 = vmul.f32 %v18362_v43, %v18353_v10  ;;  %v13688_v1 = vpop.permute.xlu0 %4584  ;;  %v5033_v2 = vmul.f32 %v18333_v34, %v18353_v10  ;;  %v18364_v38 = vld [vmem:[#allocation73_spill] sm:$0xff]  ;;  %v18366_v7 = vld [vmem:[#allocation83_spill] sm:$0xff] }
 0x470   : > { %3240 = vrot.lane.b32.xlu1 %v18359_v23, %s16969_s2  ;;  %v4787_v21 = vrot.slane %v4774_v12, 1  ;;  %v4824_v9 = vrot.slane %v4811_v26, 1  ;;  %v4861_v22 = vrot.slane %v4848_v35, 1  ;;  %v4898_v61 = vrot.slane %v4885_v25, 1  ;;  %v13690_v31 = vpop.permute.xlu1 %4560  ;;  %v18368_v25 = vld [vmem:[#allocation184_spill] sm:$0xff] }
 0x471   : > { %18363 = vst [vmem:[#allocation155_spill] sm:$0xff] %v13690_v31  ;;  %v4935_v23 = vrot.slane %v4922_v24, 1  ;;  %v4972_v6 = vrot.slane %v4959_v46, 1  ;;  %v5009_v53 = vrot.slane %v4996_v57, 1  ;;  %v18365_v54 = vrot.slane %v18364_v38, 1  ;;  %v18371_v46 = vld [vmem:[#allocation142_spill] sm:$0xff] }
 0x472   : > { %v18367_v12 = vrot.slane %v18366_v7, 1  ;;  %v18369_v26 = vrot.slane %v18368_v25, 1  ;;  %v18372_v57 = vrot.slane %v18371_v46, 1  ;;  %v18374_v38 = vld [vmem:[#allocation162_spill] sm:$0xff] }
 0x473   : > { %v13697_v43 = vsel %vm924_vm2, %v18365_v54, %v4787_v21  ;;  %3290 = vrot.lane.b32.xlu0 %v18374_v38, %s16969_s2  ;;  %v18375_v21 = vld [vmem:[#allocation182_spill] sm:$0xff]  ;;  %v18376_v54 = vrot.slane %v13227_v50, 1 }
 0x474   : > { %v13702_v35 = vsel %vm924_vm2, %v18367_v12, %v4824_v9  ;;  %v13707_v31 = vsel %vm924_vm2, %v18369_v26, %v4861_v22  ;;  %v13712_v24 = vsel %vm924_vm2, %v18372_v57, %v4898_v61  ;;  %3266 = vrot.lane.b32.xlu1 %v18375_v21, %s16969_s2  ;;  %v18378_v12 = vrot.slane %v13241_v48, 1  ;;  %v18382_v38 = vld [vmem:[#allocation122_spill] sm:$0xff] }
 0x475   : > { %18370 = vst [vmem:[#allocation19_spill] sm:$0xff] %v13707_v31  ;;  %18373 = vst [vmem:[#allocation143_spill] sm:$0xff] %v13712_v24  ;;  %v13721_v9 = vsel %vm924_vm2, %v18376_v54, %v4935_v23  ;;  %v18380_v26 = vrot.slane %v13245_v11, 1  ;;  %v5046_v57 = vrot.slane %v5033_v2, 1  ;;  %v5186_v21 = vmul.f32 %v18382_v38, %v18353_v10  ;;  %v18383_v24 = vld [vmem:[#allocation194_spill] sm:$0xff]  ;;  %v18384_v54 = vld [vmem:[#allocation121_spill] sm:$0xff]  ;;  %v13745_v11 = vpop.permute.xlu1 %4586 }
 0x476   : > { %18377 = vst [vmem:[#allocation173_spill] sm:$0xff] %v13721_v9  ;;  %v13726_v22 = vsel %vm924_vm2, %v18378_v12, %v4972_v6  ;;  %v5223_v23 = vmul.f32 %v18383_v24, %v18353_v10  ;;  %v5260_v9 = vmul.f32 %v18384_v54, %v18353_v10  ;;  %v18385_v6 = vld [vmem:[#allocation200_spill] sm:$0xff]  ;;  %v5371_v24 = vmul.f32 %v13090_v28, %v18353_v10  ;;  %v18388_v31 = vld [vmem:[#allocation181_spill] sm:$0xff] }
 0x477   : > { %18379 = vst [vmem:[#allocation49_spill] sm:$0xff] %v13726_v22  ;;  %v13731_v61 = vsel %vm924_vm2, %v18380_v26, %v5009_v53  ;;  %v5297_v12 = vmul.f32 %v18385_v6, %v18353_v10  ;;  %v13743_v22 = vpop.permute.xlu0 %4610  ;;  %v18386_v53 = vrot.slane %v13586_v44, 1  ;;  %v5334_v26 = vmul.f32 %v13042_v40, %v18353_v10  ;;  %3316 = vrot.lane.b32.xlu0 %v18388_v31, %s7978_s8  ;;  %v18389_v44 = vld [vmem:[#allocation82_spill] sm:$0xff] }
 0x478   : > { %18381 = vst [vmem:[#allocation133_spill] sm:$0xff] %v13731_v61  ;;  %v5408_v38 = vmul.f32 %v13195_v15, %v18353_v10  ;;  %v5199_v54 = vrot.slane %v5186_v21, 2  ;;  %v5236_v6 = vrot.slane %v5223_v23, 2  ;;  %v5273_v61 = vrot.slane %v5260_v9, 2  ;;  %3292 = vrot.lane.b32.xlu1 %v18389_v44, %s16969_s2 }
 0x479   : > { %v13750_v2 = vsel %vm924_vm2, %v18386_v53, %v5046_v57  ;;  %v5310_v48 = vrot.slane %v5297_v12, 2  ;;  %v5347_v57 = vrot.slane %v5334_v26, 2  ;;  %v5384_v53 = vrot.slane %v5371_v24, 2 }
 0x47a   : > { %18387 = vst [vmem:[#allocation53_spill] sm:$0xff] %v13750_v2  ;;  %v5421_v2 = vrot.slane %v5408_v38, 2  ;;  %v5445_v40 = vmul.f32 %v13433_v42, %v18353_v10  ;;  %v18390_v28 = vrot.slane %v13218_v56, 2  ;;  %v18391_v9 = vrot.slane %v13222_v51, 2  ;;  %v13786_v42 = vpop.permute.xlu1 %4612  ;;  %v18402_v38 = vld [vmem:[#allocation144_spill] sm:$0xff] }
 0x47b   : > { %v18392_v31 = vrot.slane %v13231_v36, 2  ;;  %v18394_v23 = vrot.slane %v13269_v5, 2  ;;  %v13784_v56 = vpop.permute.xlu0 %4636  ;;  %v18396_v51 = vrot.slane %v13287_v60, 2  ;;  %v18398_v36 = vrot.slane %v13334_v30, 2 }
 0x47c   : > { %v13767_v15 = vsel %vm1337_vm3, %v18390_v28, %v5199_v54  ;;  %v13772_v21 = vsel %vm1337_vm3, %v18391_v9, %v5236_v6  ;;  %v18400_v5 = vrot.slane %v13392_v19, 2  ;;  %v5458_v24 = vrot.slane %v5445_v40, 2  ;;  %v18403_v54 = vld [vmem:[#allocation175_spill] sm:$0xff] }
 0x47d   : > { %v13777_v44 = vsel %vm1337_vm3, %v18392_v31, %v5273_v61  ;;  %v13782_v12 = vsel %vm1337_vm3, %v18394_v23, %v5310_v48  ;;  %v13791_v26 = vsel %vm1337_vm3, %v18396_v51, %v5347_v57  ;;  %v13796_v61 = vsel %vm1337_vm3, %v18398_v36, %v5384_v53  ;;  %v18404_v28 = vld [vmem:[#allocation35_spill] sm:$0xff]  ;;  %v18405_v57 = vld [vmem:[#allocation130_spill] sm:$0xff] }
 0x47e   : > { %18393 = vst [vmem:[#allocation37_spill] sm:$0xff] %v13777_v44  ;;  %18395 = vst [vmem:[#allocation172_spill] sm:$0xff] %v13782_v12  ;;  %v13801_v48 = vsel %vm1337_vm3, %v18400_v5, %v5421_v2  ;;  %v3358_v6 = vmul.f32 %v18403_v54, %v18402_v38  ;;  %v3333_v60 = vmul.f32 %v18404_v28, %v18064_v3  ;;  %v18406_v30 = vrot.slane %v13621_v18, 1  ;;  %v18407_v31 = vld [vmem:[#allocation39_spill] sm:$0xff]  ;;  %v18411_v2 = vld [vmem:[#allocation76_spill] sm:$0xff] }
 0x47f   : > { %18397 = vst [vmem:[#allocation132_spill] sm:$0xff] %v13791_v26  ;;  %18399 = vst [vmem:[#allocation52_spill] sm:$0xff] %v13796_v61  ;;  %v3384_v9 = vmul.f32 %v18405_v57, %v18402_v38  ;;  %v18408_v53 = vrot.slane %v18407_v31, 1  ;;  %v18410_v19 = vld [vmem:[#allocation187_spill] sm:$0xff]  ;;  %3318 = vrot.lane.b32.xlu1 %v18411_v2, %s7978_s8  ;;  %v18412_v40 = vrot.slane %v13481_v20, 2  ;;  %v18414_v36 = vrot.slane %v13625_v37, 1 }
 0x480   : > { %18401 = vst [vmem:[#allocation115_spill] sm:$0xff] %v13801_v48  ;;  %3342 = vrot.lane.b32.xlu0 %v18410_v19, %s7978_s8  ;;  %v18415_v5 = vld [vmem:[#allocation160_spill] sm:$0xff]  ;;  %v13834_v31 = vstv %s13733_s29  ;;  %v18418_v20 = vrot.slane %v13629_v29, 1  ;;  %v4658_v2 = vmul.f32 %v18343_v32, %v18353_v10  ;;  %v4745_v32 = vmul.f32 %v18350_v59, %v18353_v10  ;;  %s7415_s29 = sld [smem:[#allocation7 + $0xd]] }
 0x481   : > { %v13814_v23 = vsel %vm924_vm2, %v18408_v53, %v18406_v30  ;;  %v13823_v51 = vsel %vm1337_vm3, %v18412_v40, %v5458_v24  ;;  %v18416_v38 = vrot.slane %v18415_v5, 1  ;;  %v5079_v30 = vrot.slane %v13667_v55, 2  ;;  %v18419_v53 = vld [vmem:[#allocation59_spill] sm:$0xff] }
 0x482   : > { %18409 = vst [vmem:[#allocation120_spill] sm:$0xff] %v13814_v23  ;;  %18413 = vst [vmem:[#allocation93_spill] sm:$0xff] %v13823_v51  ;;  %v18420_v24 = vrot.slane %v18419_v53, 1  ;;  %v18422_v40 = vrot.slane %v13643_v41, 1  ;;  %v13860_v23 = vpop.permute.xlu1 %4638  ;;  %v18426_v53 = vrot.slane %v13662_v33, 2  ;;  %v18431_v33 = vrot.slane %v13625_v37, 1 }
 0x483   : > { %v13830_v28 = vsel %vm924_vm2, %v18416_v38, %v18414_v36  ;;  %v18423_v36 = vld [vmem:[#allocation179_spill] sm:$0xff]  ;;  %v4687_v38 = vmul.f32 %v18344_v39, %v18353_v10  ;;  %v13875_v39 = vmul.f32 %v13606_v17, %v18194_v8  ;;  %3344 = vrot.lane.b32.xlu1 %v3333_v60, %s7978_s8  ;;  %v5097_v60 = vmul.f32 %v13834_v31, %v17979_v58 }
 0x484   : > { %18417 = vst [vmem:[#allocation44_spill] sm:$0xff] %v13830_v28  ;;  %v13845_v19 = vsel %vm924_vm2, %v18420_v24, %v18418_v20  ;;  %v18424_v55 = vrot.slane %v18423_v36, 1  ;;  %v13858_v28 = vpop.permute.xlu0 %3543  ;;  %v4716_v20 = vmul.f32 %v18345_v62, %v18353_v10  ;;  %v18427_v24 = vrot.slane %v13647_v45, 2  ;;  %3368 = vrot.lane.b32.xlu0 %v3358_v6, %s7978_s8 }
 0x485   : > { %18421 = vst [vmem:[#allocation99_spill] sm:$0xff] %v13845_v19  ;;  %v3359_v36 = vmul.f32 %v18403_v54, %v18064_v3  ;;  %v18428_v62 = vmov %v18426_v53  ;;  %v5095_v19 = vmul.f32 %v13834_v31, %v10906_v63  ;;  %v18429_v54 = vrot.slane %v13621_v18, 1 }
 0x486   : > { %v13854_v5 = vsel %vm924_vm2, %v18424_v55, %v18422_v40  ;;  %v13871_v40 = vsel %vm1337_vm3, %v18427_v24, %v18426_v53  ;;  %v4671_v55 = vrot.slane %v4658_v2, 1  ;;  %v13882_v59 = vsel %vm1337_vm3, %v18428_v62, %v5079_v30 }
 0x487   : > { %18425 = vst [vmem:[#allocation61_spill] sm:$0xff] %v13854_v5  ;;  %v4700_v5 = vrot.slane %v4687_v38, 1  ;;  %v4729_v45 = vrot.slane %v4716_v20, 1  ;;  %v4758_v53 = vrot.slane %v4745_v32, 1  ;;  %v16822_v24 = vrot.slane %v13875_v39, 2  ;;  %v3546_v32 = vpop.permute.xlu1 %3545  ;;  %3370 = vrot.lane.b32.xlu1 %v3359_v36, %s7978_s8 }
 0x488   : > { %v13892_v2 = vsel %vm924_vm2, %v18429_v54, %v4671_v55  ;;  %v5096_v6 = vmul.f32 %v13834_v31, %v10924_v4  ;;  %v3581_v20 = vpop.permute.xlu0 %3580  ;;  %v18433_v18 = vrot.slane %v13629_v29, 1  ;;  %v18435_v37 = vrot.slane %v13643_v41, 1  ;;  %3394 = vrot.lane.b32.xlu0 %v3384_v9, %s7978_s8 }
 0x489   : > { %18430 = vst [vmem:[#allocation40_spill] sm:$0xff] %v13892_v2  ;;  %v13897_v38 = vsel %vm924_vm2, %v18431_v33, %v4700_v5  ;;  %v13916_v62 = vsel %vm1337_vm3, %v5079_v30, %v16822_v24  ;;  %v5105_v54 = vrot.slane %v5095_v19, 2  ;;  %v18438_v33 = vld [vmem:[#allocation34_spill] sm:$0xff]  ;;  %v13922_v29 = vmul.f32 %v13834_v31, %v18194_v8  ;;  %v18439_v24 = vld [vmem:[#allocation188_spill] sm:$0xff] }
 0x48a   : > { %18432 = vst [vmem:[#allocation119_spill] sm:$0xff] %v13897_v38  ;;  %v13906_v55 = vsel %vm924_vm2, %v18433_v18, %v4729_v45  ;;  %v13911_v5 = vsel %vm924_vm2, %v18435_v37, %v4758_v53  ;;  %18437 = vst [vmem:[#allocation129_spill] sm:$0xff] %v13916_v62  ;;  %v4448_v38 = vmul.f32 %v18438_v33, %v17979_v58  ;;  %v5106_v2 = vrot.slane %v5096_v6, 2 }
 0x48b   : > { %18434 = vst [vmem:[#allocation63_spill] sm:$0xff] %v13906_v55  ;;  %18436 = vst [vmem:[#allocation167_spill] sm:$0xff] %v13911_v5  ;;  %v3385_v41 = vmul.f32 %v18405_v57, %v18064_v3  ;;  %v5108_v45 = vrot.slane %v5097_v60, 2  ;;  %v13929_v53 = vstv %s13836_s12  ;;  %v13932_v30 = vstv %s13838_s0  ;;  %v3583_v37 = vpop.permute.xlu1 %3582  ;;  %s7416_s12 = sld [smem:[#allocation7 + $0x1f]]  ;;  %s7417_s0 = sld [smem:[#allocation7 + $0xe]] }
 0x48c   : > { %v13935_v19 = vsel %vm1337_vm3, %v5105_v54, %v5106_v2  ;;  %v5124_v18 = vmul.f32 %v13929_v53, %v10906_v63  ;;  %v5125_v9 = vmul.f32 %v13929_v53, %v10924_v4  ;;  %v3618_v36 = vpop.permute.xlu0 %3617  ;;  %v5126_v57 = vmul.f32 %v13929_v53, %v17979_v58  ;;  %4458 = vrot.lane.b32.xlu0 %v4448_v38, %s16969_s2 }
 0x48d   : > { %v13943_v3 = vsel %vm1337_vm3, %v5106_v2, %v5108_v45  ;;  %v13949_v60 = vmul.f32 %v13929_v53, %v18194_v8  ;;  %v5153_v54 = vmul.f32 %v13932_v30, %v10906_v63  ;;  %v4474_v6 = vmul.f32 %v18439_v24, %v17979_v58  ;;  %3396 = vrot.lane.b32.xlu1 %v3385_v41, %s7978_s8 }
 0x48e   : > { %v18440_v62 = vrot.slane %v13922_v29, 2  ;;  %v5134_v2 = vrot.slane %v5124_v18, 2  ;;  %v5135_v55 = vrot.slane %v5125_v9, 2  ;;  %v5137_v51 = vrot.slane %v5126_v57, 2 }
 0x48f   : > { %v16823_v48 = vrot.slane %v13949_v60, 2  ;;  %v5154_v61 = vmul.f32 %v13932_v30, %v10924_v4  ;;  %v4449_v26 = vmul.f32 %v18438_v33, %v18194_v8  ;;  %v5163_v12 = vrot.slane %v5153_v54, 2  ;;  %v3620_v41 = vpop.permute.xlu1 %3619 }
 0x490   : > { %v13958_v5 = vsel %vm1337_vm3, %v5108_v45, %v18440_v62  ;;  %v5155_v62 = vmul.f32 %v13932_v30, %v17979_v58  ;;  %v13971_v45 = vmul.f32 %v13932_v30, %v18194_v8  ;;  %v3655_v38 = vpop.permute.xlu0 %3654  ;;  %v13974_v18 = vsel %vm1337_vm3, %v5134_v2, %v5135_v55  ;;  %4484 = vrot.lane.b32.xlu0 %v4474_v6, %s16969_s2 }
 0x491   : > { %18441 = vst [vmem:[#allocation83_spill] sm:$0xff] %v13958_v5  ;;  %v13979_v9 = vsel %vm1337_vm3, %v5137_v51, %v16823_v48  ;;  %v13982_v33 = vsel %vm1337_vm3, %v5135_v55, %v5137_v51  ;;  %v5164_v57 = vrot.slane %v5154_v61, 2  ;;  %4460 = vrot.lane.b32.xlu1 %v4449_v26, %s16969_s2  ;;  %v3555_v2 = vadd.f32 %v13858_v28, %v13321_v27 }
 0x492   : > { %18442 = vst [vmem:[#allocation184_spill] sm:$0xff] %v13979_v9  ;;  %v5166_v54 = vrot.slane %v5155_v62, 2  ;;  %v5168_v5 = vrot.slane %v13971_v45, 2  ;;  %v18445_v62 = vld [vmem:[#allocation38_spill] sm:$0xff]  ;;  %v4475_v26 = vmul.f32 %v18439_v24, %v18194_v8  ;;  %v3592_v27 = vadd.f32 %v3581_v20, %v13375_v14  ;;  %v18447_v24 = vld [vmem:[#allocation185_spill] sm:$0xff] }
 0x493   : > { %v13988_v44 = vsel %vm1337_vm3, %v5163_v12, %v5164_v57  ;;  %v3657_v55 = vpop.permute.xlu1 %3656  ;;  %v4500_v45 = vmul.f32 %v18445_v62, %v17979_v58  ;;  %v5070_v12 = vmul.f32 %v13606_v17, %v18353_v10  ;;  %v3556_v28 = vadd.f32 %v3546_v32, %v13378_v52  ;;  %v18450_v52 = vld [vmem:[#allocation190_spill] sm:$0xff] }
 0x494   : > { %18443 = vst [vmem:[#allocation142_spill] sm:$0xff] %v13988_v44  ;;  %v13993_v48 = vsel %vm1337_vm3, %v5166_v54, %v5168_v5  ;;  %v13996_v51 = vsel %vm1337_vm3, %v5164_v57, %v5166_v54  ;;  %v3692_v61 = vpop.permute.xlu0 %3691  ;;  %v18446_v57 = vld [vmem:[#allocation78_spill] sm:$0xff]  ;;  %v4501_v17 = vmul.f32 %v18445_v62, %v18194_v8  ;;  %v4552_v20 = vmul.f32 %v18450_v52, %v17979_v58 }
 0x495   : > { %18444 = vst [vmem:[#allocation162_spill] sm:$0xff] %v13993_v48  ;;  %v3703_v6 = vadd.f32 %v3692_v61, %v3555_v2  ;;  %4510 = vrot.lane.b32.xlu0 %v4500_v45, %s16969_s2  ;;  %4486 = vrot.lane.b32.xlu1 %v4475_v26, %s16969_s2  ;;  %v5083_v48 = vrot.slane %v5070_v12, 2  ;;  %v4526_v2 = vmul.f32 %v18447_v24, %v17979_v58  ;;  %v18448_v26 = vrot.slane %v13875_v39, 2  ;;  %v18452_v39 = vld [vmem:[#allocation126_spill] sm:$0xff] }
 0x496   : > { %v5099_v32 = vmul.f32 %v13834_v31, %v18353_v10 }
 0x497   : > { %v14009_v54 = vadd.f32 %v18446_v57, %v3703_v6  ;;  %v3694_v9 = vpop.permute.xlu1 %3693  ;;  %v14018_v14 = vsel %vm1337_vm3, %v18448_v26, %v5083_v48  ;;  %v3629_v6 = vadd.f32 %v3618_v36, %v13419_v13  ;;  %v5157_v13 = vmul.f32 %v13932_v30, %v18353_v10  ;;  %v18456_v26 = vld [vmem:[#allocation168_spill] sm:$0xff] }
 0x498   : > { %v3729_v44 = vpop.permute.xlu0 %3728  ;;  %v3704_v45 = vadd.f32 %v3694_v9, %v3556_v28  ;;  %18449 = vst [vmem:[#allocation182_spill] sm:$0xff] %v14018_v14  ;;  %v18451_v9 = vld [vmem:[#allocation139_spill] sm:$0xff]  ;;  %v4527_v28 = vmul.f32 %v18447_v24, %v18194_v8  ;;  %v5112_v57 = vrot.slane %v5099_v32, 2  ;;  %v18453_v36 = vrot.slane %v13922_v29, 2  ;;  %v18457_v32 = vld [vmem:[#allocation117_spill] sm:$0xff] }
 0x499   : > { %v3740_v61 = vadd.f32 %v3729_v44, %v3592_v27  ;;  %4536 = vrot.lane.b32.xlu0 %v4526_v2, %s16969_s2  ;;  %4512 = vrot.lane.b32.xlu1 %v4501_v17, %s16969_s2  ;;  %v3593_v44 = vadd.f32 %v3583_v37, %v13422_v47  ;;  %v5128_v2 = vmul.f32 %v13929_v53, %v18353_v10  ;;  %v5170_v24 = vrot.slane %v5157_v13, 2  ;;  %v18458_v10 = vld [vmem:[#allocation114_spill] sm:$0xff] }
 0x49a   : > { %v14032_v48 = vadd.f32 %v18452_v39, %v3704_v45  ;;  %v14045_v37 = vsel %vm1337_vm3, %v18453_v36, %v5112_v57  ;;  %v3630_v53 = vadd.f32 %v3620_v41, %v18456_v26  ;;  %v4553_v39 = vmul.f32 %v18450_v52, %v18194_v8  ;;  %v18464_v52 = vld [vmem:[#allocation101_spill] sm:$0xff]  ;;  %v18467_v26 = vld [vmem:[#allocation70_spill] sm:$0xff] }
 0x49b   : > { %v14029_v62 = vadd.f32 %v18451_v9, %v3740_v61  ;;  %v3731_v27 = vpop.permute.xlu1 %3730  ;;  %18454 = vst [vmem:[#allocation122_spill] sm:$0xff] %v14045_v37  ;;  %v5141_v17 = vrot.slane %v5128_v2, 2  ;;  %v18455_v61 = vld [vmem:[#allocation58_spill] sm:$0xff]  ;;  %v14065_v41 = vsel %vm1337_vm3, %v5168_v5, %v5170_v24  ;;  %v3667_v57 = vadd.f32 %v3657_v55, %v13504_v16  ;;  %v18463_v2 = vld [vmem:[#allocation95_spill] sm:$0xff]  ;;  %v18465_v36 = vld [vmem:[#allocation77_spill] sm:$0xff] }
 0x49c   : > { %v3766_v12 = vpop.permute.xlu0 %3765  ;;  %v3741_v47 = vadd.f32 %v3731_v27, %v3593_v44  ;;  %v3666_v45 = vadd.f32 %v3655_v38, %v18455_v61  ;;  %v18459_v44 = vld [vmem:[#allocation60_spill] sm:$0xff]  ;;  %18462 = vst [vmem:[#allocation121_spill] sm:$0xff] %v14065_v41  ;;  %v4604_v5 = vmul.f32 %v18465_v36, %v17979_v58  ;;  %v18466_v16 = vld [vmem:[#allocation151_spill] sm:$0xff] }
 0x49d   : > { %v3777_v31 = vadd.f32 %v3766_v12, %v3629_v6  ;;  %4562 = vrot.lane.b32.xlu0 %v4552_v20, %s7978_s8  ;;  %4538 = vrot.lane.b32.xlu1 %v4527_v28, %s16969_s2  ;;  %v4578_v29 = vmul.f32 %v18459_v44, %v17979_v58  ;;  %v18460_v12 = vrot.slane %v13949_v60, 2 }
 0x49e   : > { %v14053_v30 = vadd.f32 %v18458_v10, %v3741_v47  ;;  %v14091_v10 = vmul.f32 %v18333_v34, %v17979_v58 }
 0x49f   : > { %v14050_v9 = vadd.f32 %v18457_v32, %v3777_v31  ;;  %v3768_v6 = vpop.permute.xlu1 %3767  ;;  %v14062_v38 = vsel %vm1337_vm3, %v18460_v12, %v5141_v17  ;;  %v4579_v17 = vmul.f32 %v18459_v44, %v18194_v8  ;;  %v4605_v32 = vmul.f32 %v18465_v36, %v18194_v8  ;;  %v18470_v12 = vld [vmem:[#allocation74_spill] sm:$0xff] }
 0x4a0   : > { %v3803_v20 = vpop.permute.xlu0 %3802  ;;  %18461 = vst [vmem:[#allocation194_spill] sm:$0xff] %v14062_v38  ;;  %v3778_v28 = vadd.f32 %v3768_v6, %v3630_v53  ;;  %v4630_v53 = vmul.f32 %v18467_v26, %v17979_v58  ;;  %v4631_v44 = vmul.f32 %v18467_v26, %v18194_v8  ;;  %v18474_v36 = vld [vmem:[#allocation174_spill] sm:$0xff] }
 0x4a1   : > { %v3814_v27 = vadd.f32 %v3803_v20, %v3666_v45  ;;  %4588 = vrot.lane.b32.xlu0 %v4578_v29, %s7978_s8  ;;  %4564 = vrot.lane.b32.xlu1 %v4553_v39, %s7978_s8  ;;  %v18468_v29 = vld [vmem:[#allocation23_spill] sm:$0xff] }
 0x4a2   : > { %v14074_v31 = vadd.f32 %v18464_v52, %v3778_v28  ;;  %v18469_v39 = vrot.slane %v18468_v29, 1  ;;  %v18472_v52 = vld [vmem:[#allocation136_spill] sm:$0xff] }
 0x4a3   : > { %v14071_v13 = vadd.f32 %v18463_v2, %v3814_v27  ;;  %v3805_v47 = vpop.permute.xlu1 %3804  ;;  %v18471_v27 = vrot.slane %v18470_v12, 1 }
 0x4a4   : > { %v3956_v60 = vpop.permute.xlu0 %3955  ;;  %v3815_v24 = vadd.f32 %v3805_v47, %v3667_v57  ;;  %v16824_v57 = vrot.slane %v14091_v10, 1  ;;  %v18473_v47 = vrot.slane %v18472_v52, 1  ;;  %v18480_v52 = vld [vmem:[#allocation81_spill] sm:$0xff] }
 0x4a5   : > { %4614 = vrot.lane.b32.xlu0 %v4604_v5, %s7978_s8  ;;  %4590 = vrot.lane.b32.xlu1 %v4579_v17, %s7978_s8  ;;  %v3540_v28 = vsel %vm924_vm2, %v18471_v27, %v18469_v39  ;;  %v18475_v5 = vrot.slane %v18474_v36, 1  ;;  %v18478_v27 = vld [vmem:[#allocation67_spill] sm:$0xff] }
 0x4a6   : > { %v14083_v55 = vadd.f32 %v18466_v16, %v3815_v24  ;;  %v18476_v24 = vld [vmem:[#allocation147_spill] sm:$0xff] }
 0x4a7   : > { %v3958_v45 = vpop.permute.xlu1 %3957  ;;  %v3577_v17 = vsel %vm924_vm2, %v18475_v5, %v18473_v47  ;;  %v18477_v16 = vrot.slane %v18476_v24, 1  ;;  %v18481_v47 = vrot.slane %v18480_v52, 1  ;;  %v14129_v5 = vstv %s7324_s9  ;;  %s7421_s9 = sld [smem:[#allocation7 + $0x10]] }
 0x4a8   : > { %v3993_v61 = vpop.permute.xlu0 %3992 }
 0x4a9   : > { %4640 = vrot.lane.b32.xlu0 %v4630_v53, %s7978_s8  ;;  %4616 = vrot.lane.b32.xlu1 %v4605_v32, %s7978_s8  ;;  %v5043_v26 = vsel %vm924_vm2, %v18477_v16, %v16824_v57  ;;  %v14117_v53 = vstv %s7323_s22  ;;  %v3967_v32 = vadd.f32 %v3956_v60, %v14009_v54  ;;  %v18482_v54 = vld [vmem:[#allocation79_spill] sm:$0xff]  ;;  %v4004_v60 = vadd.f32 %v3993_v61, %v14029_v62  ;;  %v18486_v61 = vld [vmem:[#allocation92_spill] sm:$0xff]  ;;  %s7418_s22 = sld [smem:[#allocation7 + $0x20]] }
 0x4aa   : > { %v4406_v39 = vmul.f32 %v14117_v53, %v10906_v63  ;;  %v4416_v16 = vmul.f32 %v14129_v5, %v10906_v63 }
 0x4ab   : > { %v3995_v6 = vpop.permute.xlu1 %3994 }
 0x4ac   : > { %v4030_v20 = vpop.permute.xlu0 %4029  ;;  %v4005_v57 = vadd.f32 %v3995_v6, %v14053_v30  ;;  %v18493_v6 = vld [vmem:[#allocation56_spill] sm:$0xff] }
 0x4ad   : > { %3547 = vrot.lane.b32.xlu0 %v3540_v28, %s16969_s2  ;;  %4642 = vrot.lane.b32.xlu1 %v4631_v44, %s7978_s8  ;;  %v18479_v28 = vrot.slane %v18478_v27, 1  ;;  %v14140_v27 = vstv %s7325_s30  ;;  %s7382_s30 = sld [smem:[#allocation7 + $0x1]] }
 0x4af   : > { %v4032_v2 = vpop.permute.xlu1 %4031  ;;  %v3614_v36 = vsel %vm924_vm2, %v18481_v47, %v18479_v28  ;;  %v18483_v28 = vld [vmem:[#allocation91_spill] sm:$0xff] }
 0x4b0   : > { %v4067_v34 = vpop.permute.xlu0 %4066 }
 0x4b1   : > { %3584 = vrot.lane.b32.xlu0 %v3577_v17, %s16969_s2  ;;  %5050 = vrot.lane.b32.xlu1 %v5043_v26, %s7978_s8  ;;  %v3968_v17 = vadd.f32 %v3958_v45, %v14032_v48  ;;  %v18487_v48 = vrot.slane %v18486_v61, 1 }
 0x4b3   : > { %v4069_v29 = vpop.permute.xlu1 %4068 }
 0x4b4   : > { %v4104_v44 = vpop.permute.xlu0 %4103 }
 0x4b5   : > { %v4115_v12 = vadd.f32 %v4104_v44, %v3967_v32  ;;  %3621 = vrot.lane.b32.xlu0 %v3614_v36, %s16969_s2  ;;  %3549 = vrot.lane.b32.xlu1 %v18482_v54, %s16969_s2  ;;  %v4407_v32 = vmul.f32 %v14117_v53, %v10924_v4  ;;  %v18484_v54 = vld [vmem:[#allocation54_spill] sm:$0xff] }
 0x4b6   : > { %v18485_v62 = vrot.slane %v18484_v54, 1  ;;  %v18491_v54 = vld [vmem:[#allocation94_spill] sm:$0xff] }
 0x4b7   : > { %v4410_v24 = vadd.f32 %v4406_v39, %v4115_v12  ;;  %v4106_v44 = vpop.permute.xlu1 %4105  ;;  %v4041_v39 = vadd.f32 %v4030_v20, %v14050_v9  ;;  %v18488_v12 = vld [vmem:[#allocation88_spill] sm:$0xff]  ;;  %v18489_v9 = vld [vmem:[#allocation27_spill] sm:$0xff] }
 0x4b8   : > { %v4141_v26 = vpop.permute.xlu0 %4140  ;;  %v4116_v36 = vadd.f32 %v4106_v44, %v3968_v17  ;;  %v3651_v45 = vsel %vm924_vm2, %v18487_v48, %v18485_v62  ;;  %v4426_v17 = vmul.f32 %v14140_v27, %v10906_v63  ;;  %v4417_v44 = vmul.f32 %v14129_v5, %v10924_v4 }
 0x4b9   : > { %v4466_v52 = vadd.f32 %v18483_v28, %v4410_v24  ;;  %v4152_v47 = vadd.f32 %v4141_v26, %v4004_v60  ;;  %3658 = vrot.lane.b32.xlu0 %v3651_v45, %s16969_s2  ;;  %3586 = vrot.lane.b32.xlu1 %v18488_v12, %s16969_s2  ;;  %v18490_v20 = vrot.slane %v18489_v9, 1  ;;  %v18492_v62 = vrot.slane %v18491_v54, 1  ;;  %v18495_v45 = vld [vmem:[#allocation105_spill] sm:$0xff]  ;;  %v18502_v54 = vld [vmem:[#allocation84_spill] sm:$0xff] }
 0x4ba   : > { %v4411_v24 = vadd.f32 %v4407_v32, %v4116_v36  ;;  %v14164_v48 = vstv %s14120_s3  ;;  %v18494_v36 = vld [vmem:[#allocation62_spill] sm:$0xff]  ;;  %s7383_s3 = sld [smem:[#allocation7 + $0x13]] }
 0x4bb   : > { %v4420_v41 = vadd.f32 %v4416_v16, %v4152_v47  ;;  %v4570_v60 = vadd.f32 %v13655_v49, %v4466_v52  ;;  %v4143_v28 = vpop.permute.xlu1 %4142  ;;  %v3688_v61 = vsel %vm924_vm2, %v18492_v62, %v18490_v20  ;;  %v4078_v52 = vadd.f32 %v4067_v34, %v14071_v13 }
 0x4bc   : > { %v4178_v26 = vpop.permute.xlu0 %4177  ;;  %v4467_v49 = vadd.f32 %v18493_v6, %v4411_v24  ;;  %v4153_v32 = vadd.f32 %v4143_v28, %v4005_v57  ;;  %v4042_v47 = vadd.f32 %v4032_v2, %v14074_v31  ;;  %v4436_v57 = vmul.f32 %v14164_v48, %v10906_v63  ;;  %v18497_v2 = vld [vmem:[#allocation137_spill] sm:$0xff] }
 0x4bd   : > { %v4492_v30 = vadd.f32 %v13508_v0, %v4420_v41  ;;  %v4189_v16 = vadd.f32 %v4178_v26, %v4041_v39  ;;  %3695 = vrot.lane.b32.xlu0 %v3688_v61, %s7978_s8  ;;  %3623 = vrot.lane.b32.xlu1 %v18494_v36, %s16969_s2  ;;  %v14174_v12 = vadd.f32 %v18495_v45, %v4570_v60  ;;  %v18496_v41 = vld [vmem:[#allocation155_spill] sm:$0xff]  ;;  %v18498_v39 = vrot.slane %v18497_v2, 1  ;;  %v18499_v26 = vld [vmem:[#allocation108_spill] sm:$0xff]  ;;  %v18503_v63 = vld [vmem:[#allocation177_spill] sm:$0xff] }
 0x4be   : > { %v4421_v20 = vadd.f32 %v4417_v44, %v4153_v32  ;;  %v4571_v24 = vadd.f32 %v18496_v41, %v4467_v49  ;;  %v4427_v31 = vmul.f32 %v14140_v27, %v10924_v4  ;;  %v18500_v28 = vrot.slane %v18499_v26, 1  ;;  %v18504_v6 = vld [vmem:[#allocation41_spill] sm:$0xff]  ;;  %v18508_v2 = vld [vmem:[#allocation87_spill] sm:$0xff] }
 0x4bf   : > { %v4430_v9 = vadd.f32 %v4426_v17, %v4189_v16  ;;  %v4596_v0 = vadd.f32 %v13688_v1, %v4492_v30  ;;  %v4180_v34 = vpop.permute.xlu1 %4179  ;;  %v18501_v17 = vld [vmem:[#allocation203_spill] sm:$0xff]  ;;  %v4079_v30 = vadd.f32 %v4069_v29, %v14083_v55  ;;  %v18505_v16 = vld [vmem:[#allocation169_spill] sm:$0xff]  ;;  %v4437_v55 = vmul.f32 %v14164_v48, %v10924_v4  ;;  %v18514_v4 = vld [vmem:[#allocation138_spill] sm:$0xff] }
 0x4c0   : > { %v4215_v13 = vpop.permute.xlu0 %4214  ;;  %v3725_v60 = vsel %vm924_vm2, %v18500_v28, %v18498_v39  ;;  %v4493_v1 = vadd.f32 %v18502_v54, %v4421_v20  ;;  %v4190_v61 = vadd.f32 %v4180_v34, %v4042_v47  ;;  %v14197_v32 = vadd.f32 %v18505_v16, %v4571_v24  ;;  %v18506_v20 = vld [vmem:[#allocation47_spill] sm:$0xff]  ;;  %v18510_v24 = vld [vmem:[#allocation124_spill] sm:$0xff] }
 0x4c1   : > { %v4518_v44 = vadd.f32 %v18501_v17, %v4430_v9  ;;  %v4226_v62 = vadd.f32 %v4215_v13, %v4078_v52  ;;  %3732 = vrot.lane.b32.xlu0 %v3725_v60, %s7978_s8  ;;  %3660 = vrot.lane.b32.xlu1 %v18503_v63, %s16969_s2  ;;  %v14194_v49 = vadd.f32 %v18504_v6, %v4596_v0  ;;  %v18507_v13 = vld [vmem:[#allocation191_spill] sm:$0xff]  ;;  %v18509_v39 = vrot.slane %v18508_v2, 1  ;;  %v18518_v6 = vld [vmem:[#allocation97_spill] sm:$0xff] }
 0x4c2   : > { %v4431_v45 = vadd.f32 %v4427_v31, %v4190_v61  ;;  %v4597_v52 = vadd.f32 %v13745_v11, %v4493_v1  ;;  %v18511_v26 = vrot.slane %v18510_v24, 1  ;;  %v18512_v11 = vld [vmem:[#allocation146_spill] sm:$0xff]  ;;  %v18519_v16 = vrot.slane %v18518_v6, 1  ;;  %v18535_v6 = vld [vmem:[#allocation80_spill] sm:$0xff] }
 0x4c3   : > { %v4440_v36 = vadd.f32 %v4436_v57, %v4226_v62  ;;  %v4622_v9 = vadd.f32 %v13743_v22, %v4518_v44  ;;  %v4217_v29 = vpop.permute.xlu1 %4216  ;;  %v18513_v22 = vld [vmem:[#allocation202_spill] sm:$0xff] }
 0x4c4   : > { %v4790_v47 = vpop.permute.xlu0 %4789  ;;  %v4519_v34 = vadd.f32 %v18507_v13, %v4431_v45  ;;  %v4227_v0 = vadd.f32 %v4217_v29, %v4079_v30  ;;  %v3762_v57 = vsel %vm924_vm2, %v18511_v26, %v18509_v39  ;;  %v14217_v28 = vadd.f32 %v18514_v4, %v4597_v52  ;;  %v18515_v62 = vld [vmem:[#allocation22_spill] sm:$0xff]  ;;  %v18516_v30 = vld [vmem:[#allocation71_spill] sm:$0xff]  ;;  %v18520_v45 = vld [vmem:[#allocation33_spill] sm:$0xff] }
 0x4c5   : > { %v4544_v41 = vadd.f32 %v18506_v20, %v4440_v36  ;;  %3769 = vrot.lane.b32.xlu0 %v3762_v57, %s7978_s8  ;;  %3697 = vrot.lane.b32.xlu1 %v18512_v11, %s7978_s8  ;;  %v14214_v31 = vadd.f32 %v18513_v22, %v4622_v9  ;;  %v18517_v63 = vrot.slane %v18516_v30, 1  ;;  %v18527_v39 = vld [vmem:[#allocation199_spill] sm:$0xff]  ;;  %v18528_v26 = vld [vmem:[#allocation148_spill] sm:$0xff] }
 0x4c6   : > { %v4441_v60 = vadd.f32 %v4437_v55, %v4227_v0  ;;  %v4623_v44 = vadd.f32 %v13786_v42, %v4519_v34  ;;  %v18522_v42 = vld [vmem:[#allocation166_spill] sm:$0xff]  ;;  %v18525_v34 = vld [vmem:[#allocation128_spill] sm:$0xff]  ;;  %v18531_v4 = vld [vmem:[#allocation103_spill] sm:$0xff] }
 0x4c7   : > { %v4648_v17 = vadd.f32 %v13784_v56, %v4544_v41  ;;  %v4792_v1 = vpop.permute.xlu1 %4791  ;;  %v3799_v36 = vsel %vm924_vm2, %v18519_v16, %v18517_v63  ;;  %v18521_v56 = vld [vmem:[#allocation152_spill] sm:$0xff]  ;;  %v18526_v0 = vrot.slane %v18525_v34, 2  ;;  %v18536_v16 = vrot.slane %v18535_v6, 2 }
 0x4c8   : > { %v14221_v54 = vpop.permute.xlu0 %4826  ;;  %v4545_v61 = vadd.f32 %v18515_v62, %v4441_v60  ;;  %v14236_v52 = vadd.f32 %v18522_v42, %v4623_v44  ;;  %v18523_v41 = vld [vmem:[#allocation28_spill] sm:$0xff]  ;;  %v18532_v60 = vrot.slane %v18531_v4, 2  ;;  %v14266_v62 = vpop.f32.mrb[26].mxu1  ;;  %v18539_v42 = vld [vmem:[#allocation89_spill] sm:$0xff] }
 0x4c9   : > { %v14230_v9 = vadd.f32 %v18520_v45, %v4648_v17  ;;  %3806 = vrot.lane.b32.xlu0 %v3799_v36, %s7978_s8  ;;  %3734 = vrot.lane.b32.xlu1 %v18521_v56, %s7978_s8  ;;  %v18524_v13 = vrot.slane %v18523_v41, 2  ;;  %v18529_v11 = vld [vmem:[#allocation104_spill] sm:$0xff]  ;;  %18534 = vst [vmem:[#allocation200_spill] sm:$0xff] %v14266_v62  ;;  %v18537_v36 = vld [vmem:[#allocation154_spill] sm:$0xff] }
 0x4ca   : > { %v4649_v55 = vadd.f32 %v13860_v23, %v4545_v61  ;;  %v18530_v22 = vrot.slane %v18529_v11, 2  ;;  %v18533_v44 = vld [vmem:[#allocation64_spill] sm:$0xff]  ;;  %v7625_v61 = vpop.f32.mrb[27].mxu1  ;;  %v18538_v45 = vrot.slane %v18537_v36, 2 }
 0x4cb   : > { %v14241_v20 = vpop.permute.xlu1 %4828  ;;  %v3952_v2 = vsel %vm1337_vm3, %v18526_v0, %v18524_v13  ;;  %v18541_v0 = vld [vmem:[#allocation161_spill] sm:$0xff] }
 0x4cc   : > { %v14239_v29 = vpop.permute.xlu0 %4863  ;;  %v14249_v24 = vadd.f32 %v18527_v39, %v4649_v55  ;;  %v3989_v17 = vsel %vm1337_vm3, %v18532_v60, %v18530_v22  ;;  %v4026_v56 = vsel %vm1337_vm3, %v18538_v45, %v18536_v16  ;;  %v14278_v55 = vpop.f32.mrb[28].mxu1  ;;  %v18543_v39 = vld [vmem:[#allocation131_spill] sm:$0xff]  ;;  %v18545_v22 = vld [vmem:[#allocation141_spill] sm:$0xff] }
 0x4cd   : > { %3959 = vrot.lane.b32.xlu0 %v3952_v2, %s16969_s2  ;;  %3771 = vrot.lane.b32.xlu1 %v18528_v26, %s7978_s8  ;;  %18540 = vst [vmem:[#allocation181_spill] sm:$0xff] %v14278_v55  ;;  %v7628_v41 = vpop.f32.mrb[29].mxu1  ;;  %v18542_v2 = vrot.slane %v18541_v0, 2  ;;  %v18544_v26 = vrot.slane %v18543_v39, 2  ;;  %v18546_v61 = vld [vmem:[#allocation21_spill] sm:$0xff]  ;;  %v18548_v16 = vld [vmem:[#allocation183_spill] sm:$0xff]  ;;  %v4801_v0 = vadd.f32 %v4790_v47, %v14174_v12  ;;  %v4802_v12 = vadd.f32 %v4792_v1, %v14197_v32 }
 0x4ce   : > { %v14288_v4 = vpop.f32.mrb[30].mxu1  ;;  %v18547_v6 = vrot.slane %v18546_v61, 2  ;;  %v18549_v36 = vrot.slane %v18548_v16, 2  ;;  %v18556_v61 = vld [vmem:[#allocation198_spill] sm:$0xff]  ;;  %v18558_v47 = vld [vmem:[#allocation113_spill] sm:$0xff] }
 0x4cf   : > { %v14256_v23 = vpop.permute.xlu1 %4865  ;;  %v4063_v11 = vsel %vm1337_vm3, %v18544_v26, %v18542_v2  ;;  %v7631_v60 = vpop.f32.mrb[31].mxu1  ;;  %v18551_v2 = vld [vmem:[#allocation51_spill] sm:$0xff]  ;;  %v18553_v26 = vld [vmem:[#allocation46_spill] sm:$0xff] }
 0x4d0   : > { %v14254_v57 = vpop.permute.xlu0 %4900  ;;  %v4100_v45 = vsel %vm1337_vm3, %v18549_v36, %v18547_v6  ;;  %v18552_v39 = vrot.slane %v18551_v2, 2  ;;  %v14306_v60 = vpop.f32.mrb[26].mxu0  ;;  %v18559_v2 = vrot.slane %v18558_v47, 2  ;;  %v18565_v47 = vld [vmem:[#allocation134_spill] sm:$0xff] }
 0x4d1   : > { %3996 = vrot.lane.b32.xlu0 %v3989_v17, %s16969_s2  ;;  %3808 = vrot.lane.b32.xlu1 %v18533_v44, %s7978_s8  ;;  %18555 = vst [vmem:[#allocation82_spill] sm:$0xff] %v14306_v60  ;;  %v7651_v6 = vpop.f32.mrb[27].mxu0  ;;  %v18566_v37 = vrot.slane %v18565_v47, 2 }
 0x4d2   : > { %v14311_v36 = vpop.f32.mrb[28].mxu0 }
 0x4d3   : > { %v14268_v63 = vpop.permute.xlu1 %4902  ;;  %18557 = vst [vmem:[#allocation144_spill] sm:$0xff] %v14311_v36 }
 0x4d4   : > { %v4938_v30 = vpop.permute.xlu0 %4937 }
 0x4d5   : > { %4033 = vrot.lane.b32.xlu0 %v4026_v56, %s16969_s2  ;;  %3961 = vrot.lane.b32.xlu1 %v18539_v42, %s16969_s2  ;;  %v18550_v56 = vld [vmem:[#allocation196_spill] sm:$0xff]  ;;  %v4949_v16 = vadd.f32 %v4938_v30, %v4801_v0 }
 0x4d7   : > { %v4940_v34 = vpop.permute.xlu1 %4939  ;;  %v14325_v0 = vadd.f32 %v13871_v40, %v4949_v16  ;;  %v4838_v40 = vadd.f32 %v14221_v54, %v14194_v49 }
 0x4d8   : > { %v4975_v13 = vpop.permute.xlu0 %4974  ;;  %v4950_v30 = vadd.f32 %v4940_v34, %v4802_v12  ;;  %v18571_v12 = vld [vmem:[#allocation73_spill] sm:$0xff] }
 0x4d9   : > { %4070 = vrot.lane.b32.xlu0 %v4063_v11, %s16969_s2  ;;  %3998 = vrot.lane.b32.xlu1 %v18545_v22, %s16969_s2  ;;  %v18554_v11 = vrot.slane %v18553_v26, 2  ;;  %v18560_v26 = vld [vmem:[#allocation159_spill] sm:$0xff]  ;;  %18564 = vst [vmem:[#allocation35_spill] sm:$0xff] %v14325_v0 }
 0x4da   : > { %v18561_v38 = vrot.slane %v18560_v26, 2  ;;  %v18567_v26 = vld [vmem:[#allocation186_spill] sm:$0xff] }
 0x4db   : > { %v4977_v44 = vpop.permute.xlu1 %4976  ;;  %v4137_v22 = vsel %vm1337_vm3, %v18554_v11, %v18552_v39  ;;  %v7654_v11 = vpop.f32.mrb[29].mxu0  ;;  %v18568_v14 = vrot.slane %v18567_v26, 2  ;;  %v18576_v26 = vld [vmem:[#allocation158_spill] sm:$0xff] }
 0x4dc   : > { %v5012_v17 = vpop.permute.xlu0 %5011  ;;  %v4174_v39 = vsel %vm1337_vm3, %v18561_v38, %v18559_v2  ;;  %v18569_v2 = vld [vmem:[#allocation107_spill] sm:$0xff]  ;;  %v18572_v11 = vrot.slane %v18571_v12, 1  ;;  %v18578_v12 = vld [vmem:[#allocation36_spill] sm:$0xff] }
 0x4dd   : > { %4107 = vrot.lane.b32.xlu0 %v4100_v45, %s7978_s8  ;;  %4035 = vrot.lane.b32.xlu1 %v18550_v56, %s16969_s2  ;;  %v4211_v38 = vsel %vm1337_vm3, %v18568_v14, %v18566_v37  ;;  %v4986_v14 = vadd.f32 %v4975_v13, %v4838_v40  ;;  %v18575_v37 = vld [vmem:[#allocation98_spill] sm:$0xff]  ;;  %v18580_v40 = vld [vmem:[#allocation75_spill] sm:$0xff] }
 0x4df   : > { %v14298_v42 = vpop.permute.xlu1 %5013 }
 0x4e0   : > { %v3213_v41 = vpop.permute.xlu0 %3212 }
 0x4e1   : > { %4144 = vrot.lane.b32.xlu0 %v4137_v22, %s7978_s8  ;;  %4072 = vrot.lane.b32.xlu1 %v18556_v61, %s16969_s2  ;;  %v18562_v22 = vld [vmem:[#allocation112_spill] sm:$0xff]  ;;  %v14322_v61 = vpop.f32.mrb[30].mxu0 }
 0x4e2   : > { %18563 = vst [vmem:[#allocation175_spill] sm:$0xff] %v14322_v61  ;;  %v7657_v6 = vpop.f32.mrb[31].mxu0 }
 0x4e3   : > { %v3215_v56 = vpop.permute.xlu1 %3214 }
 0x4e4   : > { %v3239_v45 = vpop.permute.xlu0 %3238 }
 0x4e5   : > { %4181 = vrot.lane.b32.xlu0 %v4174_v39, %s7978_s8  ;;  %4109 = vrot.lane.b32.xlu1 %v18562_v22, %s7978_s8  ;;  %v14336_v39 = vadd.f32 %v13882_v59, %v4950_v30  ;;  %v18573_v22 = vld [vmem:[#allocation145_spill] sm:$0xff]  ;;  %v3222_v59 = vadd.f32 %v3213_v41, %v18576_v26  ;;  %v4839_v30 = vadd.f32 %v14241_v20, %v14217_v28  ;;  %v14359_v41 = vpop.f32.mrb[32].mxu1  ;;  %v18582_v20 = vld [vmem:[#allocation178_spill] sm:$0xff] }
 0x4e6   : > { %v18574_v6 = vrot.slane %v18573_v22, 1  ;;  %v18579_v22 = vrot.slane %v18578_v12, 1  ;;  %v14362_v28 = vadd.f32 %v13935_v19, %v4986_v14 }
 0x4e7   : > { %v3241_v1 = vpop.permute.xlu1 %3240  ;;  %18570 = vst [vmem:[#allocation130_spill] sm:$0xff] %v14336_v39  ;;  %v4987_v13 = vadd.f32 %v4977_v44, %v4839_v30  ;;  %v4875_v44 = vadd.f32 %v14239_v29, %v14214_v31  ;;  %v18590_v29 = vld [vmem:[#allocation171_spill] sm:$0xff] }
 0x4e8   : > { %v3265_v32 = vpop.permute.xlu0 %3264  ;;  %v4786_v47 = vsel %vm924_vm2, %v18574_v6, %v18572_v11  ;;  %18581 = vst [vmem:[#allocation39_spill] sm:$0xff] %v14362_v28  ;;  %v3248_v6 = vadd.f32 %v3239_v45, %v18582_v20  ;;  %v18591_v20 = vld [vmem:[#allocation26_spill] sm:$0xff]  ;;  %v14554_v28 = vstv %s7396_s15  ;;  %s7386_s15 = sld [smem:[#allocation7 + $0x3]] }
 0x4e9   : > { %4218 = vrot.lane.b32.xlu0 %v4211_v38, %s7978_s8  ;;  %4146 = vrot.lane.b32.xlu1 %v18569_v2, %s7978_s8  ;;  %v18577_v2 = vrot.slane %v18366_v7, 1  ;;  %v5023_v45 = vadd.f32 %v5012_v17, %v4875_v44  ;;  %v14381_v31 = vadd.f32 %v13943_v3, %v4987_v13  ;;  %v4876_v3 = vadd.f32 %v14256_v23, %v14236_v52  ;;  %v18595_v44 = vld [vmem:[#allocation42_spill] sm:$0xff]  ;;  %v18599_v23 = vld [vmem:[#allocation140_spill] sm:$0xff] }
 0x4ea   : > { %18638 = vst [vmem:[#allocation117_spill] sm:$0xff] %v14554_v28 }
 0x4eb   : > { %v3267_v16 = vpop.permute.xlu1 %3266  ;;  %v4823_v11 = vsel %vm924_vm2, %v18579_v22, %v18577_v2  ;;  %v18585_v22 = vrot.slane %v18368_v25, 1  ;;  %18589 = vst [vmem:[#allocation187_spill] sm:$0xff] %v14381_v31  ;;  %v18637_v31 = vld [vmem:[#allocation133_spill] sm:$0xff] }
 0x4ec   : > { %v3291_v34 = vpop.permute.xlu0 %3290 }
 0x4ed   : > { %4793 = vrot.lane.b32.xlu0 %v4786_v47, %s16969_s2  ;;  %4183 = vrot.lane.b32.xlu1 %v18575_v37, %s7978_s8  ;;  %v18583_v47 = vld [vmem:[#allocation30_spill] sm:$0xff]  ;;  %v18584_v37 = vld [vmem:[#allocation157_spill] sm:$0xff] }
 0x4ee   : > { %v3223_v7 = vadd.f32 %v3215_v56, %v18583_v47  ;;  %v18588_v56 = vld [vmem:[#allocation164_spill] sm:$0xff] }
 0x4ef   : > { %v3293_v54 = vpop.permute.xlu1 %3292 }
 0x4f0   : > { %v3317_v49 = vpop.permute.xlu0 %3316 }
 0x4f1   : > { %v3326_v38 = vadd.f32 %v3317_v49, %v3222_v59  ;;  %4830 = vrot.lane.b32.xlu0 %v4823_v11, %s16969_s2  ;;  %4220 = vrot.lane.b32.xlu1 %v18580_v40, %s7978_s8  ;;  %v7634_v59 = vpop.f32.mrb[33].mxu1  ;;  %v18586_v11 = vld [vmem:[#allocation66_spill] sm:$0xff]  ;;  %v3274_v40 = vadd.f32 %v3265_v32, %v18588_v56 }
 0x4f2   : > { %v18587_v19 = vrot.slane %v18586_v11, 1  ;;  %v18594_v59 = vrot.slane %v18371_v46, 1  ;;  %v18600_v46 = vld [vmem:[#allocation100_spill] sm:$0xff] }
 0x4f3   : > { %v14367_v26 = vadd.f32 %v18584_v37, %v3326_v38  ;;  %v3319_v49 = vpop.permute.xlu1 %3318  ;;  %v3249_v38 = vadd.f32 %v3241_v1, %v18590_v29 }
 0x4f4   : > { %v3343_v30 = vpop.permute.xlu0 %3342  ;;  %v3327_v12 = vadd.f32 %v3319_v49, %v3223_v7  ;;  %v4860_v14 = vsel %vm924_vm2, %v18587_v19, %v18585_v22  ;;  %v14390_v7 = vstv %s7388_s24  ;;  %v18598_v22 = vld [vmem:[#allocation197_spill] sm:$0xff]  ;;  %s7384_s24 = sld [smem:[#allocation7 + $0x2]] }
 0x4f5   : > { %v3352_v2 = vadd.f32 %v3343_v30, %v3248_v6  ;;  %4867 = vrot.lane.b32.xlu0 %v4860_v14, %s16969_s2  ;;  %4795 = vrot.lane.b32.xlu1 %v13697_v43, %s16969_s2  ;;  %v18592_v6 = vld [vmem:[#allocation106_spill] sm:$0xff]  ;;  %v5899_v37 = vmul.f32 %v14390_v7, %v14266_v62  ;;  %v14396_v43 = vmul.f32 %v14390_v7, %v14278_v55  ;;  %v18596_v30 = vrot.slane %v18595_v44, 1 }
 0x4f6   : > { %v14388_v47 = vadd.f32 %v18592_v6, %v3327_v12  ;;  %v3275_v11 = vadd.f32 %v3267_v16, %v18598_v22  ;;  %v5024_v6 = vadd.f32 %v14298_v42, %v4876_v3  ;;  %v18609_v42 = vld [vmem:[#allocation165_spill] sm:$0xff] }
 0x4f7   : > { %v14385_v25 = vadd.f32 %v18591_v20, %v3352_v2  ;;  %v3345_v32 = vpop.permute.xlu1 %3344  ;;  %18593 = vst [vmem:[#allocation76_spill] sm:$0xff] %v14396_v43  ;;  %v4897_v49 = vsel %vm924_vm2, %v18596_v30, %v18594_v59  ;;  %v18597_v2 = vld [vmem:[#allocation25_spill] sm:$0xff]  ;;  %v5909_v19 = vrot.slane %v5899_v37, 1  ;;  %v16828_v52 = vrot.slane %v14396_v43, 1  ;;  %v18608_v30 = vld [vmem:[#allocation110_spill] sm:$0xff] }
 0x4f8   : > { %v3369_v17 = vpop.permute.xlu0 %3368  ;;  %v3353_v13 = vadd.f32 %v3345_v32, %v3249_v38  ;;  %v3300_v12 = vadd.f32 %v3291_v34, %v18597_v2  ;;  %v14420_v34 = vadd.f32 %v13974_v18, %v5023_v45  ;;  %v18604_v18 = vrot.slane %v13227_v50, 1  ;;  %v18605_v45 = vld [vmem:[#allocation102_spill] sm:$0xff]  ;;  %v18610_v2 = vld [vmem:[#allocation127_spill] sm:$0xff] }
 0x4f9   : > { %v3378_v1 = vadd.f32 %v3369_v17, %v3274_v40  ;;  %4904 = vrot.lane.b32.xlu0 %v4897_v49, %s16969_s2  ;;  %4832 = vrot.lane.b32.xlu1 %v13702_v35, %s16969_s2  ;;  %v14417_v40 = vstv %s7389_s13  ;;  %v14425_v35 = vsel %vm924_vm2, %v5909_v19, %v16828_v52  ;;  %v18606_v37 = vrot.slane %v18605_v45, 1  ;;  %v18618_v45 = vld [vmem:[#allocation143_spill] sm:$0xff]  ;;  %s14769_s13 = sld [smem:[#allocation7 + $0x14]] }
 0x4fa   : > { %v14415_v56 = vadd.f32 %v18600_v46, %v3353_v13  ;;  %18601 = vst [vmem:[#allocation160_spill] sm:$0xff] %v14420_v34  ;;  %18602 = vst [vmem:[#allocation59_spill] sm:$0xff] %v14425_v35  ;;  %v5936_v38 = vmul.f32 %v14417_v40, %v14266_v62  ;;  %v14431_v20 = vmul.f32 %v14417_v40, %v14278_v55  ;;  %v18607_v13 = vld [vmem:[#allocation19_spill] sm:$0xff]  ;;  %v14622_v35 = vstv %s7416_s12  ;;  %s15208_s12 = sld [smem:[#allocation7 + $0x18]] }
 0x4fb   : > { %v14412_v14 = vadd.f32 %v18599_v23, %v3378_v1  ;;  %v3371_v29 = vpop.permute.xlu1 %3370  ;;  %v4934_v1 = vsel %vm924_vm2, %v18606_v37, %v18604_v18  ;;  %v3301_v49 = vadd.f32 %v3293_v54, %v18608_v30  ;;  %v14471_v18 = vadd.f32 %v13982_v33, %v5024_v6  ;;  %18655 = vst [vmem:[#allocation147_spill] sm:$0xff] %v14622_v35 }
 0x4fc   : > { %v3395_v16 = vpop.permute.xlu0 %3394  ;;  %18603 = vst [vmem:[#allocation179_spill] sm:$0xff] %v14431_v20  ;;  %v3379_v32 = vadd.f32 %v3371_v29, %v3275_v11  ;;  %v5946_v59 = vrot.slane %v5936_v38, 1  ;;  %v16827_v44 = vrot.slane %v14431_v20, 1  ;;  %v18615_v38 = vld [vmem:[#allocation150_spill] sm:$0xff]  ;;  %v14480_v30 = vstv %s7391_s16  ;;  %v18681_v20 = vld [vmem:[#allocation176_spill] sm:$0xff]  ;;  %s14780_s16 = sld [smem:[#allocation7 + $0x1c]] }
 0x4fd   : > { %v3404_v17 = vadd.f32 %v3395_v16, %v3300_v12  ;;  %4941 = vrot.lane.b32.xlu0 %v4934_v1, %s7978_s8  ;;  %4869 = vrot.lane.b32.xlu1 %v18607_v13, %s16969_s2  ;;  %v14450_v12 = vstv %s7390_s25  ;;  %v18613_v16 = vld [vmem:[#allocation195_spill] sm:$0xff]  ;;  %18617 = vst [vmem:[#allocation38_spill] sm:$0xff] %v14471_v18  ;;  %v18619_v13 = vld [vmem:[#allocation118_spill] sm:$0xff]  ;;  %v6010_v6 = vmul.f32 %v14480_v30, %v14266_v62  ;;  %v18636_v18 = vrot.slane %v14091_v10, 1  ;;  %s14771_s25 = sld [smem:[#allocation7 + $0xa]] }
 0x4fe   : > { %v14448_v50 = vadd.f32 %v18610_v2, %v3379_v32  ;;  %v14457_v19 = vsel %vm924_vm2, %v5946_v59, %v16827_v44  ;;  %v5973_v23 = vmul.f32 %v14450_v12, %v14266_v62  ;;  %v14463_v54 = vmul.f32 %v14450_v12, %v14278_v55 }
 0x4ff   : > { %v14445_v3 = vadd.f32 %v18609_v42, %v3404_v17  ;;  %v3397_v11 = vpop.permute.xlu1 %3396  ;;  %18611 = vst [vmem:[#allocation34_spill] sm:$0xff] %v14457_v19  ;;  %v18614_v29 = vrot.slane %v18613_v16, 1  ;;  %v18616_v17 = vrot.slane %v18615_v38, 1  ;;  %v14495_v2 = vmul.f32 %v14480_v30, %v14278_v55  ;;  %v18626_v38 = vld [vmem:[#allocation173_spill] sm:$0xff] }
 0x500   : > { %v14452_v22 = vpop.permute.xlu0 %4458  ;;  %18612 = vst [vmem:[#allocation188_spill] sm:$0xff] %v14463_v54  ;;  %v3405_v46 = vadd.f32 %v3397_v11, %v3301_v49  ;;  %v5983_v37 = vrot.slane %v5973_v23, 1  ;;  %v16825_v1 = vrot.slane %v14463_v54, 1  ;;  %v18622_v11 = vld [vmem:[#allocation116_spill] sm:$0xff] }
 0x501   : > { %v4971_v32 = vsel %vm924_vm2, %v18616_v17, %v18614_v29  ;;  %4906 = vrot.lane.b32.xlu1 %v18618_v45, %s16969_s2  ;;  %18621 = vst [vmem:[#allocation185_spill] sm:$0xff] %v14495_v2  ;;  %v18623_v23 = vrot.slane %v18622_v11, 1  ;;  %v6020_v17 = vrot.slane %v6010_v6, 1  ;;  %v14506_v45 = vstv %s7394_s4  ;;  %v18629_v6 = vld [vmem:[#allocation109_spill] sm:$0xff]  ;;  %s14782_s4 = sld [smem:[#allocation7 + $0xb]] }
 0x502   : > { %4978 = vrot.lane.b32.xlu0 %v4971_v32, %s7978_s8  ;;  %v14478_v59 = vadd.f32 %v18619_v13, %v3405_v46  ;;  %v14489_v33 = vsel %vm924_vm2, %v5983_v37, %v16825_v1  ;;  %v18624_v46 = vld [vmem:[#allocation153_spill] sm:$0xff]  ;;  %v16826_v32 = vrot.slane %v14495_v2, 1  ;;  %v14528_v1 = vstv %s7395_s14  ;;  %s14826_s14 = sld [smem:[#allocation7 + $0x1d]] }
 0x503   : > { %v14484_v42 = vpop.permute.xlu1 %4460  ;;  %18620 = vst [vmem:[#allocation78_spill] sm:$0xff] %v14489_v33  ;;  %v18625_v16 = vrot.slane %v18624_v46, 1  ;;  %v14521_v46 = vmul.f32 %v14506_v45, %v14278_v55  ;;  %v14600_v33 = vstv %s7415_s29  ;;  %s15167_s29 = sld [smem:[#allocation7 + $0x6]] }
 0x504   : > { %v14482_v49 = vpop.permute.xlu0 %4484  ;;  %v14515_v11 = vsel %vm924_vm2, %v6020_v17, %v16826_v32  ;;  %18650 = vst [vmem:[#allocation23_spill] sm:$0xff] %v14600_v33 }
 0x505   : > { %v5008_v29 = vsel %vm924_vm2, %v18625_v16, %v18623_v23  ;;  %4943 = vrot.lane.b32.xlu1 %v18626_v38, %s7978_s8  ;;  %18627 = vst [vmem:[#allocation190_spill] sm:$0xff] %v14515_v11  ;;  %v6105_v23 = vmul.f32 %v14506_v45, %v14266_v62  ;;  %18628 = vst [vmem:[#allocation139_spill] sm:$0xff] %v14521_v46  ;;  %v18630_v16 = vld [vmem:[#allocation49_spill] sm:$0xff]  ;;  %v16829_v38 = vrot.slane %v14521_v46, 2  ;;  %v18661_v46 = vld [vmem:[#allocation123_spill] sm:$0xff] }
 0x506   : > { %5015 = vrot.lane.b32.xlu0 %v5008_v29, %s7978_s8 }
 0x507   : > { %v14510_v13 = vpop.permute.xlu1 %4486  ;;  %v6115_v29 = vrot.slane %v6105_v23, 2  ;;  %v18634_v23 = vld [vmem:[#allocation111_spill] sm:$0xff] }
 0x508   : > { %v14508_v37 = vpop.permute.xlu0 %4510  ;;  %v18635_v52 = vrot.slane %v18634_v23, 1 }
 0x509   : > { %4980 = vrot.lane.b32.xlu1 %v18630_v16, %s7978_s8  ;;  %v14537_v44 = vsel %vm1337_vm3, %v6115_v29, %v16829_v38  ;;  %v14543_v16 = vmul.f32 %v14528_v1, %v14278_v55 }
 0x50a   : > { %5048 = vrot.lane.b32.xlu0 %v18629_v6, %s7978_s8  ;;  %18632 = vst [vmem:[#allocation58_spill] sm:$0xff] %v14537_v44  ;;  %v6142_v6 = vmul.f32 %v14528_v1, %v14266_v62  ;;  %v5045_v34 = vsel %vm924_vm2, %v18636_v18, %v18635_v52  ;;  %v6179_v52 = vmul.f32 %v14554_v28, %v14266_v62  ;;  %v18643_v18 = vld [vmem:[#allocation85_spill] sm:$0xff] }
 0x50b   : > { %v14532_v32 = vpop.permute.xlu1 %4512  ;;  %18633 = vst [vmem:[#allocation168_spill] sm:$0xff] %v14543_v16  ;;  %v16830_v38 = vrot.slane %v14543_v16, 2 }
 0x50c   : > { %v14530_v17 = vpop.permute.xlu0 %4536  ;;  %18631 = vst [vmem:[#allocation126_spill] sm:$0xff] %v14532_v32  ;;  %v6152_v29 = vrot.slane %v6142_v6, 2  ;;  %v18644_v6 = vld [vmem:[#allocation53_spill] sm:$0xff]  ;;  %v6189_v23 = vrot.slane %v6179_v52, 2 }
 0x50d   : > { %5017 = vrot.lane.b32.xlu1 %v18637_v31, %s7978_s8  ;;  %v14569_v31 = vmul.f32 %v14554_v28, %v14278_v55  ;;  %v18720_v28 = vld [vmem:[#allocation93_spill] sm:$0xff] }
 0x50e   : > { %5052 = vrot.lane.b32.xlu0 %v5045_v34, %s7978_s8  ;;  %v14563_v10 = vsel %vm1337_vm3, %v6152_v29, %v16830_v38  ;;  %v14571_v34 = vpop.f32.mrb[32].mxu0 }
 0x50f   : > { %v14558_v0 = vpop.permute.xlu1 %4538  ;;  %18640 = vst [vmem:[#allocation60_spill] sm:$0xff] %v14563_v10  ;;  %18641 = vst [vmem:[#allocation95_spill] sm:$0xff] %v14569_v31  ;;  %v16834_v29 = vrot.slane %v14569_v31, 2  ;;  %v7660_v38 = vpop.f32.mrb[33].mxu0  ;;  %v14578_v10 = vstv %s7397_s26  ;;  %s7387_s26 = sld [smem:[#allocation7 + $0x15]] }
 0x510   : > { %v14556_v39 = vpop.permute.xlu0 %4562  ;;  %18639 = vst [vmem:[#allocation114_spill] sm:$0xff] %v14558_v0  ;;  %18642 = vst [vmem:[#allocation101_spill] sm:$0xff] %v14571_v34  ;;  %v14593_v52 = vmul.f32 %v14578_v10, %v14278_v55  ;;  %v18648_v38 = vld [vmem:[#allocation90_spill] sm:$0xff]  ;;  %v14644_v34 = vstv %s7417_s0  ;;  %v18670_v0 = vld [vmem:[#allocation192_spill] sm:$0xff]  ;;  %s15290_s0 = sld [smem:[#allocation7 + $0x22]] }
 0x511   : > { %5054 = vrot.lane.b32.xlu1 %v18644_v6, %s7978_s8  ;;  %18645 = vst [vmem:[#allocation77_spill] sm:$0xff] %v14578_v10  ;;  %v14587_v16 = vsel %vm1337_vm3, %v6189_v23, %v16834_v29  ;;  %v18649_v6 = vld [vmem:[#allocation31_spill] sm:$0xff]  ;;  %18662 = vst [vmem:[#allocation54_spill] sm:$0xff] %v14644_v34 }
 0x512   : > { %5201 = vrot.lane.b32.xlu0 %v18643_v18, %s16969_s2  ;;  %18646 = vst [vmem:[#allocation151_spill] sm:$0xff] %v14587_v16  ;;  %v6216_v18 = vmul.f32 %v14578_v10, %v14266_v62  ;;  %18647 = vst [vmem:[#allocation70_spill] sm:$0xff] %v14593_v52  ;;  %v16836_v31 = vrot.slane %v14593_v52, 2  ;;  %v18714_v10 = vld [vmem:[#allocation86_spill] sm:$0xff] }
 0x513   : > { %v14582_v61 = vpop.permute.xlu1 %4564 }
 0x514   : > { %v14580_v44 = vpop.permute.xlu0 %4588  ;;  %v6226_v11 = vrot.slane %v6216_v18, 2  ;;  %v18654_v18 = vld [vmem:[#allocation24_spill] sm:$0xff] }
 0x515   : > { %5203 = vrot.lane.b32.xlu1 %v18649_v6, %s16969_s2  ;;  %v14615_v6 = vmul.f32 %v14600_v33, %v14311_v36 }
 0x516   : > { %5205 = vrot.lane.b32.xlu0 %v18648_v38, %s16969_s2  ;;  %v14609_v16 = vsel %vm1337_vm3, %v6226_v11, %v16836_v31  ;;  %v6609_v38 = vmul.f32 %v14600_v33, %v14306_v60 }
 0x517   : > { %v14604_v29 = vpop.permute.xlu1 %4590  ;;  %18652 = vst [vmem:[#allocation136_spill] sm:$0xff] %v14609_v16  ;;  %18653 = vst [vmem:[#allocation174_spill] sm:$0xff] %v14615_v6  ;;  %v16842_v52 = vrot.slane %v14615_v6, 1 }
 0x518   : > { %v14602_v23 = vpop.permute.xlu0 %4614  ;;  %18651 = vst [vmem:[#allocation74_spill] sm:$0xff] %v14604_v29  ;;  %v6619_v19 = vrot.slane %v6609_v38, 1  ;;  %v18660_v38 = vld [vmem:[#allocation170_spill] sm:$0xff] }
 0x519   : > { %5207 = vrot.lane.b32.xlu1 %v13767_v15, %s16969_s2  ;;  %v14637_v15 = vmul.f32 %v14622_v35, %v14311_v36 }
 0x51a   : > { %5238 = vrot.lane.b32.xlu0 %v18654_v18, %s16969_s2  ;;  %v14631_v16 = vsel %vm924_vm2, %v6619_v19, %v16842_v52  ;;  %v6646_v18 = vmul.f32 %v14622_v35, %v14306_v60  ;;  %v6683_v35 = vmul.f32 %v14644_v34, %v14306_v60 }
 0x51b   : > { %v14626_v31 = vpop.permute.xlu1 %4616  ;;  %18658 = vst [vmem:[#allocation79_spill] sm:$0xff] %v14631_v16  ;;  %18659 = vst [vmem:[#allocation91_spill] sm:$0xff] %v14637_v15  ;;  %v16846_v6 = vrot.slane %v14637_v15, 1 }
 0x51c   : > { %v14624_v11 = vpop.permute.xlu0 %4640  ;;  %18657 = vst [vmem:[#allocation81_spill] sm:$0xff] %v14626_v31  ;;  %v6656_v33 = vrot.slane %v6646_v18, 1  ;;  %v6693_v18 = vrot.slane %v6683_v35, 1 }
 0x51d   : > { %18656 = vst [vmem:[#allocation67_spill] sm:$0xff] %v14624_v11  ;;  %5240 = vrot.lane.b32.xlu1 %v18661_v46, %s16969_s2  ;;  %v18666_v46 = vld [vmem:[#allocation29_spill] sm:$0xff] }
 0x51e   : > { %5242 = vrot.lane.b32.xlu0 %v18660_v38, %s16969_s2  ;;  %v14651_v16 = vsel %vm924_vm2, %v6656_v33, %v16846_v6  ;;  %v14657_v38 = vmul.f32 %v14644_v34, %v14311_v36  ;;  %v4913_v33 = vadd.f32 %v14268_v63, %v14249_v24  ;;  %v14666_v6 = vstv %s7418_s22  ;;  %v18671_v24 = vld [vmem:[#allocation20_spill] sm:$0xff]  ;;  %s15317_s22 = sld [smem:[#allocation7 + $0x11]] }
 0x51f   : > { %v14646_v52 = vpop.permute.xlu1 %4642  ;;  %18664 = vst [vmem:[#allocation88_spill] sm:$0xff] %v14651_v16  ;;  %18667 = vst [vmem:[#allocation94_spill] sm:$0xff] %v14666_v6 }
 0x520   : > { %v3548_v19 = vpop.permute.xlu0 %3547  ;;  %18663 = vst [vmem:[#allocation92_spill] sm:$0xff] %v14646_v52  ;;  %18665 = vst [vmem:[#allocation27_spill] sm:$0xff] %v14657_v38  ;;  %v16850_v15 = vrot.slane %v14657_v38, 1 }
 0x521   : > { %5244 = vrot.lane.b32.xlu1 %v13772_v21, %s16969_s2  ;;  %v14677_v21 = vmul.f32 %v14666_v6, %v14311_v36 }
 0x522   : > { %5275 = vrot.lane.b32.xlu0 %v18666_v46, %s16969_s2  ;;  %v14671_v34 = vsel %vm924_vm2, %v6693_v18, %v16850_v15  ;;  %v6720_v46 = vmul.f32 %v14666_v6, %v14306_v60  ;;  %v14687_v15 = vstv %s7421_s9  ;;  %s15341_s9 = sld [smem:[#allocation7 + $0xc]] }
 0x523   : > { %v5051_v52 = vpop.permute.xlu1 %5050  ;;  %18668 = vst [vmem:[#allocation56_spill] sm:$0xff] %v14671_v34  ;;  %18669 = vst [vmem:[#allocation62_spill] sm:$0xff] %v14677_v21  ;;  %v16853_v38 = vrot.slane %v14677_v21, 1 }
 0x524   : > { %v3585_v16 = vpop.permute.xlu0 %3584  ;;  %v5061_v35 = vadd.f32 %v5051_v52, %v4913_v33  ;;  %v6730_v63 = vrot.slane %v6720_v46, 1  ;;  %18673 = vst [vmem:[#allocation155_spill] sm:$0xff] %v14687_v15  ;;  %v14698_v33 = vmul.f32 %v14687_v15, %v14311_v36  ;;  %v18676_v46 = vld [vmem:[#allocation65_spill] sm:$0xff] }
 0x525   : > { %5277 = vrot.lane.b32.xlu1 %v18671_v24, %s16969_s2 }
 0x526   : > { %5279 = vrot.lane.b32.xlu0 %v18670_v0, %s16969_s2  ;;  %v14685_v18 = vadd.f32 %v13996_v51, %v5061_v35  ;;  %v14692_v52 = vsel %vm924_vm2, %v6730_v63, %v16853_v38  ;;  %v6815_v0 = vmul.f32 %v14687_v15, %v14306_v60  ;;  %18675 = vst [vmem:[#allocation108_spill] sm:$0xff] %v14698_v33  ;;  %v18677_v51 = vld [vmem:[#allocation37_spill] sm:$0xff]  ;;  %v16860_v24 = vrot.slane %v14698_v33, 2  ;;  %v14710_v38 = vpop.f32.mrb[34].mxu1  ;;  %v18683_v33 = vld [vmem:[#allocation55_spill] sm:$0xff] }
 0x527   : > { %v3550_v2 = vpop.permute.xlu1 %3549  ;;  %18674 = vst [vmem:[#allocation137_spill] sm:$0xff] %v14692_v52  ;;  %v18679_v52 = vld [vmem:[#allocation57_spill] sm:$0xff]  ;;  %v7637_v15 = vpop.f32.mrb[35].mxu1  ;;  %v5940_v32 = vmul.f32 %v14417_v40, %v14710_v38 }
 0x528   : > { %18672 = vst [vmem:[#allocation105_spill] sm:$0xff] %v14685_v18  ;;  %v3622_v34 = vpop.permute.xlu0 %3621  ;;  %v6825_v35 = vrot.slane %v6815_v0, 2  ;;  %v3557_v0 = vadd.f32 %v3548_v19, %v14367_v26  ;;  %v18684_v15 = vld [vmem:[#allocation193_spill] sm:$0xff] }
 0x529   : > { %5281 = vrot.lane.b32.xlu1 %v18677_v51, %s16969_s2  ;;  %v18685_v26 = vld [vmem:[#allocation201_spill] sm:$0xff]  ;;  %v3631_v19 = vadd.f32 %v3622_v34, %v14412_v14 }
 0x52a   : > { %5312 = vrot.lane.b32.xlu0 %v18676_v46, %s16969_s2  ;;  %v14708_v63 = vsel %vm1337_vm3, %v6825_v35, %v16860_v24  ;;  %v18680_v46 = vld [vmem:[#allocation72_spill] sm:$0xff]  ;;  %v3594_v24 = vadd.f32 %v3585_v16, %v14385_v25 }
 0x52b   : > { %v3587_v21 = vpop.permute.xlu1 %3586  ;;  %18678 = vst [vmem:[#allocation203_spill] sm:$0xff] %v14708_v63  ;;  %v18682_v35 = vld [vmem:[#allocation172_spill] sm:$0xff] }
 0x52c   : > { %v3659_v18 = vpop.permute.xlu0 %3658 }
 0x52d   : > { %5314 = vrot.lane.b32.xlu1 %v18680_v46, %s16969_s2  ;;  %v3668_v14 = vadd.f32 %v3659_v18, %v14445_v3  ;;  %v18694_v18 = vld [vmem:[#allocation48_spill] sm:$0xff] }
 0x52e   : > { %5316 = vrot.lane.b32.xlu0 %v18679_v52, %s16969_s2 }
 0x52f   : > { %v3624_v6 = vpop.permute.xlu1 %3623 }
 0x530   : > { %v3696_v51 = vpop.permute.xlu0 %3695  ;;  %v3632_v3 = vadd.f32 %v3624_v6, %v14448_v50  ;;  %v18698_v50 = vld [vmem:[#allocation189_spill] sm:$0xff] }
 0x531   : > { %v3705_v54 = vadd.f32 %v3696_v51, %v3557_v0  ;;  %5318 = vrot.lane.b32.xlu1 %v18682_v35, %s16969_s2  ;;  %v18686_v0 = vld [vmem:[#allocation68_spill] sm:$0xff]  ;;  %v14734_v35 = vpop.f32.mrb[34].mxu0 }
 0x532   : > { %5349 = vrot.lane.b32.xlu0 %v18681_v20, %s7978_s8  ;;  %v3558_v20 = vadd.f32 %v3550_v2, %v14388_v47  ;;  %18687 = vst [vmem:[#allocation84_spill] sm:$0xff] %v14734_v35  ;;  %v3595_v47 = vadd.f32 %v3587_v21, %v14415_v56  ;;  %v18690_v2 = vld [vmem:[#allocation125_spill] sm:$0xff]  ;;  %v18695_v21 = vld [vmem:[#allocation96_spill] sm:$0xff] }
 0x533   : > { %v14723_v63 = vadd.f32 %v18683_v33, %v3705_v54  ;;  %v3661_v31 = vpop.permute.xlu1 %3660 }
 0x534   : > { %v3733_v52 = vpop.permute.xlu0 %3732 }
 0x535   : > { %v3742_v46 = vadd.f32 %v3733_v52, %v3594_v24  ;;  %5351 = vrot.lane.b32.xlu1 %v18685_v26, %s7978_s8  ;;  %v18688_v24 = vld [vmem:[#allocation149_spill] sm:$0xff]  ;;  %v18689_v52 = vld [vmem:[#allocation132_spill] sm:$0xff] }
 0x536   : > { %5353 = vrot.lane.b32.xlu0 %v18684_v15, %s7978_s8  ;;  %v7663_v15 = vpop.f32.mrb[35].mxu0 }
 0x537   : > { %v14732_v51 = vadd.f32 %v18686_v0, %v3742_v46  ;;  %v3698_v16 = vpop.permute.xlu1 %3697  ;;  %v18691_v46 = vld [vmem:[#allocation180_spill] sm:$0xff] }
 0x538   : > { %v3770_v25 = vpop.permute.xlu0 %3769  ;;  %v3706_v33 = vadd.f32 %v3698_v16, %v3558_v20  ;;  %v18692_v16 = vld [vmem:[#allocation163_spill] sm:$0xff] }
 0x539   : > { %v3779_v54 = vadd.f32 %v3770_v25, %v3631_v19  ;;  %5355 = vrot.lane.b32.xlu1 %v18689_v52, %s7978_s8 }
 0x53a   : > { %5386 = vrot.lane.b32.xlu0 %v18688_v24, %s7978_s8  ;;  %v14746_v26 = vadd.f32 %v18691_v46, %v3706_v33  ;;  %v18693_v24 = vld [vmem:[#allocation43_spill] sm:$0xff] }
 0x53b   : > { %v14743_v34 = vadd.f32 %v18690_v2, %v3779_v54  ;;  %v3735_v20 = vpop.permute.xlu1 %3734  ;;  %v3669_v2 = vadd.f32 %v3661_v31, %v14478_v59 }
 0x53c   : > { %v3807_v19 = vpop.permute.xlu0 %3806  ;;  %v3743_v25 = vadd.f32 %v3735_v20, %v3595_v47  ;;  %v18697_v47 = vld [vmem:[#allocation52_spill] sm:$0xff] }
 0x53d   : > { %v3816_v0 = vadd.f32 %v3807_v19, %v3668_v14  ;;  %5388 = vrot.lane.b32.xlu1 %v18693_v24, %s7978_s8  ;;  %v18696_v14 = vld [vmem:[#allocation32_spill] sm:$0xff] }
 0x53e   : > { %5390 = vrot.lane.b32.xlu0 %v18692_v16, %s7978_s8  ;;  %v14757_v54 = vadd.f32 %v18695_v21, %v3743_v25  ;;  %v18700_v25 = vld [vmem:[#allocation156_spill] sm:$0xff]  ;;  %v18701_v16 = vld [vmem:[#allocation50_spill] sm:$0xff]  ;;  %v14794_v21 = vmul.f32 %v14129_v5, %v17979_v58 }
 0x53f   : > { %v14754_v56 = vadd.f32 %v18694_v18, %v3816_v0  ;;  %v3772_v52 = vpop.permute.xlu1 %3771  ;;  %v18699_v0 = vld [vmem:[#allocation45_spill] sm:$0xff]  ;;  %v14790_v18 = vstv %s7382_s30  ;;  %s15376_s30 = sld [smem:[#allocation7 + $0x1e]] }
 0x540   : > { %v3960_v33 = vpop.permute.xlu0 %3959  ;;  %v3780_v15 = vadd.f32 %v3772_v52, %v3632_v3  ;;  %v4408_v3 = vmul.f32 %v14117_v53, %v17979_v58  ;;  %18702 = vst [vmem:[#allocation177_spill] sm:$0xff] %v14790_v18  ;;  %v14798_v52 = vmul.f32 %v14140_v27, %v17979_v58 }
 0x541   : > { %5392 = vrot.lane.b32.xlu1 %v18697_v47, %s7978_s8  ;;  %v14808_v47 = vmul.f32 %v14164_v48, %v17979_v58  ;;  %v14824_v58 = vmul.f32 %v14140_v27, %v18194_v8  ;;  %v3969_v43 = vadd.f32 %v3960_v33, %v14723_v63  ;;  %v14903_v33 = vmul.f32 %v14450_v12, %v14359_v41 }
 0x542   : > { %5423 = vrot.lane.b32.xlu0 %v18696_v14, %s7978_s8  ;;  %v14765_v6 = vadd.f32 %v18698_v50, %v3780_v15  ;;  %v14800_v15 = vstv %s7383_s3  ;;  %v14804_v14 = vmul.f32 %v14117_v53, %v18194_v8  ;;  %v18705_v50 = vld [vmem:[#allocation69_spill] sm:$0xff]  ;;  %v5903_v53 = vmul.f32 %v14390_v7, %v14710_v38  ;;  %s15402_s3 = sld [smem:[#allocation7 + $0x23]] }
 0x543   : > { %v3809_v19 = vpop.permute.xlu1 %3808  ;;  %18703 = vst [vmem:[#allocation41_spill] sm:$0xff] %v14800_v15  ;;  %18707 = vst [vmem:[#allocation47_spill] sm:$0xff] %v14824_v58  ;;  %v14853_v35 = vmul.f32 %v14800_v15, %v14278_v55 }
 0x544   : > { %v14767_v46 = vpop.permute.xlu0 %3996  ;;  %v3817_v20 = vadd.f32 %v3809_v19, %v3669_v2  ;;  %v14812_v2 = vmul.f32 %v14390_v7, %v14359_v41  ;;  %v18706_v19 = vld [vmem:[#allocation115_spill] sm:$0xff]  ;;  %18718 = vst [vmem:[#allocation97_spill] sm:$0xff] %v14903_v33 }
 0x545   : > { %5425 = vrot.lane.b32.xlu1 %v18700_v25, %s7978_s8  ;;  %v5737_v25 = vmul.f32 %v14790_v18, %v14266_v62 }
 0x546   : > { %5427 = vrot.lane.b32.xlu0 %v18699_v0, %s7978_s8  ;;  %v14778_v59 = vadd.f32 %v18701_v16, %v3817_v20  ;;  %18704 = vst [vmem:[#allocation169_spill] sm:$0xff] %v14812_v2  ;;  %v14820_v20 = vmul.f32 %v14129_v5, %v18194_v8  ;;  %v14832_v0 = vadd.f32 %v14254_v57, %v14230_v9  ;;  %v14836_v16 = vstv %s7384_s24  ;;  %s15449_s24 = sld [smem:[#allocation7 + $0xf]] }
 0x547   : > { %v14786_v24 = vpop.permute.xlu1 %3961  ;;  %18709 = vst [vmem:[#allocation87_spill] sm:$0xff] %v14836_v16  ;;  %v14840_v5 = vmul.f32 %v14164_v48, %v18194_v8  ;;  %v5738_v9 = vmul.f32 %v14790_v18, %v14278_v55  ;;  %v16870_v57 = vrot.slane %v14812_v2, 1  ;;  %v14856_v8 = vstv %s14769_s13  ;;  %v18715_v18 = vld [vmem:[#allocation135_spill] sm:$0xff]  ;;  %s15504_s13 = sld [smem:[#allocation7 + $0x21]] }
 0x548   : > { %v14784_v31 = vpop.permute.xlu0 %4033  ;;  %18708 = vst [vmem:[#allocation191_spill] sm:$0xff] %v14832_v0  ;;  %v5916_v0 = vrot.slane %v5903_v53, 1  ;;  %18711 = vst [vmem:[#allocation146_spill] sm:$0xff] %v14856_v8  ;;  %v14859_v48 = vstv %s14771_s25  ;;  %v5789_v53 = vmul.f32 %v14836_v16, %v14266_v62  ;;  %v14881_v29 = vmul.f32 %v14836_v16, %v14278_v55  ;;  %s5476_s25 = sld [smem:[#allocation5]] }
 0x549   : > { %5429 = vrot.lane.b32.xlu1 %v18706_v19, %s7978_s8  ;;  %18710 = vst [vmem:[#allocation124_spill] sm:$0xff] %v14840_v5  ;;  %v5763_v19 = vmul.f32 %v14800_v15, %v14266_v62  ;;  %18712 = vst [vmem:[#allocation202_spill] sm:$0xff] %v14859_v48  ;;  %v14863_v5 = vmul.f32 %v14417_v40, %v14359_v41  ;;  %v14899_v63 = vmul.f32 %v14856_v8, %v14278_v55 }
 0x54a   : > { %5460 = vrot.lane.b32.xlu0 %v18705_v50, %s7978_s8  ;;  %v14874_v15 = vsel %vm924_vm2, %v16870_v57, %v5916_v0  ;;  %v14891_v0 = vmul.f32 %v14856_v8, %v14266_v62  ;;  %v14895_v57 = vmul.f32 %v14859_v48, %v14306_v60  ;;  %v14907_v2 = vmul.f32 %v14859_v48, %v14311_v36 }
 0x54b   : > { %v14844_v50 = vpop.permute.xlu1 %3998  ;;  %18713 = vst [vmem:[#allocation138_spill] sm:$0xff] %v14863_v5  ;;  %18716 = vst [vmem:[#allocation22_spill] sm:$0xff] %v14874_v15  ;;  %v5953_v62 = vrot.slane %v5940_v32, 1  ;;  %v4006_v32 = vadd.f32 %v14767_v46, %v14732_v51  ;;  %v14944_v51 = vmul.f32 %v14480_v30, %v14359_v41 }
 0x54c   : > { %v14842_v27 = vpop.permute.xlu0 %4070  ;;  %18717 = vst [vmem:[#allocation71_spill] sm:$0xff] %v14899_v63  ;;  %18719 = vst [vmem:[#allocation33_spill] sm:$0xff] %v14907_v2  ;;  %v14959_v63 = vmul.f32 %v14417_v40, %v14288_v4 }
 0x54d   : > { %5462 = vrot.lane.b32.xlu1 %v18715_v18, %s7978_s8  ;;  %v14887_v18 = vstv %s14782_s4  ;;  %18725 = vst [vmem:[#allocation128_spill] sm:$0xff] %v14944_v51 }
 0x54e   : > { %5464 = vrot.lane.b32.xlu0 %v18714_v10, %s7978_s8  ;;  %v14884_v10 = vstv %s14780_s16  ;;  %v14919_v55 = vmul.f32 %v14887_v18, %v14306_v60  ;;  %18727 = vst [vmem:[#allocation148_spill] sm:$0xff] %v14959_v63  ;;  %s15691_s16 = sand.u32 1, %s7960_s18  }
 0x54f   : > { %v4036_v58 = vpop.permute.xlu1 %4035  ;;  %v14915_v8 = vmul.f32 %v14884_v10, %v14306_v60  ;;  %s7176_s4 = sshll.u32 %s15691_s16, 7 }
 0x550   : > { %v4108_v11 = vpop.permute.xlu0 %4107  ;;  %18722 = vst [vmem:[#allocation166_spill] sm:$0xff] %v14919_v55 }
 0x551   : > { %v4117_v15 = vadd.f32 %v4108_v11, %v3969_v43  ;;  %5466 = vrot.lane.b32.xlu1 %v18720_v28, %s7978_s8  ;;  %18721 = vst [vmem:[#allocation152_spill] sm:$0xff] %v14915_v8  ;;  %v14922_v43 = vstv %s14826_s14  ;;  %v5977_v11 = vmul.f32 %v14450_v12, %v14710_v38  ;;  %v14930_v28 = vmul.f32 %v14884_v10, %v14311_v36  ;;  %s7359_s14 = sld [smem:[#allocation5 + $0x1]] }
 0x552   : > { %5745 = vrot.lane.b32.xlu0 %v5737_v25, %s16969_s2  ;;  %v18723_v25 = vrot.slane %v14863_v5, 1  ;;  %v14939_v8 = vmul.f32 %v14887_v18, %v14311_v36 }
 0x553   : > { %v4412_v16 = vadd.f32 %v4408_v3, %v4117_v15  ;;  %v4073_v55 = vpop.permute.xlu1 %4072  ;;  %v5990_v46 = vrot.slane %v5977_v11, 1  ;;  %v18728_v11 = vrot.slane %v14903_v33, 1 }
 0x554   : > { %v14935_v48 = vsel %vm924_vm2, %v18723_v25, %v5953_v62  ;;  %v4145_v2 = vpop.permute.xlu0 %4144  ;;  %v14949_v62 = vmul.f32 %v14922_v43, %v14306_v60  ;;  %v14953_v25 = vmul.f32 %v14390_v7, %v14288_v4  ;;  %v4043_v7 = vadd.f32 %v14784_v31, %v14743_v34 }
 0x555   : > { %18724 = vst [vmem:[#allocation28_spill] sm:$0xff] %v14935_v48  ;;  %v4468_v3 = vadd.f32 %v14452_v22, %v4412_v16  ;;  %v4154_v15 = vadd.f32 %v4145_v2, %v4006_v32  ;;  %5747 = vrot.lane.b32.xlu1 %v5738_v9, %s16969_s2  ;;  %v14964_v22 = vsel %vm924_vm2, %v18728_v11, %v5990_v46  ;;  %v16886_v46 = vrot.slane %v14944_v51, 1 }
 0x556   : > { %18726 = vst [vmem:[#allocation199_spill] sm:$0xff] %v14953_v25  ;;  %5771 = vrot.lane.b32.xlu0 %v5763_v19, %s16969_s2  ;;  %18729 = vst [vmem:[#allocation104_spill] sm:$0xff] %v14964_v22  ;;  %v6014_v2 = vmul.f32 %v14480_v30, %v14710_v38  ;;  %v3970_v16 = vadd.f32 %v14786_v24, %v14746_v26  ;;  %v14976_v48 = vmul.f32 %v14450_v12, %v14288_v4 }
 0x557   : > { %v4422_v19 = vadd.f32 %v14794_v21, %v4154_v15  ;;  %v4572_v9 = vadd.f32 %v14556_v39, %v4468_v3  ;;  %v4110_v32 = vpop.permute.xlu1 %4109  ;;  %v14981_v11 = vmul.f32 %v14506_v45, %v14359_v41  ;;  %v18732_v21 = vld [vmem:[#allocation120_spill] sm:$0xff]  ;;  %v4080_v39 = vadd.f32 %v14842_v27, %v14754_v56 }
 0x558   : > { %v4182_v40 = vpop.permute.xlu0 %4181  ;;  %18730 = vst [vmem:[#allocation103_spill] sm:$0xff] %v14976_v48  ;;  %v6027_v34 = vrot.slane %v6014_v2, 1  ;;  %v4118_v24 = vadd.f32 %v4110_v32, %v3970_v16  ;;  %v16891_v12 = vrot.slane %v14953_v25, 1  ;;  %v4007_v2 = vadd.f32 %v14844_v50, %v14757_v54  ;;  %v18858_v25 = vld [vmem:[#allocation88_spill] sm:$0xff] }
 0x559   : > { %18731 = vst [vmem:[#allocation64_spill] sm:$0xff] %v14981_v11  ;;  %v4494_v31 = vadd.f32 %v14482_v49, %v4422_v19  ;;  %v4191_v26 = vadd.f32 %v4182_v40, %v4043_v7  ;;  %v14985_v15 = vadd.f32 %v18732_v21, %v4572_v9  ;;  %5773 = vrot.lane.b32.xlu1 %v14853_v35, %s16969_s2  ;;  %v16885_v19 = vrot.slane %v14981_v11, 2 }
 0x55a   : > { %5797 = vrot.lane.b32.xlu0 %v5789_v53, %s7978_s8  ;;  %v14996_v3 = vsel %vm924_vm2, %v16886_v46, %v6027_v34  ;;  %v6109_v49 = vmul.f32 %v14506_v45, %v14710_v38  ;;  %v4413_v27 = vadd.f32 %v14804_v14, %v4118_v24  ;;  %v4044_v35 = vadd.f32 %v4036_v58, %v14765_v6 }
 0x55b   : > { %18733 = vst [vmem:[#allocation80_spill] sm:$0xff] %v14996_v3  ;;  %v4432_v56 = vadd.f32 %v14798_v52, %v4191_v26  ;;  %v4598_v53 = vadd.f32 %v14580_v44, %v4494_v31  ;;  %v4147_v16 = vpop.permute.xlu1 %4146  ;;  %v15009_v9 = vmul.f32 %v14528_v1, %v14359_v41  ;;  %v18735_v44 = vld [vmem:[#allocation44_spill] sm:$0xff]  ;;  %v16890_v14 = vrot.slane %v14959_v63, 1  ;;  %v18788_v3 = vld [vmem:[#allocation54_spill] sm:$0xff] }
 0x55c   : > { %v4219_v7 = vpop.permute.xlu0 %4218  ;;  %v6122_v40 = vrot.slane %v6109_v49, 2  ;;  %v4469_v54 = vadd.f32 %v14484_v42, %v4413_v27  ;;  %v4155_v50 = vadd.f32 %v4147_v16, %v4007_v2  ;;  %v6146_v42 = vmul.f32 %v14528_v1, %v14710_v38  ;;  %v18746_v16 = vld [vmem:[#allocation74_spill] sm:$0xff] }
 0x55d   : > { %18734 = vst [vmem:[#allocation154_spill] sm:$0xff] %v15009_v9  ;;  %v4520_v32 = vadd.f32 %v14508_v37, %v4432_v56  ;;  %v4228_v52 = vadd.f32 %v4219_v7, %v4080_v39  ;;  %5799 = vrot.lane.b32.xlu1 %v14881_v29, %s7978_s8  ;;  %v15018_v6 = vadd.f32 %v18735_v44, %v4598_v53  ;;  %v16884_v39 = vrot.slane %v15009_v9, 2  ;;  %v18742_v56 = vld [vmem:[#allocation40_spill] sm:$0xff]  ;;  %v18744_v53 = vld [vmem:[#allocation47_spill] sm:$0xff] }
 0x55e   : > { %5823 = vrot.lane.b32.xlu0 %v14891_v0, %s7978_s8  ;;  %v15024_v58 = vsel %vm1337_vm3, %v16885_v19, %v6122_v40  ;;  %v4423_v0 = vadd.f32 %v14820_v20, %v4155_v50  ;;  %v4573_v29 = vadd.f32 %v14582_v61, %v4469_v54  ;;  %v4081_v31 = vadd.f32 %v4073_v55, %v14778_v59  ;;  %v18740_v55 = vld [vmem:[#allocation71_spill] sm:$0xff]  ;;  %v18747_v44 = vld [vmem:[#allocation76_spill] sm:$0xff] }
 0x55f   : > { %18736 = vst [vmem:[#allocation89_spill] sm:$0xff] %v15024_v58  ;;  %v4442_v37 = vadd.f32 %v14808_v47, %v4228_v52  ;;  %v4624_v34 = vadd.f32 %v14602_v23, %v4520_v32  ;;  %v4184_v24 = vpop.permute.xlu1 %4183  ;;  %v15037_v21 = vmul.f32 %v14480_v30, %v14288_v4  ;;  %v6159_v49 = vrot.slane %v6146_v42, 2  ;;  %v18738_v23 = vld [vmem:[#allocation117_spill] sm:$0xff]  ;;  %v18741_v30 = vld [vmem:[#allocation99_spill] sm:$0xff] }
 0x560   : > { %v15033_v26 = vpop.permute.xlu0 %4793  ;;  %v4495_v20 = vadd.f32 %v14510_v13, %v4423_v0  ;;  %v4192_v2 = vadd.f32 %v4184_v24, %v4044_v35  ;;  %v15044_v61 = vmul.f32 %v18738_v23, %v14359_v41  ;;  %v15054_v27 = vadd.f32 %v18742_v56, %v4573_v29  ;;  %v18750_v29 = vld [vmem:[#allocation126_spill] sm:$0xff]  ;;  %v18755_v56 = vld [vmem:[#allocation33_spill] sm:$0xff] }
 0x561   : > { %18737 = vst [vmem:[#allocation161_spill] sm:$0xff] %v15037_v21  ;;  %v4546_v47 = vadd.f32 %v14530_v17, %v4442_v37  ;;  %5825 = vrot.lane.b32.xlu1 %v18740_v55, %s7978_s8  ;;  %v15051_v59 = vadd.f32 %v18741_v30, %v4624_v34  ;;  %v16889_v17 = vrot.slane %v14976_v48, 1  ;;  %v15060_v13 = vsel %vm1337_vm3, %v16884_v39, %v6159_v49  ;;  %v18754_v30 = vld [vmem:[#allocation152_spill] sm:$0xff]  ;;  %v18767_v39 = vld [vmem:[#allocation63_spill] sm:$0xff] }
 0x562   : > { %18739 = vst [vmem:[#allocation131_spill] sm:$0xff] %v15044_v61  ;;  %6455 = vrot.lane.b32.xlu0 %v14895_v57, %s16969_s2  ;;  %18743 = vst [vmem:[#allocation141_spill] sm:$0xff] %v15060_v13  ;;  %v4433_v35 = vadd.f32 %v18744_v53, %v4192_v2  ;;  %v18745_v57 = vld [vmem:[#allocation67_spill] sm:$0xff]  ;;  %v4599_v40 = vadd.f32 %v18746_v16, %v4495_v20  ;;  %v6183_v32 = vmul.f32 %v18738_v23, %v14710_v38  ;;  %v18752_v2 = vld [vmem:[#allocation77_spill] sm:$0xff] }
 0x563   : > { %v4650_v7 = vadd.f32 %v18745_v57, %v4546_v47  ;;  %v4221_v52 = vpop.permute.xlu1 %4220  ;;  %v15071_v50 = vmul.f32 %v14922_v43, %v14311_v36  ;;  %v18748_v42 = vrot.slane %v18747_v44, 1  ;;  %v16888_v0 = vrot.slane %v15037_v21, 1  ;;  %v18751_v47 = vld [vmem:[#allocation61_spill] sm:$0xff]  ;;  %v18756_v53 = vld [vmem:[#allocation119_spill] sm:$0xff] }
 0x564   : > { %v15067_v54 = vpop.permute.xlu0 %4830  ;;  %v15083_v34 = vmul.f32 %v14506_v45, %v14288_v4  ;;  %v4521_v24 = vadd.f32 %v18750_v29, %v4433_v35  ;;  %v4229_v49 = vadd.f32 %v4221_v52, %v4081_v31  ;;  %v15091_v55 = vmul.f32 %v18752_v2, %v14359_v41  ;;  %v18758_v52 = vld [vmem:[#allocation81_spill] sm:$0xff] }
 0x565   : > { %v15078_v37 = vsel %vm924_vm2, %v18748_v42, %v16891_v12  ;;  %v15087_v20 = vadd.f32 %v18751_v47, %v4650_v7  ;;  %6457 = vrot.lane.b32.xlu1 %v18755_v56, %s16969_s2  ;;  %v15098_v57 = vadd.f32 %v18756_v53, %v4599_v40  ;;  %v16887_v45 = vrot.slane %v15044_v61, 2  ;;  %v18757_v7 = vld [vmem:[#allocation124_spill] sm:$0xff]  ;;  %v18759_v42 = vld [vmem:[#allocation179_spill] sm:$0xff] }
 0x566   : > { %18749 = vst [vmem:[#allocation21_spill] sm:$0xff] %v15083_v34  ;;  %18753 = vst [vmem:[#allocation183_spill] sm:$0xff] %v15091_v55  ;;  %6481 = vrot.lane.b32.xlu0 %v18754_v30, %s16969_s2  ;;  %v6196_v35 = vrot.slane %v6183_v32, 2  ;;  %v6220_v31 = vmul.f32 %v18752_v2, %v14710_v38  ;;  %v4443_v16 = vadd.f32 %v18757_v7, %v4229_v49  ;;  %v18760_v29 = vrot.slane %v18759_v42, 1  ;;  %v18761_v40 = vld [vmem:[#allocation188_spill] sm:$0xff]  ;;  %v18780_v61 = vld [vmem:[#allocation139_spill] sm:$0xff] }
 0x567   : > { %v4625_v44 = vadd.f32 %v18758_v52, %v4521_v24  ;;  %v18762_v30 = vrot.slane %v18761_v40, 1  ;;  %v15119_v53 = vpop.permute.xlu1 %4795  ;;  %v18763_v24 = vld [vmem:[#allocation185_spill] sm:$0xff]  ;;  %v15133_v42 = vstv %s7386_s15  ;;  %v18766_v40 = vld [vmem:[#allocation114_spill] sm:$0xff]  ;;  %v18781_v58 = vrot.slane %v18780_v61, 2  ;;  %s15724_s15 = scalar_lea.vmem [#allocation10], %s7176_s4 }
 0x568   : > { %v15110_v47 = vsel %vm924_vm2, %v18760_v29, %v16890_v14  ;;  %v4868_v56 = vpop.permute.xlu0 %4867  ;;  %v18764_v49 = vrot.slane %v18763_v24, 1  ;;  %v15131_v52 = vsel %vm1337_vm3, %v16887_v45, %v6196_v35  ;;  %v6233_v29 = vrot.slane %v6220_v31, 2  ;;  %v18770_v31 = vld [vmem:[#allocation200_spill] sm:$0xff] }
 0x569   : > { %v15117_v32 = vsel %vm924_vm2, %v18762_v30, %v16889_v17  ;;  %18765 = vst [vmem:[#allocation196_spill] sm:$0xff] %v15131_v52  ;;  %v4547_v30 = vadd.f32 %v18766_v40, %v4443_v16  ;;  %v15137_v19 = vadd.f32 %v18767_v39, %v4625_v44  ;;  %v16892_v24 = vrot.slane %v15091_v55, 2  ;;  %6483 = vrot.lane.b32.xlu1 %v14930_v28, %s16969_s2  ;;  %v18771_v40 = vld [vmem:[#allocation181_spill] sm:$0xff]  ;;  %v18772_v44 = vld [vmem:[#allocation92_spill] sm:$0xff]  ;;  %v18774_v17 = vld [vmem:[#allocation23_spill] sm:$0xff] }
 0x56a   : > { %v15126_v7 = vsel %vm924_vm2, %v18764_v49, %v16888_v0  ;;  %v18768_v49 = vld [vmem:[#allocation166_spill] sm:$0xff]  ;;  %v15147_v35 = vmul.f32 %v14528_v1, %v14288_v4  ;;  %v5841_v16 = vmul.f32 %v15133_v42, %v18770_v31  ;;  %v5842_v39 = vmul.f32 %v15133_v42, %v18771_v40  ;;  %v18773_v0 = vld [vmem:[#allocation101_spill] sm:$0xff]  ;;  %v18777_v52 = vld [vmem:[#allocation84_spill] sm:$0xff] }
 0x56b   : > { %6507 = vrot.lane.b32.xlu0 %v18768_v49, %s7978_s8  ;;  %v4651_v45 = vadd.f32 %v18772_v44, %v4547_v30  ;;  %v15156_v14 = vmul.f32 %v18774_v17, %v18773_v0  ;;  %v15161_v28 = vsel %vm1337_vm3, %v16892_v24, %v6233_v29  ;;  %v15165_v1 = vmul.f32 %v15133_v42, %v14288_v4  ;;  %v4833_v12 = vpop.permute.xlu1 %4832  ;;  %v18778_v24 = vld [vmem:[#allocation167_spill] sm:$0xff] }
 0x56c   : > { %18769 = vst [vmem:[#allocation51_spill] sm:$0xff] %v15147_v35  ;;  %18776 = vst [vmem:[#allocation198_spill] sm:$0xff] %v15161_v28  ;;  %v15169_v49 = vpop.permute.xlu0 %4904  ;;  %v5851_v46 = vrot.slane %v5841_v16, 1  ;;  %v5852_v30 = vrot.slane %v5842_v39, 1  ;;  %v15171_v44 = vstv %s7387_s26  ;;  %v6613_v13 = vmul.f32 %v18774_v17, %v18777_v52  ;;  %s15728_s26 = sld [smem:[#allocation5 + $0x2]] }
 0x56d   : > { %18775 = vst [vmem:[#allocation46_spill] sm:$0xff] %v15156_v14  ;;  %v4803_v29 = vadd.f32 %v15033_v26, %v14985_v15  ;;  %v15178_v28 = vadd.f32 %v18778_v24, %v4651_v45  ;;  %v18779_v55 = vrot.slane %v15083_v34, 2  ;;  %v5870_v16 = vmul.f32 %v15171_v44, %v18770_v31  ;;  %6509 = vrot.lane.b32.xlu1 %v14939_v8, %s7978_s8 }
 0x56e   : > { %v15194_v15 = vsel %vm924_vm2, %v5851_v46, %v5852_v30  ;;  %v5871_v26 = vmul.f32 %v15171_v44, %v18771_v40  ;;  %v16900_v45 = vrot.slane %v15156_v14, 1  ;;  %v6626_v39 = vrot.slane %v6613_v13, 1 }
 0x56f   : > { %v15185_v9 = vsel %vm1337_vm3, %v18781_v58, %v18779_v55  ;;  %6533 = vrot.lane.b32.xlu0 %v14949_v62, %s7978_s8  ;;  %18782 = vst [vmem:[#allocation113_spill] sm:$0xff] %v15194_v15  ;;  %v18783_v58 = vld [vmem:[#allocation147_spill] sm:$0xff]  ;;  %v5880_v24 = vrot.slane %v5870_v16, 1  ;;  %v15206_v62 = vmul.f32 %v15171_v44, %v14288_v4  ;;  %v15210_v46 = vpop.permute.xlu1 %4869  ;;  %v18785_v34 = vrot.slane %v15165_v1, 1 }
 0x570   : > { %v15201_v55 = vmul.f32 %v18783_v58, %v18773_v0  ;;  %v4942_v8 = vpop.permute.xlu0 %4941  ;;  %v5881_v61 = vrot.slane %v5871_v26, 1  ;;  %v6650_v13 = vmul.f32 %v18783_v58, %v18777_v52  ;;  %v15223_v22 = vsel %vm924_vm2, %v16900_v45, %v6626_v39 }
 0x571   : > { %v15216_v11 = vsel %vm924_vm2, %v5852_v30, %v18785_v34  ;;  %v4951_v16 = vadd.f32 %v4942_v8, %v4803_v29  ;;  %18787 = vst [vmem:[#allocation134_spill] sm:$0xff] %v15223_v22  ;;  %v16901_v21 = vrot.slane %v15206_v62, 1  ;;  %v15228_v26 = vmul.f32 %v18788_v3, %v18773_v0  ;;  %v18790_v34 = vld [vmem:[#allocation59_spill] sm:$0xff]  ;;  %6535 = vrot.lane.b32.xlu1 %v15071_v50, %s7978_s8  ;;  %v18792_v8 = vld [vmem:[#allocation129_spill] sm:$0xff] }
 0x572   : > { %18784 = vst [vmem:[#allocation159_spill] sm:$0xff] %v15201_v55  ;;  %18786 = vst [vmem:[#allocation112_spill] sm:$0xff] %v15216_v11  ;;  %v4840_v51 = vadd.f32 %v15067_v54, %v15018_v6  ;;  %v15237_v30 = vsel %vm924_vm2, %v5880_v24, %v5881_v61  ;;  %v16904_v29 = vrot.slane %v15201_v55, 1  ;;  %v6663_v39 = vrot.slane %v6650_v13, 1 }
 0x573   : > { %18789 = vst [vmem:[#allocation186_spill] sm:$0xff] %v15228_v26  ;;  %5918 = vrot.lane.b32.xlu0 %v18790_v34, %s16969_s2  ;;  %18791 = vst [vmem:[#allocation107_spill] sm:$0xff] %v15237_v30  ;;  %v15241_v45 = vadd.f32 %v18792_v8, %v4951_v16  ;;  %v15246_v22 = vsel %vm924_vm2, %v5881_v61, %v16901_v21  ;;  %v6687_v6 = vmul.f32 %v18788_v3, %v18777_v52  ;;  %v15254_v34 = vpop.permute.xlu1 %4906  ;;  %v18795_v16 = vld [vmem:[#allocation94_spill] sm:$0xff]  ;;  %v18817_v30 = vld [vmem:[#allocation168_spill] sm:$0xff] }
 0x574   : > { %18793 = vst [vmem:[#allocation73_spill] sm:$0xff] %v15246_v22  ;;  %v15251_v54 = vstv %s15167_s29  ;;  %v4877_v50 = vadd.f32 %v4868_v56, %v15051_v59  ;;  %v4979_v24 = vpop.permute.xlu0 %4978  ;;  %v15259_v13 = vsel %vm924_vm2, %v16904_v29, %v6663_v39  ;;  %v15263_v61 = vmul.f32 %v18795_v16, %v18773_v0  ;;  %v18797_v29 = vld [vmem:[#allocation34_spill] sm:$0xff]  ;;  %s7369_s29 = sld [smem:[#allocation5 + $0x3]] }
 0x575   : > { %18794 = vst [vmem:[#allocation145_spill] sm:$0xff] %v15259_v13  ;;  %v6047_v8 = vmul.f32 %v15251_v54, %v18770_v31  ;;  %v4988_v21 = vadd.f32 %v4979_v24, %v4840_v51  ;;  %v16906_v14 = vrot.slane %v15228_v26, 1  ;;  %v6700_v59 = vrot.slane %v6687_v6, 1  ;;  %5920 = vrot.lane.b32.xlu1 %v15078_v37, %s16969_s2  ;;  %v18798_v24 = vld [vmem:[#allocation83_spill] sm:$0xff] }
 0x576   : > { %18796 = vst [vmem:[#allocation98_spill] sm:$0xff] %v15263_v61  ;;  %v6048_v56 = vmul.f32 %v15251_v54, %v18771_v40  ;;  %v4804_v55 = vadd.f32 %v15119_v53, %v15054_v27  ;;  %v4841_v39 = vadd.f32 %v4833_v12, %v15098_v57  ;;  %v6724_v51 = vmul.f32 %v18795_v16, %v18777_v52 }
 0x577   : > { %5955 = vrot.lane.b32.xlu0 %v18797_v29, %s16969_s2  ;;  %v6057_v13 = vrot.slane %v6047_v8, 2  ;;  %v15280_v6 = vadd.f32 %v18798_v24, %v4988_v21  ;;  %v15285_v22 = vsel %vm924_vm2, %v16906_v14, %v6700_v59  ;;  %v15288_v12 = vstv %s15208_s12  ;;  %v4944_v53 = vpop.permute.xlu1 %4943  ;;  %v18801_v14 = vld [vmem:[#allocation78_spill] sm:$0xff]  ;;  %s15825_s12 = sld [smem:[#allocation7]] }
 0x578   : > { %18799 = vst [vmem:[#allocation158_spill] sm:$0xff] %v15285_v22  ;;  %v6058_v27 = vrot.slane %v6048_v56, 2  ;;  %v5016_v57 = vpop.permute.xlu0 %5015  ;;  %v6737_v29 = vrot.slane %v6724_v51, 1  ;;  %v6076_v8 = vmul.f32 %v15288_v12, %v18770_v31  ;;  %v6077_v21 = vmul.f32 %v15288_v12, %v18771_v40  ;;  %v18802_v51 = vld [vmem:[#allocation155_spill] sm:$0xff] }
 0x579   : > { %v5025_v24 = vadd.f32 %v5016_v57, %v4877_v50  ;;  %v4952_v26 = vadd.f32 %v4944_v53, %v4804_v55  ;;  %v15302_v56 = vmul.f32 %v15251_v54, %v14288_v4  ;;  %5957 = vrot.lane.b32.xlu1 %v15110_v47, %s16969_s2  ;;  %v15310_v37 = vmul.f32 %v18802_v51, %v18773_v0  ;;  %v18806_v53 = vld [vmem:[#allocation182_spill] sm:$0xff] }
 0x57a   : > { %v15298_v59 = vsel %vm1337_vm3, %v6057_v13, %v6058_v27  ;;  %v18804_v50 = vrot.slane %v15263_v61, 1  ;;  %v6086_v13 = vrot.slane %v6076_v8, 2  ;;  %v6087_v57 = vrot.slane %v6077_v21, 2 }
 0x57b   : > { %18800 = vst [vmem:[#allocation36_spill] sm:$0xff] %v15298_v59  ;;  %5992 = vrot.lane.b32.xlu0 %v18801_v14, %s7978_s8  ;;  %18803 = vst [vmem:[#allocation75_spill] sm:$0xff] %v15310_v37  ;;  %v15320_v22 = vadd.f32 %v18806_v53, %v4952_v26  ;;  %v18807_v14 = vld [vmem:[#allocation184_spill] sm:$0xff]  ;;  %v6819_v11 = vmul.f32 %v18802_v51, %v18777_v52  ;;  %v4981_v8 = vpop.permute.xlu1 %4980  ;;  %v15332_v21 = vmul.f32 %v18738_v23, %v14288_v4  ;;  %v18810_v53 = vld [vmem:[#allocation191_spill] sm:$0xff] }
 0x57c   : > { %v15315_v55 = vsel %vm924_vm2, %v18804_v50, %v6737_v29  ;;  %v15323_v59 = vadd.f32 %v18807_v14, %v5025_v24  ;;  %v4914_v29 = vadd.f32 %v15169_v49, %v15087_v20  ;;  %v5049_v50 = vpop.permute.xlu0 %5048  ;;  %v15335_v26 = vsel %vm1337_vm3, %v6086_v13, %v6087_v57  ;;  %v18813_v23 = vld [vmem:[#allocation190_spill] sm:$0xff] }
 0x57d   : > { %18805 = vst [vmem:[#allocation178_spill] sm:$0xff] %v15315_v55  ;;  %18808 = vst [vmem:[#allocation30_spill] sm:$0xff] %v15332_v21  ;;  %v15339_v24 = vmul.f32 %v15288_v12, %v14288_v4  ;;  %v5060_v14 = vadd.f32 %v5049_v50, %v18810_v53  ;;  %v4989_v47 = vadd.f32 %v4981_v8, %v4841_v39  ;;  %v18811_v20 = vrot.slane %v15302_v56, 2  ;;  %v18814_v8 = vld [vmem:[#allocation122_spill] sm:$0xff] }
 0x57e   : > { %18809 = vst [vmem:[#allocation157_spill] sm:$0xff] %v15335_v26  ;;  %v6851_v55 = vstv %s15290_s0  ;;  %5994 = vrot.lane.b32.xlu1 %v15117_v32, %s7978_s8  ;;  %v6832_v50 = vrot.slane %v6819_v11, 2  ;;  %v4878_v39 = vadd.f32 %v15210_v46, %v15137_v19  ;;  %v18815_v53 = vld [vmem:[#allocation142_spill] sm:$0xff]  ;;  %v18816_v13 = vrot.slane %v15147_v35, 2  ;;  %s15847_s0 = sld [smem:[#allocation7 + $0x12]] }
 0x57f   : > { %v15347_v49 = vsel %vm1337_vm3, %v6058_v27, %v18811_v20  ;;  %6029 = vrot.lane.b32.xlu0 %v18813_v23, %s7978_s8  ;;  %v6852_v26 = vmul.f32 %v6851_v55, %v14306_v60  ;;  %v6853_v61 = vmul.f32 %v6851_v55, %v14311_v36  ;;  %v15360_v27 = vadd.f32 %v18814_v8, %v4989_v47  ;;  %v5018_v32 = vpop.permute.xlu1 %5017 }
 0x580   : > { %18812 = vst [vmem:[#allocation66_spill] sm:$0xff] %v15347_v49  ;;  %v15363_v20 = vadd.f32 %v18815_v53, %v5060_v14  ;;  %v16910_v23 = vrot.slane %v15339_v24, 2  ;;  %v5053_v49 = vpop.permute.xlu0 %5052  ;;  %v18818_v15 = vrot.slane %v18817_v30, 2  ;;  %v18819_v19 = vrot.slane %v15310_v37, 2  ;;  %v18822_v53 = vld [vmem:[#allocation175_spill] sm:$0xff] }
 0x581   : > { %v6862_v48 = vrot.slane %v6852_v26, 2  ;;  %v6863_v33 = vrot.slane %v6853_v61, 2  ;;  %v5062_v47 = vadd.f32 %v5053_v49, %v4914_v29  ;;  %v5026_v14 = vadd.f32 %v5018_v32, %v4878_v39  ;;  %v18826_v39 = vld [vmem:[#allocation162_spill] sm:$0xff] }
 0x582   : > { %v6156_v11 = vsel %vm1337_vm3, %v18818_v15, %v18816_v13  ;;  %v15374_v46 = vsel %vm1337_vm3, %v18819_v19, %v6832_v50  ;;  %v15381_v8 = vsel %vm1337_vm3, %v6087_v57, %v16910_v23  ;;  %v6854_v30 = vmul.f32 %v6851_v55, %v18822_v53  ;;  %v18823_v15 = vld [vmem:[#allocation58_spill] sm:$0xff]  ;;  %6031 = vrot.lane.b32.xlu1 %v15126_v7, %s7978_s8 }
 0x583   : > { %18820 = vst [vmem:[#allocation164_spill] sm:$0xff] %v15374_v46  ;;  %18821 = vst [vmem:[#allocation171_spill] sm:$0xff] %v15381_v8  ;;  %6124 = vrot.lane.b32.xlu0 %v18823_v15, %s16969_s2  ;;  %v15390_v26 = vsel %vm1337_vm3, %v6862_v48, %v6863_v33  ;;  %v6855_v29 = vmul.f32 %v6851_v55, %v18773_v0  ;;  %v6888_v49 = vstv %s15317_s22  ;;  %v18825_v13 = vld [vmem:[#allocation194_spill] sm:$0xff]  ;;  %v5055_v15 = vpop.permute.xlu1 %5054  ;;  %v15409_v46 = vstv %s15341_s9  ;;  %s7407_s22 = sld [smem:[#allocation7 + $0x9]]  ;;  %s7408_s9 = sld [smem:[#allocation7 + $0x1b]] }
 0x584   : > { %18824 = vst [vmem:[#allocation26_spill] sm:$0xff] %v15390_v26  ;;  %v4915_v57 = vadd.f32 %v15254_v34, %v15178_v28  ;;  %v15397_v50 = vadd.f32 %v18825_v13, %v5026_v14  ;;  %v15400_v32 = vadd.f32 %v18826_v39, %v5062_v47  ;;  %v6865_v19 = vrot.slane %v6854_v30, 2  ;;  %v15404_v7 = vpop.permute.xlu0 %5201  ;;  %v18829_v30 = vld [vmem:[#allocation60_spill] sm:$0xff]  ;;  %v18832_v39 = vld [vmem:[#allocation95_spill] sm:$0xff] }
 0x585   : > { %v6867_v48 = vrot.slane %v6855_v29, 2  ;;  %v6889_v23 = vmul.f32 %v6888_v49, %v14306_v60  ;;  %v6890_v61 = vmul.f32 %v6888_v49, %v14311_v36  ;;  %v15413_v34 = vmul.f32 %v18752_v2, %v14288_v4 }
 0x586   : > { %v5063_v28 = vadd.f32 %v5055_v15, %v4915_v57  ;;  %v15416_v47 = vsel %vm1337_vm3, %v6863_v33, %v6865_v19  ;;  %v6856_v14 = vmul.f32 %v6851_v55, %v18777_v52  ;;  %6126 = vrot.lane.b32.xlu1 %v15185_v9, %s16969_s2  ;;  %v6551_v2 = vmul.f32 %v15409_v46, %v14306_v60 }
 0x587   : > { %18827 = vst [vmem:[#allocation106_spill] sm:$0xff] %v15413_v34  ;;  %18828 = vst [vmem:[#allocation42_spill] sm:$0xff] %v15416_v47  ;;  %6161 = vrot.lane.b32.xlu0 %v18829_v30, %s16969_s2  ;;  %v15424_v29 = vsel %vm1337_vm3, %v6865_v19, %v6867_v48  ;;  %v6899_v57 = vrot.slane %v6889_v23, 2  ;;  %v6900_v13 = vrot.slane %v6890_v61, 2  ;;  %v18831_v33 = vrot.slane %v15332_v21, 2  ;;  %v18834_v47 = vld [vmem:[#allocation121_spill] sm:$0xff]  ;;  %v15440_v23 = vpop.permute.xlu1 %5203 }
 0x588   : > { %18830 = vst [vmem:[#allocation25_spill] sm:$0xff] %v15424_v29  ;;  %v18833_v15 = vrot.slane %v18832_v39, 2  ;;  %v15434_v26 = vadd.f32 %v18834_v47, %v5063_v28  ;;  %v6869_v30 = vrot.slane %v6856_v14, 2  ;;  %v6552_v9 = vmul.f32 %v15409_v46, %v14311_v36  ;;  %v15438_v19 = vpop.permute.xlu0 %5205 }
 0x589   : > { %v15443_v61 = vsel %vm1337_vm3, %v6899_v57, %v6900_v13  ;;  %v6561_v29 = vrot.slane %v6551_v2, 1  ;;  %v6891_v39 = vmul.f32 %v6888_v49, %v18822_v53  ;;  %v15447_v8 = vstv %s15376_s30  ;;  %v18838_v57 = vld [vmem:[#allocation151_spill] sm:$0xff]  ;;  %s7001_s30 = sshll.u32 %s15724_s15, 4  ;;  %s16125_s30 = int_to_ptr.vmem [resolvable:$true] %s7001_s30 }
 0x58a   : > { %v6193_v55 = vsel %vm1337_vm3, %v18833_v15, %v18831_v33  ;;  %18835 = vst [vmem:[#allocation197_spill] sm:$0xff] %v15443_v61  ;;  %v15454_v47 = vmul.f32 %v18774_v17, %v18822_v53  ;;  %v15457_v14 = vsel %vm1337_vm3, %v6867_v48, %v6869_v30  ;;  %v6562_v33 = vrot.slane %v6552_v9, 1  ;;  %6163 = vrot.lane.b32.xlu1 %v6156_v11, %s16969_s2  ;;  %s7862_s4 = scalar_lea.vmem %s16125_s30, 2048 }
 0x58b   : > { %18837 = vst [vmem:[#allocation100_spill] sm:$0xff] %v15457_v14  ;;  %6198 = vrot.lane.b32.xlu0 %v18838_v57, %s7978_s8  ;;  %v6892_v2 = vmul.f32 %v6888_v49, %v18773_v0  ;;  %v6902_v15 = vrot.slane %v6891_v39, 2  ;;  %v6580_v61 = vmul.f32 %v15447_v8, %v14306_v60  ;;  %v6581_v28 = vmul.f32 %v15447_v8, %v14311_v36  ;;  %v15478_v57 = vpop.permute.xlu1 %5207  ;;  %p7863_p8 = scmp.ne.s32.totalorder %s16125_s30, %s7862_s4 }
 0x58c   : > { %18836 = vst [vmem:[#allocation140_spill] sm:$0xff] %v15454_v47  ;;  %v15468_v17 = vsel %vm924_vm2, %v6561_v29, %v6562_v33  ;;  %v15472_v48 = vmul.f32 %v15409_v46, %v18822_v53  ;;  %v6925_v30 = vstv %s15402_s3  ;;  %v6893_v9 = vmul.f32 %v6888_v49, %v18777_v52  ;;  %v15476_v11 = vpop.permute.xlu0 %5238 }
 0x58d   : > { %18839 = vst [vmem:[#allocation102_spill] sm:$0xff] %v15468_v17  ;;  %v6904_v39 = vrot.slane %v6892_v2, 2  ;;  %v15481_v14 = vsel %vm1337_vm3, %v6900_v13, %v6902_v15  ;;  %v6590_v37 = vrot.slane %v6580_v61, 1  ;;  %v6591_v21 = vrot.slane %v6581_v28, 1  ;;  %v18842_v17 = vld [vmem:[#allocation70_spill] sm:$0xff]  ;;  %v18845_v2 = vld [vmem:[#allocation136_spill] sm:$0xff]  ;;  %p7864_p13 = pnand %p7863_p8, %p19000_p11 }
 0x58e   : > { %18840 = vst [vmem:[#allocation19_spill] sm:$0xff] %v15481_v14  ;;  %v18841_v29 = vrot.slane %v15413_v34, 2  ;;  %v18843_v35 = vrot.slane %v18842_v17, 2  ;;  %v15490_v5 = vmul.f32 %v18783_v58, %v18822_v53  ;;  %v16917_v49 = vrot.slane %v15472_v48, 1  ;;  %6200 = vrot.lane.b32.xlu1 %v6193_v55, %s7978_s8 }
 0x58f   : > { %v6926_v40 = vmul.f32 %v6925_v30, %v14306_v60  ;;  %6235 = vrot.lane.b32.xlu0 %v18845_v2, %s7978_s8  ;;  %v15498_v13 = vsel %vm1337_vm3, %v6902_v15, %v6904_v39  ;;  %v15501_v61 = vsel %vm924_vm2, %v6590_v37, %v6591_v21  ;;  %v6906_v58 = vrot.slane %v6893_v9, 2  ;;  %v15518_v37 = vpop.permute.xlu1 %5240  ;;  %p7865_p1 = pneg %p7864_p13 }
 0x590   : > { %v6230_v63 = vsel %vm1337_vm3, %v18843_v35, %v18841_v29  ;;  %18844 = vst [vmem:[#allocation110_spill] sm:$0xff] %v15490_v5  ;;  %18846 = vst [vmem:[#allocation165_spill] sm:$0xff] %v15498_v13  ;;  %v6927_v35 = vmul.f32 %v6925_v30, %v14311_v36  ;;  %v15509_v28 = vsel %vm924_vm2, %v6562_v33, %v16917_v49  ;;  %v15516_v29 = vpop.permute.xlu0 %5242  ;;  %v15525_v14 = vstv %s15449_s24  ;;  %v18850_v13 = vld [vmem:[#allocation79_spill] sm:$0xff] }
 0x591   : > { %18847 = vst [vmem:[#allocation127_spill] sm:$0xff] %v15501_v61  ;;  %18848 = vst [vmem:[#allocation195_spill] sm:$0xff] %v15509_v28  ;;  %v6936_v17 = vrot.slane %v6926_v40, 2  ;;  %v15513_v55 = vmul.f32 %v15447_v8, %v18822_v53  ;;  %v6928_v15 = vmul.f32 %v6925_v30, %v18822_v53  ;;  %v15521_v9 = vsel %vm1337_vm3, %v6904_v39, %v6906_v58 }
 0x592   : > { %v6937_v2 = vrot.slane %v6927_v35, 2  ;;  %18849 = vst [vmem:[#allocation150_spill] sm:$0xff] %v15521_v9  ;;  %v6929_v61 = vmul.f32 %v6925_v30, %v18773_v0  ;;  %v16922_v40 = vrot.slane %v15454_v47, 1  ;;  %6237 = vrot.lane.b32.xlu1 %v6230_v63, %s7978_s8  ;;  %v6930_v58 = vmul.f32 %v6925_v30, %v18777_v52 }
 0x593   : > { %v16918_v49 = vrot.slane %v15513_v55, 1  ;;  %v6939_v28 = vrot.slane %v6928_v15, 2  ;;  %6628 = vrot.lane.b32.xlu0 %v18850_v13, %s16969_s2  ;;  %v6757_v9 = vmul.f32 %v15525_v14, %v14306_v60  ;;  %v6758_v63 = vmul.f32 %v15525_v14, %v14311_v36 }
 0x594   : > { %v15534_v35 = vsel %vm1337_vm3, %v6936_v17, %v6937_v2  ;;  %v6941_v39 = vrot.slane %v6929_v61, 2  ;;  %v15551_v13 = vmul.f32 %v15525_v14, %v18822_v53  ;;  %v15553_v30 = vpop.permute.xlu0 %5275  ;;  %v15555_v61 = vpop.permute.xlu1 %5244 }
 0x595   : > { %18851 = vst [vmem:[#allocation143_spill] sm:$0xff] %v15534_v35  ;;  %v15542_v33 = vsel %vm924_vm2, %v6591_v21, %v16918_v49  ;;  %v15545_v15 = vsel %vm1337_vm3, %v6937_v2, %v6939_v28  ;;  %v6943_v21 = vrot.slane %v6930_v58, 2  ;;  %v6767_v49 = vrot.slane %v6757_v9, 2  ;;  %v18855_v2 = vld [vmem:[#allocation174_spill] sm:$0xff]  ;;  %v18860_v9 = vld [vmem:[#allocation91_spill] sm:$0xff] }
 0x596   : > { %18852 = vst [vmem:[#allocation118_spill] sm:$0xff] %v15542_v33  ;;  %18853 = vst [vmem:[#allocation116_spill] sm:$0xff] %v15545_v15  ;;  %v15558_v17 = vsel %vm1337_vm3, %v6939_v28, %v6941_v39  ;;  %v18856_v15 = vrot.slane %v18855_v2, 1  ;;  %v15567_v35 = vmul.f32 %v18788_v3, %v18822_v53  ;;  %v6768_v34 = vrot.slane %v6758_v63, 2 }
 0x597   : > { %18854 = vst [vmem:[#allocation153_spill] sm:$0xff] %v15558_v17  ;;  %v16923_v52 = vrot.slane %v15551_v13, 2  ;;  %6665 = vrot.lane.b32.xlu0 %v18858_v25, %s16969_s2  ;;  %v18859_v28 = vrot.slane %v15490_v5, 1  ;;  %v18861_v58 = vrot.slane %v18860_v9, 1  ;;  %v15583_v3 = vmul.f32 %v15133_v42, %v14359_v41 }
 0x598   : > { %v6623_v33 = vsel %vm924_vm2, %v18856_v15, %v16922_v40  ;;  %18857 = vst [vmem:[#allocation173_spill] sm:$0xff] %v15567_v35  ;;  %v15579_v15 = vsel %vm1337_vm3, %v6941_v39, %v6943_v21  ;;  %v15586_v63 = vstv %s15504_s13  ;;  %v15589_v40 = vsel %vm1337_vm3, %v6767_v49, %v6768_v34  ;;  %v15604_v21 = vpop.permute.xlu0 %5279 }
 0x599   : > { %6630 = vrot.lane.b32.xlu1 %v6623_v33, %s16969_s2  ;;  %v6660_v2 = vsel %vm924_vm2, %v18861_v58, %v18859_v28  ;;  %18862 = vst [vmem:[#allocation109_spill] sm:$0xff] %v15579_v15  ;;  %18863 = vst [vmem:[#allocation49_spill] sm:$0xff] %v15589_v40  ;;  %v15594_v25 = vsel %vm1337_vm3, %v6768_v34, %v16923_v52  ;;  %v15598_v33 = vmul.f32 %v15171_v44, %v14359_v41  ;;  %v15606_v28 = vpop.permute.xlu1 %5277  ;;  %v18866_v40 = vld [vmem:[#allocation56_spill] sm:$0xff] }
 0x59a   : > { %18864 = vst [vmem:[#allocation111_spill] sm:$0xff] %v15594_v25  ;;  %v15602_v39 = vmul.f32 %v15251_v54, %v14359_v41  ;;  %v15611_v9 = vmul.f32 %v15288_v12, %v14359_v41  ;;  %v6786_v34 = vmul.f32 %v15586_v63, %v14306_v60  ;;  %v6787_v58 = vmul.f32 %v15586_v63, %v14311_v36 }
 0x59b   : > { %v15620_v25 = vmul.f32 %v18795_v16, %v18822_v53  ;;  %v16930_v15 = vrot.slane %v15598_v33, 1  ;;  %6702 = vrot.lane.b32.xlu0 %v18866_v40, %s7978_s8  ;;  %v18867_v17 = vrot.slane %v15583_v3, 1  ;;  %v18868_v60 = vrot.slane %v15165_v1, 1 }
 0x59c   : > { %v16931_v52 = vrot.slane %v15611_v9, 2  ;;  %v6796_v16 = vrot.slane %v6786_v34, 2  ;;  %v6797_v5 = vrot.slane %v6787_v58, 2  ;;  %v18870_v49 = vrot.slane %v15206_v62, 1 }
 0x59d   : > { %18865 = vst [vmem:[#allocation133_spill] sm:$0xff] %v15620_v25  ;;  %6667 = vrot.lane.b32.xlu1 %v6660_v2, %s16969_s2  ;;  %v15632_v36 = vsel %vm924_vm2, %v18868_v60, %v18867_v17  ;;  %v18872_v40 = vrot.slane %v15602_v39, 2  ;;  %v18873_v2 = vrot.slane %v15302_v56, 2  ;;  %v15651_v60 = vmul.f32 %v15586_v63, %v18822_v53  ;;  %v15653_v17 = vpop.permute.xlu0 %5312  ;;  %v15655_v34 = vpop.permute.xlu1 %5281 }
 0x59e   : > { %18869 = vst [vmem:[#allocation85_spill] sm:$0xff] %v15632_v36  ;;  %v15640_v47 = vsel %vm924_vm2, %v18870_v49, %v16930_v15  ;;  %v18875_v62 = vrot.slane %v15339_v24, 2  ;;  %v15665_v56 = vsel %vm1337_vm3, %v6796_v16, %v6797_v5  ;;  %v18878_v58 = vrot.slane %v15567_v35, 1 }
 0x59f   : > { %18871 = vst [vmem:[#allocation53_spill] sm:$0xff] %v15640_v47  ;;  %v15647_v1 = vsel %vm1337_vm3, %v18873_v2, %v18872_v40  ;;  %18877 = vst [vmem:[#allocation24_spill] sm:$0xff] %v15665_v56  ;;  %v18879_v40 = vld [vmem:[#allocation27_spill] sm:$0xff]  ;;  %v15675_v47 = vmul.f32 %v18802_v51, %v18822_v53  ;;  %v16932_v24 = vrot.slane %v15651_v60, 2  ;;  %v18884_v51 = vld [vmem:[#allocation62_spill] sm:$0xff] }
 0x5a0   : > { %18874 = vst [vmem:[#allocation90_spill] sm:$0xff] %v15647_v1  ;;  %v15662_v49 = vsel %vm1337_vm3, %v18875_v62, %v16931_v52  ;;  %v18880_v2 = vrot.slane %v18879_v40, 1  ;;  %v16933_v1 = vrot.slane %v15620_v25, 1  ;;  %v18882_v62 = vld [vmem:[#allocation137_spill] sm:$0xff]  ;;  %v18886_v52 = vld [vmem:[#allocation203_spill] sm:$0xff] }
 0x5a1   : > { %18876 = vst [vmem:[#allocation31_spill] sm:$0xff] %v15662_v49  ;;  %18881 = vst [vmem:[#allocation170_spill] sm:$0xff] %v15675_v47  ;;  %6739 = vrot.lane.b32.xlu0 %v18882_v62, %s7978_s8  ;;  %v15684_v16 = vsel %vm1337_vm3, %v6797_v5, %v16932_v24  ;;  %v15686_v40 = vpop.permute.xlu0 %5316  ;;  %v18887_v5 = vld [vmem:[#allocation35_spill] sm:$0xff]  ;;  %v5477_v49 = vstv %s5476_s25  ;;  %s6983_s25 = scalar_lea.sflag [#allocation3], %s15691_s16 }
 0x5a2   : > { %v6697_v15 = vsel %vm924_vm2, %v18880_v2, %v18878_v58  ;;  %18883 = vst [vmem:[#allocation123_spill] sm:$0xff] %v15684_v16  ;;  %v15688_v58 = vpop.permute.xlu1 %5314  ;;  %v18885_v2 = vrot.slane %v18884_v51, 1  ;;  %v5213_v24 = vadd.f32 %v15404_v7, %v18887_v5  ;;  %v18888_v51 = vld [vmem:[#allocation177_spill] sm:$0xff]  ;;  %v18891_v5 = vld [vmem:[#allocation130_spill] sm:$0xff] }
 0x5a3   : > { %6704 = vrot.lane.b32.xlu1 %v6697_v15, %s7978_s8  ;;  %v16937_v15 = vrot.slane %v15675_v47, 2  ;;  %v5739_v56 = vmul.f32 %v18888_v51, %v14288_v4  ;;  %v5740_v7 = vmul.f32 %v18888_v51, %v14359_v41 }
 0x5a4   : > { %v6734_v62 = vsel %vm924_vm2, %v18885_v2, %v16933_v1  ;;  %v18889_v1 = vld [vmem:[#allocation108_spill] sm:$0xff] }
 0x5a5   : > { %6834 = vrot.lane.b32.xlu0 %v18886_v52, %s16969_s2  ;;  %v5350_v36 = vpop.permute.xlu0 %5349  ;;  %v18890_v25 = vrot.slane %v18889_v1, 2  ;;  %v18892_v1 = vld [vmem:[#allocation41_spill] sm:$0xff] }
 0x5a6   : > { %v15705_v16 = vpop.permute.xlu1 %5318  ;;  %v5361_v2 = vadd.f32 %v5350_v36, %v5213_v24  ;;  %v5214_v36 = vadd.f32 %v15440_v23, %v18891_v5  ;;  %v5216_v23 = vadd.f32 %v15478_v57, %v15320_v22  ;;  %v5488_v5 = vstv %s7359_s14  ;;  %v18895_v22 = vld [vmem:[#allocation146_spill] sm:$0xff]  ;;  %s7979_s14 = smov [#allocation10]  }
 0x5a7   : > { %6741 = vrot.lane.b32.xlu1 %v6734_v62, %s7978_s8  ;;  %v6829_v52 = vsel %vm1337_vm3, %v18890_v25, %v16937_v15  ;;  %v5215_v62 = vadd.f32 %v15438_v19, %v15241_v45  ;;  %v5765_v25 = vmul.f32 %v18892_v1, %v14288_v4  ;;  %v18893_v45 = vld [vmem:[#allocation39_spill] sm:$0xff]  ;;  %v5817_v57 = vmul.f32 %v18895_v22, %v14288_v4 }
 0x5a8   : > { %v5478_v24 = vadd.f32 %v5477_v49, %v5361_v2  ;;  %v5250_v19 = vadd.f32 %v15476_v11, %v18893_v45 }
 0x5a9   : > { %5749 = vrot.lane.b32.xlu0 %v5739_v56, %s16969_s2  ;;  %v5354_v47 = vpop.permute.xlu0 %5353 }
 0x5aa   : > { %v5352_v35 = vpop.permute.xlu1 %5351  ;;  %5483 = vst.msk [vmem:[%s15724_s15] sm:$0xff] %vm5482_vm4, %v5478_v24  ;;  %v5363_v56 = vadd.f32 %v5354_v47, %v5215_v62  ;;  %v18894_v47 = vld [vmem:[#allocation87_spill] sm:$0xff]  ;;  %v5766_v62 = vmul.f32 %v18892_v1, %v14359_v41  ;;  %v18896_v1 = vld [vmem:[#allocation202_spill] sm:$0xff] }
 0x5ab   : > { %6836 = vrot.lane.b32.xlu1 %v6829_v52, %s16969_s2  ;;  %v5362_v51 = vadd.f32 %v5352_v35, %v5214_v36  ;;  %v5791_v35 = vmul.f32 %v18894_v47, %v14288_v4  ;;  %v5792_v36 = vmul.f32 %v18894_v47, %v14359_v41  ;;  %v15766_v47 = vmul.f32 %v15525_v14, %v18773_v0 }
 0x5ac   : > { %v5480_v2 = vadd.f32 %v5477_v49, %v5363_v56  ;;  %v18897_v56 = vld [vmem:[#allocation187_spill] sm:$0xff] }
 0x5ad   : > { %5775 = vrot.lane.b32.xlu0 %v5765_v25, %s16969_s2  ;;  %v5479_v52 = vadd.f32 %v5477_v49, %v5362_v51  ;;  %v5387_v15 = vpop.permute.xlu0 %5386  ;;  %v6449_v25 = vmul.f32 %v18896_v1, %v18822_v53  ;;  %v5251_v51 = vadd.f32 %v15518_v37, %v18897_v56  ;;  %v18900_v56 = vrot.slane %v15513_v55, 1 }
 0x5ae   : > { %v5356_v24 = vpop.permute.xlu1 %5355  ;;  %5485 = vst.msk [vmem:[%s15724_s15 + $0x10] sm:$0xff] %vm5482_vm4, %v5480_v2 }
 0x5af   : > { %5751 = vrot.lane.b32.xlu1 %v5740_v7, %s16969_s2  ;;  %5484 = vst.msk [vmem:[%s15724_s15 + $0x8] sm:$0xff] %vm5482_vm4, %v5479_v52  ;;  %v5398_v7 = vadd.f32 %v5387_v15, %v5250_v19  ;;  %v5364_v11 = vadd.f32 %v5356_v24, %v5216_v23  ;;  %v5252_v15 = vadd.f32 %v15516_v29, %v15280_v6 }
 0x5b0   : > { %v15758_v52 = vmul.f32 %v15409_v46, %v18773_v0  ;;  %v15762_v24 = vmul.f32 %v15447_v8, %v18773_v0  ;;  %v15770_v6 = vmul.f32 %v15586_v63, %v18773_v0 }
 0x5b1   : > { %5801 = vrot.lane.b32.xlu0 %v5791_v35, %s7978_s8  ;;  %v5489_v45 = vadd.f32 %v5488_v5, %v5398_v7  ;;  %v5481_v19 = vadd.f32 %v5477_v49, %v5364_v11  ;;  %v5391_v23 = vpop.permute.xlu0 %5390  ;;  %v5499_v49 = vstv %s15728_s26  ;;  %v5818_v35 = vmul.f32 %v18895_v22, %v14359_v41 }
 0x5b2   : > { %v5389_v2 = vpop.permute.xlu1 %5388  ;;  %v5400_v29 = vadd.f32 %v5391_v23, %v5252_v15  ;;  %v6595_v7 = vrot.slane %v15762_v24, 1  ;;  %v6772_v11 = vrot.slane %v15766_v47, 2  ;;  %v18898_v15 = vld [vmem:[#allocation160_spill] sm:$0xff]  ;;  %v5253_v22 = vadd.f32 %v15555_v61, %v15360_v27  ;;  %v18948_v24 = vld [vmem:[#allocation30_spill] sm:$0xff]  ;;  %v18950_v47 = vld [vmem:[#allocation141_spill] sm:$0xff] }
 0x5b3   : > { %5777 = vrot.lane.b32.xlu1 %v5766_v62, %s16969_s2  ;;  %7360 = vst.msk [vmem:[%s15724_s15 + $0x20] sm:$0xff] %vm5482_vm4, %v5489_v45  ;;  %5486 = vst.msk [vmem:[%s15724_s15 + $0x18] sm:$0xff] %vm5482_vm4, %v5481_v19  ;;  %v5399_v37 = vadd.f32 %v5389_v2, %v5251_v51  ;;  %v6566_v62 = vrot.slane %v15758_v52, 1  ;;  %v5287_v51 = vadd.f32 %v15553_v30, %v18898_v15  ;;  %v18899_v23 = vrot.slane %v15472_v48, 1  ;;  %v18904_v15 = vld [vmem:[#allocation38_spill] sm:$0xff] }
 0x5b4   : > { %v5491_v45 = vadd.f32 %v5488_v5, %v5400_v29  ;;  %v15801_v30 = vsel %vm924_vm2, %v18900_v56, %v6595_v7  ;;  %v18901_v27 = vrot.slane %v15551_v13, 2  ;;  %v18902_v29 = vrot.slane %v15770_v6, 2 }
 0x5b5   : > { %5827 = vrot.lane.b32.xlu0 %v5817_v57, %s7978_s8  ;;  %v5490_v57 = vadd.f32 %v5488_v5, %v5399_v37  ;;  %v5424_v19 = vpop.permute.xlu0 %5423  ;;  %v15794_v2 = vsel %vm924_vm2, %v18899_v23, %v6566_v62  ;;  %v18903_v48 = vrot.slane %v15651_v60, 2  ;;  %v6450_v13 = vmul.f32 %v18896_v1, %v18773_v0 }
 0x5b6   : > { %v15808_v61 = vsel %vm1337_vm3, %v18901_v27, %v6772_v11  ;;  %7362 = vst.msk [vmem:[%s15724_s15 + $0x30] sm:$0xff] %vm5482_vm4, %v5491_v45  ;;  %v5435_v55 = vadd.f32 %v5424_v19, %v5287_v51  ;;  %v5289_v60 = vadd.f32 %v15604_v21, %v15323_v59  ;;  %v5288_v45 = vadd.f32 %v15606_v28, %v18904_v15 }
 0x5b7   : > { %5803 = vrot.lane.b32.xlu1 %v5792_v36, %s7978_s8  ;;  %v5393_v36 = vpop.permute.xlu1 %5392  ;;  %v15815_v37 = vsel %vm1337_vm3, %v18903_v48, %v18902_v29  ;;  %7361 = vst.msk [vmem:[%s15724_s15 + $0x28] sm:$0xff] %vm5482_vm4, %v5490_v57  ;;  %v5324_v59 = vadd.f32 %v15653_v17, %v15363_v20  ;;  %v5290_v21 = vadd.f32 %v15655_v34, %v15397_v50 }
 0x5b8   : > { %v5401_v56 = vadd.f32 %v5393_v36, %v5253_v22  ;;  %v5500_v23 = vadd.f32 %v5499_v49, %v5435_v55  ;;  %v5510_v22 = vstv %s7369_s29  ;;  %v6501_v29 = vmul.f32 %v14887_v18, %v18822_v53  ;;  %v18905_v55 = vld [vmem:[#allocation105_spill] sm:$0xff] }
 0x5b9   : > { %6459 = vrot.lane.b32.xlu0 %v6449_v25, %s16969_s2  ;;  %v5428_v57 = vpop.permute.xlu0 %5427  ;;  %v6475_v25 = vmul.f32 %v14884_v10, %v18822_v53  ;;  %v6476_v48 = vmul.f32 %v14884_v10, %v18773_v0  ;;  %v5845_v17 = vmul.f32 %v15133_v42, %v14710_v38  ;;  %v5326_v34 = vadd.f32 %v15686_v40, %v15400_v32 }
 0x5ba   : > { %v5492_v27 = vadd.f32 %v5488_v5, %v5401_v56  ;;  %7365 = vst.msk [vmem:[%s15724_s15 + $0x40] sm:$0xff] %vm5482_vm4, %v5500_v23  ;;  %v5437_v1 = vadd.f32 %v5428_v57, %v5289_v60  ;;  %v15860_v10 = vstv %s15825_s12  ;;  %v5325_v56 = vadd.f32 %v15688_v58, %v18905_v55  ;;  %v18912_v55 = vld [vmem:[#allocation181_spill] sm:$0xff] }
 0x5bb   : > { %5829 = vrot.lane.b32.xlu1 %v5818_v35, %s7978_s8  ;;  %v5426_v51 = vpop.permute.xlu1 %5425  ;;  %v5858_v15 = vrot.slane %v5845_v17, 1  ;;  %v6527_v42 = vmul.f32 %v14922_v43, %v18822_v53  ;;  %v6502_v32 = vmul.f32 %v14887_v18, %v18773_v0  ;;  %v5874_v57 = vmul.f32 %v15171_v44, %v14710_v38 }
 0x5bc   : > { %7363 = vst.msk [vmem:[%s15724_s15 + $0x38] sm:$0xff] %vm5482_vm4, %v5492_v27  ;;  %v5436_v35 = vadd.f32 %v5426_v51, %v5288_v45  ;;  %v5502_v28 = vadd.f32 %v5499_v49, %v5437_v1  ;;  %v5717_v18 = vmul.f32 %v15860_v10, %v18770_v31  ;;  %v5327_v51 = vadd.f32 %v15705_v16, %v15434_v26  ;;  %v18909_v26 = vld [vmem:[#allocation199_spill] sm:$0xff] }
 0x5bd   : > { %6485 = vrot.lane.b32.xlu0 %v6475_v25, %s16969_s2  ;;  %v5461_v19 = vpop.permute.xlu0 %5460  ;;  %v18910_v16 = vrot.slane %v18909_v26, 1 }
 0x5be   : > { %v5501_v5 = vadd.f32 %v5499_v49, %v5436_v35  ;;  %7367 = vst.msk [vmem:[%s15724_s15 + $0x50] sm:$0xff] %vm5482_vm4, %v5502_v28  ;;  %v5472_v20 = vadd.f32 %v5461_v19, %v5324_v59  ;;  %v5887_v35 = vrot.slane %v5874_v57, 1  ;;  %v15888_v28 = vstv %s15847_s0  ;;  %v18907_v19 = vld [vmem:[#allocation169_spill] sm:$0xff] }
 0x5bf   : > { %6461 = vrot.lane.b32.xlu1 %v6450_v13, %s16969_s2  ;;  %v5430_v36 = vpop.permute.xlu1 %5429  ;;  %v5728_v57 = vmul.f32 %v15888_v28, %v18912_v55 }
 0x5c0   : > { %7366 = vst.msk [vmem:[%s15724_s15 + $0x48] sm:$0xff] %vm5482_vm4, %v5501_v5  ;;  %v5438_v50 = vadd.f32 %v5430_v36, %v5290_v21  ;;  %v5511_v13 = vadd.f32 %v5510_v22, %v5472_v20  ;;  %v6528_v21 = vmul.f32 %v14922_v43, %v18773_v0  ;;  %v18908_v36 = vrot.slane %v18907_v19, 1 }
 0x5c1   : > { %6511 = vrot.lane.b32.xlu0 %v6501_v29, %s7978_s8  ;;  %v5465_v45 = vpop.permute.xlu0 %5464  ;;  %v6051_v43 = vmul.f32 %v15251_v54, %v14710_v38 }
 0x5c2   : > { %v5503_v60 = vadd.f32 %v5499_v49, %v5438_v50  ;;  %7370 = vst.msk [vmem:[%s15724_s15 + $0x60] sm:$0xff] %vm5482_vm4, %v5511_v13  ;;  %v5474_v40 = vadd.f32 %v5465_v45, %v5326_v34  ;;  %v18906_v49 = vrot.slane %v15583_v3, 1  ;;  %v5915_v29 = vsel %vm924_vm2, %v18910_v16, %v18908_v36 }
 0x5c3   : > { %6487 = vrot.lane.b32.xlu1 %v6476_v48, %s16969_s2  ;;  %v5463_v23 = vpop.permute.xlu1 %5462  ;;  %v18911_v48 = vrot.slane %v15598_v33, 1  ;;  %v6080_v50 = vmul.f32 %v15288_v12, %v14710_v38  ;;  %v5727_v34 = vmul.f32 %v15888_v28, %v18770_v31  ;;  %v5718_v33 = vmul.f32 %v15860_v10, %v18912_v55  ;;  %v18917_v31 = vld [vmem:[#allocation22_spill] sm:$0xff]  ;;  %v18931_v55 = vld [vmem:[#allocation107_spill] sm:$0xff] }
 0x5c4   : > { %7368 = vst.msk [vmem:[%s15724_s15 + $0x58] sm:$0xff] %vm5482_vm4, %v5503_v60  ;;  %v5473_v58 = vadd.f32 %v5463_v23, %v5325_v56  ;;  %v15875_v27 = vsel %vm924_vm2, %v18906_v49, %v5858_v15  ;;  %v5513_v25 = vadd.f32 %v5510_v22, %v5474_v40  ;;  %v6064_v60 = vrot.slane %v6051_v43, 2  ;;  %v18928_v43 = vld [vmem:[#allocation161_spill] sm:$0xff] }
 0x5c5   : > { %6537 = vrot.lane.b32.xlu0 %v6527_v42, %s7978_s8  ;;  %v5746_v59 = vpop.permute.xlu0 %5745  ;;  %v15902_v20 = vsel %vm924_vm2, %v18911_v48, %v5887_v35  ;;  %v6093_v15 = vrot.slane %v6080_v50, 2  ;;  %v18913_v42 = vld [vmem:[#allocation138_spill] sm:$0xff]  ;;  %v18918_v12 = vrot.slane %v15602_v39, 2  ;;  %v18920_v35 = vld [vmem:[#allocation97_spill] sm:$0xff]  ;;  %v18926_v48 = vld [vmem:[#allocation128_spill] sm:$0xff]  ;;  %v18929_v50 = vrot.slane %v18928_v43, 1 }
 0x5c6   : > { %v5512_v1 = vadd.f32 %v5510_v22, %v5473_v58  ;;  %7372 = vst.msk [vmem:[%s15724_s15 + $0x70] sm:$0xff] %vm5482_vm4, %v5513_v25  ;;  %v5757_v5 = vadd.f32 %v5746_v59, %v5717_v18  ;;  %v18914_v54 = vrot.slane %v18913_v42, 1  ;;  %v18919_v58 = vrot.slane %v15611_v9, 2  ;;  %v18922_v59 = vld [vmem:[#allocation103_spill] sm:$0xff]  ;;  %v18924_v9 = vld [vmem:[#allocation28_spill] sm:$0xff] }
 0x5c7   : > { %6513 = vrot.lane.b32.xlu1 %v6502_v32, %s7978_s8  ;;  %v5467_v3 = vpop.permute.xlu1 %5466  ;;  %v18915_v32 = vld [vmem:[#allocation148_spill] sm:$0xff] }
 0x5c8   : > { %7371 = vst.msk [vmem:[%s15724_s15 + $0x68] sm:$0xff] %vm5482_vm4, %v5512_v1  ;;  %v5475_v44 = vadd.f32 %v5467_v3, %v5327_v51  ;;  %v18916_v40 = vrot.slane %v18915_v32, 1  ;;  %v15932_v49 = vsel %vm1337_vm3, %v18919_v58, %v6093_v15  ;;  %v18921_v3 = vrot.slane %v18920_v35, 1  ;;  %v18939_v58 = vld [vmem:[#allocation73_spill] sm:$0xff] }
 0x5c9   : > { %5922 = vrot.lane.b32.xlu0 %v5915_v29, %s16969_s2  ;;  %v5772_v56 = vpop.permute.xlu0 %5771 }
 0x5ca   : > { %v5514_v17 = vadd.f32 %v5510_v22, %v5475_v44  ;;  %v5783_v45 = vadd.f32 %v5772_v56, %v5727_v34  ;;  %v5952_v38 = vsel %vm924_vm2, %v18916_v40, %v18914_v54  ;;  %v15927_v22 = vsel %vm1337_vm3, %v18918_v12, %v6064_v60  ;;  %v18925_v44 = vld [vmem:[#allocation113_spill] sm:$0xff]  ;;  %v18930_v34 = vld [vmem:[#allocation104_spill] sm:$0xff] }
 0x5cb   : > { %6539 = vrot.lane.b32.xlu1 %v6528_v21, %s7978_s8  ;;  %v5748_v13 = vpop.permute.xlu1 %5747  ;;  %v18923_v21 = vrot.slane %v18922_v59, 1  ;;  %v18932_v56 = vld [vmem:[#allocation112_spill] sm:$0xff]  ;;  %v18935_v54 = vld [vmem:[#allocation21_spill] sm:$0xff]  ;;  %v18940_v59 = vld [vmem:[#allocation154_spill] sm:$0xff] }
 0x5cc   : > { %7373 = vst.msk [vmem:[%s15724_s15 + $0x78] sm:$0xff] %vm5482_vm4, %v5514_v17  ;;  %v5758_v23 = vadd.f32 %v5748_v13, %v5718_v33  ;;  %v18936_v32 = vrot.slane %v18935_v54, 2  ;;  %s7866_s15 = sshll.u32 %s7979_s14, 4  ;;  %s7867_s15 = int_to_ptr.vmem [resolvable:$false] %s7866_s15 }
 0x5cd   : > { %5959 = vrot.lane.b32.xlu0 %v5952_v38, %s16969_s2  ;;  %v5798_v18 = vpop.permute.xlu0 %5797  ;;  %v5989_v39 = vsel %vm924_vm2, %v18923_v21, %v18921_v3  ;;  %v18937_v38 = vld [vmem:[#allocation80_spill] sm:$0xff]  ;;  %v18941_v21 = vrot.slane %v18940_v59, 2  ;;  %v18961_v59 = vld [vmem:[#allocation159_spill] sm:$0xff]  ;;  %s7868_s26 = scalar_lea.vmem %s7867_s15, 4096  ;;  %p7869_p2 = scmp.lt.s32.totalorder %s16125_s30, %s7867_s15 }
 0x5ce   : > { %v5809_v25 = vadd.f32 %v5798_v18, %v5757_v5  ;;  %v18927_v5 = vrot.slane %v18926_v48, 1  ;;  %p7870_p3 = scmp.lt.s32.totalorder %s7868_s26, %s7862_s4 }
 0x5cf   : > { %5924 = vrot.lane.b32.xlu1 %v18917_v31, %s16969_s2  ;;  %v5774_v51 = vpop.permute.xlu1 %5773  ;;  %v18938_v31 = vld [vmem:[#allocation84_spill] sm:$0xff] }
 0x5d0   : > { %v5784_v1 = vadd.f32 %v5774_v51, %v5728_v57  ;;  %v5864_v19 = vadd.f32 %v18925_v44, %v5809_v25  ;;  %v6026_v17 = vsel %vm924_vm2, %v18929_v50, %v18927_v5  ;;  %v6555_v12 = vmul.f32 %v15409_v46, %v18938_v31  ;;  %p7871_p4 = por %p7870_p3, %p7869_p2 }
 0x5d1   : > { %5996 = vrot.lane.b32.xlu0 %v5989_v39, %s7978_s8  ;;  %v5824_v36 = vpop.permute.xlu0 %5823  ;;  %v6584_v18 = vmul.f32 %v15447_v8, %v18938_v31  ;;  %v6761_v51 = vmul.f32 %v15525_v14, %v18938_v31  ;;  %v6790_v25 = vmul.f32 %v15586_v63, %v18938_v31  ;;  %v18942_v39 = vld [vmem:[#allocation51_spill] sm:$0xff]  ;;  %v18944_v14 = vld [vmem:[#allocation89_spill] sm:$0xff]  ;;  %v18949_v50 = vrot.slane %v18948_v24, 2 }
 0x5d2   : > { %v5835_v16 = vadd.f32 %v5824_v36, %v5783_v45  ;;  %v6568_v3 = vrot.slane %v6555_v12, 1  ;;  %v18943_v46 = vrot.slane %v18942_v39, 2  ;;  %v18963_v39 = vld [vmem:[#allocation110_spill] sm:$0xff]  ;;  %v18970_v24 = vld [vmem:[#allocation145_spill] sm:$0xff]  ;;  %p7872_p9 = pnand %p7871_p4, %p7865_p1 }
 0x5d3   : > { %5961 = vrot.lane.b32.xlu1 %v18924_v9, %s16969_s2  ;;  %v5800_v26 = vpop.permute.xlu1 %5799  ;;  %v6597_v44 = vrot.slane %v6584_v18, 1  ;;  %v6774_v36 = vrot.slane %v6761_v51, 2  ;;  %v6803_v8 = vrot.slane %v6790_v25, 2 }
 0x5d4   : > { %v5810_v29 = vadd.f32 %v5800_v26, %v5758_v23  ;;  %v5893_v33 = vadd.f32 %v18931_v55, %v5835_v16  ;;  %v18933_v23 = vld [vmem:[#allocation64_spill] sm:$0xff]  ;;  %v6158_v9 = vsel %vm1337_vm3, %v18943_v46, %v18941_v21  ;;  %v15989_v63 = vsel %vm924_vm2, %v6566_v62, %v6568_v3  ;;  %v18946_v62 = vld [vmem:[#allocation131_spill] sm:$0xff]  ;;  %v18953_v55 = vld [vmem:[#allocation106_spill] sm:$0xff] }
 0x5d5   : > { %6033 = vrot.lane.b32.xlu0 %v6026_v17, %s7978_s8  ;;  %v15955_v60 = vpop.permute.xlu0 %6455  ;;  %v18934_v42 = vrot.slane %v18933_v23, 2  ;;  %v15994_v26 = vsel %vm924_vm2, %v6595_v7, %v6597_v44  ;;  %v15999_v16 = vsel %vm1337_vm3, %v6772_v11, %v6774_v36  ;;  %v18947_v43 = vrot.slane %v18946_v62, 2  ;;  %v18951_v17 = vld [vmem:[#allocation183_spill] sm:$0xff] }
 0x5d6   : > { %v5865_v13 = vadd.f32 %v18932_v56, %v5810_v29  ;;  %v18945_v29 = vrot.slane %v15770_v6, 2  ;;  %v18954_v56 = vrot.slane %v18953_v55, 2  ;;  %v18962_v21 = vrot.slane %v18961_v59, 1  ;;  %v18981_v59 = vld [vmem:[#allocation170_spill] sm:$0xff] }
 0x5d7   : > { %5998 = vrot.lane.b32.xlu1 %v18930_v34, %s7978_s8  ;;  %v5826_v15 = vpop.permute.xlu1 %5825  ;;  %v6121_v40 = vsel %vm1337_vm3, %v18936_v32, %v18934_v42  ;;  %v6195_v7 = vsel %vm1337_vm3, %v18949_v50, %v18947_v43  ;;  %v18952_v34 = vrot.slane %v18951_v17, 2  ;;  %v18956_v32 = vld [vmem:[#allocation46_spill] sm:$0xff]  ;;  %v18964_v46 = vrot.slane %v18963_v39, 1  ;;  %v18968_v43 = vld [vmem:[#allocation173_spill] sm:$0xff]  ;;  %v18971_v50 = vld [vmem:[#allocation36_spill] sm:$0xff] }
 0x5d8   : > { %v5836_v45 = vadd.f32 %v5826_v15, %v5784_v1  ;;  %v16004_v48 = vsel %vm1337_vm3, %v18945_v29, %v6803_v8  ;;  %v18966_v29 = vld [vmem:[#allocation186_spill] sm:$0xff] }
 0x5d9   : > { %6128 = vrot.lane.b32.xlu0 %v6121_v40, %s16969_s2  ;;  %v15974_v1 = vpop.permute.xlu0 %6481  ;;  %v6232_v15 = vsel %vm1337_vm3, %v18954_v56, %v18952_v34  ;;  %v18957_v40 = vrot.slane %v18956_v32, 1  ;;  %v18967_v62 = vrot.slane %v18966_v29, 1  ;;  %v18972_v56 = vld [vmem:[#allocation98_spill] sm:$0xff]  ;;  %v18977_v32 = vld [vmem:[#allocation157_spill] sm:$0xff] }
 0x5da   : > { %v5894_v57 = vadd.f32 %v18939_v58, %v5836_v45  ;;  %v18955_v45 = vld [vmem:[#allocation196_spill] sm:$0xff]  ;;  %v18960_v58 = vld [vmem:[#allocation198_spill] sm:$0xff] }
 0x5db   : > { %6035 = vrot.lane.b32.xlu1 %v18937_v38, %s7978_s8  ;;  %v15976_v35 = vpop.permute.xlu1 %6457  ;;  %v18958_v38 = vld [vmem:[#allocation140_spill] sm:$0xff] }
 0x5dc   : > { %v18959_v31 = vrot.slane %v18958_v38, 1  ;;  %v18978_v38 = vld [vmem:[#allocation66_spill] sm:$0xff] }
 0x5dd   : > { %6165 = vrot.lane.b32.xlu0 %v6158_v9, %s16969_s2  ;;  %v16006_v5 = vpop.permute.xlu0 %6507  ;;  %v18965_v9 = vld [vmem:[#allocation134_spill] sm:$0xff] }
 0x5de   : > { %v6625_v12 = vsel %vm924_vm2, %v18959_v31, %v18957_v40 }
 0x5df   : > { %6130 = vrot.lane.b32.xlu1 %v18944_v14, %s16969_s2  ;;  %v16008_v52 = vpop.permute.xlu1 %6483 }
 0x5e1   : > { %6202 = vrot.lane.b32.xlu0 %v6195_v7, %s7978_s8  ;;  %v16018_v11 = vpop.permute.xlu0 %6533 }
 0x5e3   : > { %6167 = vrot.lane.b32.xlu1 %v18950_v47, %s16969_s2  ;;  %v16020_v6 = vpop.permute.xlu1 %6509 }
 0x5e5   : > { %6239 = vrot.lane.b32.xlu0 %v6232_v15, %s7978_s8  ;;  %v5919_v23 = vpop.permute.xlu0 %5918  ;;  %v18973_v15 = vrot.slane %v18972_v56, 1 }
 0x5e6   : > { %v5930_v54 = vadd.f32 %v5919_v23, %v5864_v19  ;;  %v6662_v19 = vsel %vm924_vm2, %v18964_v46, %v18962_v21  ;;  %v18982_v21 = vrot.slane %v18981_v59, 2  ;;  %v18983_v46 = vld [vmem:[#allocation178_spill] sm:$0xff] }
 0x5e7   : > { %6204 = vrot.lane.b32.xlu1 %v18955_v45, %s7978_s8  ;;  %v16030_v42 = vpop.permute.xlu1 %6535 }
 0x5e9   : > { %6632 = vrot.lane.b32.xlu0 %v6625_v12, %s16969_s2  ;;  %v5956_v18 = vpop.permute.xlu0 %5955 }
 0x5ea   : > { %v5967_v25 = vadd.f32 %v5956_v18, %v5893_v33  ;;  %v18969_v33 = vrot.slane %v18968_v43, 1  ;;  %v16080_v43 = vstv %s7407_s22 }
 0x5eb   : > { %6241 = vrot.lane.b32.xlu1 %v18960_v58, %s7978_s8  ;;  %v5921_v51 = vpop.permute.xlu1 %5920 }
 0x5ec   : > { %v5931_v3 = vadd.f32 %v5921_v51, %v5865_v13  ;;  %v6699_v13 = vsel %vm924_vm2, %v18969_v33, %v18967_v62  ;;  %v18986_v62 = vld [vmem:[#allocation164_spill] sm:$0xff] }
 0x5ed   : > { %6669 = vrot.lane.b32.xlu0 %v6662_v19, %s16969_s2  ;;  %v5993_v44 = vpop.permute.xlu0 %5992  ;;  %v18984_v19 = vld [vmem:[#allocation171_spill] sm:$0xff] }
 0x5ee   : > { %v6004_v8 = vadd.f32 %v5993_v44, %v5930_v54  ;;  %v18976_v54 = vld [vmem:[#allocation158_spill] sm:$0xff] }
 0x5ef   : > { %6634 = vrot.lane.b32.xlu1 %v18965_v9, %s16969_s2  ;;  %v5958_v36 = vpop.permute.xlu1 %5957 }
 0x5f0   : > { %v5968_v14 = vadd.f32 %v5958_v36, %v5894_v57  ;;  %v6070_v7 = vadd.f32 %v18971_v50, %v6004_v8  ;;  %v18974_v57 = vld [vmem:[#allocation133_spill] sm:$0xff] }
 0x5f1   : > { %6706 = vrot.lane.b32.xlu0 %v6699_v13, %s7978_s8  ;;  %v6030_v47 = vpop.permute.xlu0 %6029  ;;  %v18975_v45 = vrot.slane %v18974_v57, 1 }
 0x5f2   : > { %v6041_v34 = vadd.f32 %v6030_v47, %v5967_v25  ;;  %v18979_v25 = vld [vmem:[#allocation75_spill] sm:$0xff] }
 0x5f3   : > { %6671 = vrot.lane.b32.xlu1 %v18970_v24, %s16969_s2  ;;  %v5995_v17 = vpop.permute.xlu1 %5994  ;;  %v6736_v23 = vsel %vm924_vm2, %v18975_v45, %v18973_v15  ;;  %v18987_v24 = vld [vmem:[#allocation82_spill] sm:$0xff] }
 0x5f4   : > { %v6005_v55 = vadd.f32 %v5995_v17, %v5931_v3  ;;  %v6099_v40 = vadd.f32 %v18977_v32, %v6041_v34  ;;  %v18980_v3 = vrot.slane %v18979_v25, 2  ;;  %v6427_v50 = vmul.f32 %v16080_v43, %v18987_v24  ;;  %v18988_v34 = vld [vmem:[#allocation25_spill] sm:$0xff]  ;;  %v18990_v32 = vld [vmem:[#allocation144_spill] sm:$0xff] }
 0x5f5   : > { %6743 = vrot.lane.b32.xlu0 %v6736_v23, %s7978_s8  ;;  %v6125_v12 = vpop.permute.xlu0 %6124  ;;  %v16084_v17 = vstv %s7408_s9 }
 0x5f6   : > { %v6071_v31 = vadd.f32 %v18978_v38, %v6005_v55  ;;  %v6136_v18 = vadd.f32 %v6125_v12, %v6070_v7  ;;  %v6831_v39 = vsel %vm1337_vm3, %v18982_v21, %v18980_v3  ;;  %v18989_v55 = vld [vmem:[#allocation42_spill] sm:$0xff]  ;;  %v6437_v15 = vmul.f32 %v16084_v17, %v18987_v24  ;;  %v18992_v12 = vld [vmem:[#allocation100_spill] sm:$0xff] }
 0x5f7   : > { %6708 = vrot.lane.b32.xlu1 %v18976_v54, %s7978_s8  ;;  %v6032_v58 = vpop.permute.xlu1 %6031  ;;  %v6438_v3 = vmul.f32 %v16084_v17, %v18990_v32 }
 0x5f8   : > { %v6042_v51 = vadd.f32 %v6032_v58, %v5968_v14  ;;  %v18985_v14 = vld [vmem:[#allocation26_spill] sm:$0xff] }
 0x5f9   : > { %6838 = vrot.lane.b32.xlu0 %v6831_v39, %s16969_s2  ;;  %v6162_v44 = vpop.permute.xlu0 %6161  ;;  %v18993_v39 = vld [vmem:[#allocation102_spill] sm:$0xff] }
 0x5fa   : > { %v6100_v9 = vadd.f32 %v18984_v19, %v6042_v51  ;;  %v6173_v8 = vadd.f32 %v6162_v44, %v6099_v40  ;;  %v6428_v40 = vmul.f32 %v16080_v43, %v18990_v32  ;;  %v18995_v44 = vld [vmem:[#allocation19_spill] sm:$0xff] }
 0x5fb   : > { %6745 = vrot.lane.b32.xlu1 %v18983_v46, %s7978_s8  ;;  %v6127_v36 = vpop.permute.xlu1 %6126 }
 0x5fc   : > { %v6137_v29 = vadd.f32 %v6127_v36, %v6071_v31  ;;  %v18991_v31 = vld [vmem:[#allocation197_spill] sm:$0xff] }
 0x5fd   : > { %6871 = vrot.lane.b32.xlu0 %v18985_v14, %s16969_s2  ;;  %v6199_v33 = vpop.permute.xlu0 %6198 }
 0x5fe   : > { %v6210_v7 = vadd.f32 %v6199_v33, %v6136_v18 }
 0x5ff   : > { %6840 = vrot.lane.b32.xlu1 %v18986_v62, %s16969_s2  ;;  %v6164_v13 = vpop.permute.xlu1 %6163  ;;  %v18996_v62 = vld [vmem:[#allocation127_spill] sm:$0xff] }
 0x600   : > { %v6174_v47 = vadd.f32 %v6164_v13, %v6100_v9  ;;  %v6431_v56 = vadd.f32 %v6427_v50, %v6210_v7  ;;  %v18994_v9 = vld [vmem:[#allocation165_spill] sm:$0xff]  ;;  %v18997_v13 = vld [vmem:[#allocation195_spill] sm:$0xff]  ;;  %v18999_v7 = vld [vmem:[#allocation150_spill] sm:$0xff] }
 0x601   : > { %6875 = vrot.lane.b32.xlu0 %v18988_v34, %s16969_s2  ;;  %v6236_v57 = vpop.permute.xlu0 %6235  ;;  %v18998_v50 = vld [vmem:[#allocation143_spill] sm:$0xff] }
 0x602   : > { %v6467_v23 = vadd.f32 %v15955_v60, %v6431_v56  ;;  %v6247_v54 = vadd.f32 %v6236_v57, %v6173_v8 }
 0x603   : > { %6873 = vrot.lane.b32.xlu1 %v18989_v55, %s16969_s2  ;;  %v6201_v45 = vpop.permute.xlu1 %6200 }
 0x604   : > { %v6211_v38 = vadd.f32 %v6201_v45, %v6137_v29  ;;  %v6441_v58 = vadd.f32 %v6437_v15, %v6247_v54  ;;  %v6519_v51 = vadd.f32 %v16006_v5, %v6467_v23 }
 0x605   : > { %6908 = vrot.lane.b32.xlu0 %v18991_v31, %s7978_s8  ;;  %v6629_v25 = vpop.permute.xlu0 %6628 }
 0x606   : > { %v6432_v18 = vadd.f32 %v6428_v40, %v6211_v38  ;;  %v6493_v59 = vadd.f32 %v15974_v1, %v6441_v58  ;;  %v6574_v46 = vadd.f32 %v18993_v39, %v6519_v51 }
 0x607   : > { %6877 = vrot.lane.b32.xlu1 %v18992_v12, %s16969_s2  ;;  %v6238_v60 = vpop.permute.xlu1 %6237  ;;  %s7440_s2 = sshll.u32 %s8064_s21, 11 }
 0x608   : > { %v6468_v21 = vadd.f32 %v15976_v35, %v6432_v18  ;;  %v6248_v19 = vadd.f32 %v6238_v60, %v6174_v47  ;;  %v6640_v5 = vadd.f32 %v6629_v25, %v6574_v46  ;;  %v6545_v8 = vadd.f32 %v16018_v11, %v6493_v59  ;;  %s16123_s13 = scalar_lea.hbm %s16292_s10, %s7440_s2 }
 0x609   : > { %6912 = vrot.lane.b32.xlu0 %v18994_v9, %s7978_s8  ;;  %v6666_v14 = vpop.permute.xlu0 %6665 }
 0x60a   : > { %v6442_v36 = vadd.f32 %v6438_v3, %v6248_v19  ;;  %v6520_v29 = vadd.f32 %v16020_v6, %v6468_v21  ;;  %v6603_v33 = vadd.f32 %v18996_v62, %v6545_v8 }
 0x60b   : > { %6910 = vrot.lane.b32.xlu1 %v18995_v44, %s7978_s8  ;;  %v6631_v1 = vpop.permute.xlu1 %6630 }
 0x60c   : > { %v6494_v35 = vadd.f32 %v16008_v52, %v6442_v36  ;;  %v6575_v24 = vadd.f32 %v18997_v13, %v6520_v29  ;;  %v6677_v52 = vadd.f32 %v6666_v14, %v6603_v33 }
 0x60d   : > { %6945 = vrot.lane.b32.xlu0 %v18998_v50, %s7978_s8  ;;  %v6703_v47 = vpop.permute.xlu0 %6702 }
 0x60e   : > { %v6641_v11 = vadd.f32 %v6631_v1, %v6575_v24  ;;  %v6546_v6 = vadd.f32 %v16030_v42, %v6494_v35 }
 0x60f   : > { %6914 = vrot.lane.b32.xlu1 %v18999_v7, %s7978_s8  ;;  %v6668_v34 = vpop.permute.xlu1 %6667 }
 0x610   : > { %7875 = shalt.err (!%p7872_p9)
}
 0x611   : > { %s7876_s29 = scalar_lea.hbm %s16123_s13, 2048  ;;  %s7880_s22 = scalar_lea.hbm %s16292_s10, 4096 }
 0x612   : > { %p7877_p7 = scmp.ne.s32.totalorder %s16123_s13, %s7876_s29  ;;  %p7881_p6 = scmp.lt.u32.totalorder %s16123_s13, %s16292_s10 }
 0x613   : > { %p7882_p12 = scmp.lt.u32.totalorder %s7880_s22, %s7876_s29  ;;  %p7884_p8 = scmp.lt.u32.totalorder %s7876_s29, %s16123_s13 }
 0x614   : > { %p7878_p0 = pnand %p7877_p7, %p19000_p11 }
 0x615   : > { %p7883_p10 = por %p7882_p12, %p7881_p6 }
 0x616   : > { %p7879_p5 = pneg %p7878_p0 }
 0x617   : > { %p7885_p13 = por %p7884_p8, %p7883_p10 }
 0x619   : > { %p7886_p1 = pnand %p7885_p13, %p7879_p5 }
 0x61b   : > { %7889 = shalt.err (!%p7886_p1)
}
 0x61c   : > { %s7980_s3 = smov 128   ;;  %s7981_s24 = smov 8   ;;  %v6714_v42 = vadd.f32 %v6703_v47, %v6640_v5  ;;  %v19001_v55 = vld [vmem:[#allocation118_spill] sm:$0xff]  ;;  %v19002_v15 = vld [vmem:[#allocation153_spill] sm:$0xff]  ;;  %v19003_v57 = vld [vmem:[#allocation116_spill] sm:$0xff]  ;;  %v6740_v32 = vpop.permute.xlu0 %6739  ;;  %v6705_v40 = vpop.permute.xlu1 %6704  ;;  %v5719_v39 = vmul.f32 %v15860_v10, %v14288_v4  ;;  %v5729_v8 = vmul.f32 %v15888_v28, %v14288_v4  ;;  %v5720_v29 = vmul.f32 %v15860_v10, %v14359_v41 }
 0x61d   : > { %7722 = dma.vmem_to_hbm [thread:$0]  (%p19000_p11), %s16125_s30, 2048, %s16123_s13, %s6983_s25, %s7980_s3, %s7980_s3, %s7981_s24   ;;  %v6604_v56 = vadd.f32 %v19001_v55, %v6546_v6  ;;  %v19004_v23 = vld [vmem:[#allocation49_spill] sm:$0xff]  ;;  %v6751_v38 = vadd.f32 %v6740_v32, %v6677_v52  ;;  %v6715_v31 = vadd.f32 %v6705_v40, %v6641_v11  ;;  %v19006_v58 = vld [vmem:[#allocation111_spill] sm:$0xff]  ;;  %v19007_v51 = vld [vmem:[#allocation24_spill] sm:$0xff]  ;;  %v5730_v33 = vmul.f32 %v15888_v28, %v14359_v41 }
 0x61e   : > { %6949 = vrot.lane.b32.xlu0 %v19002_v15, %s7978_s8  ;;  %6947 = vrot.lane.b32.xlu1 %v19003_v57, %s7978_s8  ;;  %v6780_v54 = vadd.f32 %v19004_v23, %v6714_v42  ;;  %v19005_v12 = vld [vmem:[#allocation109_spill] sm:$0xff]  ;;  %v19008_v46 = vld [vmem:[#allocation123_spill] sm:$0xff]  ;;  %s7177_s30 = sshll.u32 %s15691_s16, 6  ;;  %s7425_s13 = sld [smem:[#allocation8 + $0x1]] }
 0x61f   : > { %v6678_v45 = vadd.f32 %v6668_v34, %v6604_v56  ;;  %v6781_v18 = vadd.f32 %v19006_v58, %v6715_v31  ;;  %v16165_v25 = vadd.f32 %v19007_v51, %v6751_v38  ;;  %v19009_v52 = vld [vmem:[#allocation85_spill] sm:$0xff]  ;;  %s16208_s25 = scalar_lea.vmem [#allocation11], %s7177_s30  ;;  %s7441_s4 = sshll.u32 %s8064_s21, 10 }
 0x620   : > { %v6835_v3 = vpop.permute.xlu0 %6834  ;;  %v6742_v60 = vpop.permute.xlu1 %6741  ;;  %v19010_v42 = vld [vmem:[#allocation53_spill] sm:$0xff]  ;;  %s7017_s14 = sshll.u32 %s16208_s25, 4  ;;  %s16232_s29 = scalar_lea.hbm %s16293_s11, %s7441_s4  ;;  %s16234_s14 = int_to_ptr.vmem [resolvable:$true] %s7017_s14 }
 0x621   : > { %v16167_v59 = vadd.f32 %v6835_v3, %v6780_v54  ;;  %v6752_v21 = vadd.f32 %v6742_v60, %v6678_v45  ;;  %s6988_s21 = scalar_lea.sflag [#allocation12], %s15691_s16  ;;  %s7890_s12 = scalar_lea.vmem %s16234_s14, 1024 }
 0x622   : > { %6951 = vrot.lane.b32.xlu1 %v19005_v12, %s7978_s8  ;;  %s6961_s8 = sld [smem:[#allocation8]]  ;;  %p7891_p2 = scmp.ne.s32.totalorder %s16234_s14, %s7890_s12 }
 0x623   : > { %v16172_v19 = vadd.f32 %v19008_v46, %v6752_v21  ;;  %s7982_s0 = smov [#allocation11]  }
 0x624   : > { %v6837_v9 = vpop.permute.xlu1 %6836  ;;  %v5750_v44 = vpop.permute.xlu0 %5749  ;;  %p7892_p3 = pnand %p7891_p2, %p19000_p11  ;;  %s7894_s22 = sshll.u32 %s7982_s0, 4  ;;  %s7895_s22 = int_to_ptr.vmem [resolvable:$false] %s7894_s22 }
 0x625   : > { %v16174_v5 = vadd.f32 %v6837_v9, %v6781_v18  ;;  %v5759_v36 = vadd.f32 %v5750_v44, %v5719_v39  ;;  %v19011_v39 = vld [vmem:[#allocation90_spill] sm:$0xff]  ;;  %s7896_s9 = scalar_lea.vmem %s7895_s22, 2048  ;;  %p7897_p9 = scmp.lt.s32.totalorder %s16234_s14, %s7895_s22 }
 0x626   : > { %p7893_p4 = pneg %p7892_p3  ;;  %p7898_p7 = scmp.lt.s32.totalorder %s7896_s9, %s7890_s12 }
 0x628   : > { %v5776_v14 = vpop.permute.xlu0 %5775  ;;  %v5752_v1 = vpop.permute.xlu1 %5751  ;;  %p7899_p0 = por %p7898_p7, %p7897_p9 }
 0x629   : > { %v5785_v35 = vadd.f32 %v5776_v14, %v5729_v8  ;;  %v5760_v62 = vadd.f32 %v5752_v1, %v5720_v29  ;;  %v19012_v29 = vld [vmem:[#allocation31_spill] sm:$0xff] }
 0x62a   : > { %p7900_p5 = pnand %p7899_p0, %p7893_p4 }
 0x62c   : > { %v5802_v13 = vpop.permute.xlu0 %5801  ;;  %v5778_v24 = vpop.permute.xlu1 %5777 }
 0x62d   : > { %v5811_v50 = vadd.f32 %v5802_v13, %v5759_v36  ;;  %v5786_v7 = vadd.f32 %v5778_v24, %v5730_v33 }
 0x62f   : > { %v5866_v11 = vadd.f32 %v19009_v52, %v5811_v50 }
 0x630   : > { %v5828_v6 = vpop.permute.xlu0 %5827  ;;  %v5804_v47 = vpop.permute.xlu1 %5803 }
 0x631   : > { %v5837_v34 = vadd.f32 %v5828_v6, %v5785_v35  ;;  %v5812_v4 = vadd.f32 %v5804_v47, %v5760_v62  ;;  %v6429_v6 = vmul.f32 %v16080_v43, %v18822_v53 }
 0x633   : > { %v5895_v55 = vadd.f32 %v19010_v42, %v5837_v34  ;;  %v5867_v10 = vadd.f32 %v15875_v27, %v5812_v4 }
 0x634   : > { %v6460_v56 = vpop.permute.xlu0 %6459  ;;  %v5830_v15 = vpop.permute.xlu1 %5829 }
 0x635   : > { %v5838_v57 = vadd.f32 %v5830_v15, %v5786_v7 }
 0x637   : > { %v5896_v45 = vadd.f32 %v15902_v20, %v5838_v57 }
 0x638   : > { %v6486_v41 = vpop.permute.xlu0 %6485  ;;  %v6462_v28 = vpop.permute.xlu1 %6461 }
 0x63c   : > { %v6512_v23 = vpop.permute.xlu0 %6511  ;;  %v6488_v54 = vpop.permute.xlu1 %6487 }
 0x640   : > { %v6538_v32 = vpop.permute.xlu0 %6537  ;;  %v6514_v40 = vpop.permute.xlu1 %6513 }
 0x644   : > { %v5923_v38 = vpop.permute.xlu0 %5922  ;;  %v6540_v31 = vpop.permute.xlu1 %6539 }
 0x645   : > { %v5932_v18 = vadd.f32 %v5923_v38, %v5866_v11 }
 0x648   : > { %v5960_v12 = vpop.permute.xlu0 %5959  ;;  %v5925_v58 = vpop.permute.xlu1 %5924 }
 0x649   : > { %v5969_v27 = vadd.f32 %v5960_v12, %v5895_v55  ;;  %v5933_v21 = vadd.f32 %v5925_v58, %v5867_v10 }
 0x64c   : > { %v5997_v51 = vpop.permute.xlu0 %5996  ;;  %v5962_v3 = vpop.permute.xlu1 %5961 }
 0x64d   : > { %v6006_v60 = vadd.f32 %v5997_v51, %v5932_v18  ;;  %v5970_v8 = vadd.f32 %v5962_v3, %v5896_v45  ;;  %v6440_v3 = vmul.f32 %v16084_v17, %v18773_v0 }
 0x64f   : > { %v6072_v46 = vadd.f32 %v19011_v39, %v6006_v60 }
 0x650   : > { %v6034_v9 = vpop.permute.xlu0 %6033  ;;  %v5999_v20 = vpop.permute.xlu1 %5998 }
 0x651   : > { %v6043_v44 = vadd.f32 %v6034_v9, %v5969_v27  ;;  %v6007_v36 = vadd.f32 %v5999_v20, %v5933_v21 }
 0x653   : > { %v6101_v14 = vadd.f32 %v19012_v29, %v6043_v44  ;;  %v6073_v1 = vadd.f32 %v15927_v22, %v6007_v36  ;;  %v6439_v22 = vmul.f32 %v16084_v17, %v18822_v53 }
 0x654   : > { %v6129_v35 = vpop.permute.xlu0 %6128  ;;  %v6036_v62 = vpop.permute.xlu1 %6035 }
 0x655   : > { %v6044_v33 = vadd.f32 %v6036_v62, %v5970_v8  ;;  %v6138_v7 = vadd.f32 %v6129_v35, %v6072_v46 }
 0x657   : > { %v6102_v13 = vadd.f32 %v15932_v49, %v6044_v33  ;;  %v6430_v49 = vmul.f32 %v16080_v43, %v18773_v0 }
 0x658   : > { %v6166_v24 = vpop.permute.xlu0 %6165  ;;  %v6131_v50 = vpop.permute.xlu1 %6130 }
 0x659   : > { %v6175_v34 = vadd.f32 %v6166_v24, %v6101_v14  ;;  %v6139_v4 = vadd.f32 %v6131_v50, %v6073_v1 }
 0x65c   : > { %v6203_v52 = vpop.permute.xlu0 %6202  ;;  %v6168_v11 = vpop.permute.xlu1 %6167 }
 0x65d   : > { %v6212_v47 = vadd.f32 %v6203_v52, %v6138_v7  ;;  %v6176_v38 = vadd.f32 %v6168_v11, %v6102_v13  ;;  %v6962_v52 = vstv %s6961_s8 }
 0x65f   : > { %v6433_v42 = vadd.f32 %v6429_v6, %v6212_v47 }
 0x660   : > { %v6240_v55 = vpop.permute.xlu0 %6239  ;;  %v6205_v10 = vpop.permute.xlu1 %6204 }
 0x661   : > { %v6469_v15 = vadd.f32 %v6460_v56, %v6433_v42  ;;  %v6249_v57 = vadd.f32 %v6240_v55, %v6175_v34  ;;  %v6213_v45 = vadd.f32 %v6205_v10, %v6139_v4 }
 0x663   : > { %v6443_v12 = vadd.f32 %v6439_v22, %v6249_v57  ;;  %v6434_v58 = vadd.f32 %v6430_v49, %v6213_v45  ;;  %v6521_v18 = vadd.f32 %v6512_v23, %v6469_v15  ;;  %v6972_v15 = vstv %s7425_s13 }
 0x664   : > { %v6633_v51 = vpop.permute.xlu0 %6632  ;;  %v6242_v60 = vpop.permute.xlu1 %6241 }
 0x665   : > { %v6495_v27 = vadd.f32 %v6486_v41, %v6443_v12  ;;  %v6470_v21 = vadd.f32 %v6462_v28, %v6434_v58  ;;  %v6576_v53 = vadd.f32 %v15794_v2, %v6521_v18  ;;  %v6250_v39 = vadd.f32 %v6242_v60, %v6176_v38 }
 0x667   : > { %v6444_v56 = vadd.f32 %v6440_v3, %v6250_v39  ;;  %v6547_v46 = vadd.f32 %v6538_v32, %v6495_v27  ;;  %v6522_v9 = vadd.f32 %v6514_v40, %v6470_v21  ;;  %v6642_v8 = vadd.f32 %v6633_v51, %v6576_v53 }
 0x668   : > { %v6670_v20 = vpop.permute.xlu0 %6669  ;;  %v6635_v43 = vpop.permute.xlu1 %6634 }
 0x669   : > { %v6496_v44 = vadd.f32 %v6488_v54, %v6444_v56  ;;  %v6605_v36 = vadd.f32 %v15801_v30, %v6547_v46  ;;  %v6577_v23 = vadd.f32 %v15989_v63, %v6522_v9 }
 0x66b   : > { %v6548_v29 = vadd.f32 %v6540_v31, %v6496_v44  ;;  %v6679_v28 = vadd.f32 %v6670_v20, %v6605_v36  ;;  %v6643_v2 = vadd.f32 %v6635_v43, %v6577_v23 }
 0x66c   : > { %v6707_v14 = vpop.permute.xlu0 %6706  ;;  %v6672_v0 = vpop.permute.xlu1 %6671 }
 0x66d   : > { %v6716_v17 = vadd.f32 %v6707_v14, %v6642_v8  ;;  %v6606_v41 = vadd.f32 %v15994_v26, %v6548_v29 }
 0x66f   : > { %v6782_v1 = vadd.f32 %v15808_v61, %v6716_v17  ;;  %v6680_v62 = vadd.f32 %v6672_v0, %v6606_v41 }
 0x670   : > { %v6744_v32 = vpop.permute.xlu0 %6743  ;;  %v6709_v40 = vpop.permute.xlu1 %6708 }
 0x671   : > { %v6753_v35 = vadd.f32 %v6744_v32, %v6679_v28  ;;  %v6717_v54 = vadd.f32 %v6709_v40, %v6643_v2 }
 0x673   : > { %v6783_v30 = vadd.f32 %v15999_v16, %v6717_v54  ;;  %v6811_v63 = vadd.f32 %v15815_v37, %v6753_v35 }
 0x674   : > { %v6839_v31 = vpop.permute.xlu0 %6838  ;;  %v6746_v33 = vpop.permute.xlu1 %6745 }
 0x675   : > { %v6754_v13 = vadd.f32 %v6746_v33, %v6680_v62  ;;  %v6848_v16 = vadd.f32 %v6839_v31, %v6782_v1 }
 0x677   : > { %v6812_v24 = vadd.f32 %v16004_v48, %v6754_v13 }
 0x678   : > { %v6872_v26 = vpop.permute.xlu0 %6871  ;;  %v6841_v50 = vpop.permute.xlu1 %6840 }
 0x679   : > { %v6883_v22 = vadd.f32 %v6872_v26, %v16165_v25  ;;  %v6849_v55 = vadd.f32 %v6841_v50, %v6783_v30 }
 0x67c   : > { %v6876_v7 = vpop.permute.xlu0 %6875  ;;  %v6874_v61 = vpop.permute.xlu1 %6873 }
 0x67d   : > { %v6885_v12 = vadd.f32 %v6876_v7, %v6811_v63  ;;  %v6884_v25 = vadd.f32 %v6874_v61, %v16172_v19 }
 0x680   : > { %v6909_v11 = vpop.permute.xlu0 %6908  ;;  %v6878_v6 = vpop.permute.xlu1 %6877 }
 0x681   : > { %v6920_v47 = vadd.f32 %v6909_v11, %v16167_v59  ;;  %v6886_v27 = vadd.f32 %v6878_v6, %v6812_v24 }
 0x683   : > { %v6963_v34 = vadd.f32 %v6962_v52, %v6920_v47 }
 0x684   : > { %v6913_v37 = vpop.permute.xlu0 %6912  ;;  %v6911_v4 = vpop.permute.xlu1 %6910 }
 0x685   : > { %6967 = vst.msk [vmem:[%s16208_s25] sm:$0xff] %vm5482_vm4, %v6963_v34  ;;  %v6922_v48 = vadd.f32 %v6913_v37, %v6848_v16  ;;  %v6921_v42 = vadd.f32 %v6911_v4, %v16174_v5 }
 0x687   : > { %v6965_v10 = vadd.f32 %v6962_v52, %v6922_v48  ;;  %v6964_v59 = vadd.f32 %v6962_v52, %v6921_v42 }
 0x688   : > { %v6946_v57 = vpop.permute.xlu0 %6945  ;;  %v6915_v49 = vpop.permute.xlu1 %6914 }
 0x689   : > { %6969 = vst.msk [vmem:[%s16208_s25 + $0x10] sm:$0xff] %vm5482_vm4, %v6965_v10  ;;  %6968 = vst.msk [vmem:[%s16208_s25 + $0x8] sm:$0xff] %vm5482_vm4, %v6964_v59  ;;  %v6957_v45 = vadd.f32 %v6946_v57, %v6883_v22  ;;  %v6923_v38 = vadd.f32 %v6915_v49, %v6849_v55 }
 0x68b   : > { %v6973_v5 = vadd.f32 %v6972_v15, %v6957_v45  ;;  %v6966_v58 = vadd.f32 %v6962_v52, %v6923_v38 }
 0x68d   : > { %7426 = vst.msk [vmem:[%s16208_s25 + $0x20] sm:$0xff] %vm5482_vm4, %v6973_v5  ;;  %6970 = vst.msk [vmem:[%s16208_s25 + $0x18] sm:$0xff] %vm5482_vm4, %v6966_v58 }
 0x690   : > { %v6950_v18 = vpop.permute.xlu0 %6949  ;;  %v6948_v51 = vpop.permute.xlu1 %6947 }
 0x691   : > { %v6959_v3 = vadd.f32 %v6950_v18, %v6885_v12  ;;  %v6958_v60 = vadd.f32 %v6948_v51, %v6884_v25 }
 0x693   : > { %v6975_v21 = vadd.f32 %v6972_v15, %v6959_v3  ;;  %v6974_v53 = vadd.f32 %v6972_v15, %v6958_v60 }
 0x694   : > { %v6952_v39 = vpop.permute.xlu1 %6951 }
 0x695   : > { %7428 = vst.msk [vmem:[%s16208_s25 + $0x30] sm:$0xff] %vm5482_vm4, %v6975_v21  ;;  %7427 = vst.msk [vmem:[%s16208_s25 + $0x28] sm:$0xff] %vm5482_vm4, %v6974_v53  ;;  %v6960_v19 = vadd.f32 %v6952_v39, %v6886_v27 }
 0x697   : > { %v6976_v56 = vadd.f32 %v6972_v15, %v6960_v19 }
 0x699   : > { %7429 = vst.msk [vmem:[%s16208_s25 + $0x38] sm:$0xff] %vm5482_vm4, %v6976_v56 }
 0x69a   : > { %7903 = shalt.err (!%p7900_p5)
}
 0x69b   : > { %s7904_s2 = scalar_lea.hbm %s16232_s29, 1024  ;;  %s7908_s13 = scalar_lea.hbm %s16293_s11, 2048 }
 0x69c   : > { %p7905_p6 = scmp.ne.s32.totalorder %s16232_s29, %s7904_s2  ;;  %p7909_p8 = scmp.lt.u32.totalorder %s16232_s29, %s16293_s11 }
 0x69d   : > { %p7910_p13 = scmp.lt.u32.totalorder %s7908_s13, %s7904_s2  ;;  %p7912_p2 = scmp.lt.u32.totalorder %s7904_s2, %s16232_s29 }
 0x69e   : > { %p7906_p12 = pnand %p7905_p6, %p19000_p11 }
 0x69f   : > { %p7911_p1 = por %p7910_p13, %p7909_p8 }
 0x6a0   : > { %p7907_p10 = pneg %p7906_p12 }
 0x6a1   : > { %p7913_p3 = por %p7912_p2, %p7911_p1 }
 0x6a3   : > { %p7914_p4 = pnand %p7913_p3, %p7907_p10 }
 0x6a5   : > { %7917 = shalt.err (!%p7914_p4)
}
 0x6a6   : > { %7723 = dma.vmem_to_hbm [thread:$0]  (%p19000_p11), %s16234_s14, 1024, %s16232_s29, %s6988_s21, %s7980_s3, %s7980_s3, %s7981_s24  }
 0x6a7 PF: > { %p7754_p9 = scmp.ge.s32.totalorder %s7968_s20, 2  ;;  %s7032_s15 = sand.u32 1, %s7956_s17  }
 0x6a8   : > { %p19013_p7 = scmp.ne.s32.totalorder %s16946_s28, 0  ;;  %s7033_s26 = scalar_lea.sflag [#allocation3], %s7032_s15 }
 0x6aa   : > { %p7740_p0 = pnand %p7754_p9, %p19013_p7 }
 0x6ac   : > { %7947 = dma.done.wait (!%p7740_p0), %s7033_s26, 2048  }
 0x6ad   : > { %7949 = vsyncadd (!%p7740_p0), %s7033_s26, 4294965248  ;;  %s7042_s27 = scalar_lea.sflag [#allocation12], %s7032_s15 }
 0x6ae   : > { %7951 = dma.done.wait (!%p7740_p0), %s7042_s27, 1024  }
 0x6af   : > { %7953 = vsyncadd (!%p7740_p0), %s7042_s27, 4294966272  ;;  %s19014_s16 = sld [smem:[#allocation18_spill]]  ;;  %p28_p11 = scmp.ge.s32.totalorder %s8068_s23, 4  }
 0x6b0   : > { %s19015_s17 = smov %s7960_s18  ;;  %s19016_s18 = smov %s7964_s19 }
 0x6b1   : > { %s19018_s20 = smov %s8068_s23  ;;  %30 = sbr.rel (!%p28_p11) target bundleno = 15 (0xf), region = 140 }
 0x6b5   : > { %s19017_s19 = smov %s19014_s16 }
 0x6b8   :  { %7047 = vsyncpa [#allocation3], 1 }
 0x6b9   :  { %7049 = vsyncpa [#allocation3 + $0x1], 1 }
 0x6ba   :  { %7050 = vsyncpa [#allocation12], 1 }
 0x6bb   :  { %7052 = vsyncpa [#allocation12 + $0x1], 1 }
 0x6bc   :  { %7053 = vsyncpa [#allocation4], 1 }
 0x6bd   :  { %7055 = vsyncpa [#allocation4 + $0x1], 1 }
 0x6be   :  { %7056 = vsyncpa [#allocation6], 1 }
 0x6bf   :  { %7057 = vsyncpa [#allocation9], 1 }

</bundles_post_ra>
